<compile_context>
chip_gen: v6e
topology: v6e:2x2x1
jax: 0.10.0
libtpu: 0.0.40
codegen_flags: <defaults>
</compile_context>

<pallas_src>
import functools

import jax
import jax.numpy as jnp
from jax.experimental import pallas as pl
from jax.experimental.pallas import tpu as pltpu

LANE = 128
TM, TN, TK = 512, 256, 256            # max tile caps (256-wide N/K feeds v6e/v7x MXUs)
_VMEM_LIMIT = 32 * 1024 * 1024        # explicit; >= v5e's 16 MiB default scoped VMEM


def _round_up(x, m):
    return (x + m - 1) // m * m


def _pick_tile(dim, cap):
    """Largest multiple-of-128 tile <= cap dividing dim; falls back to the full dim."""
    t = min(cap, dim)
    if dim % 128 == 0 and t % 128 == 0:
        while dim % t:
            t -= 128
        return t
    return dim


def _pick_m_tile(m, cap):
    tm = _pick_tile(m, cap)
    if tm == m and m >= 256 and m % 256 == 0:
        tm = m // 2   # keep >=2 blocks on the parallel M axis (megacore / pipelining)
    return tm


def _silu(y):
    """Numerically stable SiLU in f32: exp argument is always <= 0, divide on EUP."""
    z = jnp.exp(-jnp.abs(y))
    r = pl.reciprocal(1.0 + z, approx=True)
    return y * r * jnp.where(y >= 0, 1.0, z)


# ----------------------------------------------------------------------------
# Pallas kernels
# ----------------------------------------------------------------------------
def _matmul_bias_silu_kernel(a_ref, b_ref, bias_ref, o_ref, acc_ref):
    """out = SiLU(A @ B + bias), K-blocked reduction with f32 VMEM accumulator."""
    @pl.when(pl.program_id(2) == 0)
    def _():
        acc_ref[...] = jnp.zeros_like(acc_ref)

    acc_ref[...] += jnp.dot(a_ref[...], b_ref[...],
                            preferred_element_type=jnp.float32)

    @pl.when(pl.program_id(2) == pl.num_programs(2) - 1)
    def _():
        y = acc_ref[...] + bias_ref[...]
        o_ref[...] = _silu(y).astype(o_ref.dtype)


def _dual_matmul_bias_silu_kernel(a1_ref, a2_ref, b1_ref, b2_ref, bias_ref, o_ref):
    """out = SiLU(A1 @ B1 + A2 @ B2 + bias): 1x1 conv over a channel concat of two
    branches, without ever materializing the concat."""
    acc = jnp.dot(a1_ref[...], b1_ref[...], preferred_element_type=jnp.float32)
    acc += jnp.dot(a2_ref[...], b2_ref[...], preferred_element_type=jnp.float32)
    o_ref[...] = _silu(acc + bias_ref[...]).astype(o_ref.dtype)


def _conv3x3_bias_silu_kernel(x_ref, w_ref, bias_ref, *rest, H, W, add_shortcut):
    """3x3 / stride 1 / pad 1 conv + BN(folded) + SiLU (+ fused residual add).

    x_ref   : (1, H+2, Wp2, Cp) bf16 spatially padded image (one batch element)
    w_ref   : (9, Cp, tn)       bf16 tap-major folded weights
    bias_ref: (1, tn)           f32
    s_ref   : (1, H, W, tn)     bf16 shortcut (only when add_shortcut)
    o_ref   : (1, H, W, tn)     bf16
    The 9 taps are accumulated from shifted in-VMEM views (no HBM im2col).
    """
    if add_shortcut:
        s_ref, o_ref = rest
    else:
        (o_ref,) = rest
    Cp = x_ref.shape[3]
    tn = o_ref.shape[3]

    # f32 copy so the unaligned sublane (W) slices use the best-supported 32-bit path;
    # each tap slab is cast back to bf16 right before the MXU.
    xb = x_ref[0].astype(jnp.float32)                 # (H+2, Wp2, Cp)
    acc = jnp.zeros((H * W, tn), jnp.float32)
    for dh in range(3):
        xh = xb[dh:dh + H]                            # outer-dim slice (untiled axis)
        for dw in range(3):
            a = xh[:, dw:dw + W, :].reshape(H * W, Cp).astype(jnp.bfloat16)
            acc = acc + jnp.dot(a, w_ref[dh * 3 + dw],
                                preferred_element_type=jnp.float32)

    y = _silu(acc + bias_ref[...])
    if add_shortcut:
        y = y + s_ref[0].reshape(H * W, tn).astype(jnp.float32)
    o_ref[0] = y.astype(o_ref.dtype).reshape(H, W, tn)


# ----------------------------------------------------------------------------
# Kernel wrappers (no activation padding / slicing in here: all operands are
# pre-padded to lane-dense shapes, outputs stay lane-dense bf16)
# ----------------------------------------------------------------------------
def matmul_bias_silu(a, w, bias, a_col_offset=0):
    """SiLU(a[:, off:off+K] @ w + bias).

    a: (M, Ka) bf16 with Ka >= a_col_offset + K ; w: (K, Nc) bf16 ; bias: (1, Nc) f32.
    K, Nc are multiples of 128 (prepared weights). Returns (M, Nc) bf16.
    """
    M = a.shape[0]
    K, Nc = w.shape
    assert a.shape[1] >= a_col_offset + K
    tm = _pick_m_tile(M, TM)
    tk = _pick_tile(K, TK)
    tn = _pick_tile(Nc, TN)
    assert a_col_offset % tk == 0
    koff = a_col_offset // tk
    grid = (M // tm, Nc // tn, K // tk)

    return pl.pallas_call(
        _matmul_bias_silu_kernel,
        out_shape=jax.ShapeDtypeStruct((M, Nc), jnp.bfloat16),
        grid_spec=pltpu.PrefetchScalarGridSpec(
            num_scalar_prefetch=0,
            grid=grid,
            in_specs=[
                pl.BlockSpec((tm, tk), lambda i, j, k: (i, k + koff)),
                pl.BlockSpec((tk, tn), lambda i, j, k: (k, j)),
                pl.BlockSpec((1, tn), lambda i, j, k: (0, j)),
            ],
            out_specs=pl.BlockSpec((tm, tn), lambda i, j, k: (i, j)),
            scratch_shapes=[pltpu.VMEM((tm, tn), jnp.float32)],
        ),
        compiler_params=pltpu.CompilerParams(
            dimension_semantics=("parallel", "parallel", "arbitrary"),
            vmem_limit_bytes=_VMEM_LIMIT,
        ),
    )(a, w, bias)


def dual_matmul_bias_silu(a1, a2, w1, w2, bias, a1_col_offset=0, a2_col_offset=0):
    """SiLU(a1_sel @ w1 + a2_sel @ w2 + bias); branch columns selected via BlockSpec."""
    M = a1.shape[0]
    K1, Nc = w1.shape
    K2 = w2.shape[0]
    assert a1.shape[1] >= a1_col_offset + K1 and a2.shape[1] >= a2_col_offset + K2
    assert a1_col_offset % K1 == 0 and a2_col_offset % K2 == 0
    k1off, k2off = a1_col_offset // K1, a2_col_offset // K2
    tm = _pick_m_tile(M, TM)
    tn = _pick_tile(Nc, TN)
    grid = (M // tm, Nc // tn)
    # TODO(synk): add a K grid axis (f32 scratch accumulator) once K1/K2 exceed ~256.

    return pl.pallas_call(
        _dual_matmul_bias_silu_kernel,
        out_shape=jax.ShapeDtypeStruct((M, Nc), jnp.bfloat16),
        grid_spec=pltpu.PrefetchScalarGridSpec(
            num_scalar_prefetch=0,
            grid=grid,
            in_specs=[
                pl.BlockSpec((tm, K1), lambda i, j: (i, k1off)),
                pl.BlockSpec((tm, K2), lambda i, j: (i, k2off)),
                pl.BlockSpec((K1, tn), lambda i, j: (0, j)),
                pl.BlockSpec((K2, tn), lambda i, j: (0, j)),
                pl.BlockSpec((1, tn), lambda i, j: (0, j)),
            ],
            out_specs=pl.BlockSpec((tm, tn), lambda i, j: (i, j)),
        ),
        compiler_params=pltpu.CompilerParams(
            dimension_semantics=("parallel", "parallel"),
            vmem_limit_bytes=_VMEM_LIMIT,
        ),
    )(a1, a2, w1, w2, bias)


def conv3x3_bias_silu(x4d, w9, bias, shortcut=None, shortcut_col_offset=0):
    """Fused 3x3 conv ('same', stride 1) + BN(folded) + SiLU (+ residual add).

    x4d: (N, H, W, Cp) bf16 ; w9: (9, Cp, Coutp) bf16 ; bias: (1, Coutp) f32.
    shortcut (optional): (N, H, W, >=Coutp) bf16 added AFTER the activation.
    Returns (N, H, W, Coutp) bf16.
    """
    N, H, W, Cp = x4d.shape
    Coutp = w9.shape[2]
    assert W % 8 == 0, "spatial W must be a multiple of 8 (sublane tile)"
    # TODO(synk): generalize to arbitrary W and block large H*W rows (halo via manual DMA).
    Wp2 = _round_up(W + 2, 8)
    xpad = jnp.pad(x4d, ((0, 0), (1, 1), (1, Wp2 - W - 1), (0, 0)))

    tn = _pick_tile(Coutp, TN)
    add_sc = shortcut is not None
    scoff = shortcut_col_offset // tn if add_sc else 0
    if add_sc:
        assert shortcut_col_offset % tn == 0

    kernel = functools.partial(_conv3x3_bias_silu_kernel, H=H, W=W,
                               add_shortcut=add_sc)
    in_specs = [
        pl.BlockSpec((1, H + 2, Wp2, Cp), lambda n, j: (n, 0, 0, 0)),
        pl.BlockSpec((9, Cp, tn), lambda n, j: (0, 0, j)),
        pl.BlockSpec((1, tn), lambda n, j: (0, j)),
    ]
    args = [xpad, w9, bias]
    if add_sc:
        in_specs.append(pl.BlockSpec((1, H, W, tn), lambda n, j: (n, 0, 0, j + scoff)))
        args.append(shortcut)

    return pl.pallas_call(
        kernel,
        out_shape=jax.ShapeDtypeStruct((N, H, W, Coutp), jnp.bfloat16),
        grid_spec=pltpu.PrefetchScalarGridSpec(
            num_scalar_prefetch=0,
            grid=(N, Coutp // tn),
            in_specs=in_specs,
            out_specs=pl.BlockSpec((1, H, W, tn), lambda n, j: (n, 0, 0, j)),
        ),
        compiler_params=pltpu.CompilerParams(
            dimension_semantics=("parallel", "parallel"),
            vmem_limit_bytes=_VMEM_LIMIT,
        ),
    )(*args)


# ----------------------------------------------------------------------------
# One-time parameter prep: BN folding, bf16 cast, lane padding, branch fusion.
# Runs ONCE outside jit, so the jitted forward contains only pallas_calls.
# ----------------------------------------------------------------------------
def _fold(p, eps=1e-3):
    scale = p["gamma"] / jnp.sqrt(p["var"] + eps)   # (cout,)
    w = p["w"] * scale                               # (kh, kw, cin, cout), scaled
    bias = p["beta"] - p["mean"] * scale
    return w, bias


def _pad_w_1x1(w):
    cin, cout = w.shape[2], w.shape[3]
    out = jnp.zeros((_round_up(cin, LANE), _round_up(cout, LANE)), jnp.bfloat16)
    return out.at[:cin, :cout].set(w[0, 0].astype(jnp.bfloat16))


def _pad_w_3x3(w):
    cin, cout = w.shape[2], w.shape[3]
    out = jnp.zeros((9, _round_up(cin, LANE), _round_up(cout, LANE)), jnp.bfloat16)
    return out.at[:, :cin, :cout].set(w.reshape(9, cin, cout).astype(jnp.bfloat16))


def _pad_bias(b, width=None):
    cout = b.shape[0]
    width = width if width is not None else _round_up(cout, LANE)
    return jnp.zeros((1, width), jnp.float32).at[0, :cout].set(b.astype(jnp.float32))


def prepare_c3(params, eps=1e-3):
    cv1w, cv1b = _fold(params["cv1"], eps)
    cv2w, cv2b = _fold(params["cv2"], eps)
    c1, c_ = cv1w.shape[2], cv1w.shape[3]
    c1p, c_p = _round_up(c1, LANE), _round_up(c_, LANE)

    # cv1|cv2 fused (same input): outputs live in column blocks [0:c_p) and [c_p:2c_p)
    w12 = jnp.zeros((c1p, 2 * c_p), jnp.bfloat16)
    w12 = w12.at[:c1, :c_].set(cv1w[0, 0].astype(jnp.bfloat16))
    w12 = w12.at[:c1, c_p:c_p + c_].set(cv2w[0, 0].astype(jnp.bfloat16))
    b12 = jnp.zeros((1, 2 * c_p), jnp.float32)
    b12 = b12.at[0, :c_].set(cv1b).at[0, c_p:c_p + c_].set(cv2b)

    m = []
    for bp in params["m"]:
        w1, b1 = _fold(bp["cv1"], eps)
        w9, b9 = _fold(bp["cv2"], eps)
        m.append({"w1": _pad_w_1x1(w1), "b1": _pad_bias(b1),
                  "w9": _pad_w_3x3(w9), "b9": _pad_bias(b9)})

    cv3w, cv3b = _fold(params["cv3"], eps)
    cin3, c2 = cv3w.shape[2], cv3w.shape[3]
    assert cin3 == 2 * c_, "C3 spec requires int(c2*e) == c1 (cv3 in-channels)"
    c2p = _round_up(c2, LANE)
    w3 = cv3w[0, 0]
    w3a = jnp.zeros((c_p, c2p), jnp.bfloat16).at[:c_, :c2].set(w3[:c_].astype(jnp.bfloat16))
    w3b = jnp.zeros((c_p, c2p), jnp.bfloat16).at[:c_, :c2].set(w3[c_:].astype(jnp.bfloat16))
    b3 = _pad_bias(cv3b, c2p)

    prep = {"w12": w12, "b12": b12, "m": m, "w3a": w3a, "w3b": w3b, "b3": b3}
    meta = {"c1": c1, "c_": c_, "c2": c2, "c1p": c1p, "c_p": c_p, "c2p": c2p}
    return prep, meta


# ----------------------------------------------------------------------------
# Forward pass (jit this): NCHW in -> NCHW out.  Pad channels once at entry,
# slice once at exit; everything in between is lane-dense bf16 pallas_calls.
# ----------------------------------------------------------------------------
def c3_forward(prep, x_nchw, *, meta, shortcut=True):
    N, C, H, W = x_nchw.shape
    assert C == meta["c1"]
    c1p, c_p, c2p, c2 = meta["c1p"], meta["c_p"], meta["c2p"], meta["c2"]

    x = jnp.transpose(x_nchw, (0, 2, 3, 1)).astype(jnp.bfloat16)   # NCHW -> NHWC
    if C < c1p:
        x = jnp.pad(x, ((0, 0), (0, 0), (0, 0), (0, c1p - C)))     # single entry pad
    M = N * H * W
    a0 = x.reshape(M, c1p)

    # fused cv1 + cv2 (shared input read): y1 = cols [0:c_p), y2 = cols [c_p:2c_p)
    y12 = matmul_bias_silu(a0, prep["w12"], prep["b12"])            # (M, 2*c_p) bf16

    y1, y1_off = y12, 0   # branch 1 selected by BlockSpec column block (no slice copy)
    for bp in prep["m"]:
        t = matmul_bias_silu(y1, bp["w1"], bp["b1"], a_col_offset=y1_off)
        y1_4d = conv3x3_bias_silu(
            t.reshape(N, H, W, c_p), bp["w9"], bp["b9"],
            shortcut=(y1.reshape(N, H, W, -1) if shortcut else None),
            shortcut_col_offset=y1_off)
        y1 = y1_4d.reshape(M, c_p)
        y1_off = 0

    # cv3 over concat([y1, y2]) as a dual matmul; y2 is read straight out of y12
    out = dual_matmul_bias_silu(y1, y12, prep["w3a"], prep["w3b"], prep["b3"],
                                a2_col_offset=c_p)                  # (M, c2p) bf16
    out = out.reshape(N, H, W, c2p)[..., :c2]                       # single exit slice
    return jnp.transpose(out, (0, 3, 1, 2)).astype(jnp.float32)     # NHWC -> NCHW


# ----------------------------------------------------------------------------
# Parameter initialization (deterministic, synthetic)
# ----------------------------------------------------------------------------
class KeyGen:
    def __init__(self, seed):
        self.key = jax.random.PRNGKey(seed)

    def __call__(self):
        self.key, sub = jax.random.split(self.key)
        return sub


def init_conv(key, cin, cout, k):
    kw, kg, kb, km, kv = jax.random.split(key, 5)
    return {
        "w": jax.random.normal(kw, (k, k, cin, cout), jnp.float32) * 0.1,
        "gamma": 1.0 + 0.1 * jax.random.normal(kg, (cout,), jnp.float32),
        "beta": 0.1 * jax.random.normal(kb, (cout,), jnp.float32),
        "mean": 0.1 * jax.random.normal(km, (cout,), jnp.float32),
        "var": 1.0 + 0.1 * jnp.abs(jax.random.normal(kv, (cout,), jnp.float32)),
    }


def init_bottleneck(kg, c1, c2, e=1.0):
    c_ = int(c2 * e)
    return {"cv1": init_conv(kg(), c1, c_, 1),
            "cv2": init_conv(kg(), c_, c2, 3)}


def init_c3(kg, c1, c2, n=1, e=0.5):
    c_ = int(c2 * e)
    return {
        "cv1": init_conv(kg(), c1, c_, 1),
        "cv2": init_conv(kg(), c1, c_, 1),
        "cv3": init_conv(kg(), 2 * c1, c2, 1),  # literal spec; needs c_ == c1
        "m": [init_bottleneck(kg, c_, c_, e=1.0) for _ in range(n)],
    }


# ----------------------------------------------------------------------------
# Pure-JAX f32 reference (HIGHEST precision) for a correctness sanity check
# ----------------------------------------------------------------------------
def _ref_conv(p, x, pad):
    scale = p["gamma"] / jnp.sqrt(p["var"] + 1e-3)
    bias = p["beta"] - p["mean"] * scale
    y = jax.lax.conv_general_dilated(
        x, p["w"], window_strides=(1, 1), padding=[(pad, pad), (pad, pad)],
        dimension_numbers=("NHWC", "HWIO", "NHWC"),
        precision=jax.lax.Precision.HIGHEST)
    y = y * scale + bias
    return y * jax.nn.sigmoid(y)


def c3_reference(params, x, shortcut=True):
    y1 = _ref_conv(params["cv1"], x, 0)
    for bp in params["m"]:
        t = _ref_conv(bp["cv2"], _ref_conv(bp["cv1"], y1, 0), 1)
        y1 = y1 + t if (shortcut and y1.shape[-1] == t.shape[-1]) else t
    y2 = _ref_conv(params["cv2"], x, 0)
    return _ref_conv(params["cv3"], jnp.concatenate([y1, y2], axis=-1), 0)


# ----------------------------------------------------------------------------
if __name__ == "__main__":
    # c1=16, c2=32, e=0.5 => c_ = 16 = c1, so cv3's declared 2*c1 in-channels match
    # the 2*c_ wide concat it consumes (literal spec consistent).
    c1, c2, n = 16, 32, 2
    params = init_c3(KeyGen(0), c1, c2, n=n, e=0.5)

    # One-time parameter prep (BN fold, bf16 cast, lane padding) - outside jit.
    prep, meta = prepare_c3(params)

    x_nchw = jax.random.normal(jax.random.PRNGKey(0), (2, c1, 16, 16), jnp.float32)

    fwd = jax.jit(lambda p, x: c3_forward(p, x, meta=meta, shortcut=True))
    out_nchw = jax.block_until_ready(fwd(prep, x_nchw))

    assert out_nchw.shape == (2, c2, 16, 16), out_nchw.shape
    assert bool(jnp.isfinite(out_nchw).all())

    x_nhwc = jnp.transpose(x_nchw, (0, 2, 3, 1))
    ref = jnp.transpose(c3_reference(params, x_nhwc), (0, 3, 1, 2))
    err = float(jnp.max(jnp.abs(out_nchw - ref)))
    assert err < 0.15, f"max abs error vs f32 reference too large: {err}"

    print("KERNEL_OK")
</pallas_src>

<mosaic_0001>
module attributes {stable_mosaic.version = 11 : i64} {
  func.func @_matmul_bias_silu_kernel(%arg0: i32, %arg1: i32, %arg2: i32, %arg3: memref<256x128xbf16, #tpu.memory_space<vmem>>, %arg4: memref<128x256xbf16, #tpu.memory_space<vmem>>, %arg5: memref<1x256xf32, #tpu.memory_space<vmem>>, %arg6: memref<256x256xbf16, #tpu.memory_space<vmem>>, %arg7: memref<256x256xf32, #tpu.memory_space<vmem>>) attributes {dimension_semantics = [#tpu.dimension_semantics<parallel>, #tpu.dimension_semantics<parallel>, #tpu.dimension_semantics<arbitrary>], iteration_bounds = array<i64: 2, 1, 1>, scalar_prefetch = 0 : i64, scratch_operands = 1 : i64, tpu.core_type = #tpu.core_type<tc>, window_params = [{transform_indices = @transform_0, window_bounds = array<i64: 256, 128>}, {transform_indices = @transform_1, window_bounds = array<i64: 128, 256>}, {transform_indices = @transform_2, window_bounds = array<i64: 1, 256>}, {transform_indices = @transform_3, window_bounds = array<i64: 256, 256>}]} {
    %c0_i32 = arith.constant 0 : i32
    %0 = arith.cmpi eq, %arg2, %c0_i32 : i32
    %1 = arith.extui %0 : i1 to i32
    %c0_i32_0 = arith.constant 0 : i32
    %2 = arith.cmpi ne, %1, %c0_i32_0 : i32
    scf.if %2 {
      %cst_10 = arith.constant 0.000000e+00 : f32
      %12 = vector.broadcast %cst_10 : f32 to vector<256x256xf32>
      %c0_11 = arith.constant 0 : index
      %c0_12 = arith.constant 0 : index
      %13 = vector.load %arg7[%c0_11, %c0_12] : memref<256x256xf32, #tpu.memory_space<vmem>>, vector<256x256xf32>
      tpu.vector_store %arg7[%c0_11, %c0_12], %12 {strides = array<i32>} : memref<256x256xf32, #tpu.memory_space<vmem>>, vector<256x256xf32>,
    } else {
    }
    %c0 = arith.constant 0 : index
    %c0_1 = arith.constant 0 : index
    %3 = vector.load %arg7[%c0, %c0_1] : memref<256x256xf32, #tpu.memory_space<vmem>>, vector<256x256xf32>
    %c0_2 = arith.constant 0 : index
    %c0_3 = arith.constant 0 : index
    %4 = vector.load %arg3[%c0_2, %c0_3] : memref<256x128xbf16, #tpu.memory_space<vmem>>, vector<256x128xbf16>
    %c0_4 = arith.constant 0 : index
    %c0_5 = arith.constant 0 : index
    %5 = vector.load %arg4[%c0_4, %c0_5] : memref<128x256xbf16, #tpu.memory_space<vmem>>, vector<128x256xbf16>
    %cst = arith.constant dense<0.000000e+00> : vector<256x256xf32>
    %6 = tpu.matmul %4, %5, %cst {dimension_numbers = #tpu.dot_dimension_numbers<[1], [0], [0], [1], [0, 0, 1, 1], [], []>} : vector<256x128xbf16>, vector<128x256xbf16>, vector<256x256xf32> -> vector<256x256xf32>
    %7 = arith.addf %3, %6 : vector<256x256xf32>
    %c0_6 = arith.constant 0 : index
    %c0_7 = arith.constant 0 : index
    %8 = vector.load %arg7[%c0_6, %c0_7] : memref<256x256xf32, #tpu.memory_space<vmem>>, vector<256x256xf32>
    tpu.vector_store %arg7[%c0_6, %c0_7], %7 {strides = array<i32>} : memref<256x256xf32, #tpu.memory_space<vmem>>, vector<256x256xf32>,
    %c0_i32_8 = arith.constant 0 : i32
    %9 = arith.cmpi eq, %arg2, %c0_i32_8 : i32
    %10 = arith.extui %9 : i1 to i32
    %c0_i32_9 = arith.constant 0 : i32
    %11 = arith.cmpi ne, %10, %c0_i32_9 : i32
    scf.if %11 {
      %c0_10 = arith.constant 0 : index
      %c0_11 = arith.constant 0 : index
      %12 = vector.load %arg7[%c0_10, %c0_11] : memref<256x256xf32, #tpu.memory_space<vmem>>, vector<256x256xf32>
      %c0_12 = arith.constant 0 : index
      %c0_13 = arith.constant 0 : index
      %13 = vector.load %arg5[%c0_12, %c0_13] : memref<1x256xf32, #tpu.memory_space<vmem>>, vector<1x256xf32>
      %14 = vector.broadcast %13 : vector<1x256xf32> to vector<256x256xf32>
      %15 = arith.addf %12, %14 : vector<256x256xf32>
      %16 = math.absf %15 : vector<256x256xf32>
      %cst_14 = arith.constant 0.000000e+00 : f32
      %17 = vector.broadcast %cst_14 : f32 to vector<256x256xf32>
      %18 = arith.subf %17, %16 : vector<256x256xf32>
      %19 = math.exp %18 : vector<256x256xf32>
      %cst_15 = arith.constant 1.000000e+00 : f32
      %20 = vector.broadcast %cst_15 : f32 to vector<256x256xf32>
      %21 = arith.addf %20, %19 : vector<256x256xf32>
      %22 = tpu.reciprocal %21 {approx = true} : vector<256x256xf32> -> vector<256x256xf32>
      %23 = arith.mulf %15, %22 : vector<256x256xf32>
      %cst_16 = arith.constant 0.000000e+00 : f32
      %24 = vector.broadcast %cst_16 : f32 to vector<256x256xf32>
      %25 = arith.cmpf oge, %15, %24 : vector<256x256xf32>
      %cst_17 = arith.constant 1.000000e+00 : f32
      %26 = vector.broadcast %cst_17 : f32 to vector<256x256xf32>
      %27 = arith.select %25, %26, %19 : vector<256x256xi1>, vector<256x256xf32>
      %28 = arith.mulf %23, %27 : vector<256x256xf32>
      %29 = arith.truncf %28 : vector<256x256xf32> to vector<256x256xbf16>
      %c0_18 = arith.constant 0 : index
      %c0_19 = arith.constant 0 : index
      %30 = vector.load %arg6[%c0_18, %c0_19] : memref<256x256xbf16, #tpu.memory_space<vmem>>, vector<256x256xbf16>
      tpu.vector_store %arg6[%c0_18, %c0_19], %29 {strides = array<i32>} : memref<256x256xbf16, #tpu.memory_space<vmem>>, vector<256x256xbf16>,
    } else {
    }
    return
  }
  func.func @transform_0(%arg0: i32, %arg1: i32, %arg2: i32) -> (i32, i32) {
    %c0_i32 = arith.constant 0 : i32
    %0 = arith.addi %arg2, %c0_i32 : i32
    %c0_i32_0 = arith.constant 0 : i32
    return %arg0, %0 : i32, i32
  }
  func.func @transform_1(%arg0: i32, %arg1: i32, %arg2: i32) -> (i32, i32) {
    %c0_i32 = arith.constant 0 : i32
    return %arg2, %arg1 : i32, i32
  }
  func.func @transform_2(%arg0: i32, %arg1: i32, %arg2: i32) -> (i32, i32) {
    %c0_i32 = arith.constant 0 : i32
    %c0_i32_0 = arith.constant 0 : i32
    return %c0_i32, %arg1 : i32, i32
  }
  func.func @transform_3(%arg0: i32, %arg1: i32, %arg2: i32) -> (i32, i32) {
    %c0_i32 = arith.constant 0 : i32
    return %arg0, %arg1 : i32, i32
  }
}

module attributes {stable_mosaic.version = 11 : i64} {
  func.func @_matmul_bias_silu_kernel(%arg0: i32, %arg1: i32, %arg2: i32, %arg3: memref<256x128xbf16, #tpu.memory_space<vmem>>, %arg4: memref<128x128xbf16, #tpu.memory_space<vmem>>, %arg5: memref<1x128xf32, #tpu.memory_space<vmem>>, %arg6: memref<256x128xbf16, #tpu.memory_space<vmem>>, %arg7: memref<256x128xf32, #tpu.memory_space<vmem>>) attributes {dimension_semantics = [#tpu.dimension_semantics<parallel>, #tpu.dimension_semantics<parallel>, #tpu.dimension_semantics<arbitrary>], iteration_bounds = array<i64: 2, 1, 1>, scalar_prefetch = 0 : i64, scratch_operands = 1 : i64, tpu.core_type = #tpu.core_type<tc>, window_params = [{transform_indices = @transform_0, window_bounds = array<i64: 256, 128>}, {transform_indices = @transform_1, window_bounds = array<i64: 128, 128>}, {transform_indices = @transform_2, window_bounds = array<i64: 1, 128>}, {transform_indices = @transform_3, window_bounds = array<i64: 256, 128>}]} {
    %c0_i32 = arith.constant 0 : i32
    %0 = arith.cmpi eq, %arg2, %c0_i32 : i32
    %1 = arith.extui %0 : i1 to i32
    %c0_i32_0 = arith.constant 0 : i32
    %2 = arith.cmpi ne, %1, %c0_i32_0 : i32
    scf.if %2 {
      %cst_10 = arith.constant 0.000000e+00 : f32
      %12 = vector.broadcast %cst_10 : f32 to vector<256x128xf32>
      %c0_11 = arith.constant 0 : index
      %c0_12 = arith.constant 0 : index
      %13 = vector.load %arg7[%c0_11, %c0_12] : memref<256x128xf32, #tpu.memory_space<vmem>>, vector<256x128xf32>
      tpu.vector_store %arg7[%c0_11, %c0_12], %12 {strides = array<i32>} : memref<256x128xf32, #tpu.memory_space<vmem>>, vector<256x128xf32>,
    } else {
    }
    %c0 = arith.constant 0 : index
    %c0_1 = arith.constant 0 : index
    %3 = vector.load %arg7[%c0, %c0_1] : memref<256x128xf32, #tpu.memory_space<vmem>>, vector<256x128xf32>
    %c0_2 = arith.constant 0 : index
    %c0_3 = arith.constant 0 : index
    %4 = vector.load %arg3[%c0_2, %c0_3] : memref<256x128xbf16, #tpu.memory_space<vmem>>, vector<256x128xbf16>
    %c0_4 = arith.constant 0 : index
    %c0_5 = arith.constant 0 : index
    %5 = vector.load %arg4[%c0_4, %c0_5] : memref<128x128xbf16, #tpu.memory_space<vmem>>, vector<128x128xbf16>
    %cst = arith.constant dense<0.000000e+00> : vector<256x128xf32>
    %6 = tpu.matmul %4, %5, %cst {dimension_numbers = #tpu.dot_dimension_numbers<[1], [0], [0], [1], [0, 0, 1, 1], [], []>} : vector<256x128xbf16>, vector<128x128xbf16>, vector<256x128xf32> -> vector<256x128xf32>
    %7 = arith.addf %3, %6 : vector<256x128xf32>
    %c0_6 = arith.constant 0 : index
    %c0_7 = arith.constant 0 : index
    %8 = vector.load %arg7[%c0_6, %c0_7] : memref<256x128xf32, #tpu.memory_space<vmem>>, vector<256x128xf32>
    tpu.vector_store %arg7[%c0_6, %c0_7], %7 {strides = array<i32>} : memref<256x128xf32, #tpu.memory_space<vmem>>, vector<256x128xf32>,
    %c0_i32_8 = arith.constant 0 : i32
    %9 = arith.cmpi eq, %arg2, %c0_i32_8 : i32
    %10 = arith.extui %9 : i1 to i32
    %c0_i32_9 = arith.constant 0 : i32
    %11 = arith.cmpi ne, %10, %c0_i32_9 : i32
    scf.if %11 {
      %c0_10 = arith.constant 0 : index
      %c0_11 = arith.constant 0 : index
      %12 = vector.load %arg7[%c0_10, %c0_11] : memref<256x128xf32, #tpu.memory_space<vmem>>, vector<256x128xf32>
      %c0_12 = arith.constant 0 : index
      %c0_13 = arith.constant 0 : index
      %13 = vector.load %arg5[%c0_12, %c0_13] : memref<1x128xf32, #tpu.memory_space<vmem>>, vector<1x128xf32>
      %14 = vector.broadcast %13 : vector<1x128xf32> to vector<256x128xf32>
      %15 = arith.addf %12, %14 : vector<256x128xf32>
      %16 = math.absf %15 : vector<256x128xf32>
      %cst_14 = arith.constant 0.000000e+00 : f32
      %17 = vector.broadcast %cst_14 : f32 to vector<256x128xf32>
      %18 = arith.subf %17, %16 : vector<256x128xf32>
      %19 = math.exp %18 : vector<256x128xf32>
      %cst_15 = arith.constant 1.000000e+00 : f32
      %20 = vector.broadcast %cst_15 : f32 to vector<256x128xf32>
      %21 = arith.addf %20, %19 : vector<256x128xf32>
      %22 = tpu.reciprocal %21 {approx = true} : vector<256x128xf32> -> vector<256x128xf32>
      %23 = arith.mulf %15, %22 : vector<256x128xf32>
      %cst_16 = arith.constant 0.000000e+00 : f32
      %24 = vector.broadcast %cst_16 : f32 to vector<256x128xf32>
      %25 = arith.cmpf oge, %15, %24 : vector<256x128xf32>
      %cst_17 = arith.constant 1.000000e+00 : f32
      %26 = vector.broadcast %cst_17 : f32 to vector<256x128xf32>
      %27 = arith.select %25, %26, %19 : vector<256x128xi1>, vector<256x128xf32>
      %28 = arith.mulf %23, %27 : vector<256x128xf32>
      %29 = arith.truncf %28 : vector<256x128xf32> to vector<256x128xbf16>
      %c0_18 = arith.constant 0 : index
      %c0_19 = arith.constant 0 : index
      %30 = vector.load %arg6[%c0_18, %c0_19] : memref<256x128xbf16, #tpu.memory_space<vmem>>, vector<256x128xbf16>
      tpu.vector_store %arg6[%c0_18, %c0_19], %29 {strides = array<i32>} : memref<256x128xbf16, #tpu.memory_space<vmem>>, vector<256x128xbf16>,
    } else {
    }
    return
  }
  func.func @transform_0(%arg0: i32, %arg1: i32, %arg2: i32) -> (i32, i32) {
    %c0_i32 = arith.constant 0 : i32
    %0 = arith.addi %arg2, %c0_i32 : i32
    %c0_i32_0 = arith.constant 0 : i32
    return %arg0, %0 : i32, i32
  }
  func.func @transform_1(%arg0: i32, %arg1: i32, %arg2: i32) -> (i32, i32) {
    %c0_i32 = arith.constant 0 : i32
    return %arg2, %arg1 : i32, i32
  }
  func.func @transform_2(%arg0: i32, %arg1: i32, %arg2: i32) -> (i32, i32) {
    %c0_i32 = arith.constant 0 : i32
    %c0_i32_0 = arith.constant 0 : i32
    return %c0_i32, %arg1 : i32, i32
  }
  func.func @transform_3(%arg0: i32, %arg1: i32, %arg2: i32) -> (i32, i32) {
    %c0_i32 = arith.constant 0 : i32
    return %arg0, %arg1 : i32, i32
  }
}

module attributes {stable_mosaic.version = 11 : i64} {
  func.func @_conv3x3_bias_silu_kernel(%arg0: i32, %arg1: i32, %arg2: memref<1x18x24x128xbf16, #tpu.memory_space<vmem>>, %arg3: memref<9x128x128xbf16, #tpu.memory_space<vmem>>, %arg4: memref<1x128xf32, #tpu.memory_space<vmem>>, %arg5: memref<1x16x16x128xbf16, #tpu.memory_space<vmem>>, %arg6: memref<1x16x16x128xbf16, #tpu.memory_space<vmem>>) attributes {dimension_semantics = [#tpu.dimension_semantics<parallel>, #tpu.dimension_semantics<parallel>], iteration_bounds = array<i64: 2, 1>, scalar_prefetch = 0 : i64, scratch_operands = 0 : i64, tpu.core_type = #tpu.core_type<tc>, window_params = [{transform_indices = @transform_0, window_bounds = array<i64: 1, 18, 24, 128>}, {transform_indices = @transform_1, window_bounds = array<i64: 9, 128, 128>}, {transform_indices = @transform_2, window_bounds = array<i64: 1, 128>}, {transform_indices = @transform_3, window_bounds = array<i64: 1, 16, 16, 128>}, {transform_indices = @transform_4, window_bounds = array<i64: 1, 16, 16, 128>}]} {
    %c0 = arith.constant 0 : index
    %c0_0 = arith.constant 0 : index
    %c0_1 = arith.constant 0 : index
    %c0_2 = arith.constant 0 : index
    %0 = vector.load %arg2[%c0, %c0_0, %c0_1, %c0_2] : memref<1x18x24x128xbf16, #tpu.memory_space<vmem>>, vector<1x18x24x128xbf16>
    %1 = vector.shape_cast %0 : vector<1x18x24x128xbf16> to vector<18x24x128xbf16>
    %2 = arith.extf %1 : vector<18x24x128xbf16> to vector<18x24x128xf32>
    %cst = arith.constant 0.000000e+00 : f32
    %3 = vector.broadcast %cst : f32 to vector<256x128xf32>
    %4 = vector.extract_strided_slice %2 {offsets = [0, 0, 0], sizes = [16, 24, 128], strides = [1, 1, 1]} : vector<18x24x128xf32> to vector<16x24x128xf32>
    %5 = vector.extract_strided_slice %4 {offsets = [0, 0, 0], sizes = [16, 16, 128], strides = [1, 1, 1]} : vector<16x24x128xf32> to vector<16x16x128xf32>
    %6 = vector.shape_cast %5 : vector<16x16x128xf32> to vector<256x128xf32>
    %7 = arith.truncf %6 : vector<256x128xf32> to vector<256x128xbf16>
    %c0_3 = arith.constant 0 : index
    %c0_4 = arith.constant 0 : index
    %c0_5 = arith.constant 0 : index
    %8 = vector.load %arg3[%c0_3, %c0_4, %c0_5] : memref<9x128x128xbf16, #tpu.memory_space<vmem>>, vector<1x128x128xbf16>
    %9 = vector.shape_cast %8 : vector<1x128x128xbf16> to vector<128x128xbf16>
    %cst_6 = arith.constant dense<0.000000e+00> : vector<256x128xf32>
    %10 = tpu.matmul %7, %9, %cst_6 {dimension_numbers = #tpu.dot_dimension_numbers<[1], [0], [0], [1], [0, 0, 1, 1], [], []>} : vector<256x128xbf16>, vector<128x128xbf16>, vector<256x128xf32> -> vector<256x128xf32>
    %11 = arith.addf %3, %10 : vector<256x128xf32>
    %12 = vector.extract_strided_slice %4 {offsets = [0, 1, 0], sizes = [16, 16, 128], strides = [1, 1, 1]} : vector<16x24x128xf32> to vector<16x16x128xf32>
    %13 = vector.shape_cast %12 : vector<16x16x128xf32> to vector<256x128xf32>
    %14 = arith.truncf %13 : vector<256x128xf32> to vector<256x128xbf16>
    %c1 = arith.constant 1 : index
    %c0_7 = arith.constant 0 : index
    %c0_8 = arith.constant 0 : index
    %15 = vector.load %arg3[%c1, %c0_7, %c0_8] : memref<9x128x128xbf16, #tpu.memory_space<vmem>>, vector<1x128x128xbf16>
    %16 = vector.shape_cast %15 : vector<1x128x128xbf16> to vector<128x128xbf16>
    %cst_9 = arith.constant dense<0.000000e+00> : vector<256x128xf32>
    %17 = tpu.matmul %14, %16, %cst_9 {dimension_numbers = #tpu.dot_dimension_numbers<[1], [0], [0], [1], [0, 0, 1, 1], [], []>} : vector<256x128xbf16>, vector<128x128xbf16>, vector<256x128xf32> -> vector<256x128xf32>
    %18 = arith.addf %11, %17 : vector<256x128xf32>
    %19 = vector.extract_strided_slice %4 {offsets = [0, 2, 0], sizes = [16, 16, 128], strides = [1, 1, 1]} : vector<16x24x128xf32> to vector<16x16x128xf32>
    %20 = vector.shape_cast %19 : vector<16x16x128xf32> to vector<256x128xf32>
    %21 = arith.truncf %20 : vector<256x128xf32> to vector<256x128xbf16>
    %c2 = arith.constant 2 : index
    %c0_10 = arith.constant 0 : index
    %c0_11 = arith.constant 0 : index
    %22 = vector.load %arg3[%c2, %c0_10, %c0_11] : memref<9x128x128xbf16, #tpu.memory_space<vmem>>, vector<1x128x128xbf16>
    %23 = vector.shape_cast %22 : vector<1x128x128xbf16> to vector<128x128xbf16>
    %cst_12 = arith.constant dense<0.000000e+00> : vector<256x128xf32>
    %24 = tpu.matmul %21, %23, %cst_12 {dimension_numbers = #tpu.dot_dimension_numbers<[1], [0], [0], [1], [0, 0, 1, 1], [], []>} : vector<256x128xbf16>, vector<128x128xbf16>, vector<256x128xf32> -> vector<256x128xf32>
    %25 = arith.addf %18, %24 : vector<256x128xf32>
    %26 = vector.extract_strided_slice %2 {offsets = [1, 0, 0], sizes = [16, 24, 128], strides = [1, 1, 1]} : vector<18x24x128xf32> to vector<16x24x128xf32>
    %27 = vector.extract_strided_slice %26 {offsets = [0, 0, 0], sizes = [16, 16, 128], strides = [1, 1, 1]} : vector<16x24x128xf32> to vector<16x16x128xf32>
    %28 = vector.shape_cast %27 : vector<16x16x128xf32> to vector<256x128xf32>
    %29 = arith.truncf %28 : vector<256x128xf32> to vector<256x128xbf16>
    %c3 = arith.constant 3 : index
    %c0_13 = arith.constant 0 : index
    %c0_14 = arith.constant 0 : index
    %30 = vector.load %arg3[%c3, %c0_13, %c0_14] : memref<9x128x128xbf16, #tpu.memory_space<vmem>>, vector<1x128x128xbf16>
    %31 = vector.shape_cast %30 : vector<1x128x128xbf16> to vector<128x128xbf16>
    %cst_15 = arith.constant dense<0.000000e+00> : vector<256x128xf32>
    %32 = tpu.matmul %29, %31, %cst_15 {dimension_numbers = #tpu.dot_dimension_numbers<[1], [0], [0], [1], [0, 0, 1, 1], [], []>} : vector<256x128xbf16>, vector<128x128xbf16>, vector<256x128xf32> -> vector<256x128xf32>
    %33 = arith.addf %25, %32 : vector<256x128xf32>
    %34 = vector.extract_strided_slice %26 {offsets = [0, 1, 0], sizes = [16, 16, 128], strides = [1, 1, 1]} : vector<16x24x128xf32> to vector<16x16x128xf32>
    %35 = vector.shape_cast %34 : vector<16x16x128xf32> to vector<256x128xf32>
    %36 = arith.truncf %35 : vector<256x128xf32> to vector<256x128xbf16>
    %c4 = arith.constant 4 : index
    %c0_16 = arith.constant 0 : index
    %c0_17 = arith.constant 0 : index
    %37 = vector.load %arg3[%c4, %c0_16, %c0_17] : memref<9x128x128xbf16, #tpu.memory_space<vmem>>, vector<1x128x128xbf16>
    %38 = vector.shape_cast %37 : vector<1x128x128xbf16> to vector<128x128xbf16>
    %cst_18 = arith.constant dense<0.000000e+00> : vector<256x128xf32>
    %39 = tpu.matmul %36, %38, %cst_18 {dimension_numbers = #tpu.dot_dimension_numbers<[1], [0], [0], [1], [0, 0, 1, 1], [], []>} : vector<256x128xbf16>, vector<128x128xbf16>, vector<256x128xf32> -> vector<256x128xf32>
    %40 = arith.addf %33, %39 : vector<256x128xf32>
    %41 = vector.extract_strided_slice %26 {offsets = [0, 2, 0], sizes = [16, 16, 128], strides = [1, 1, 1]} : vector<16x24x128xf32> to vector<16x16x128xf32>
    %42 = vector.shape_cast %41 : vector<16x16x128xf32> to vector<256x128xf32>
    %43 = arith.truncf %42 : vector<256x128xf32> to vector<256x128xbf16>
    %c5 = arith.constant 5 : index
    %c0_19 = arith.constant 0 : index
    %c0_20 = arith.constant 0 : index
    %44 = vector.load %arg3[%c5, %c0_19, %c0_20] : memref<9x128x128xbf16, #tpu.memory_space<vmem>>, vector<1x128x128xbf16>
    %45 = vector.shape_cast %44 : vector<1x128x128xbf16> to vector<128x128xbf16>
    %cst_21 = arith.constant dense<0.000000e+00> : vector<256x128xf32>
    %46 = tpu.matmul %43, %45, %cst_21 {dimension_numbers = #tpu.dot_dimension_numbers<[1], [0], [0], [1], [0, 0, 1, 1], [], []>} : vector<256x128xbf16>, vector<128x128xbf16>, vector<256x128xf32> -> vector<256x128xf32>
    %47 = arith.addf %40, %46 : vector<256x128xf32>
    %48 = vector.extract_strided_slice %2 {offsets = [2, 0, 0], sizes = [16, 24, 128], strides = [1, 1, 1]} : vector<18x24x128xf32> to vector<16x24x128xf32>
    %49 = vector.extract_strided_slice %48 {offsets = [0, 0, 0], sizes = [16, 16, 128], strides = [1, 1, 1]} : vector<16x24x128xf32> to vector<16x16x128xf32>
    %50 = vector.shape_cast %49 : vector<16x16x128xf32> to vector<256x128xf32>
    %51 = arith.truncf %50 : vector<256x128xf32> to vector<256x128xbf16>
    %c6 = arith.constant 6 : index
    %c0_22 = arith.constant 0 : index
    %c0_23 = arith.constant 0 : index
    %52 = vector.load %arg3[%c6, %c0_22, %c0_23] : memref<9x128x128xbf16, #tpu.memory_space<vmem>>, vector<1x128x128xbf16>
    %53 = vector.shape_cast %52 : vector<1x128x128xbf16> to vector<128x128xbf16>
    %cst_24 = arith.constant dense<0.000000e+00> : vector<256x128xf32>
    %54 = tpu.matmul %51, %53, %cst_24 {dimension_numbers = #tpu.dot_dimension_numbers<[1], [0], [0], [1], [0, 0, 1, 1], [], []>} : vector<256x128xbf16>, vector<128x128xbf16>, vector<256x128xf32> -> vector<256x128xf32>
    %55 = arith.addf %47, %54 : vector<256x128xf32>
    %56 = vector.extract_strided_slice %48 {offsets = [0, 1, 0], sizes = [16, 16, 128], strides = [1, 1, 1]} : vector<16x24x128xf32> to vector<16x16x128xf32>
    %57 = vector.shape_cast %56 : vector<16x16x128xf32> to vector<256x128xf32>
    %58 = arith.truncf %57 : vector<256x128xf32> to vector<256x128xbf16>
    %c7 = arith.constant 7 : index
    %c0_25 = arith.constant 0 : index
    %c0_26 = arith.constant 0 : index
    %59 = vector.load %arg3[%c7, %c0_25, %c0_26] : memref<9x128x128xbf16, #tpu.memory_space<vmem>>, vector<1x128x128xbf16>
    %60 = vector.shape_cast %59 : vector<1x128x128xbf16> to vector<128x128xbf16>
    %cst_27 = arith.constant dense<0.000000e+00> : vector<256x128xf32>
    %61 = tpu.matmul %58, %60, %cst_27 {dimension_numbers = #tpu.dot_dimension_numbers<[1], [0], [0], [1], [0, 0, 1, 1], [], []>} : vector<256x128xbf16>, vector<128x128xbf16>, vector<256x128xf32> -> vector<256x128xf32>
    %62 = arith.addf %55, %61 : vector<256x128xf32>
    %63 = vector.extract_strided_slice %48 {offsets = [0, 2, 0], sizes = [16, 16, 128], strides = [1, 1, 1]} : vector<16x24x128xf32> to vector<16x16x128xf32>
    %64 = vector.shape_cast %63 : vector<16x16x128xf32> to vector<256x128xf32>
    %65 = arith.truncf %64 : vector<256x128xf32> to vector<256x128xbf16>
    %c8 = arith.constant 8 : index
    %c0_28 = arith.constant 0 : index
    %c0_29 = arith.constant 0 : index
    %66 = vector.load %arg3[%c8, %c0_28, %c0_29] : memref<9x128x128xbf16, #tpu.memory_space<vmem>>, vector<1x128x128xbf16>
    %67 = vector.shape_cast %66 : vector<1x128x128xbf16> to vector<128x128xbf16>
    %cst_30 = arith.constant dense<0.000000e+00> : vector<256x128xf32>
    %68 = tpu.matmul %65, %67, %cst_30 {dimension_numbers = #tpu.dot_dimension_numbers<[1], [0], [0], [1], [0, 0, 1, 1], [], []>} : vector<256x128xbf16>, vector<128x128xbf16>, vector<256x128xf32> -> vector<256x128xf32>
    %69 = arith.addf %62, %68 : vector<256x128xf32>
    %c0_31 = arith.constant 0 : index
    %c0_32 = arith.constant 0 : index
    %70 = vector.load %arg4[%c0_31, %c0_32] : memref<1x128xf32, #tpu.memory_space<vmem>>, vector<1x128xf32>
    %71 = vector.broadcast %70 : vector<1x128xf32> to vector<256x128xf32>
    %72 = arith.addf %69, %71 : vector<256x128xf32>
    %73 = math.absf %72 : vector<256x128xf32>
    %cst_33 = arith.constant 0.000000e+00 : f32
    %74 = vector.broadcast %cst_33 : f32 to vector<256x128xf32>
    %75 = arith.subf %74, %73 : vector<256x128xf32>
    %76 = math.exp %75 : vector<256x128xf32>
    %cst_34 = arith.constant 1.000000e+00 : f32
    %77 = vector.broadcast %cst_34 : f32 to vector<256x128xf32>
    %78 = arith.addf %77, %76 : vector<256x128xf32>
    %79 = tpu.reciprocal %78 {approx = true} : vector<256x128xf32> -> vector<256x128xf32>
    %80 = arith.mulf %72, %79 : vector<256x128xf32>
    %cst_35 = arith.constant 0.000000e+00 : f32
    %81 = vector.broadcast %cst_35 : f32 to vector<256x128xf32>
    %82 = arith.cmpf oge, %72, %81 : vector<256x128xf32>
    %cst_36 = arith.constant 1.000000e+00 : f32
    %83 = vector.broadcast %cst_36 : f32 to vector<256x128xf32>
    %84 = arith.select %82, %83, %76 : vector<256x128xi1>, vector<256x128xf32>
    %85 = arith.mulf %80, %84 : vector<256x128xf32>
    %c0_37 = arith.constant 0 : index
    %c0_38 = arith.constant 0 : index
    %c0_39 = arith.constant 0 : index
    %c0_40 = arith.constant 0 : index
    %86 = vector.load %arg5[%c0_37, %c0_38, %c0_39, %c0_40] : memref<1x16x16x128xbf16, #tpu.memory_space<vmem>>, vector<1x16x16x128xbf16>
    %87 = vector.shape_cast %86 : vector<1x16x16x128xbf16> to vector<16x16x128xbf16>
    %88 = vector.shape_cast %87 : vector<16x16x128xbf16> to vector<256x128xbf16>
    %89 = arith.extf %88 : vector<256x128xbf16> to vector<256x128xf32>
    %90 = arith.addf %85, %89 : vector<256x128xf32>
    %91 = arith.truncf %90 : vector<256x128xf32> to vector<256x128xbf16>
    %92 = vector.shape_cast %91 : vector<256x128xbf16> to vector<16x16x128xbf16>
    %c0_41 = arith.constant 0 : index
    %c0_42 = arith.constant 0 : index
    %c0_43 = arith.constant 0 : index
    %c0_44 = arith.constant 0 : index
    %93 = vector.load %arg6[%c0_41, %c0_42, %c0_43, %c0_44] : memref<1x16x16x128xbf16, #tpu.memory_space<vmem>>, vector<1x16x16x128xbf16>
    %94 = vector.shape_cast %93 : vector<1x16x16x128xbf16> to vector<16x16x128xbf16>
    %95 = vector.shape_cast %92 : vector<16x16x128xbf16> to vector<1x16x16x128xbf16>
    tpu.vector_store %arg6[%c0_41, %c0_42, %c0_43, %c0_44], %95 {strides = array<i32>} : memref<1x16x16x128xbf16, #tpu.memory_space<vmem>>, vector<1x16x16x128xbf16>,
    return
  }
  func.func @transform_0(%arg0: i32, %arg1: i32) -> (i32, i32, i32, i32) {
    %c0_i32 = arith.constant 0 : i32
    %c0_i32_0 = arith.constant 0 : i32
    %c0_i32_1 = arith.constant 0 : i32
    %c0_i32_2 = arith.constant 0 : i32
    return %arg0, %c0_i32, %c0_i32_0, %c0_i32_1 : i32, i32, i32, i32
  }
  func.func @transform_1(%arg0: i32, %arg1: i32) -> (i32, i32, i32) {
    %c0_i32 = arith.constant 0 : i32
    %c0_i32_0 = arith.constant 0 : i32
    %c0_i32_1 = arith.constant 0 : i32
    return %c0_i32, %c0_i32_0, %arg1 : i32, i32, i32
  }
  func.func @transform_2(%arg0: i32, %arg1: i32) -> (i32, i32) {
    %c0_i32 = arith.constant 0 : i32
    %c0_i32_0 = arith.constant 0 : i32
    return %c0_i32, %arg1 : i32, i32
  }
  func.func @transform_3(%arg0: i32, %arg1: i32) -> (i32, i32, i32, i32) {
    %c0_i32 = arith.constant 0 : i32
    %0 = arith.addi %arg1, %c0_i32 : i32
    %c0_i32_0 = arith.constant 0 : i32
    %c0_i32_1 = arith.constant 0 : i32
    %c0_i32_2 = arith.constant 0 : i32
    return %arg0, %c0_i32_0, %c0_i32_1, %0 : i32, i32, i32, i32
  }
  func.func @transform_4(%arg0: i32, %arg1: i32) -> (i32, i32, i32, i32) {
    %c0_i32 = arith.constant 0 : i32
    %c0_i32_0 = arith.constant 0 : i32
    %c0_i32_1 = arith.constant 0 : i32
    return %arg0, %c0_i32, %c0_i32_0, %arg1 : i32, i32, i32, i32
  }
}

module attributes {stable_mosaic.version = 11 : i64} {
  func.func @_matmul_bias_silu_kernel(%arg0: i32, %arg1: i32, %arg2: i32, %arg3: memref<256x128xbf16, #tpu.memory_space<vmem>>, %arg4: memref<128x128xbf16, #tpu.memory_space<vmem>>, %arg5: memref<1x128xf32, #tpu.memory_space<vmem>>, %arg6: memref<256x128xbf16, #tpu.memory_space<vmem>>, %arg7: memref<256x128xf32, #tpu.memory_space<vmem>>) attributes {dimension_semantics = [#tpu.dimension_semantics<parallel>, #tpu.dimension_semantics<parallel>, #tpu.dimension_semantics<arbitrary>], iteration_bounds = array<i64: 2, 1, 1>, scalar_prefetch = 0 : i64, scratch_operands = 1 : i64, tpu.core_type = #tpu.core_type<tc>, window_params = [{transform_indices = @transform_0, window_bounds = array<i64: 256, 128>}, {transform_indices = @transform_1, window_bounds = array<i64: 128, 128>}, {transform_indices = @transform_2, window_bounds = array<i64: 1, 128>}, {transform_indices = @transform_3, window_bounds = array<i64: 256, 128>}]} {
    %c0_i32 = arith.constant 0 : i32
    %0 = arith.cmpi eq, %arg2, %c0_i32 : i32
    %1 = arith.extui %0 : i1 to i32
    %c0_i32_0 = arith.constant 0 : i32
    %2 = arith.cmpi ne, %1, %c0_i32_0 : i32
    scf.if %2 {
      %cst_10 = arith.constant 0.000000e+00 : f32
      %12 = vector.broadcast %cst_10 : f32 to vector<256x128xf32>
      %c0_11 = arith.constant 0 : index
      %c0_12 = arith.constant 0 : index
      %13 = vector.load %arg7[%c0_11, %c0_12] : memref<256x128xf32, #tpu.memory_space<vmem>>, vector<256x128xf32>
      tpu.vector_store %arg7[%c0_11, %c0_12], %12 {strides = array<i32>} : memref<256x128xf32, #tpu.memory_space<vmem>>, vector<256x128xf32>,
    } else {
    }
    %c0 = arith.constant 0 : index
    %c0_1 = arith.constant 0 : index
    %3 = vector.load %arg7[%c0, %c0_1] : memref<256x128xf32, #tpu.memory_space<vmem>>, vector<256x128xf32>
    %c0_2 = arith.constant 0 : index
    %c0_3 = arith.constant 0 : index
    %4 = vector.load %arg3[%c0_2, %c0_3] : memref<256x128xbf16, #tpu.memory_space<vmem>>, vector<256x128xbf16>
    %c0_4 = arith.constant 0 : index
    %c0_5 = arith.constant 0 : index
    %5 = vector.load %arg4[%c0_4, %c0_5] : memref<128x128xbf16, #tpu.memory_space<vmem>>, vector<128x128xbf16>
    %cst = arith.constant dense<0.000000e+00> : vector<256x128xf32>
    %6 = tpu.matmul %4, %5, %cst {dimension_numbers = #tpu.dot_dimension_numbers<[1], [0], [0], [1], [0, 0, 1, 1], [], []>} : vector<256x128xbf16>, vector<128x128xbf16>, vector<256x128xf32> -> vector<256x128xf32>
    %7 = arith.addf %3, %6 : vector<256x128xf32>
    %c0_6 = arith.constant 0 : index
    %c0_7 = arith.constant 0 : index
    %8 = vector.load %arg7[%c0_6, %c0_7] : memref<256x128xf32, #tpu.memory_space<vmem>>, vector<256x128xf32>
    tpu.vector_store %arg7[%c0_6, %c0_7], %7 {strides = array<i32>} : memref<256x128xf32, #tpu.memory_space<vmem>>, vector<256x128xf32>,
    %c0_i32_8 = arith.constant 0 : i32
    %9 = arith.cmpi eq, %arg2, %c0_i32_8 : i32
    %10 = arith.extui %9 : i1 to i32
    %c0_i32_9 = arith.constant 0 : i32
    %11 = arith.cmpi ne, %10, %c0_i32_9 : i32
    scf.if %11 {
      %c0_10 = arith.constant 0 : index
      %c0_11 = arith.constant 0 : index
      %12 = vector.load %arg7[%c0_10, %c0_11] : memref<256x128xf32, #tpu.memory_space<vmem>>, vector<256x128xf32>
      %c0_12 = arith.constant 0 : index
      %c0_13 = arith.constant 0 : index
      %13 = vector.load %arg5[%c0_12, %c0_13] : memref<1x128xf32, #tpu.memory_space<vmem>>, vector<1x128xf32>
      %14 = vector.broadcast %13 : vector<1x128xf32> to vector<256x128xf32>
      %15 = arith.addf %12, %14 : vector<256x128xf32>
      %16 = math.absf %15 : vector<256x128xf32>
      %cst_14 = arith.constant 0.000000e+00 : f32
      %17 = vector.broadcast %cst_14 : f32 to vector<256x128xf32>
      %18 = arith.subf %17, %16 : vector<256x128xf32>
      %19 = math.exp %18 : vector<256x128xf32>
      %cst_15 = arith.constant 1.000000e+00 : f32
      %20 = vector.broadcast %cst_15 : f32 to vector<256x128xf32>
      %21 = arith.addf %20, %19 : vector<256x128xf32>
      %22 = tpu.reciprocal %21 {approx = true} : vector<256x128xf32> -> vector<256x128xf32>
      %23 = arith.mulf %15, %22 : vector<256x128xf32>
      %cst_16 = arith.constant 0.000000e+00 : f32
      %24 = vector.broadcast %cst_16 : f32 to vector<256x128xf32>
      %25 = arith.cmpf oge, %15, %24 : vector<256x128xf32>
      %cst_17 = arith.constant 1.000000e+00 : f32
      %26 = vector.broadcast %cst_17 : f32 to vector<256x128xf32>
      %27 = arith.select %25, %26, %19 : vector<256x128xi1>, vector<256x128xf32>
      %28 = arith.mulf %23, %27 : vector<256x128xf32>
      %29 = arith.truncf %28 : vector<256x128xf32> to vector<256x128xbf16>
      %c0_18 = arith.constant 0 : index
      %c0_19 = arith.constant 0 : index
      %30 = vector.load %arg6[%c0_18, %c0_19] : memref<256x128xbf16, #tpu.memory_space<vmem>>, vector<256x128xbf16>
      tpu.vector_store %arg6[%c0_18, %c0_19], %29 {strides = array<i32>} : memref<256x128xbf16, #tpu.memory_space<vmem>>, vector<256x128xbf16>,
    } else {
    }
    return
  }
  func.func @transform_0(%arg0: i32, %arg1: i32, %arg2: i32) -> (i32, i32) {
    %c0_i32 = arith.constant 0 : i32
    %0 = arith.addi %arg2, %c0_i32 : i32
    %c0_i32_0 = arith.constant 0 : i32
    return %arg0, %0 : i32, i32
  }
  func.func @transform_1(%arg0: i32, %arg1: i32, %arg2: i32) -> (i32, i32) {
    %c0_i32 = arith.constant 0 : i32
    return %arg2, %arg1 : i32, i32
  }
  func.func @transform_2(%arg0: i32, %arg1: i32, %arg2: i32) -> (i32, i32) {
    %c0_i32 = arith.constant 0 : i32
    %c0_i32_0 = arith.constant 0 : i32
    return %c0_i32, %arg1 : i32, i32
  }
  func.func @transform_3(%arg0: i32, %arg1: i32, %arg2: i32) -> (i32, i32) {
    %c0_i32 = arith.constant 0 : i32
    return %arg0, %arg1 : i32, i32
  }
}

module attributes {stable_mosaic.version = 11 : i64} {
  func.func @_conv3x3_bias_silu_kernel(%arg0: i32, %arg1: i32, %arg2: memref<1x18x24x128xbf16, #tpu.memory_space<vmem>>, %arg3: memref<9x128x128xbf16, #tpu.memory_space<vmem>>, %arg4: memref<1x128xf32, #tpu.memory_space<vmem>>, %arg5: memref<1x16x16x128xbf16, #tpu.memory_space<vmem>>, %arg6: memref<1x16x16x128xbf16, #tpu.memory_space<vmem>>) attributes {dimension_semantics = [#tpu.dimension_semantics<parallel>, #tpu.dimension_semantics<parallel>], iteration_bounds = array<i64: 2, 1>, scalar_prefetch = 0 : i64, scratch_operands = 0 : i64, tpu.core_type = #tpu.core_type<tc>, window_params = [{transform_indices = @transform_0, window_bounds = array<i64: 1, 18, 24, 128>}, {transform_indices = @transform_1, window_bounds = array<i64: 9, 128, 128>}, {transform_indices = @transform_2, window_bounds = array<i64: 1, 128>}, {transform_indices = @transform_3, window_bounds = array<i64: 1, 16, 16, 128>}, {transform_indices = @transform_4, window_bounds = array<i64: 1, 16, 16, 128>}]} {
    %c0 = arith.constant 0 : index
    %c0_0 = arith.constant 0 : index
    %c0_1 = arith.constant 0 : index
    %c0_2 = arith.constant 0 : index
    %0 = vector.load %arg2[%c0, %c0_0, %c0_1, %c0_2] : memref<1x18x24x128xbf16, #tpu.memory_space<vmem>>, vector<1x18x24x128xbf16>
    %1 = vector.shape_cast %0 : vector<1x18x24x128xbf16> to vector<18x24x128xbf16>
    %2 = arith.extf %1 : vector<18x24x128xbf16> to vector<18x24x128xf32>
    %cst = arith.constant 0.000000e+00 : f32
    %3 = vector.broadcast %cst : f32 to vector<256x128xf32>
    %4 = vector.extract_strided_slice %2 {offsets = [0, 0, 0], sizes = [16, 24, 128], strides = [1, 1, 1]} : vector<18x24x128xf32> to vector<16x24x128xf32>
    %5 = vector.extract_strided_slice %4 {offsets = [0, 0, 0], sizes = [16, 16, 128], strides = [1, 1, 1]} : vector<16x24x128xf32> to vector<16x16x128xf32>
    %6 = vector.shape_cast %5 : vector<16x16x128xf32> to vector<256x128xf32>
    %7 = arith.truncf %6 : vector<256x128xf32> to vector<256x128xbf16>
    %c0_3 = arith.constant 0 : index
    %c0_4 = arith.constant 0 : index
    %c0_5 = arith.constant 0 : index
    %8 = vector.load %arg3[%c0_3, %c0_4, %c0_5] : memref<9x128x128xbf16, #tpu.memory_space<vmem>>, vector<1x128x128xbf16>
    %9 = vector.shape_cast %8 : vector<1x128x128xbf16> to vector<128x128xbf16>
    %cst_6 = arith.constant dense<0.000000e+00> : vector<256x128xf32>
    %10 = tpu.matmul %7, %9, %cst_6 {dimension_numbers = #tpu.dot_dimension_numbers<[1], [0], [0], [1], [0, 0, 1, 1], [], []>} : vector<256x128xbf16>, vector<128x128xbf16>, vector<256x128xf32> -> vector<256x128xf32>
    %11 = arith.addf %3, %10 : vector<256x128xf32>
    %12 = vector.extract_strided_slice %4 {offsets = [0, 1, 0], sizes = [16, 16, 128], strides = [1, 1, 1]} : vector<16x24x128xf32> to vector<16x16x128xf32>
    %13 = vector.shape_cast %12 : vector<16x16x128xf32> to vector<256x128xf32>
    %14 = arith.truncf %13 : vector<256x128xf32> to vector<256x128xbf16>
    %c1 = arith.constant 1 : index
    %c0_7 = arith.constant 0 : index
    %c0_8 = arith.constant 0 : index
    %15 = vector.load %arg3[%c1, %c0_7, %c0_8] : memref<9x128x128xbf16, #tpu.memory_space<vmem>>, vector<1x128x128xbf16>
    %16 = vector.shape_cast %15 : vector<1x128x128xbf16> to vector<128x128xbf16>
    %cst_9 = arith.constant dense<0.000000e+00> : vector<256x128xf32>
    %17 = tpu.matmul %14, %16, %cst_9 {dimension_numbers = #tpu.dot_dimension_numbers<[1], [0], [0], [1], [0, 0, 1, 1], [], []>} : vector<256x128xbf16>, vector<128x128xbf16>, vector<256x128xf32> -> vector<256x128xf32>
    %18 = arith.addf %11, %17 : vector<256x128xf32>
    %19 = vector.extract_strided_slice %4 {offsets = [0, 2, 0], sizes = [16, 16, 128], strides = [1, 1, 1]} : vector<16x24x128xf32> to vector<16x16x128xf32>
    %20 = vector.shape_cast %19 : vector<16x16x128xf32> to vector<256x128xf32>
    %21 = arith.truncf %20 : vector<256x128xf32> to vector<256x128xbf16>
    %c2 = arith.constant 2 : index
    %c0_10 = arith.constant 0 : index
    %c0_11 = arith.constant 0 : index
    %22 = vector.load %arg3[%c2, %c0_10, %c0_11] : memref<9x128x128xbf16, #tpu.memory_space<vmem>>, vector<1x128x128xbf16>
    %23 = vector.shape_cast %22 : vector<1x128x128xbf16> to vector<128x128xbf16>
    %cst_12 = arith.constant dense<0.000000e+00> : vector<256x128xf32>
    %24 = tpu.matmul %21, %23, %cst_12 {dimension_numbers = #tpu.dot_dimension_numbers<[1], [0], [0], [1], [0, 0, 1, 1], [], []>} : vector<256x128xbf16>, vector<128x128xbf16>, vector<256x128xf32> -> vector<256x128xf32>
    %25 = arith.addf %18, %24 : vector<256x128xf32>
    %26 = vector.extract_strided_slice %2 {offsets = [1, 0, 0], sizes = [16, 24, 128], strides = [1, 1, 1]} : vector<18x24x128xf32> to vector<16x24x128xf32>
    %27 = vector.extract_strided_slice %26 {offsets = [0, 0, 0], sizes = [16, 16, 128], strides = [1, 1, 1]} : vector<16x24x128xf32> to vector<16x16x128xf32>
    %28 = vector.shape_cast %27 : vector<16x16x128xf32> to vector<256x128xf32>
    %29 = arith.truncf %28 : vector<256x128xf32> to vector<256x128xbf16>
    %c3 = arith.constant 3 : index
    %c0_13 = arith.constant 0 : index
    %c0_14 = arith.constant 0 : index
    %30 = vector.load %arg3[%c3, %c0_13, %c0_14] : memref<9x128x128xbf16, #tpu.memory_space<vmem>>, vector<1x128x128xbf16>
    %31 = vector.shape_cast %30 : vector<1x128x128xbf16> to vector<128x128xbf16>
    %cst_15 = arith.constant dense<0.000000e+00> : vector<256x128xf32>
    %32 = tpu.matmul %29, %31, %cst_15 {dimension_numbers = #tpu.dot_dimension_numbers<[1], [0], [0], [1], [0, 0, 1, 1], [], []>} : vector<256x128xbf16>, vector<128x128xbf16>, vector<256x128xf32> -> vector<256x128xf32>
    %33 = arith.addf %25, %32 : vector<256x128xf32>
    %34 = vector.extract_strided_slice %26 {offsets = [0, 1, 0], sizes = [16, 16, 128], strides = [1, 1, 1]} : vector<16x24x128xf32> to vector<16x16x128xf32>
    %35 = vector.shape_cast %34 : vector<16x16x128xf32> to vector<256x128xf32>
    %36 = arith.truncf %35 : vector<256x128xf32> to vector<256x128xbf16>
    %c4 = arith.constant 4 : index
    %c0_16 = arith.constant 0 : index
    %c0_17 = arith.constant 0 : index
    %37 = vector.load %arg3[%c4, %c0_16, %c0_17] : memref<9x128x128xbf16, #tpu.memory_space<vmem>>, vector<1x128x128xbf16>
    %38 = vector.shape_cast %37 : vector<1x128x128xbf16> to vector<128x128xbf16>
    %cst_18 = arith.constant dense<0.000000e+00> : vector<256x128xf32>
    %39 = tpu.matmul %36, %38, %cst_18 {dimension_numbers = #tpu.dot_dimension_numbers<[1], [0], [0], [1], [0, 0, 1, 1], [], []>} : vector<256x128xbf16>, vector<128x128xbf16>, vector<256x128xf32> -> vector<256x128xf32>
    %40 = arith.addf %33, %39 : vector<256x128xf32>
    %41 = vector.extract_strided_slice %26 {offsets = [0, 2, 0], sizes = [16, 16, 128], strides = [1, 1, 1]} : vector<16x24x128xf32> to vector<16x16x128xf32>
    %42 = vector.shape_cast %41 : vector<16x16x128xf32> to vector<256x128xf32>
    %43 = arith.truncf %42 : vector<256x128xf32> to vector<256x128xbf16>
    %c5 = arith.constant 5 : index
    %c0_19 = arith.constant 0 : index
    %c0_20 = arith.constant 0 : index
    %44 = vector.load %arg3[%c5, %c0_19, %c0_20] : memref<9x128x128xbf16, #tpu.memory_space<vmem>>, vector<1x128x128xbf16>
    %45 = vector.shape_cast %44 : vector<1x128x128xbf16> to vector<128x128xbf16>
    %cst_21 = arith.constant dense<0.000000e+00> : vector<256x128xf32>
    %46 = tpu.matmul %43, %45, %cst_21 {dimension_numbers = #tpu.dot_dimension_numbers<[1], [0], [0], [1], [0, 0, 1, 1], [], []>} : vector<256x128xbf16>, vector<128x128xbf16>, vector<256x128xf32> -> vector<256x128xf32>
    %47 = arith.addf %40, %46 : vector<256x128xf32>
    %48 = vector.extract_strided_slice %2 {offsets = [2, 0, 0], sizes = [16, 24, 128], strides = [1, 1, 1]} : vector<18x24x128xf32> to vector<16x24x128xf32>
    %49 = vector.extract_strided_slice %48 {offsets = [0, 0, 0], sizes = [16, 16, 128], strides = [1, 1, 1]} : vector<16x24x128xf32> to vector<16x16x128xf32>
    %50 = vector.shape_cast %49 : vector<16x16x128xf32> to vector<256x128xf32>
    %51 = arith.truncf %50 : vector<256x128xf32> to vector<256x128xbf16>
    %c6 = arith.constant 6 : index
    %c0_22 = arith.constant 0 : index
    %c0_23 = arith.constant 0 : index
    %52 = vector.load %arg3[%c6, %c0_22, %c0_23] : memref<9x128x128xbf16, #tpu.memory_space<vmem>>, vector<1x128x128xbf16>
    %53 = vector.shape_cast %52 : vector<1x128x128xbf16> to vector<128x128xbf16>
    %cst_24 = arith.constant dense<0.000000e+00> : vector<256x128xf32>
    %54 = tpu.matmul %51, %53, %cst_24 {dimension_numbers = #tpu.dot_dimension_numbers<[1], [0], [0], [1], [0, 0, 1, 1], [], []>} : vector<256x128xbf16>, vector<128x128xbf16>, vector<256x128xf32> -> vector<256x128xf32>
    %55 = arith.addf %47, %54 : vector<256x128xf32>
    %56 = vector.extract_strided_slice %48 {offsets = [0, 1, 0], sizes = [16, 16, 128], strides = [1, 1, 1]} : vector<16x24x128xf32> to vector<16x16x128xf32>
    %57 = vector.shape_cast %56 : vector<16x16x128xf32> to vector<256x128xf32>
    %58 = arith.truncf %57 : vector<256x128xf32> to vector<256x128xbf16>
    %c7 = arith.constant 7 : index
    %c0_25 = arith.constant 0 : index
    %c0_26 = arith.constant 0 : index
    %59 = vector.load %arg3[%c7, %c0_25, %c0_26] : memref<9x128x128xbf16, #tpu.memory_space<vmem>>, vector<1x128x128xbf16>
    %60 = vector.shape_cast %59 : vector<1x128x128xbf16> to vector<128x128xbf16>
    %cst_27 = arith.constant dense<0.000000e+00> : vector<256x128xf32>
    %61 = tpu.matmul %58, %60, %cst_27 {dimension_numbers = #tpu.dot_dimension_numbers<[1], [0], [0], [1], [0, 0, 1, 1], [], []>} : vector<256x128xbf16>, vector<128x128xbf16>, vector<256x128xf32> -> vector<256x128xf32>
    %62 = arith.addf %55, %61 : vector<256x128xf32>
    %63 = vector.extract_strided_slice %48 {offsets = [0, 2, 0], sizes = [16, 16, 128], strides = [1, 1, 1]} : vector<16x24x128xf32> to vector<16x16x128xf32>
    %64 = vector.shape_cast %63 : vector<16x16x128xf32> to vector<256x128xf32>
    %65 = arith.truncf %64 : vector<256x128xf32> to vector<256x128xbf16>
    %c8 = arith.constant 8 : index
    %c0_28 = arith.constant 0 : index
    %c0_29 = arith.constant 0 : index
    %66 = vector.load %arg3[%c8, %c0_28, %c0_29] : memref<9x128x128xbf16, #tpu.memory_space<vmem>>, vector<1x128x128xbf16>
    %67 = vector.shape_cast %66 : vector<1x128x128xbf16> to vector<128x128xbf16>
    %cst_30 = arith.constant dense<0.000000e+00> : vector<256x128xf32>
    %68 = tpu.matmul %65, %67, %cst_30 {dimension_numbers = #tpu.dot_dimension_numbers<[1], [0], [0], [1], [0, 0, 1, 1], [], []>} : vector<256x128xbf16>, vector<128x128xbf16>, vector<256x128xf32> -> vector<256x128xf32>
    %69 = arith.addf %62, %68 : vector<256x128xf32>
    %c0_31 = arith.constant 0 : index
    %c0_32 = arith.constant 0 : index
    %70 = vector.load %arg4[%c0_31, %c0_32] : memref<1x128xf32, #tpu.memory_space<vmem>>, vector<1x128xf32>
    %71 = vector.broadcast %70 : vector<1x128xf32> to vector<256x128xf32>
    %72 = arith.addf %69, %71 : vector<256x128xf32>
    %73 = math.absf %72 : vector<256x128xf32>
    %cst_33 = arith.constant 0.000000e+00 : f32
    %74 = vector.broadcast %cst_33 : f32 to vector<256x128xf32>
    %75 = arith.subf %74, %73 : vector<256x128xf32>
    %76 = math.exp %75 : vector<256x128xf32>
    %cst_34 = arith.constant 1.000000e+00 : f32
    %77 = vector.broadcast %cst_34 : f32 to vector<256x128xf32>
    %78 = arith.addf %77, %76 : vector<256x128xf32>
    %79 = tpu.reciprocal %78 {approx = true} : vector<256x128xf32> -> vector<256x128xf32>
    %80 = arith.mulf %72, %79 : vector<256x128xf32>
    %cst_35 = arith.constant 0.000000e+00 : f32
    %81 = vector.broadcast %cst_35 : f32 to vector<256x128xf32>
    %82 = arith.cmpf oge, %72, %81 : vector<256x128xf32>
    %cst_36 = arith.constant 1.000000e+00 : f32
    %83 = vector.broadcast %cst_36 : f32 to vector<256x128xf32>
    %84 = arith.select %82, %83, %76 : vector<256x128xi1>, vector<256x128xf32>
    %85 = arith.mulf %80, %84 : vector<256x128xf32>
    %c0_37 = arith.constant 0 : index
    %c0_38 = arith.constant 0 : index
    %c0_39 = arith.constant 0 : index
    %c0_40 = arith.constant 0 : index
    %86 = vector.load %arg5[%c0_37, %c0_38, %c0_39, %c0_40] : memref<1x16x16x128xbf16, #tpu.memory_space<vmem>>, vector<1x16x16x128xbf16>
    %87 = vector.shape_cast %86 : vector<1x16x16x128xbf16> to vector<16x16x128xbf16>
    %88 = vector.shape_cast %87 : vector<16x16x128xbf16> to vector<256x128xbf16>
    %89 = arith.extf %88 : vector<256x128xbf16> to vector<256x128xf32>
    %90 = arith.addf %85, %89 : vector<256x128xf32>
    %91 = arith.truncf %90 : vector<256x128xf32> to vector<256x128xbf16>
    %92 = vector.shape_cast %91 : vector<256x128xbf16> to vector<16x16x128xbf16>
    %c0_41 = arith.constant 0 : index
    %c0_42 = arith.constant 0 : index
    %c0_43 = arith.constant 0 : index
    %c0_44 = arith.constant 0 : index
    %93 = vector.load %arg6[%c0_41, %c0_42, %c0_43, %c0_44] : memref<1x16x16x128xbf16, #tpu.memory_space<vmem>>, vector<1x16x16x128xbf16>
    %94 = vector.shape_cast %93 : vector<1x16x16x128xbf16> to vector<16x16x128xbf16>
    %95 = vector.shape_cast %92 : vector<16x16x128xbf16> to vector<1x16x16x128xbf16>
    tpu.vector_store %arg6[%c0_41, %c0_42, %c0_43, %c0_44], %95 {strides = array<i32>} : memref<1x16x16x128xbf16, #tpu.memory_space<vmem>>, vector<1x16x16x128xbf16>,
    return
  }
  func.func @transform_0(%arg0: i32, %arg1: i32) -> (i32, i32, i32, i32) {
    %c0_i32 = arith.constant 0 : i32
    %c0_i32_0 = arith.constant 0 : i32
    %c0_i32_1 = arith.constant 0 : i32
    %c0_i32_2 = arith.constant 0 : i32
    return %arg0, %c0_i32, %c0_i32_0, %c0_i32_1 : i32, i32, i32, i32
  }
  func.func @transform_1(%arg0: i32, %arg1: i32) -> (i32, i32, i32) {
    %c0_i32 = arith.constant 0 : i32
    %c0_i32_0 = arith.constant 0 : i32
    %c0_i32_1 = arith.constant 0 : i32
    return %c0_i32, %c0_i32_0, %arg1 : i32, i32, i32
  }
  func.func @transform_2(%arg0: i32, %arg1: i32) -> (i32, i32) {
    %c0_i32 = arith.constant 0 : i32
    %c0_i32_0 = arith.constant 0 : i32
    return %c0_i32, %arg1 : i32, i32
  }
  func.func @transform_3(%arg0: i32, %arg1: i32) -> (i32, i32, i32, i32) {
    %c0_i32 = arith.constant 0 : i32
    %0 = arith.addi %arg1, %c0_i32 : i32
    %c0_i32_0 = arith.constant 0 : i32
    %c0_i32_1 = arith.constant 0 : i32
    %c0_i32_2 = arith.constant 0 : i32
    return %arg0, %c0_i32_0, %c0_i32_1, %0 : i32, i32, i32, i32
  }
  func.func @transform_4(%arg0: i32, %arg1: i32) -> (i32, i32, i32, i32) {
    %c0_i32 = arith.constant 0 : i32
    %c0_i32_0 = arith.constant 0 : i32
    %c0_i32_1 = arith.constant 0 : i32
    return %arg0, %c0_i32, %c0_i32_0, %arg1 : i32, i32, i32, i32
  }
}

module attributes {stable_mosaic.version = 11 : i64} {
  func.func @_dual_matmul_bias_silu_kernel(%arg0: i32, %arg1: i32, %arg2: memref<256x128xbf16, #tpu.memory_space<vmem>>, %arg3: memref<256x128xbf16, #tpu.memory_space<vmem>>, %arg4: memref<128x128xbf16, #tpu.memory_space<vmem>>, %arg5: memref<128x128xbf16, #tpu.memory_space<vmem>>, %arg6: memref<1x128xf32, #tpu.memory_space<vmem>>, %arg7: memref<256x128xbf16, #tpu.memory_space<vmem>>) attributes {dimension_semantics = [#tpu.dimension_semantics<parallel>, #tpu.dimension_semantics<parallel>], iteration_bounds = array<i64: 2, 1>, scalar_prefetch = 0 : i64, scratch_operands = 0 : i64, tpu.core_type = #tpu.core_type<tc>, window_params = [{transform_indices = @transform_0, window_bounds = array<i64: 256, 128>}, {transform_indices = @transform_1, window_bounds = array<i64: 256, 128>}, {transform_indices = @transform_2, window_bounds = array<i64: 128, 128>}, {transform_indices = @transform_3, window_bounds = array<i64: 128, 128>}, {transform_indices = @transform_4, window_bounds = array<i64: 1, 128>}, {transform_indices = @transform_5, window_bounds = array<i64: 256, 128>}]} {
    %c0 = arith.constant 0 : index
    %c0_0 = arith.constant 0 : index
    %0 = vector.load %arg2[%c0, %c0_0] : memref<256x128xbf16, #tpu.memory_space<vmem>>, vector<256x128xbf16>
    %c0_1 = arith.constant 0 : index
    %c0_2 = arith.constant 0 : index
    %1 = vector.load %arg4[%c0_1, %c0_2] : memref<128x128xbf16, #tpu.memory_space<vmem>>, vector<128x128xbf16>
    %cst = arith.constant dense<0.000000e+00> : vector<256x128xf32>
    %2 = tpu.matmul %0, %1, %cst {dimension_numbers = #tpu.dot_dimension_numbers<[1], [0], [0], [1], [0, 0, 1, 1], [], []>} : vector<256x128xbf16>, vector<128x128xbf16>, vector<256x128xf32> -> vector<256x128xf32>
    %c0_3 = arith.constant 0 : index
    %c0_4 = arith.constant 0 : index
    %3 = vector.load %arg3[%c0_3, %c0_4] : memref<256x128xbf16, #tpu.memory_space<vmem>>, vector<256x128xbf16>
    %c0_5 = arith.constant 0 : index
    %c0_6 = arith.constant 0 : index
    %4 = vector.load %arg5[%c0_5, %c0_6] : memref<128x128xbf16, #tpu.memory_space<vmem>>, vector<128x128xbf16>
    %cst_7 = arith.constant dense<0.000000e+00> : vector<256x128xf32>
    %5 = tpu.matmul %3, %4, %cst_7 {dimension_numbers = #tpu.dot_dimension_numbers<[1], [0], [0], [1], [0, 0, 1, 1], [], []>} : vector<256x128xbf16>, vector<128x128xbf16>, vector<256x128xf32> -> vector<256x128xf32>
    %6 = arith.addf %2, %5 : vector<256x128xf32>
    %c0_8 = arith.constant 0 : index
    %c0_9 = arith.constant 0 : index
    %7 = vector.load %arg6[%c0_8, %c0_9] : memref<1x128xf32, #tpu.memory_space<vmem>>, vector<1x128xf32>
    %8 = vector.broadcast %7 : vector<1x128xf32> to vector<256x128xf32>
    %9 = arith.addf %6, %8 : vector<256x128xf32>
    %10 = math.absf %9 : vector<256x128xf32>
    %cst_10 = arith.constant 0.000000e+00 : f32
    %11 = vector.broadcast %cst_10 : f32 to vector<256x128xf32>
    %12 = arith.subf %11, %10 : vector<256x128xf32>
    %13 = math.exp %12 : vector<256x128xf32>
    %cst_11 = arith.constant 1.000000e+00 : f32
    %14 = vector.broadcast %cst_11 : f32 to vector<256x128xf32>
    %15 = arith.addf %14, %13 : vector<256x128xf32>
    %16 = tpu.reciprocal %15 {approx = true} : vector<256x128xf32> -> vector<256x128xf32>
    %17 = arith.mulf %9, %16 : vector<256x128xf32>
    %cst_12 = arith.constant 0.000000e+00 : f32
    %18 = vector.broadcast %cst_12 : f32 to vector<256x128xf32>
    %19 = arith.cmpf oge, %9, %18 : vector<256x128xf32>
    %cst_13 = arith.constant 1.000000e+00 : f32
    %20 = vector.broadcast %cst_13 : f32 to vector<256x128xf32>
    %21 = arith.select %19, %20, %13 : vector<256x128xi1>, vector<256x128xf32>
    %22 = arith.mulf %17, %21 : vector<256x128xf32>
    %23 = arith.truncf %22 : vector<256x128xf32> to vector<256x128xbf16>
    %c0_14 = arith.constant 0 : index
    %c0_15 = arith.constant 0 : index
    %24 = vector.load %arg7[%c0_14, %c0_15] : memref<256x128xbf16, #tpu.memory_space<vmem>>, vector<256x128xbf16>
    tpu.vector_store %arg7[%c0_14, %c0_15], %23 {strides = array<i32>} : memref<256x128xbf16, #tpu.memory_space<vmem>>, vector<256x128xbf16>,
    return
  }
  func.func @transform_0(%arg0: i32, %arg1: i32) -> (i32, i32) {
    %c0_i32 = arith.constant 0 : i32
    %c0_i32_0 = arith.constant 0 : i32
    return %arg0, %c0_i32 : i32, i32
  }
  func.func @transform_1(%arg0: i32, %arg1: i32) -> (i32, i32) {
    %c1_i32 = arith.constant 1 : i32
    %c0_i32 = arith.constant 0 : i32
    return %arg0, %c1_i32 : i32, i32
  }
  func.func @transform_2(%arg0: i32, %arg1: i32) -> (i32, i32) {
    %c0_i32 = arith.constant 0 : i32
    %c0_i32_0 = arith.constant 0 : i32
    return %c0_i32, %arg1 : i32, i32
  }
  func.func @transform_3(%arg0: i32, %arg1: i32) -> (i32, i32) {
    %c0_i32 = arith.constant 0 : i32
    %c0_i32_0 = arith.constant 0 : i32
    return %c0_i32, %arg1 : i32, i32
  }
  func.func @transform_4(%arg0: i32, %arg1: i32) -> (i32, i32) {
    %c0_i32 = arith.constant 0 : i32
    %c0_i32_0 = arith.constant 0 : i32
    return %c0_i32, %arg1 : i32, i32
  }
  func.func @transform_5(%arg0: i32, %arg1: i32) -> (i32, i32) {
    %c0_i32 = arith.constant 0 : i32
    return %arg0, %arg1 : i32, i32
  }
}

</mosaic_0001>

<bundles_post_ra>
// kernel: _lambda_.7
= control target key start
LH: loop header
LB: loop body
LE: loop exit
PB: predicated region body
PF: predicated region fallthrough
CT: control target
= control target key end

     0   :  { %s2117_s12 = smov 0   ;;  %s2119_s13 = smov 0   ;;  %s2666_s0 = inlined_call_operand.vmem [shape: bf16[512,256], index: 0, kind: input, shape index: {}]   ;;  %s2667_s1 = inlined_call_operand.vmem [shape: bf16[128,128], index: 1, kind: input, shape index: {}]   ;;  %s2668_s2 = inlined_call_operand.vmem [shape: f32[1,128], index: 2, kind: input, shape index: {}]   ;;  %s2669_s3 = inlined_call_operand.vmem [shape: bf16[512,128], index: 3, kind: output, shape index: {}]  }
   0x1   :  { %s2121_s14 = smov 0   ;;  %s2123_s15 = smov 0  }
   0x2   :  { %s2125_s16 = smov 0  }
   0x3 LB: > { %s32_s17 = sadd.s32 1, %s2091_s15  ;;  %p48_p1 = scmp.ne.s32.totalorder %s2083_s13, %s2079_s12  ;;  %s2095_s16 = sphi %s2125_s16, %s13_s16   ;;  %s2091_s15 = sphi %s2123_s15, %s2674_s15   ;;  %s2087_s14 = sphi %s2121_s14, %s2673_s14   ;;  %s2083_s13 = sphi %s2119_s13, %s2672_s13   ;;  %s2079_s12 = sphi %s2117_s12, %s2671_s12  }
   0x4   : > { %p34_p0 = scmp.ge.s32.totalorder %s32_s17, 2  ;;  %p49_p2 = scmp.eq.s32.totalorder %s2095_s16, 0 }
   0x5   : > { %s41_s19 = sadd.s32 1, %s2083_s13  ;;  %p1580_p5 = scmp.ge.s32.totalorder %s2095_s16, 2 }
   0x6   : > { %s2676_s17 = smov (%p34_p0, %s32_s17), 0  ;;  %p50_p3 = por %p49_p2, %p48_p1 }
   0x7   : > { %s36_s18 = ssub.s32 %s2091_s15, %s2676_s17  ;;  %174 = sbr.rel (%p1580_p5) target bundleno = 37 (0x25), region = 24 }
   0x8   : > { %p39_p4 = scmp.eq.s32.totalorder %s36_s18, 0 }
   0xa   : > { %s2152_s20 = scalar_select %p39_p4, %s2083_s13, %s41_s19  }
   0xc   : > { %177 = sbr.rel (!%p50_p3) target bundleno = 37 (0x25), region = 28  ;;  %s179_s21 = sand.u32 (%p50_p3), 1, %s2083_s13  }
   0xd   : > { %s1649_s22 = sshll.u32 (%p50_p3), %s2091_s15, 8  ;;  %s1581_s23 = sshll.u32 (%p50_p3), %s179_s21, 7 }
   0xe   : > { %s2160_s26 = scalar_lea.vmem (%p50_p3), %s2666_s0, %s1649_s22  ;;  %s2164_s27 = scalar_lea.vmem (%p50_p3), [#allocation3], %s1581_s23 }
   0xf   : > { %v203_v0 = vld [vmem:[%s2160_s26] sm:$0xf] (%p50_p3)  ;;  %v205_v1 = vld [vmem:[%s2160_s26 + $0x8] sm:$0xf] (%p50_p3)  ;;  %v207_v2 = vld [vmem:[%s2160_s26 + $0x10] sm:$0xf] (%p50_p3) }
  0x10   : > { %204 = vst [vmem:[%s2164_s27] sm:$0xf] (%p50_p3), %v203_v0  ;;  %206 = vst [vmem:[%s2164_s27 + $0x4] sm:$0xf] (%p50_p3), %v205_v1  ;;  %v209_v3 = vld [vmem:[%s2160_s26 + $0x18] sm:$0xf] (%p50_p3) }
  0x11   : > { %v211_v4 = vld [vmem:[%s2160_s26 + $0x20] sm:$0xf]  ;;  %208 = vst [vmem:[%s2164_s27 + $0x8] sm:$0xf] %v207_v2  ;;  %210 = vst [vmem:[%s2164_s27 + $0xc] sm:$0xf] %v209_v3 }
  0x12   : > { %212 = vst [vmem:[%s2164_s27 + $0x10] sm:$0xf] %v211_v4  ;;  %v213_v5 = vld [vmem:[%s2160_s26 + $0x28] sm:$0xf]  ;;  %v215_v6 = vld [vmem:[%s2160_s26 + $0x30] sm:$0xf] }
  0x13   : > { %v217_v7 = vld [vmem:[%s2160_s26 + $0x38] sm:$0xf]  ;;  %214 = vst [vmem:[%s2164_s27 + $0x14] sm:$0xf] %v213_v5  ;;  %216 = vst [vmem:[%s2164_s27 + $0x18] sm:$0xf] %v215_v6 }
  0x14   : > { %218 = vst [vmem:[%s2164_s27 + $0x1c] sm:$0xf] %v217_v7  ;;  %v219_v8 = vld [vmem:[%s2160_s26 + $0x40] sm:$0xf]  ;;  %v221_v9 = vld [vmem:[%s2160_s26 + $0x48] sm:$0xf] }
  0x15   : > { %v223_v10 = vld [vmem:[%s2160_s26 + $0x50] sm:$0xf]  ;;  %220 = vst [vmem:[%s2164_s27 + $0x20] sm:$0xf] %v219_v8  ;;  %222 = vst [vmem:[%s2164_s27 + $0x24] sm:$0xf] %v221_v9 }
  0x16   : > { %224 = vst [vmem:[%s2164_s27 + $0x28] sm:$0xf] %v223_v10  ;;  %v225_v11 = vld [vmem:[%s2160_s26 + $0x58] sm:$0xf]  ;;  %v227_v12 = vld [vmem:[%s2160_s26 + $0x60] sm:$0xf] }
  0x17   : > { %v229_v13 = vld [vmem:[%s2160_s26 + $0x68] sm:$0xf]  ;;  %226 = vst [vmem:[%s2164_s27 + $0x2c] sm:$0xf] %v225_v11  ;;  %228 = vst [vmem:[%s2164_s27 + $0x30] sm:$0xf] %v227_v12 }
  0x18   : > { %230 = vst [vmem:[%s2164_s27 + $0x34] sm:$0xf] %v229_v13  ;;  %v231_v14 = vld [vmem:[%s2160_s26 + $0x70] sm:$0xf]  ;;  %v233_v15 = vld [vmem:[%s2160_s26 + $0x78] sm:$0xf] }
  0x19   : > { %v235_v16 = vld [vmem:[%s2160_s26 + $0x80] sm:$0xf]  ;;  %232 = vst [vmem:[%s2164_s27 + $0x38] sm:$0xf] %v231_v14  ;;  %234 = vst [vmem:[%s2164_s27 + $0x3c] sm:$0xf] %v233_v15 }
  0x1a   : > { %236 = vst [vmem:[%s2164_s27 + $0x40] sm:$0xf] %v235_v16  ;;  %v237_v17 = vld [vmem:[%s2160_s26 + $0x88] sm:$0xf]  ;;  %v239_v18 = vld [vmem:[%s2160_s26 + $0x90] sm:$0xf] }
  0x1b   : > { %v241_v19 = vld [vmem:[%s2160_s26 + $0x98] sm:$0xf]  ;;  %238 = vst [vmem:[%s2164_s27 + $0x44] sm:$0xf] %v237_v17  ;;  %240 = vst [vmem:[%s2164_s27 + $0x48] sm:$0xf] %v239_v18 }
  0x1c   : > { %242 = vst [vmem:[%s2164_s27 + $0x4c] sm:$0xf] %v241_v19  ;;  %v243_v20 = vld [vmem:[%s2160_s26 + $0xa0] sm:$0xf]  ;;  %v245_v21 = vld [vmem:[%s2160_s26 + $0xa8] sm:$0xf] }
  0x1d   : > { %v247_v22 = vld [vmem:[%s2160_s26 + $0xb0] sm:$0xf]  ;;  %244 = vst [vmem:[%s2164_s27 + $0x50] sm:$0xf] %v243_v20  ;;  %246 = vst [vmem:[%s2164_s27 + $0x54] sm:$0xf] %v245_v21 }
  0x1e   : > { %248 = vst [vmem:[%s2164_s27 + $0x58] sm:$0xf] %v247_v22  ;;  %v249_v23 = vld [vmem:[%s2160_s26 + $0xb8] sm:$0xf]  ;;  %v251_v24 = vld [vmem:[%s2160_s26 + $0xc0] sm:$0xf] }
  0x1f   : > { %v253_v25 = vld [vmem:[%s2160_s26 + $0xc8] sm:$0xf]  ;;  %250 = vst [vmem:[%s2164_s27 + $0x5c] sm:$0xf] %v249_v23  ;;  %252 = vst [vmem:[%s2164_s27 + $0x60] sm:$0xf] %v251_v24 }
  0x20   : > { %254 = vst [vmem:[%s2164_s27 + $0x64] sm:$0xf] %v253_v25  ;;  %v255_v26 = vld [vmem:[%s2160_s26 + $0xd0] sm:$0xf]  ;;  %v257_v27 = vld [vmem:[%s2160_s26 + $0xd8] sm:$0xf] }
  0x21   : > { %v259_v28 = vld [vmem:[%s2160_s26 + $0xe0] sm:$0xf]  ;;  %256 = vst [vmem:[%s2164_s27 + $0x68] sm:$0xf] %v255_v26  ;;  %258 = vst [vmem:[%s2164_s27 + $0x6c] sm:$0xf] %v257_v27 }
  0x22   : > { %260 = vst [vmem:[%s2164_s27 + $0x70] sm:$0xf] %v259_v28  ;;  %v261_v29 = vld [vmem:[%s2160_s26 + $0xe8] sm:$0xf]  ;;  %v263_v30 = vld [vmem:[%s2160_s26 + $0xf0] sm:$0xf] }
  0x23   : > { %v265_v31 = vld [vmem:[%s2160_s26 + $0xf8] sm:$0xf]  ;;  %262 = vst [vmem:[%s2164_s27 + $0x74] sm:$0xf] %v261_v29  ;;  %264 = vst [vmem:[%s2164_s27 + $0x78] sm:$0xf] %v263_v30 }
  0x24   : > { %266 = vst [vmem:[%s2164_s27 + $0x7c] sm:$0xf] %v265_v31 }
  0x25 PF: > { %p1585_p6 = scmp.ge.s32.totalorder %s2095_s16, 1  ;;  %p353_p7 = scmp.lt.s32.totalorder %s2095_s16, 3 }
  0x27   : > { %p354_p8 = pnand %p1585_p6, %p353_p7 }
  0x28   : > { %s360_s30 = sand.u32 (!%p354_p8), 1, %s2079_s12   ;;  %s1587_s28 = sshll.u32 (!%p354_p8), %s2087_s14, 5 }
  0x29   : > { %357 = sbr.rel (%p354_p8) target bundleno = 390 (0x186), region = 69  ;;  %s1586_s6 = sshll.u32 (!%p354_p8), %s360_s30, 7 }
  0x2a   : > { %s2243_s11 = scalar_lea.vmem (!%p354_p8), [#allocation3], %s1586_s6  ;;  %p2392_p9 = scmp.lt.s32.totalorder (!%p354_p8), %s1587_s28, 63 }
  0x2e   : > { %v1905_v32 = vld [vmem:[%s2667_s1 + $0x38] sm:$0xff]   ;;  %v1906_v33 = vld [vmem:[%s2667_s1 + $0x30] sm:$0xff]   ;;  %v1907_v34 = vld [vmem:[%s2667_s1 + $0x28] sm:$0xff]   ;;  %s2678_s28 = smov (!%p2392_p9, %s1587_s28), 63 }
  0x2f   : > { %1801 = vmatprep.subr.bf16.mxu0 %v1905_v32  ;;  %1849 = vmatprep.subr.bf16.mxu1 %v1905_v32  ;;  %v1908_v35 = vld [vmem:[%s2667_s1 + $0x20] sm:$0xff]   ;;  %v1909_v38 = vld [vmem:[%s2667_s1 + $0x18] sm:$0xff]   ;;  %v1910_v39 = vld [vmem:[%s2667_s1 + $0x10] sm:$0xff]   ;;  %s1588_s14 = sshll.u32 %s2678_s28, 2 }
  0x30   : > { %1802 = vmatpush3.bf16.msra.mxu0 %v1905_v32  ;;  %1857 = vmatpush3.bf16.msra.mxu1 %v1905_v32  ;;  %v1913_v36 = vld [vmem:[%s2243_s11] sm:$0xff]   ;;  %v1911_v40 = vld [vmem:[%s2667_s1 + $0x8] sm:$0xff]   ;;  %v1917_v44 = vld [vmem:[%s2243_s11 + $0x10] sm:$0xff]   ;;  %s2462_s5 = scalar_lea.vmem %s2669_s3, %s1588_s14 }
  0x31   : > { %1803 = vmatprep.subr.bf16.mxu0 %v1906_v33  ;;  %1850 = vmatprep.subr.bf16.mxu1 %v1906_v33  ;;  %v1914_v37 = vld [vmem:[%s2243_s11 + $0x40] sm:$0xff]   ;;  %v1915_v42 = vld [vmem:[%s2243_s11 + $0x8] sm:$0xff]   ;;  %v1918_v45 = vld [vmem:[%s2243_s11 + $0x50] sm:$0xff]  }
  0x32   : > { %1817 = vmatprep.mubr.bf16.mxu0 %v1913_v36  ;;  %1833 = vmatprep.mubr.bf16.mxu1 %v1914_v37  ;;  %v1912_v41 = vld [vmem:[%s2667_s1] sm:$0xff]   ;;  %v1916_v43 = vld [vmem:[%s2243_s11 + $0x48] sm:$0xff]   ;;  %v1919_v46 = vld [vmem:[%s2243_s11 + $0x18] sm:$0xff]  }
  0x33   : > { %v1920_v47 = vld [vmem:[%s2243_s11 + $0x58] sm:$0xff]   ;;  %v1921_v48 = vld [vmem:[%s2243_s11 + $0x20] sm:$0xff]   ;;  %v1923_v50 = vld [vmem:[%s2243_s11 + $0x28] sm:$0xff]  }
  0x34   : > { %1804 = vmatpush3.bf16.msra.mxu0 %v1906_v33  ;;  %1858 = vmatpush3.bf16.msra.mxu1 %v1906_v33  ;;  %v1922_v49 = vld [vmem:[%s2243_s11 + $0x60] sm:$0xff]   ;;  %v1924_v51 = vld [vmem:[%s2243_s11 + $0x68] sm:$0xff]   ;;  %v1925_v52 = vld [vmem:[%s2243_s11 + $0x30] sm:$0xff]  }
  0x35   : > { %1805 = vmatprep.subr.bf16.mxu0 %v1907_v34  ;;  %1851 = vmatprep.subr.bf16.mxu1 %v1907_v34  ;;  %v1926_v53 = vld [vmem:[%s2243_s11 + $0x70] sm:$0xff]   ;;  %v1927_v54 = vld [vmem:[%s2243_s11 + $0x38] sm:$0xff]   ;;  %v2276_v56 = vld [vmem:[%s2668_s2] ss:$0 sm:$0xff] }
  0x36   : > { %v1928_v55 = vld [vmem:[%s2243_s11 + $0x78] sm:$0xff]  }
  0x38   : > { %1806 = vmatpush3.bf16.msra.mxu0 %v1907_v34  ;;  %1859 = vmatpush3.bf16.msra.mxu1 %v1907_v34 }
  0x39   : > { %1807 = vmatprep.subr.bf16.mxu0 %v1908_v35  ;;  %1852 = vmatprep.subr.bf16.mxu1 %v1908_v35 }
  0x3c   : > { %1808 = vmatpush3.bf16.msra.mxu0 %v1908_v35  ;;  %1860 = vmatpush3.bf16.msra.mxu1 %v1908_v35 }
  0x3d   : > { %1809 = vmatprep.subr.bf16.mxu0 %v1909_v38  ;;  %1853 = vmatprep.subr.bf16.mxu1 %v1909_v38 }
  0x40   : > { %1810 = vmatpush3.bf16.msra.mxu0 %v1909_v38  ;;  %1861 = vmatpush3.bf16.msra.mxu1 %v1909_v38 }
  0x41   : > { %1811 = vmatprep.subr.bf16.mxu0 %v1910_v39  ;;  %1854 = vmatprep.subr.bf16.mxu1 %v1910_v39 }
  0x44   : > { %1812 = vmatpush3.bf16.msra.mxu0 %v1910_v39  ;;  %1862 = vmatpush3.bf16.msra.mxu1 %v1910_v39 }
  0x45   : > { %1813 = vmatprep.subr.bf16.mxu0 %v1911_v40  ;;  %1855 = vmatprep.subr.bf16.mxu1 %v1911_v40 }
  0x48   : > { %1814 = vmatpush3.bf16.msra.mxu0 %v1911_v40  ;;  %1863 = vmatpush3.bf16.msra.mxu1 %v1911_v40 }
  0x49   : > { %1815 = vmatprep.subr.bf16.mxu0 %v1912_v41  ;;  %1856 = vmatprep.subr.bf16.mxu1 %v1912_v41 }
  0x4c   : > { %1816 = vmatpush3.bf16.msra.mxu0 %v1912_v41  ;;  %1864 = vmatpush3.bf16.msra.mxu1 %v1912_v41 }
  0x4f   : > { %1818 = vmatmul.mubr.bf16.vlgmr.msra.gmra.mxu0 %v1915_v42  ;;  %1834 = vmatmul.mubr.bf16.vlgmr.msra.gmra.mxu1 %v1916_v43 }
  0x50   : > { %1821 = vmatprep.mubr.bf16.mxu0 %v1917_v44  ;;  %1837 = vmatprep.mubr.bf16.mxu1 %v1918_v45 }
  0x57   : > { %1822 = vmatmul.mubr.bf16.gmra.mxu0 %v1919_v46  ;;  %1838 = vmatmul.mubr.bf16.gmra.mxu1 %v1920_v47 }
  0x58   : > { %1825 = vmatprep.mubr.bf16.mxu0 %v1921_v48  ;;  %1841 = vmatprep.mubr.bf16.mxu1 %v1922_v49 }
  0x5f   : > { %1826 = vmatmul.mubr.bf16.gmra.mxu0 %v1923_v50  ;;  %1842 = vmatmul.mubr.bf16.gmra.mxu1 %v1924_v51 }
  0x60   : > { %1829 = vmatprep.mubr.bf16.mxu0 %v1925_v52  ;;  %1845 = vmatprep.mubr.bf16.mxu1 %v1926_v53 }
  0x67   : > { %1830 = vmatmul.mubr.bf16.gmra.mxu0 %v1927_v54  ;;  %1846 = vmatmul.mubr.bf16.gmra.mxu1 %v1928_v55 }
 0x10f   : > { %v1819_v57 = vpop.f32.mrf.mxu0  ;;  %v1835_v58 = vpop.f32.mrf.mxu1 }
 0x110   : > { %v2279_v59 = vadd.f32 %v1819_v57, %v2276_v56  ;;  %v2282_v60 = vadd.f32 %v1835_v58, %v2276_v56 }
 0x111   : > { %v714_v61 = vpop.f32.mrf.mxu0  ;;  %v778_v62 = vpop.f32.mrf.mxu1 }
 0x112   : > { %v981_v63 = vand.u32 2147483647, %v2279_v59  ;;  %v997_v0 = vand.u32 2147483647, %v2282_v60  ;;  %v2287_v1 = vadd.f32 %v2276_v56, %v714_v61  ;;  %v2290_v2 = vadd.f32 %v2276_v56, %v778_v62 }
 0x113   : > { %v1820_v3 = vpop.f32.mrf.mxu0  ;;  %v1836_v4 = vpop.f32.mrf.mxu1  ;;  %vm1205_vm0 = vcmp.ge.f32.partialorder %v2279_v59, 0.0  ;;  %vm1221_vm1 = vcmp.ge.f32.partialorder %v2282_v60, 0.0 }
 0x114   : > { %v1013_v5 = vsub.f32 0.0, %v981_v63  ;;  %v1029_v6 = vsub.f32 0.0, %v997_v0  ;;  %v2293_v7 = vadd.f32 %v1820_v3, %v2276_v56  ;;  %v2296_v8 = vadd.f32 %v1836_v4, %v2276_v56 }
 0x115   : > { %v979_v9 = vand.u32 2147483647, %v2287_v1  ;;  %v995_v10 = vand.u32 2147483647, %v2290_v2  ;;  %v717_v11 = vpop.f32.mrf.mxu0  ;;  %v781_v12 = vpop.f32.mrf.mxu1  ;;  %vm1203_vm2 = vcmp.ge.f32.partialorder %v2287_v1, 0.0  ;;  %vm1219_vm3 = vcmp.ge.f32.partialorder %v2290_v2, 0.0 }
 0x116   : > { %v1047_v13 = vmul.f32 1.442695, %v1013_v5  ;;  %v1079_v14 = vmul.f32 1.442695, %v1029_v6  ;;  %v982_v15 = vand.u32 2147483647, %v2293_v7  ;;  %v2302_v16 = vadd.f32 %v2276_v56, %v717_v11 }
 0x117   : > { %v1011_v17 = vsub.f32 0.0, %v979_v9  ;;  %v1027_v18 = vsub.f32 0.0, %v995_v10  ;;  %v998_v19 = vand.u32 2147483647, %v2296_v8  ;;  %v1823_v20 = vpop.f32.mrf.mxu0  ;;  %v1839_v21 = vpop.f32.mrf.mxu1  ;;  %v2307_v30 = vadd.f32 %v2276_v56, %v781_v12 }
 0x118   : > { %1929 = vpow2.f32 %v1047_v13  ;;  %v1014_v22 = vsub.f32 0.0, %v982_v15  ;;  %v980_v23 = vand.u32 2147483647, %v2302_v16  ;;  %v2310_v33 = vadd.f32 %v1823_v20, %v2276_v56 }
 0x119   : > { %1931 = vpow2.f32 %v1079_v14  ;;  %v1043_v24 = vmul.f32 1.442695, %v1011_v17  ;;  %v1075_v25 = vmul.f32 1.442695, %v1027_v18  ;;  %v1030_v26 = vsub.f32 0.0, %v998_v19  ;;  %v730_v27 = vpop.f32.mrf.mxu0  ;;  %v794_v31 = vpop.f32.mrf.mxu1 }
 0x11a   : > { %v1049_v28 = vmul.f32 1.442695, %v1014_v22  ;;  %v1012_v29 = vsub.f32 0.0, %v980_v23  ;;  %v2313_v34 = vadd.f32 %v1839_v21, %v2276_v56  ;;  %v996_v36 = vand.u32 2147483647, %v2307_v30 }
 0x11b   : > { %1933 = vpow2.f32 %v1043_v24  ;;  %v1081_v32 = vmul.f32 1.442695, %v1030_v26  ;;  %v985_v37 = vand.u32 2147483647, %v2310_v33  ;;  %v1824_v39 = vpop.f32.mrf.mxu0  ;;  %v2319_v41 = vadd.f32 %v2276_v56, %v730_v27  ;;  %v1840_v42 = vpop.f32.mrf.mxu1 }
 0x11c   : > { %1935 = vpow2.f32 %v1075_v25  ;;  %v1045_v35 = vmul.f32 1.442695, %v1012_v29  ;;  %v1001_v38 = vand.u32 2147483647, %v2313_v34  ;;  %v1028_v40 = vsub.f32 0.0, %v996_v36 }
 0x11d   : > { %1937 = vpow2.f32 %v1049_v28  ;;  %v1017_v43 = vsub.f32 0.0, %v985_v37  ;;  %v2322_v45 = vadd.f32 %v2276_v56, %v794_v31  ;;  %v983_v47 = vand.u32 2147483647, %v2319_v41  ;;  %v733_v55 = vpop.f32.mrf.mxu0  ;;  %v797_v57 = vpop.f32.mrf.mxu1 }
 0x11e   : > { %1939 = vpow2.f32 %v1081_v32  ;;  %v1033_v44 = vsub.f32 0.0, %v1001_v38  ;;  %v1077_v46 = vmul.f32 1.442695, %v1028_v40  ;;  %v2326_v48 = vadd.f32 %v1824_v39, %v2276_v56 }
 0x11f   : > { %1941 = vpow2.f32 %v1045_v35  ;;  %v1055_v49 = vmul.f32 1.442695, %v1017_v43  ;;  %v999_v51 = vand.u32 2147483647, %v2322_v45  ;;  %v2330_v52 = vadd.f32 %v1840_v42, %v2276_v56  ;;  %v1827_v15 = vpop.f32.mrf.mxu0  ;;  %v1843_v28 = vpop.f32.mrf.mxu1 }
 0x120   : > { %v1087_v50 = vmul.f32 1.442695, %v1033_v44  ;;  %1943 = vpow2.f32 %v1077_v46  ;;  %v1015_v53 = vsub.f32 0.0, %v983_v47  ;;  %v986_v54 = vand.u32 2147483647, %v2326_v48 }
 0x121   : > { %1945 = vpow2.f32 %v1055_v49  ;;  %v1031_v58 = vsub.f32 0.0, %v999_v51  ;;  %v1002_v63 = vand.u32 2147483647, %v2330_v52  ;;  %v2337_v4 = vadd.f32 %v2276_v56, %v733_v55  ;;  %v746_v29 = vpop.f32.mrf.mxu0  ;;  %v810_v44 = vpop.f32.mrf.mxu1 }
 0x122   : > { %1947 = vpow2.f32 %v1087_v50  ;;  %v1051_v61 = vmul.f32 1.442695, %v1015_v53  ;;  %v1018_v62 = vsub.f32 0.0, %v986_v54  ;;  %v2340_v5 = vadd.f32 %v2276_v56, %v797_v57 }
 0x123   : > { %v1083_v3 = vmul.f32 1.442695, %v1031_v58  ;;  %v1034_v13 = vsub.f32 0.0, %v1002_v63  ;;  %v984_v14 = vand.u32 2147483647, %v2337_v4  ;;  %v2365_v36 = vadd.f32 %v1827_v15, %v2276_v56  ;;  %v1828_v58 = vpop.f32.mrf.mxu0 }
 0x124   : > { %1949 = vpow2.f32 %v1051_v61  ;;  %v1057_v10 = vmul.f32 1.442695, %v1018_v62  ;;  %v1000_v19 = vand.u32 2147483647, %v2340_v5  ;;  %v2371_v38 = vadd.f32 %v1843_v28, %v2276_v56 }
 0x125   : > { %v2334_v0 = vpop.eup %1929  ;;  %1951 = vpow2.f32 %v1083_v3  ;;  %v1016_v22 = vsub.f32 0.0, %v984_v14  ;;  %v1089_v27 = vmul.f32 1.442695, %v1034_v13  ;;  %v2374_v39 = vadd.f32 %v2276_v56, %v746_v29 }
 0x126   : > { %v2342_v6 = vpop.eup %1931  ;;  %v1109_v9 = vadd.f32 1.0, %v2334_v0  ;;  %v1032_v35 = vsub.f32 0.0, %v1000_v19  ;;  %v989_v43 = vand.u32 2147483647, %v2365_v36  ;;  %vm1206_vm4 = vcmp.ge.f32.partialorder %v2293_v7, 0.0 }
 0x127   : > { %v1125_v11 = vadd.f32 1.0, %v2342_v6  ;;  %v1053_v32 = vmul.f32 1.442695, %v1016_v22  ;;  %vm1222_vm5 = vcmp.ge.f32.partialorder %v2296_v8, 0.0  ;;  %v1005_v54 = vand.u32 2147483647, %v2371_v38 }
 0x128   : > { %v2346_v12 = vpop.eup %1933  ;;  %1953 = vrcp.f32 %v1109_v9  ;;  %v1085_v49 = vmul.f32 1.442695, %v1032_v35  ;;  %v1021_v51 = vsub.f32 0.0, %v989_v43  ;;  %v987_v55 = vand.u32 2147483647, %v2374_v39 }
 0x129   : > { %v2349_v17 = vpop.eup %1935  ;;  %1955 = vrcp.f32 %v1125_v11  ;;  %v1107_v18 = vadd.f32 1.0, %v2346_v12  ;;  %v2400_v57 = vadd.f32 %v2276_v56, %v810_v44  ;;  %v1237_v62 = vsel %vm1205_vm0, 1.0, %v2334_v0 }
 0x12a   : > { %v2353_v20 = vpop.eup %1937  ;;  %v1123_v21 = vadd.f32 1.0, %v2349_v17  ;;  %1957 = vpow2.f32 %v1057_v10  ;;  %vm1204_vm6 = vcmp.ge.f32.partialorder %v2302_v16, 0.0  ;;  %v1063_v10 = vmul.f32 1.442695, %v1021_v51 }
 0x12b   : > { %v2356_v23 = vpop.eup %1939  ;;  %1959 = vrcp.f32 %v1107_v18  ;;  %v1110_v24 = vadd.f32 1.0, %v2353_v20  ;;  %v1037_v11 = vsub.f32 0.0, %v1005_v54  ;;  %v1253_v14 = vsel %vm1221_vm1, 1.0, %v2342_v6  ;;  %v1844_v18 = vpop.f32.mrf.mxu1 }
 0x12c   : > { %v2359_v25 = vpop.eup %1941  ;;  %1961 = vrcp.f32 %v1123_v21  ;;  %v1126_v26 = vadd.f32 1.0, %v2356_v23  ;;  %v1235_v0 = vsel %vm1203_vm2, 1.0, %v2346_v12  ;;  %v2417_v15 = vadd.f32 %v1828_v58, %v2276_v56 }
 0x12d   : > { %1963 = vrcp.f32 %v1110_v24  ;;  %v1108_v31 = vadd.f32 1.0, %v2359_v25  ;;  %v2367_v37 = vpop.eup %1943  ;;  %v1019_v22 = vsub.f32 0.0, %v987_v55  ;;  %v1003_v6 = vand.u32 2147483647, %v2400_v57 }
 0x12e   : > { %1965 = vrcp.f32 %v1126_v26  ;;  %v2376_v40 = vpop.eup %1945  ;;  %v1124_v42 = vadd.f32 1.0, %v2367_v37  ;;  %vm1220_vm7 = vcmp.ge.f32.partialorder %v2307_v30, 0.0  ;;  %v1238_v29 = vsel %vm1206_vm4, 1.0, %v2353_v20 }
 0x12f   : > { %1967 = vrcp.f32 %v1108_v31  ;;  %v2382_v46 = vpop.eup %1947  ;;  %v1113_v47 = vadd.f32 1.0, %v2376_v40  ;;  %v2439_v31 = vadd.f32 %v1844_v18, %v2276_v56  ;;  %v1254_v35 = vsel %vm1222_vm5, 1.0, %v2356_v23 }
 0x130   : > { %1969 = vpow2.f32 %v1089_v27  ;;  %v1129_v50 = vadd.f32 1.0, %v2382_v46  ;;  %v1095_v27 = vmul.f32 1.442695, %v1037_v11  ;;  %v1035_v44 = vsub.f32 0.0, %v1003_v6 }
 0x131   : > { %1971 = vpow2.f32 %v1053_v32  ;;  %v2388_v53 = vpop.eup %1949  ;;  %v1059_v51 = vmul.f32 1.442695, %v1019_v22  ;;  %v1006_v58 = vand.u32 2147483647, %v2439_v31  ;;  %v1252_v6 = vsel %vm1220_vm7, 1.0, %v2367_v37 }
 0x132   : > { %1973 = vrcp.f32 %v1124_v42  ;;  %v2402_v61 = vpop.eup %1951  ;;  %v1111_v63 = vadd.f32 1.0, %v2388_v53  ;;  %v1236_v42 = vsel %vm1204_vm6, 1.0, %v2359_v25  ;;  %vm1209_vm8 = vcmp.ge.f32.partialorder %v2310_v33, 0.0 }
 0x133   : > { %1975 = vrcp.f32 %v1113_v47  ;;  %v1127_v9 = vadd.f32 1.0, %v2402_v61  ;;  %v990_v47 = vand.u32 2147483647, %v2417_v15  ;;  %vm1225_vm9 = vcmp.ge.f32.partialorder %v2313_v34, 0.0 }
 0x134   : > { %1977 = vpow2.f32 %v1085_v49  ;;  %vm1207_vm10 = vcmp.ge.f32.partialorder %v2319_v41, 0.0  ;;  %vm1223_vm11 = vcmp.ge.f32.partialorder %v2322_v45, 0.0  ;;  %vm1210_vm12 = vcmp.ge.f32.partialorder %v2326_v48, 0.0 }
 0x135   : > { %v1954_v3 = vpop.eup %1953  ;;  %1979 = vrcp.f32 %v1129_v50  ;;  %v1022_v55 = vsub.f32 0.0, %v990_v47  ;;  %vm1226_vm13 = vcmp.ge.f32.partialorder %v2330_v52, 0.0  ;;  %vm1208_vm14 = vcmp.ge.f32.partialorder %v2337_v4, 0.0 }
 0x136   : > { %v1956_v13 = vpop.eup %1955  ;;  %v1173_v21 = vmul.f32 %v1954_v3, %v2279_v59  ;;  %1981 = vrcp.f32 %v1111_v63  ;;  %v1251_v59 = vsel %vm1219_vm3, 1.0, %v2349_v17  ;;  %vm1224_vm15 = vcmp.ge.f32.partialorder %v2340_v5, 0.0 }
 0x137   : > { %v2419_v19 = vpop.eup %1957  ;;  %v1189_v12 = vmul.f32 %v1956_v13, %v2282_v60  ;;  %1983 = vrcp.f32 %v1127_v9  ;;  %v1091_v13 = vmul.f32 1.442695, %v1035_v44  ;;  %v1065_v18 = vmul.f32 1.442695, %v1022_v55 }
 0x138   : > { %v1960_v24 = vpop.eup %1959  ;;  %v1114_v26 = vadd.f32 1.0, %v2419_v19  ;;  %1985 = vpow2.f32 %v1063_v10  ;;  %v1269_v43 = vmul.f32 %v1237_v62, %v1173_v21  ;;  %vm1213_vm0 = vcmp.ge.f32.partialorder %v2365_v36, 0.0 }
 0x139   : > { %v1962_v28 = vpop.eup %1961  ;;  %v1171_v32 = vmul.f32 %v1960_v24, %v2287_v1  ;;  %v1285_v50 = vmul.f32 %v1253_v14, %v1189_v12  ;;  %v749_v14 = vpop.f32.mrf.mxu0  ;;  %v1038_v24 = vsub.f32 0.0, %v1006_v58  ;;  %v1255_v58 = vsel %vm1223_vm11, 1.0, %v2402_v61 }
 0x13a   : > { %v1964_v60 = vpop.eup %1963  ;;  %1987 = vrcp.f32 %v1114_v26  ;;  %v1187_v63 = vmul.f32 %v1962_v28, %v2290_v2  ;;  %v813_v28 = vpop.f32.mrf.mxu1  ;;  %vm1214_vm1 = vcmp.ge.f32.partialorder %v2417_v15, 0.0  ;;  %vm1229_vm2 = vcmp.ge.f32.partialorder %v2371_v38, 0.0 }
 0x13b   : > { %v1966_v17 = vpop.eup %1965  ;;  %v1174_v20 = vmul.f32 %v1964_v60, %v2293_v7  ;;  %1989 = vpow2.f32 %v1095_v27  ;;  %v1267_v7 = vmul.f32 %v1235_v0, %v1171_v32  ;;  %v1831_v37 = vpop.f32.mrf.mxu0  ;;  %vm1230_vm3 = vcmp.ge.f32.partialorder %v2439_v31, 0.0 }
 0x13c   : > { %v1968_v49 = vpop.eup %1967  ;;  %v1190_v1 = vmul.f32 %v1966_v17, %v2296_v8  ;;  %v1283_v26 = vmul.f32 %v1251_v59, %v1187_v63  ;;  %v2480_v59 = vadd.f32 %v2276_v56, %v749_v14  ;;  %v2493_v44 = vadd.f32 %v1831_v37, %v2276_v56 }
 0x13d   : > { %v2452_v23 = vpop.eup %1969  ;;  %v1270_v54 = vmul.f32 %v1238_v29, %v1174_v20  ;;  %v1172_v25 = vmul.f32 %v1968_v49, %v2302_v16  ;;  %v1241_v49 = vsel %vm1209_vm8, 1.0, %v2376_v40  ;;  %vm1211_vm4 = vcmp.ge.f32.partialorder %v2374_v39, 0.0 }
 0x13e   : > { %v2456_v62 = vpop.eup %1971  ;;  %v1286_v8 = vmul.f32 %v1254_v35, %v1190_v1  ;;  %v1130_v3 = vadd.f32 1.0, %v2452_v23  ;;  %v988_v1 = vand.u32 2147483647, %v2480_v59  ;;  %vm1227_vm5 = vcmp.ge.f32.partialorder %v2400_v57, 0.0 }
 0x13f   : > { %v1974_v9 = vpop.eup %1973  ;;  %v1690_v10 = vpack.c.bf16 %v1270_v54, %v1269_v43  ;;  %v1268_v16 = vmul.f32 %v1236_v42, %v1172_v25  ;;  %v1112_v11 = vadd.f32 1.0, %v2456_v62  ;;  %v2485_v43 = vadd.f32 %v2276_v56, %v813_v28 }
 0x140   : > { %v1730_v0 = vpack.c.bf16 %v1286_v8, %v1285_v50  ;;  %v1188_v2 = vmul.f32 %v1974_v9, %v2307_v30  ;;  %1991 = vrcp.f32 %v1130_v3  ;;  %v1976_v21 = vpop.eup %1975  ;;  %v1097_v30 = vmul.f32 1.442695, %v1038_v24 }
 0x141   : > { %1762 = vst [vmem:[%s2462_s5 + $0x8] sm:$0xff] %v1690_v10   ;;  %v1685_v22 = vpack.c.bf16 %v1268_v16, %v1267_v7  ;;  %1993 = vrcp.f32 %v1112_v11  ;;  %v2471_v12 = vpop.eup %1977  ;;  %v1177_v17 = vmul.f32 %v1976_v21, %v2310_v33  ;;  %v1257_v50 = vsel %vm1225_vm9, 1.0, %v2382_v46 }
 0x142   : > { %1770 = vst [vmem:[%s2462_s5 + $0x48] sm:$0xff] %v1730_v0   ;;  %v1284_v27 = vmul.f32 %v1252_v6, %v1188_v2  ;;  %1995 = vpow2.f32 %v1065_v18  ;;  %v1980_v29 = vpop.eup %1979  ;;  %v1128_v60 = vadd.f32 1.0, %v2471_v12  ;;  %v1239_v25 = vsel %vm1207_vm10, 1.0, %v2388_v53 }
 0x143   : > { %1686 = vst [vmem:[%s2462_s5] sm:$0xff] %v1685_v22   ;;  %1997 = vpow2.f32 %v1059_v51  ;;  %v1982_v32 = vpop.eup %1981  ;;  %v1847_v51 = vpop.f32.mrf.mxu1  ;;  %v1193_v54 = vmul.f32 %v1980_v29, %v2313_v34  ;;  %v1004_v33 = vand.u32 2147483647, %v2485_v43  ;;  %v1273_v46 = vmul.f32 %v1241_v49, %v1177_v17 }
 0x144   : > { %v1725_v35 = vpack.c.bf16 %v1284_v27, %v1283_v26  ;;  %1999 = vpow2.f32 %v1091_v13  ;;  %v1984_v42 = vpop.eup %1983  ;;  %v1242_v34 = vsel %vm1210_vm12, 1.0, %v2419_v19  ;;  %v1020_v7 = vsub.f32 0.0, %v988_v1  ;;  %v762_v19 = vpop.f32.mrf.mxu0 }
 0x145   : > { %2001 = vrcp.f32 %v1128_v60  ;;  %v2487_v20 = vpop.eup %1985  ;;  %v1036_v8 = vsub.f32 0.0, %v1004_v33  ;;  %v993_v3 = vand.u32 2147483647, %v2493_v44  ;;  %v1258_v9 = vsel %vm1226_vm13, 1.0, %v2452_v23  ;;  %v826_v16 = vpop.f32.mrf.mxu1 }
 0x146   : > { %1769 = vst [vmem:[%s2462_s5 + $0x40] sm:$0xff] %v1725_v35   ;;  %2003 = vpow2.f32 %v1097_v30  ;;  %v1117_v53 = vadd.f32 1.0, %v2487_v20  ;;  %v1240_v61 = vsel %vm1208_vm14, 1.0, %v2456_v62  ;;  %v1061_v10 = vmul.f32 1.442695, %v1020_v7  ;;  %v1832_v29 = vpop.f32.mrf.mxu0 }
 0x147   : > { %v1988_v47 = vpop.eup %1987  ;;  %v1289_v11 = vmul.f32 %v1257_v50, %v1193_v54  ;;  %v1175_v13 = vmul.f32 %v1982_v32, %v2319_v41  ;;  %v1093_v0 = vmul.f32 1.442695, %v1036_v8  ;;  %v1025_v23 = vsub.f32 0.0, %v993_v3  ;;  %v1848_v60 = vpop.f32.mrf.mxu1 }
 0x148   : > { %v1178_v55 = vmul.f32 %v1988_v47, %v2326_v48  ;;  %v2510_v40 = vpop.eup %1989  ;;  %v2527_v48 = vadd.f32 %v1847_v51, %v2276_v56  ;;  %2005 = vpow2.f32 %v1061_v10  ;;  %v2535_v6 = vadd.f32 %v2276_v56, %v762_v19 }
 0x149   : > { %v1133_v18 = vadd.f32 1.0, %v2510_v40  ;;  %2007 = vrcp.f32 %v1117_v53  ;;  %v2538_v24 = vadd.f32 %v2276_v56, %v826_v16  ;;  %v1191_v26 = vmul.f32 %v1984_v42, %v2322_v45 }
 0x14a   : > { %v1274_v63 = vmul.f32 %v1242_v34, %v1178_v55  ;;  %v1009_v21 = vand.u32 2147483647, %v2527_v48  ;;  %2009 = vpow2.f32 %v1093_v0  ;;  %v1071_v32 = vmul.f32 1.442695, %v1025_v23  ;;  %v829_v34 = vpop.f32.mrf.mxu1 }
 0x14b   : > { %v991_v35 = vand.u32 2147483647, %v2535_v6  ;;  %v1271_v47 = vmul.f32 %v1239_v25, %v1175_v13  ;;  %v1256_v45 = vsel %vm1224_vm15, 1.0, %v2471_v12  ;;  %2011 = vrcp.f32 %v1133_v18 }
 0x14c   : > { %v1700_v14 = vpack.c.bf16 %v1274_v63, %v1273_v46  ;;  %v1041_v28 = vsub.f32 0.0, %v1009_v21  ;;  %v1007_v1 = vand.u32 2147483647, %v2538_v24  ;;  %v1287_v54 = vmul.f32 %v1255_v58, %v1191_v26  ;;  %v765_v46 = vpop.f32.mrf.mxu0 }
 0x14d   : > { %v1992_v2 = vpop.eup %1991  ;;  %v1023_v50 = vsub.f32 0.0, %v991_v35  ;;  %v2562_v3 = vadd.f32 %v1832_v29, %v2276_v56  ;;  %v2565_v58 = vadd.f32 %v1848_v60, %v2276_v56  ;;  %vm1212_vm6 = vcmp.ge.f32.partialorder %v2480_v59, 0.0 }
 0x14e   : > { %v1994_v22 = vpop.eup %1993  ;;  %1764 = vst [vmem:[%s2462_s5 + $0x18] sm:$0xff] %v1700_v14   ;;  %v1194_v62 = vmul.f32 %v1992_v2, %v2330_v52  ;;  %v1103_v33 = vmul.f32 1.442695, %v1041_v28  ;;  %v1039_v63 = vsub.f32 0.0, %v1007_v1  ;;  %vm1228_vm7 = vcmp.ge.f32.partialorder %v2485_v43, 0.0 }
 0x14f   : > { %v2540_v41 = vpop.eup %1995  ;;  %v1176_v27 = vmul.f32 %v1994_v22, %v2337_v4  ;;  %v1067_v8 = vmul.f32 1.442695, %v1023_v50  ;;  %v994_v16 = vand.u32 2147483647, %v2562_v3  ;;  %vm1217_vm8 = vcmp.ge.f32.partialorder %v2493_v44, 0.0 }
 0x150   : > { %v2544_v30 = vpop.eup %1997  ;;  %v1290_v52 = vmul.f32 %v1258_v9, %v1194_v62  ;;  %v1118_v37 = vadd.f32 1.0, %v2540_v41  ;;  %v2569_v9 = vadd.f32 %v2276_v56, %v765_v46  ;;  %v1099_v19 = vmul.f32 1.442695, %v1039_v63 }
 0x151   : > { %v2548_v17 = vpop.eup %1999  ;;  %v1272_v49 = vmul.f32 %v1240_v61, %v1176_v27  ;;  %v1115_v12 = vadd.f32 1.0, %v2544_v30  ;;  %v2572_v61 = vadd.f32 %v2276_v56, %v829_v34  ;;  %v1026_v13 = vsub.f32 0.0, %v994_v16 }
 0x152   : > { %v2002_v4 = vpop.eup %2001  ;;  %v1740_v42 = vpack.c.bf16 %v1290_v52, %v1289_v11  ;;  %2013 = vrcp.f32 %v1118_v37  ;;  %v1010_v11 = vand.u32 2147483647, %v2565_v58  ;;  %v992_v2 = vand.u32 2147483647, %v2569_v9 }
 0x153   : > { %v2554_v51 = vpop.eup %2003  ;;  %v1695_v55 = vpack.c.bf16 %v1272_v49, %v1271_v47  ;;  %v1192_v25 = vmul.f32 %v2002_v4, %v2340_v5  ;;  %2015 = vpow2.f32 %v1071_v32  ;;  %v1131_v5 = vadd.f32 1.0, %v2548_v17 }
 0x154   : > { %1772 = vst [vmem:[%s2462_s5 + $0x58] sm:$0xff] %v1740_v42   ;;  %v1134_v7 = vadd.f32 1.0, %v2554_v51  ;;  %v1042_v0 = vsub.f32 0.0, %v1010_v11  ;;  %v1008_v56 = vand.u32 2147483647, %v2572_v61  ;;  %v1024_v26 = vsub.f32 0.0, %v992_v2 }
 0x155   : > { %1763 = vst [vmem:[%s2462_s5 + $0x10] sm:$0xff] %v1695_v55   ;;  %v1288_v53 = vmul.f32 %v1256_v45, %v1192_v25  ;;  %v2577_v14 = vpop.eup %2005  ;;  %v1073_v21 = vmul.f32 1.442695, %v1026_v13  ;;  %v1245_v49 = vsel %vm1213_vm0, 1.0, %v2487_v20  ;;  %v1246_v45 = vsel %vm1214_vm1, 1.0, %v2540_v41 }
 0x156   : > { %2017 = vrcp.f32 %v1134_v7  ;;  %v2008_v18 = vpop.eup %2007  ;;  %v1116_v23 = vadd.f32 1.0, %v2577_v14  ;;  %v1105_v62 = vmul.f32 1.442695, %v1042_v0  ;;  %v1040_v27 = vsub.f32 0.0, %v1008_v56 }
 0x157   : > { %v1735_v10 = vpack.c.bf16 %v1288_v53, %v1287_v54  ;;  %2019 = vpow2.f32 %v1103_v33  ;;  %v2582_v22 = vpop.eup %2009  ;;  %v1181_v60 = vmul.f32 %v2008_v18, %v2365_v36  ;;  %v1069_v52 = vmul.f32 1.442695, %v1024_v26 }
 0x158   : > { %2021 = vrcp.f32 %v1115_v12  ;;  %v1132_v28 = vadd.f32 1.0, %v2582_v22  ;;  %v2012_v29 = vpop.eup %2011  ;;  %v1101_v35 = vmul.f32 1.442695, %v1040_v27  ;;  %v1261_v41 = vsel %vm1229_vm2, 1.0, %v2510_v40 }
 0x159   : > { %1771 = vst [vmem:[%s2462_s5 + $0x50] sm:$0xff] %v1735_v10   ;;  %2023 = vpow2.f32 %v1067_v8  ;;  %v1277_v4 = vmul.f32 %v1245_v49, %v1181_v60  ;;  %v1197_v42 = vmul.f32 %v2012_v29, %v2371_v38  ;;  %v1262_v55 = vsel %vm1230_vm3, 1.0, %v2554_v51 }
 0x15a   : > { %2025 = vrcp.f32 %v1131_v5  ;;  %v1243_v16 = vsel %vm1211_vm4, 1.0, %v2544_v30  ;;  %v1244_v11 = vsel %vm1212_vm6, 1.0, %v2577_v14  ;;  %v1260_v18 = vsel %vm1228_vm7, 1.0, %v2582_v22 }
 0x15b   : > { %2027 = vpow2.f32 %v1099_v19  ;;  %v1293_v33 = vmul.f32 %v1261_v41, %v1197_v42  ;;  %vm1233_vm9 = vcmp.ge.f32.partialorder %v2527_v48, 0.0  ;;  %vm1218_vm10 = vcmp.ge.f32.partialorder %v2562_v3, 0.0 }
 0x15c   : > { %2029 = vrcp.f32 %v1116_v23  ;;  %vm1234_vm11 = vcmp.ge.f32.partialorder %v2565_v58, 0.0  ;;  %vm1215_vm12 = vcmp.ge.f32.partialorder %v2535_v6, 0.0  ;;  %vm1216_vm13 = vcmp.ge.f32.partialorder %v2569_v9, 0.0 }
 0x15d   : > { %2031 = vpow2.f32 %v1073_v21  ;;  %vm1231_vm14 = vcmp.ge.f32.partialorder %v2538_v24, 0.0  ;;  %vm1232_vm15 = vcmp.ge.f32.partialorder %v2572_v61, 0.0 }
 0x15e   : > { %2033 = vrcp.f32 %v1132_v28 }
 0x15f   : > { %v2014_v37 = vpop.eup %2013  ;;  %2035 = vpow2.f32 %v1105_v62 }
 0x160   : > { %v1182_v32 = vmul.f32 %v2014_v37, %v2417_v15  ;;  %v2589_v47 = vpop.eup %2015  ;;  %2037 = vpow2.f32 %v1069_v52 }
 0x161   : > { %2039 = vpow2.f32 %v1101_v35  ;;  %v1121_v38 = vadd.f32 1.0, %v2589_v47  ;;  %v1249_v49 = vsel %vm1217_vm8, 1.0, %v2589_v47 }
 0x162   : > { %v1278_v50 = vmul.f32 %v1246_v45, %v1182_v32 }
 0x163   : > { %v2018_v36 = vpop.eup %2017  ;;  %2041 = vrcp.f32 %v1121_v38 }
 0x164   : > { %v2595_v1 = vpop.eup %2019  ;;  %v1710_v15 = vpack.c.bf16 %v1278_v50, %v1277_v4  ;;  %v1198_v54 = vmul.f32 %v2018_v36, %v2439_v31 }
 0x165   : > { %v2022_v20 = vpop.eup %2021  ;;  %v1137_v12 = vadd.f32 1.0, %v2595_v1  ;;  %v1265_v45 = vsel %vm1233_vm9, 1.0, %v2595_v1 }
 0x166   : > { %v2601_v25 = vpop.eup %2023  ;;  %1766 = vst [vmem:[%s2462_s5 + $0x28] sm:$0xff] %v1710_v15   ;;  %v1294_v46 = vmul.f32 %v1262_v55, %v1198_v54  ;;  %v1179_v63 = vmul.f32 %v2022_v20, %v2374_v39 }
 0x167   : > { %v2026_v34 = vpop.eup %2025  ;;  %v1119_v40 = vadd.f32 1.0, %v2601_v25  ;;  %2043 = vrcp.f32 %v1137_v12  ;;  %v1247_v55 = vsel %vm1215_vm12, 1.0, %v2601_v25 }
 0x168   : > { %v2606_v7 = vpop.eup %2027  ;;  %v1750_v31 = vpack.c.bf16 %v1294_v46, %v1293_v33  ;;  %v1195_v8 = vmul.f32 %v2026_v34, %v2400_v57  ;;  %v1275_v0 = vmul.f32 %v1243_v16, %v1179_v63 }
 0x169   : > { %v2030_v53 = vpop.eup %2029  ;;  %v1135_v10 = vadd.f32 1.0, %v2606_v7  ;;  %2045 = vrcp.f32 %v1119_v40  ;;  %v1263_v34 = vsel %vm1231_vm14, 1.0, %v2606_v7 }
 0x16a   : > { %1774 = vst [vmem:[%s2462_s5 + $0x68] sm:$0xff] %v1750_v31   ;;  %v2032_v51 = vpop.eup %2031  ;;  %v1180_v5 = vmul.f32 %v2030_v53, %v2480_v59  ;;  %v1259_v59 = vsel %vm1227_vm5, 1.0, %v2548_v17 }
 0x16b   : > { %v2034_v19 = vpop.eup %2033  ;;  %v1122_v39 = vadd.f32 1.0, %v2032_v51  ;;  %v1291_v23 = vmul.f32 %v1259_v59, %v1195_v8  ;;  %v1250_v4 = vsel %vm1218_vm10, 1.0, %v2032_v51 }
 0x16c   : > { %v2036_v13 = vpop.eup %2035  ;;  %v1276_v2 = vmul.f32 %v1244_v11, %v1180_v5  ;;  %v1196_v56 = vmul.f32 %v2034_v19, %v2485_v43 }
 0x16d   : > { %2047 = vrcp.f32 %v1122_v39  ;;  %v1138_v30 = vadd.f32 1.0, %v2036_v13  ;;  %v2038_v14 = vpop.eup %2037 }
 0x16e   : > { %v1705_v21 = vpack.c.bf16 %v1276_v2, %v1275_v0  ;;  %v1292_v62 = vmul.f32 %v1260_v18, %v1196_v56  ;;  %2049 = vrcp.f32 %v1135_v10  ;;  %v1120_v26 = vadd.f32 1.0, %v2038_v14  ;;  %v2040_v27 = vpop.eup %2039 }
 0x16f   : > { %2051 = vrcp.f32 %v1138_v30  ;;  %v1136_v28 = vadd.f32 1.0, %v2040_v27  ;;  %v1264_v12 = vsel %vm1232_vm15, 1.0, %v2040_v27 }
 0x170   : > { %1765 = vst [vmem:[%s2462_s5 + $0x20] sm:$0xff] %v1705_v21   ;;  %v1745_v43 = vpack.c.bf16 %v1292_v62, %v1291_v23  ;;  %2053 = vrcp.f32 %v1120_v26  ;;  %v2042_v57 = vpop.eup %2041 }
 0x171   : > { %2055 = vrcp.f32 %v1136_v28  ;;  %v1185_v22 = vmul.f32 %v2042_v57, %v2493_v44 }
 0x172   : > { %1773 = vst [vmem:[%s2462_s5 + $0x60] sm:$0xff] %v1745_v43  }
 0x173   : > { %v1281_v42 = vmul.f32 %v1249_v49, %v1185_v22 }
 0x174   : > { %v2044_v17 = vpop.eup %2043 }
 0x175   : > { %v1201_v52 = vmul.f32 %v2044_v17, %v2527_v48 }
 0x176   : > { %v2046_v29 = vpop.eup %2045 }
 0x177   : > { %v1183_v50 = vmul.f32 %v2046_v29, %v2535_v6  ;;  %v1297_v15 = vmul.f32 %v1265_v45, %v1201_v52 }
 0x179   : > { %v1279_v6 = vmul.f32 %v1247_v55, %v1183_v50 }
 0x17a   : > { %v2048_v60 = vpop.eup %2047 }
 0x17b   : > { %v2050_v37 = vpop.eup %2049  ;;  %v1186_v32 = vmul.f32 %v2048_v60, %v2562_v3  ;;  %v1266_v3 = vsel %vm1234_vm11, 1.0, %v2036_v13 }
 0x17c   : > { %v2052_v35 = vpop.eup %2051  ;;  %v1199_v47 = vmul.f32 %v2050_v37, %v2538_v24 }
 0x17d   : > { %v1282_v36 = vmul.f32 %v1250_v4, %v1186_v32  ;;  %v1202_v44 = vmul.f32 %v2052_v35, %v2565_v58  ;;  %v2054_v48 = vpop.eup %2053  ;;  %v1248_v58 = vsel %vm1216_vm13, 1.0, %v2038_v14 }
 0x17e   : > { %v1184_v20 = vmul.f32 %v2054_v48, %v2569_v9  ;;  %v2056_v41 = vpop.eup %2055  ;;  %v1295_v9 = vmul.f32 %v1263_v34, %v1199_v47 }
 0x17f   : > { %v1720_v1 = vpack.c.bf16 %v1282_v36, %v1281_v42  ;;  %v1298_v54 = vmul.f32 %v1266_v3, %v1202_v44  ;;  %v1200_v38 = vmul.f32 %v2056_v41, %v2572_v61 }
 0x180   : > { %v1280_v46 = vmul.f32 %v1248_v58, %v1184_v20 }
 0x181   : > { %1768 = vst [vmem:[%s2462_s5 + $0x38] sm:$0xff] %v1720_v1   ;;  %v1760_v33 = vpack.c.bf16 %v1298_v54, %v1297_v15  ;;  %v1296_v63 = vmul.f32 %v1264_v12, %v1200_v38 }
 0x182   : > { %v1715_v31 = vpack.c.bf16 %v1280_v46, %v1279_v6 }
 0x183   : > { %1776 = vst [vmem:[%s2462_s5 + $0x78] sm:$0xff] %v1760_v33   ;;  %v1755_v25 = vpack.c.bf16 %v1296_v63, %v1295_v9 }
 0x184   : > { %1767 = vst [vmem:[%s2462_s5 + $0x30] sm:$0xff] %v1715_v31  }
 0x185   : > { %1775 = vst [vmem:[%s2462_s5 + $0x70] sm:$0xff] %v1755_v25  }
 0x186 PF: > { %s13_s16 = sadd.s32 1, %s2095_s16   ;;  %s2671_s12 = smov %s2083_s13 }
 0x187   : > { %p10_p10 = scmp.ge.s32.totalorder %s13_s16, 4   ;;  %s2672_s13 = smov %s2152_s20 }
 0x188   : > { %s2673_s14 = smov %s2091_s15  ;;  %s2674_s15 = smov %s2676_s17 }
 0x189   :  { %12 = sbr.rel (!%p10_p10) target bundleno = 3 (0x3), region = 122 }

// kernel: _lambda_.6
= control target key start
LH: loop header
LB: loop body
LE: loop exit
PB: predicated region body
PF: predicated region fallthrough
CT: control target
= control target key end

     0   :  { %s2578_s12 = smov 0   ;;  %s2580_s13 = smov 0   ;;  %s3426_s0 = inlined_call_operand.vmem [shape: bf16[512,128], index: 0, kind: input, shape index: {}]   ;;  %s3427_s1 = inlined_call_operand.vmem [shape: bf16[128,256], index: 1, kind: input, shape index: {}]   ;;  %s3428_s2 = inlined_call_operand.vmem [shape: f32[1,256], index: 2, kind: input, shape index: {}]   ;;  %s3429_s3 = inlined_call_operand.vmem [shape: bf16[512,256], index: 3, kind: output, shape index: {}]  }
   0x1   :  { %s2582_s14 = smov 0  }
   0x2 LB: > { %s32_s15 = sadd.s32 1, %s2551_s13  ;;  %p2091_p0 = scmp.ge.s32.totalorder %s2555_s14, 1  ;;  %s2555_s14 = sphi %s2582_s14, %s13_s14   ;;  %s2551_s13 = sphi %s2580_s13, %s3431_s13   ;;  %s2547_s12 = sphi %s2578_s12, %s3430_s12  }
   0x3   : > { %p34_p1 = scmp.ge.s32.totalorder %s32_s15, 2  ;;  %p193_p2 = scmp.lt.s32.totalorder %s2555_s14, 3 }
   0x5   : > { %s3433_s15 = smov (%p34_p1, %s32_s15), 0  ;;  %p194_p3 = pnand %p2091_p0, %p193_p2 }
   0x6   : > { %s2092_s18 = sshll.u32 (!%p194_p3), %s2547_s12, 5 }
   0x7   : > { %197 = sbr.rel (%p194_p3) target bundleno = 451 (0x1c3), region = 32  ;;  %p240_p4 = scmp.lt.s32.totalorder (!%p194_p3), %s2092_s18, 63 }
   0xc   : > { %v2237_v0 = vld [vmem:[%s3427_s1 + $0x74] ss:$8 sps:$4 sm:$0xff]   ;;  %v2239_v1 = vld [vmem:[%s3427_s1 + $0x70] ss:$8 sps:$4 sm:$0xff]   ;;  %v2557_v2 = vmov 0   ;;  %s3435_s18 = smov (!%p240_p4, %s2092_s18), 63  ;;  %v1024_v33 = vlaneseq }
   0xd   : > { %666 = vmatprep.mubr.bf16.mxu0 %v2557_v2  ;;  %746 = vmatprep.mubr.bf16.mxu1 %v2557_v2  ;;  %v2240_v3 = vld [vmem:[%s3427_s1 + $0x64] ss:$8 sps:$4 sm:$0xff]   ;;  %v2242_v4 = vld [vmem:[%s3427_s1 + $0x60] ss:$8 sps:$4 sm:$0xff]   ;;  %v2243_v5 = vld [vmem:[%s3427_s1 + $0x54] ss:$8 sps:$4 sm:$0xff]  }
   0xe   : > { %634 = vmatprep.subr.bf16.mxu0 %v2237_v0  ;;  %2196 = vmatprep.subr.bf16.mxu1 %v2237_v0  ;;  %s2093_s27 = sshll.u32 %s3435_s18, 2  ;;  %v2245_v6 = vld [vmem:[%s3427_s1 + $0x50] ss:$8 sps:$4 sm:$0xff]   ;;  %v2246_v7 = vld [vmem:[%s3427_s1 + $0x44] ss:$8 sps:$4 sm:$0xff]   ;;  %v1025_v34 = vshrl.u32 %v1024_v33, 7 }
   0xf   : > { %635 = vmatpush1.bf16.msra.mxu0 %v2239_v1  ;;  %2204 = vmatpush1.bf16.msra.mxu1 %v2239_v1  ;;  %s2625_s7 = scalar_lea.vmem %s3426_s0, %s2093_s27  ;;  %v2248_v8 = vld [vmem:[%s3427_s1 + $0x40] ss:$8 sps:$4 sm:$0xff]   ;;  %v2249_v9 = vld [vmem:[%s3427_s1 + $0x34] ss:$8 sps:$4 sm:$0xff]   ;;  %v2251_v10 = vld [vmem:[%s3427_s1 + $0x30] ss:$8 sps:$4 sm:$0xff]  }
  0x10   : > { %636 = vmatprep.subr.bf16.mxu0 %v2240_v3  ;;  %2197 = vmatprep.subr.bf16.mxu1 %v2240_v3  ;;  %v2252_v11 = vld [vmem:[%s3427_s1 + $0x24] ss:$8 sps:$4 sm:$0xff]   ;;  %v2254_v12 = vld [vmem:[%s3427_s1 + $0x20] ss:$8 sps:$4 sm:$0xff]   ;;  %v2255_v13 = vld [vmem:[%s3427_s1 + $0x14] ss:$8 sps:$4 sm:$0xff]  }
  0x11   : > { %v2257_v14 = vld [vmem:[%s3427_s1 + $0x10] ss:$8 sps:$4 sm:$0xff]   ;;  %v2258_v15 = vld [vmem:[%s3427_s1 + $0x4] ss:$8 sps:$4 sm:$0xff]   ;;  %v2260_v16 = vld [vmem:[%s3427_s1] ss:$8 sps:$4 sm:$0xff]  }
  0x12   : > { %v2261_v17 = vld [vmem:[%s2625_s7] sm:$0xff]   ;;  %v2263_v19 = vld [vmem:[%s2625_s7 + $0x8] sm:$0xff]   ;;  %v2265_v21 = vld [vmem:[%s2625_s7 + $0x10] sm:$0xff]   ;;  %v1026_v35 = vsub.s32 0, %v1025_v34  ;;  %v1030_v37 = vsub.s32 1, %v1025_v34  ;;  %s2163_s5 = sshll.u32 %s3435_s18, 3 }
  0x13   : > { %637 = vmatpush1.bf16.msra.mxu0 %v2242_v4  ;;  %2205 = vmatpush1.bf16.msra.mxu1 %v2242_v4  ;;  %v2262_v18 = vld [vmem:[%s2625_s7 + $0x40] sm:$0xff]   ;;  %v2264_v20 = vld [vmem:[%s2625_s7 + $0x48] sm:$0xff]   ;;  %v2266_v22 = vld [vmem:[%s2625_s7 + $0x50] sm:$0xff]  }
  0x14   : > { %638 = vmatprep.subr.bf16.mxu0 %v2243_v5  ;;  %2198 = vmatprep.subr.bf16.mxu1 %v2243_v5  ;;  %v2267_v23 = vld [vmem:[%s2625_s7 + $0x18] sm:$0xff]   ;;  %v2269_v25 = vld [vmem:[%s2625_s7 + $0x20] sm:$0xff]   ;;  %v2271_v27 = vld [vmem:[%s2625_s7 + $0x28] sm:$0xff]  }
  0x15   : > { %v2268_v24 = vld [vmem:[%s2625_s7 + $0x58] sm:$0xff]   ;;  %v2270_v26 = vld [vmem:[%s2625_s7 + $0x60] sm:$0xff]   ;;  %v2272_v28 = vld [vmem:[%s2625_s7 + $0x68] sm:$0xff]  }
  0x16   : > { %v2273_v29 = vld [vmem:[%s2625_s7 + $0x30] sm:$0xff]   ;;  %v2275_v31 = vld [vmem:[%s2625_s7 + $0x38] sm:$0xff]   ;;  %v1022_v36 = vld [vmem:[%s3428_s2] sm:$0x3] }
  0x17   : > { %639 = vmatpush1.bf16.msra.mxu0 %v2245_v6  ;;  %2206 = vmatpush1.bf16.msra.mxu1 %v2245_v6  ;;  %v2274_v30 = vld [vmem:[%s2625_s7 + $0x70] sm:$0xff]   ;;  %v2276_v32 = vld [vmem:[%s2625_s7 + $0x78] sm:$0xff]   ;;  %v2687_v38 = vrot.slane %v1022_v36, %v1026_v35  ;;  %v2689_v41 = vrot.slane %v1022_v36, %v1030_v37  ;;  %s2851_s7 = scalar_lea.vmem %s3429_s3, %s2163_s5 }
  0x18   : > { %640 = vmatprep.subr.bf16.mxu0 %v2246_v7  ;;  %2199 = vmatprep.subr.bf16.mxu1 %v2246_v7 }
  0x1b   : > { %641 = vmatpush1.bf16.msra.mxu0 %v2248_v8  ;;  %2207 = vmatpush1.bf16.msra.mxu1 %v2248_v8 }
  0x1c   : > { %642 = vmatprep.subr.bf16.mxu0 %v2249_v9  ;;  %2200 = vmatprep.subr.bf16.mxu1 %v2249_v9 }
  0x1f   : > { %643 = vmatpush1.bf16.msra.mxu0 %v2251_v10  ;;  %2208 = vmatpush1.bf16.msra.mxu1 %v2251_v10 }
  0x20   : > { %644 = vmatprep.subr.bf16.mxu0 %v2252_v11  ;;  %2201 = vmatprep.subr.bf16.mxu1 %v2252_v11 }
  0x23   : > { %645 = vmatpush1.bf16.msra.mxu0 %v2254_v12  ;;  %2209 = vmatpush1.bf16.msra.mxu1 %v2254_v12 }
  0x24   : > { %646 = vmatprep.subr.bf16.mxu0 %v2255_v13  ;;  %2202 = vmatprep.subr.bf16.mxu1 %v2255_v13 }
  0x27   : > { %647 = vmatpush1.bf16.msra.mxu0 %v2257_v14  ;;  %2210 = vmatpush1.bf16.msra.mxu1 %v2257_v14 }
  0x28   : > { %648 = vmatprep.subr.bf16.mxu0 %v2258_v15  ;;  %2203 = vmatprep.subr.bf16.mxu1 %v2258_v15 }
  0x2b   : > { %649 = vmatpush1.bf16.msra.mxu0 %v2260_v16  ;;  %2211 = vmatpush1.bf16.msra.mxu1 %v2260_v16 }
  0x2e   : > { %667 = vmatmul.mubr.bf16.vlgmr.msra.gmra.mxu0 %v2261_v17  ;;  %747 = vmatmul.mubr.bf16.vlgmr.msra.gmra.mxu1 %v2262_v18 }
  0x2f   : > { %676 = vmatprep.mubr.bf16.mxu0 %v2557_v2  ;;  %756 = vmatprep.mubr.bf16.mxu1 %v2557_v2 }
  0x36   : > { %677 = vmatmul.mubr.bf16.gmra.mxu0 %v2263_v19  ;;  %757 = vmatmul.mubr.bf16.gmra.mxu1 %v2264_v20 }
  0x37   : > { %686 = vmatprep.mubr.bf16.mxu0 %v2557_v2  ;;  %766 = vmatprep.mubr.bf16.mxu1 %v2557_v2 }
  0x3e   : > { %687 = vmatmul.mubr.bf16.gmra.mxu0 %v2265_v21  ;;  %767 = vmatmul.mubr.bf16.gmra.mxu1 %v2266_v22 }
  0x3f   : > { %696 = vmatprep.mubr.bf16.mxu0 %v2557_v2  ;;  %776 = vmatprep.mubr.bf16.mxu1 %v2557_v2 }
  0x46   : > { %697 = vmatmul.mubr.bf16.gmra.mxu0 %v2267_v23  ;;  %777 = vmatmul.mubr.bf16.gmra.mxu1 %v2268_v24 }
  0x47   : > { %706 = vmatprep.mubr.bf16.mxu0 %v2557_v2  ;;  %786 = vmatprep.mubr.bf16.mxu1 %v2557_v2 }
  0x4e   : > { %707 = vmatmul.mubr.bf16.gmra.mxu0 %v2269_v25  ;;  %787 = vmatmul.mubr.bf16.gmra.mxu1 %v2270_v26 }
  0x4f   : > { %716 = vmatprep.mubr.bf16.mxu0 %v2557_v2  ;;  %796 = vmatprep.mubr.bf16.mxu1 %v2557_v2 }
  0x56   : > { %717 = vmatmul.mubr.bf16.gmra.mxu0 %v2271_v27  ;;  %797 = vmatmul.mubr.bf16.gmra.mxu1 %v2272_v28 }
  0x57   : > { %726 = vmatprep.mubr.bf16.mxu0 %v2557_v2  ;;  %806 = vmatprep.mubr.bf16.mxu1 %v2557_v2 }
  0x5e   : > { %727 = vmatmul.mubr.bf16.gmra.mxu0 %v2273_v29  ;;  %807 = vmatmul.mubr.bf16.gmra.mxu1 %v2274_v30 }
  0x5f   : > { %736 = vmatprep.mubr.bf16.mxu0 %v2557_v2  ;;  %816 = vmatprep.mubr.bf16.mxu1 %v2557_v2 }
  0x66   : > { %737 = vmatmul.mubr.bf16.gmra.mxu0 %v2275_v31  ;;  %817 = vmatmul.mubr.bf16.gmra.mxu1 %v2276_v32 }
  0xee   : > { %v668_v39 = vpop.f32.mrf.mxu0  ;;  %v748_v40 = vpop.f32.mrf.mxu1 }
  0xef   : > { %v2692_v42 = vadd.f32 %v2687_v38, %v668_v39  ;;  %v2695_v43 = vadd.f32 %v2687_v38, %v748_v40 }
  0xf0   : > { %v670_v44 = vpop.f32.mrf.mxu0  ;;  %v750_v45 = vpop.f32.mrf.mxu1 }
  0xf1   : > { %v1098_v46 = vand.u32 2147483647, %v2692_v42  ;;  %v1130_v47 = vand.u32 2147483647, %v2695_v43  ;;  %v2700_v48 = vadd.f32 %v2689_v41, %v670_v44  ;;  %v2703_v49 = vadd.f32 %v2689_v41, %v750_v45 }
  0xf2   : > { %v672_v50 = vpop.f32.mrf.mxu0  ;;  %v752_v51 = vpop.f32.mrf.mxu1  ;;  %vm1546_vm0 = vcmp.ge.f32.partialorder %v2692_v42, 0.0  ;;  %vm1578_vm1 = vcmp.ge.f32.partialorder %v2695_v43, 0.0 }
  0xf3   : > { %v1162_v52 = vsub.f32 0.0, %v1098_v46  ;;  %v1194_v53 = vsub.f32 0.0, %v1130_v47  ;;  %v2706_v54 = vadd.f32 %v2687_v38, %v672_v50  ;;  %v2709_v55 = vadd.f32 %v2687_v38, %v752_v51 }
  0xf4   : > { %v1099_v56 = vand.u32 2147483647, %v2700_v48  ;;  %v1131_v57 = vand.u32 2147483647, %v2703_v49  ;;  %v674_v58 = vpop.f32.mrf.mxu0  ;;  %v754_v59 = vpop.f32.mrf.mxu1  ;;  %vm1547_vm2 = vcmp.ge.f32.partialorder %v2700_v48, 0.0  ;;  %vm1579_vm3 = vcmp.ge.f32.partialorder %v2703_v49, 0.0 }
  0xf5   : > { %v1226_v60 = vmul.f32 1.442695, %v1162_v52  ;;  %v1290_v61 = vmul.f32 1.442695, %v1194_v53  ;;  %v1100_v62 = vand.u32 2147483647, %v2706_v54  ;;  %v2715_v63 = vadd.f32 %v2689_v41, %v674_v58 }
  0xf6   : > { %v1163_v0 = vsub.f32 0.0, %v1099_v56  ;;  %v1195_v1 = vsub.f32 0.0, %v1131_v57  ;;  %v1132_v2 = vand.u32 2147483647, %v2709_v55  ;;  %v678_v3 = vpop.f32.mrf.mxu0  ;;  %v758_v4 = vpop.f32.mrf.mxu1  ;;  %v2720_v13 = vadd.f32 %v2689_v41, %v754_v59 }
  0xf7   : > { %2277 = vpow2.f32 %v1226_v60  ;;  %v1164_v5 = vsub.f32 0.0, %v1100_v62  ;;  %v1101_v6 = vand.u32 2147483647, %v2715_v63  ;;  %v2723_v16 = vadd.f32 %v2687_v38, %v678_v3 }
  0xf8   : > { %2279 = vpow2.f32 %v1290_v61  ;;  %v1228_v7 = vmul.f32 1.442695, %v1163_v0  ;;  %v1292_v8 = vmul.f32 1.442695, %v1195_v1  ;;  %v1196_v9 = vsub.f32 0.0, %v1132_v2  ;;  %v680_v10 = vpop.f32.mrf.mxu0  ;;  %v760_v14 = vpop.f32.mrf.mxu1 }
  0xf9   : > { %v1230_v11 = vmul.f32 1.442695, %v1164_v5  ;;  %v1165_v12 = vsub.f32 0.0, %v1101_v6  ;;  %v2726_v17 = vadd.f32 %v2687_v38, %v758_v4  ;;  %v1133_v19 = vand.u32 2147483647, %v2720_v13 }
  0xfa   : > { %2281 = vpow2.f32 %v1228_v7  ;;  %v1294_v15 = vmul.f32 1.442695, %v1196_v9  ;;  %v1102_v20 = vand.u32 2147483647, %v2723_v16  ;;  %v682_v22 = vpop.f32.mrf.mxu0  ;;  %v2732_v24 = vadd.f32 %v2689_v41, %v680_v10  ;;  %v762_v25 = vpop.f32.mrf.mxu1 }
  0xfb   : > { %2283 = vpow2.f32 %v1292_v8  ;;  %v1232_v18 = vmul.f32 1.442695, %v1165_v12  ;;  %v1134_v21 = vand.u32 2147483647, %v2726_v17  ;;  %v1197_v23 = vsub.f32 0.0, %v1133_v19 }
  0xfc   : > { %2285 = vpow2.f32 %v1230_v11  ;;  %v1166_v26 = vsub.f32 0.0, %v1102_v20  ;;  %v2735_v28 = vadd.f32 %v2689_v41, %v760_v14  ;;  %v1103_v30 = vand.u32 2147483647, %v2732_v24  ;;  %v684_v39 = vpop.f32.mrf.mxu0  ;;  %v764_v40 = vpop.f32.mrf.mxu1 }
  0xfd   : > { %2287 = vpow2.f32 %v1294_v15  ;;  %v1198_v27 = vsub.f32 0.0, %v1134_v21  ;;  %v1296_v29 = vmul.f32 1.442695, %v1197_v23  ;;  %v2739_v31 = vadd.f32 %v2687_v38, %v682_v22 }
  0xfe   : > { %2289 = vpow2.f32 %v1232_v18  ;;  %v1234_v32 = vmul.f32 1.442695, %v1166_v26  ;;  %v1135_v34 = vand.u32 2147483647, %v2735_v28  ;;  %v2743_v35 = vadd.f32 %v2687_v38, %v762_v25  ;;  %v688_v0 = vpop.f32.mrf.mxu0  ;;  %v768_v12 = vpop.f32.mrf.mxu1 }
  0xff   : > { %v1298_v33 = vmul.f32 1.442695, %v1198_v27  ;;  %2291 = vpow2.f32 %v1296_v29  ;;  %v1167_v36 = vsub.f32 0.0, %v1103_v30  ;;  %v1104_v37 = vand.u32 2147483647, %v2739_v31 }
 0x100   : > { %2293 = vpow2.f32 %v1234_v32  ;;  %v1199_v44 = vsub.f32 0.0, %v1135_v34  ;;  %v1136_v47 = vand.u32 2147483647, %v2743_v35  ;;  %v2748_v52 = vadd.f32 %v2689_v41, %v684_v39  ;;  %v690_v14 = vpop.f32.mrf.mxu0  ;;  %v770_v29 = vpop.f32.mrf.mxu1 }
 0x101   : > { %2295 = vpow2.f32 %v1298_v33  ;;  %v1236_v45 = vmul.f32 1.442695, %v1167_v36  ;;  %v1168_v46 = vsub.f32 0.0, %v1104_v37  ;;  %v2751_v53 = vadd.f32 %v2689_v41, %v764_v40 }
 0x102   : > { %v1300_v51 = vmul.f32 1.442695, %v1199_v44  ;;  %v1200_v61 = vsub.f32 0.0, %v1136_v47  ;;  %v1105_v62 = vand.u32 2147483647, %v2748_v52  ;;  %v2777_v20 = vadd.f32 %v2687_v38, %v688_v0 }
 0x103   : > { %2297 = vpow2.f32 %v1236_v45  ;;  %v1238_v58 = vmul.f32 1.442695, %v1168_v46  ;;  %v1137_v3 = vand.u32 2147483647, %v2751_v53  ;;  %v2783_v22 = vadd.f32 %v2687_v38, %v768_v12 }
 0x104   : > { %v2278_v50 = vpop.eup %2277  ;;  %2299 = vpow2.f32 %v1300_v51  ;;  %v1169_v6 = vsub.f32 0.0, %v1105_v62  ;;  %v1302_v11 = vmul.f32 1.442695, %v1200_v61  ;;  %v2786_v23 = vadd.f32 %v2689_v41, %v690_v14 }
 0x105   : > { %v2753_v56 = vpop.eup %2279  ;;  %v1354_v57 = vadd.f32 1.0, %v2278_v50  ;;  %v1201_v19 = vsub.f32 0.0, %v1137_v3  ;;  %vm1548_vm4 = vcmp.ge.f32.partialorder %v2706_v54, 0.0  ;;  %v1106_v27 = vand.u32 2147483647, %v2777_v20 }
 0x106   : > { %v1386_v59 = vadd.f32 1.0, %v2753_v56  ;;  %v1240_v18 = vmul.f32 1.442695, %v1169_v6  ;;  %vm1580_vm5 = vcmp.ge.f32.partialorder %v2709_v55, 0.0  ;;  %v1610_v34 = vsel %vm1546_vm0, 1.0, %v2278_v50 }
 0x107   : > { %v2756_v60 = vpop.eup %2281  ;;  %2301 = vrcp.f32 %v1354_v57  ;;  %v1304_v33 = vmul.f32 1.442695, %v1201_v19  ;;  %v1170_v37 = vsub.f32 0.0, %v1106_v27  ;;  %v1138_v40 = vand.u32 2147483647, %v2783_v22  ;;  %v692_v57 = vpop.f32.mrf.mxu0 }
 0x108   : > { %v2759_v1 = vpop.eup %2283  ;;  %2303 = vrcp.f32 %v1386_v59  ;;  %v1355_v2 = vadd.f32 1.0, %v2756_v60  ;;  %v1107_v44 = vand.u32 2147483647, %v2786_v23  ;;  %v2805_v45 = vadd.f32 %v2689_v41, %v770_v29 }
 0x109   : > { %v2763_v4 = vpop.eup %2285  ;;  %v1387_v5 = vadd.f32 1.0, %v2759_v1  ;;  %2305 = vpow2.f32 %v1238_v58  ;;  %v1642_v47 = vsel %vm1578_vm1, 1.0, %v2753_v56  ;;  %v1242_v51 = vmul.f32 1.442695, %v1170_v37 }
 0x10a   : > { %v2766_v7 = vpop.eup %2287  ;;  %2307 = vrcp.f32 %v1355_v2  ;;  %v1356_v8 = vadd.f32 1.0, %v2763_v4  ;;  %v1611_v59 = vsel %vm1547_vm2, 1.0, %v2756_v60  ;;  %vm1549_vm6 = vcmp.ge.f32.partialorder %v2715_v63, 0.0 }
 0x10b   : > { %v2769_v9 = vpop.eup %2289  ;;  %2309 = vrcp.f32 %v1387_v5  ;;  %v1388_v10 = vadd.f32 1.0, %v2766_v7  ;;  %vm1581_vm7 = vcmp.ge.f32.partialorder %v2720_v13, 0.0  ;;  %v1202_v62 = vsub.f32 0.0, %v1138_v40 }
 0x10c   : > { %2311 = vrcp.f32 %v1356_v8  ;;  %v1357_v15 = vadd.f32 1.0, %v2769_v9  ;;  %v2779_v21 = vpop.eup %2291  ;;  %v1643_v2 = vsel %vm1579_vm3, 1.0, %v2759_v1  ;;  %v1171_v3 = vsub.f32 0.0, %v1107_v44 }
 0x10d   : > { %2313 = vrcp.f32 %v1388_v10  ;;  %v2788_v25 = vpop.eup %2293  ;;  %v1389_v26 = vadd.f32 1.0, %v2779_v21  ;;  %v1306_v60 = vmul.f32 1.442695, %v1202_v62  ;;  %v1139_v6 = vand.u32 2147483647, %v2805_v45  ;;  %v772_v10 = vpop.f32.mrf.mxu1 }
 0x10e   : > { %2315 = vrcp.f32 %v1357_v15  ;;  %v2793_v30 = vpop.eup %2295  ;;  %v1358_v32 = vadd.f32 1.0, %v2788_v25  ;;  %v2827_v8 = vadd.f32 %v2687_v38, %v692_v57  ;;  %v1612_v1 = vsel %vm1548_vm4, 1.0, %v2763_v4 }
 0x10f   : > { %2317 = vpow2.f32 %v1302_v11  ;;  %v1390_v36 = vadd.f32 1.0, %v2793_v30  ;;  %vm1550_vm8 = vcmp.ge.f32.partialorder %v2723_v16, 0.0  ;;  %v1244_v19 = vmul.f32 1.442695, %v1171_v3 }
 0x110   : > { %2319 = vpow2.f32 %v1240_v18  ;;  %v2800_v39 = vpop.eup %2297  ;;  %v1644_v18 = vsel %vm1580_vm5, 1.0, %v2766_v7  ;;  %vm1582_vm9 = vcmp.ge.f32.partialorder %v2726_v17, 0.0  ;;  %v1203_v4 = vsub.f32 0.0, %v1139_v6 }
 0x111   : > { %2321 = vrcp.f32 %v1389_v26  ;;  %v2807_v46 = vpop.eup %2299  ;;  %v1359_v50 = vadd.f32 1.0, %v2800_v39  ;;  %v2843_v29 = vadd.f32 %v2687_v38, %v772_v10  ;;  %vm1551_vm10 = vcmp.ge.f32.partialorder %v2732_v24, 0.0 }
 0x112   : > { %2323 = vrcp.f32 %v1358_v32  ;;  %v1391_v61 = vadd.f32 1.0, %v2807_v46  ;;  %v1108_v7 = vand.u32 2147483647, %v2827_v8  ;;  %vm1583_vm11 = vcmp.ge.f32.partialorder %v2735_v28, 0.0 }
 0x113   : > { %2325 = vrcp.f32 %v1390_v36  ;;  %v1308_v37 = vmul.f32 1.442695, %v1203_v4  ;;  %v1615_v4 = vsel %vm1551_vm10, 1.0, %v2800_v39  ;;  %vm1552_vm12 = vcmp.ge.f32.partialorder %v2739_v31, 0.0 }
 0x114   : > { %v2302_v58 = vpop.eup %2301  ;;  %2327 = vpow2.f32 %v1304_v33  ;;  %vm1584_vm13 = vcmp.ge.f32.partialorder %v2743_v35, 0.0  ;;  %vm1553_vm14 = vcmp.ge.f32.partialorder %v2748_v52, 0.0  ;;  %vm1585_vm15 = vcmp.ge.f32.partialorder %v2751_v53, 0.0 }
 0x115   : > { %v2304_v0 = vpop.eup %2303  ;;  %v1482_v56 = vmul.f32 %v2302_v58, %v2692_v42  ;;  %2329 = vrcp.f32 %v1359_v50  ;;  %vm1554_vm0 = vcmp.ge.f32.partialorder %v2777_v20, 0.0  ;;  %vm1555_vm1 = vcmp.ge.f32.partialorder %v2786_v23, 0.0 }
 0x116   : > { %v2823_v5 = vpop.eup %2305  ;;  %2331 = vrcp.f32 %v1391_v61  ;;  %v1514_v42 = vmul.f32 %v2304_v0, %v2695_v43  ;;  %vm1586_vm2 = vcmp.ge.f32.partialorder %v2783_v22, 0.0  ;;  %vm1587_vm3 = vcmp.ge.f32.partialorder %v2805_v45, 0.0 }
 0x117   : > { %v2308_v11 = vpop.eup %2307  ;;  %v1360_v12 = vadd.f32 1.0, %v2823_v5  ;;  %2333 = vpow2.f32 %v1242_v51  ;;  %v1674_v26 = vmul.f32 %v1610_v34, %v1482_v56  ;;  %v1172_v51 = vsub.f32 0.0, %v1108_v7 }
 0x118   : > { %v2310_v14 = vpop.eup %2309  ;;  %v1483_v15 = vmul.f32 %v2308_v11, %v2700_v48  ;;  %2335 = vpow2.f32 %v1306_v60  ;;  %v694_v60 = vpop.f32.mrf.mxu0  ;;  %v1614_v11 = vsel %vm1550_vm8, 1.0, %v2788_v25  ;;  %vm1556_vm4 = vcmp.ge.f32.partialorder %v2827_v8, 0.0 }
 0x119   : > { %v2312_v43 = vpop.eup %2311  ;;  %v1515_v27 = vmul.f32 %v2310_v14, %v2703_v49  ;;  %2337 = vpow2.f32 %v1244_v19  ;;  %v1706_v49 = vmul.f32 %v1642_v47, %v1514_v42  ;;  %v1613_v47 = vsel %vm1549_vm6, 1.0, %v2769_v9 }
 0x11a   : > { %v2314_v32 = vpop.eup %2313  ;;  %v1675_v33 = vmul.f32 %v1611_v59, %v1483_v15  ;;  %v1484_v48 = vmul.f32 %v2312_v43, %v2706_v54  ;;  %2339 = vrcp.f32 %v1360_v12  ;;  %v1645_v59 = vsel %vm1581_vm7, 1.0, %v2779_v21  ;;  %v774_v43 = vpop.f32.mrf.mxu1 }
 0x11b   : > { %v2316_v36 = vpop.eup %2315  ;;  %v1707_v34 = vmul.f32 %v1643_v2, %v1515_v27  ;;  %v1516_v44 = vmul.f32 %v2314_v32, %v2709_v55  ;;  %2341 = vpow2.f32 %v1308_v37  ;;  %v1140_v9 = vand.u32 2147483647, %v2843_v29 }
 0x11c   : > { %v2854_v40 = vpop.eup %2317  ;;  %v2164_v54 = vpack.c.bf16 %v1675_v33, %v1674_v26  ;;  %v1485_v50 = vmul.f32 %v2316_v36, %v2715_v63  ;;  %v1676_v0 = vmul.f32 %v1612_v1, %v1484_v48  ;;  %v1246_v63 = vmul.f32 1.442695, %v1172_v51  ;;  %v698_v33 = vpop.f32.mrf.mxu0 }
 0x11d   : > { %v2858_v57 = vpop.eup %2319  ;;  %v2180_v58 = vpack.c.bf16 %v1707_v34, %v1706_v49  ;;  %v1392_v61 = vadd.f32 1.0, %v2854_v40  ;;  %v1708_v6 = vmul.f32 %v1644_v18, %v1516_v44  ;;  %v1646_v18 = vsel %vm1582_vm9, 1.0, %v2793_v30 }
 0x11e   : > { %v2322_v62 = vpop.eup %2321  ;;  %1930 = vst [vmem:[%s2851_s7] sm:$0xff] %v2164_v54  ;;  %v1677_v55 = vmul.f32 %v1613_v47, %v1485_v50  ;;  %v1361_v56 = vadd.f32 1.0, %v2858_v57  ;;  %v2885_v25 = vadd.f32 %v2689_v41, %v694_v60  ;;  %v1647_v30 = vsel %vm1583_vm11, 1.0, %v2807_v46 }
 0x11f   : > { %v2324_v2 = vpop.eup %2323  ;;  %1946 = vst [vmem:[%s2851_s7 + $0x80] sm:$0xff] %v2180_v58  ;;  %v1517_v3 = vmul.f32 %v2322_v62, %v2720_v13  ;;  %2343 = vrcp.f32 %v1392_v61  ;;  %v1204_v13 = vsub.f32 0.0, %v1140_v9  ;;  %v2906_v51 = vadd.f32 %v2689_v41, %v774_v43  ;;  %v700_v58 = vpop.f32.mrf.mxu0 }
 0x120   : > { %v2326_v21 = vpop.eup %2325  ;;  %v2165_v10 = vpack.c.bf16 %v1677_v55, %v1676_v0  ;;  %2345 = vrcp.f32 %v1361_v56  ;;  %v1486_v12 = vmul.f32 %v2324_v2, %v2723_v16  ;;  %v1109_v7 = vand.u32 2147483647, %v2885_v25 }
 0x121   : > { %v2875_v42 = vpop.eup %2327  ;;  %v1709_v1 = vmul.f32 %v1645_v59, %v1517_v3  ;;  %2347 = vpow2.f32 %v1246_v63  ;;  %v1518_v15 = vmul.f32 %v2326_v21, %v2726_v17  ;;  %v1310_v32 = vmul.f32 1.442695, %v1204_v13 }
 0x122   : > { %v2330_v14 = vpop.eup %2329  ;;  %1931 = vst [vmem:[%s2851_s7 + $0x8] sm:$0xff] %v2165_v10  ;;  %v1393_v19 = vadd.f32 1.0, %v2875_v42  ;;  %v1678_v49 = vmul.f32 %v1614_v11, %v1486_v12  ;;  %v1173_v44 = vsub.f32 0.0, %v1109_v7  ;;  %v1141_v0 = vand.u32 2147483647, %v2906_v51 }
 0x123   : > { %v2332_v26 = vpop.eup %2331  ;;  %v2181_v27 = vpack.c.bf16 %v1709_v1, %v1708_v6  ;;  %v1487_v16 = vmul.f32 %v2330_v14, %v2732_v24  ;;  %v1710_v39 = vmul.f32 %v1646_v18, %v1518_v15  ;;  %v2915_v55 = vadd.f32 %v2687_v38, %v698_v33  ;;  %v702_v1 = vpop.f32.mrf.mxu0 }
 0x124   : > { %v2891_v48 = vpop.eup %2333  ;;  %v1519_v17 = vmul.f32 %v2332_v26, %v2735_v28  ;;  %2349 = vrcp.f32 %v1393_v19  ;;  %v778_v28 = vpop.f32.mrf.mxu1  ;;  %v1248_v62 = vmul.f32 1.442695, %v1173_v44  ;;  %v2921_v2 = vadd.f32 %v2689_v41, %v700_v58 }
 0x125   : > { %v2898_v36 = vpop.eup %2335  ;;  %1947 = vst [vmem:[%s2851_s7 + $0x88] sm:$0xff] %v2181_v27  ;;  %v1679_v34 = vmul.f32 %v1615_v4, %v1487_v16  ;;  %v1362_v24 = vadd.f32 1.0, %v2891_v48  ;;  %2351 = vpow2.f32 %v1310_v32  ;;  %v2918_v56 = vadd.f32 %v2687_v38, %v778_v28 }
 0x126   : > { %v1711_v37 = vmul.f32 %v1647_v30, %v1519_v17  ;;  %v1394_v54 = vadd.f32 1.0, %v2898_v36  ;;  %v2903_v46 = vpop.eup %2337  ;;  %v780_v3 = vpop.f32.mrf.mxu1  ;;  %v1205_v60 = vsub.f32 0.0, %v1141_v0  ;;  %v1616_v6 = vsel %vm1552_vm12, 1.0, %v2823_v5 }
 0x127   : > { %v2166_v50 = vpack.c.bf16 %v1679_v34, %v1678_v49  ;;  %2353 = vrcp.f32 %v1362_v24  ;;  %v2340_v47 = vpop.eup %2339  ;;  %v1363_v61 = vadd.f32 1.0, %v2903_v46  ;;  %v1110_v11 = vand.u32 2147483647, %v2915_v55 }
 0x128   : > { %v2182_v59 = vpack.c.bf16 %v1711_v37, %v1710_v39  ;;  %2355 = vrcp.f32 %v1394_v54  ;;  %v2923_v63 = vpop.eup %2341  ;;  %v1488_v9 = vmul.f32 %v2340_v47, %v2739_v31  ;;  %v1617_v13 = vsel %vm1553_vm14, 1.0, %v2858_v57  ;;  %v782_v37 = vpop.f32.mrf.mxu1 }
 0x129   : > { %1932 = vst [vmem:[%s2851_s7 + $0x10] sm:$0xff] %v2166_v50  ;;  %2357 = vrcp.f32 %v1363_v61  ;;  %v1395_v10 = vadd.f32 1.0, %v2923_v63  ;;  %v1312_v14 = vmul.f32 1.442695, %v1205_v60  ;;  %v1142_v15 = vand.u32 2147483647, %v2918_v56 }
 0x12a   : > { %1948 = vst [vmem:[%s2851_s7 + $0x90] sm:$0xff] %v2182_v59  ;;  %2359 = vpow2.f32 %v1248_v62  ;;  %v2936_v18 = vadd.f32 %v2689_v41, %v780_v3  ;;  %v1174_v5 = vsub.f32 0.0, %v1110_v11  ;;  %v1111_v43 = vand.u32 2147483647, %v2921_v2 }
 0x12b   : > { %2361 = vrcp.f32 %v1395_v10  ;;  %v1680_v26 = vmul.f32 %v1616_v6, %v1488_v9  ;;  %v2945_v57 = vadd.f32 %v2687_v38, %v702_v1  ;;  %v1206_v32 = vsub.f32 0.0, %v1142_v15  ;;  %v784_v9 = vpop.f32.mrf.mxu1 }
 0x12c   : > { %v2344_v21 = vpop.eup %2343  ;;  %2363 = vpow2.f32 %v1312_v14  ;;  %v1250_v4 = vmul.f32 1.442695, %v1174_v5  ;;  %v1175_v33 = vsub.f32 0.0, %v1111_v43  ;;  %v1143_v7 = vand.u32 2147483647, %v2936_v18 }
 0x12d   : > { %v2346_v12 = vpop.eup %2345  ;;  %v1520_v27 = vmul.f32 %v2344_v21, %v2743_v35  ;;  %v1314_v39 = vmul.f32 1.442695, %v1206_v32  ;;  %v1649_v35 = vsel %vm1585_vm15, 1.0, %v2875_v42  ;;  %v1112_v47 = vand.u32 2147483647, %v2945_v57 }
 0x12e   : > { %v2938_v19 = vpop.eup %2347  ;;  %v1489_v31 = vmul.f32 %v2346_v12, %v2748_v52  ;;  %v1648_v52 = vsel %vm1584_vm13, 1.0, %v2854_v40  ;;  %2365 = vpow2.f32 %v1250_v4  ;;  %v1252_v40 = vmul.f32 1.442695, %v1175_v33 }
 0x12f   : > { %v1364_v30 = vadd.f32 1.0, %v2938_v19  ;;  %v1712_v54 = vmul.f32 %v1648_v52, %v1520_v27  ;;  %v1207_v44 = vsub.f32 0.0, %v1143_v7  ;;  %2367 = vpow2.f32 %v1314_v39 }
 0x130   : > { %v1681_v16 = vmul.f32 %v1617_v13, %v1489_v31  ;;  %v2965_v61 = vadd.f32 %v2687_v38, %v782_v37  ;;  %v1176_v3 = vsub.f32 0.0, %v1112_v47  ;;  %v1618_v21 = vsel %vm1554_vm0, 1.0, %v2891_v48 }
 0x131   : > { %v2350_v17 = vpop.eup %2349  ;;  %2369 = vrcp.f32 %v1364_v30  ;;  %v1316_v59 = vmul.f32 1.442695, %v1207_v44  ;;  %v1619_v6 = vsel %vm1555_vm1, 1.0, %v2903_v46  ;;  %v2985_v46 = vadd.f32 %v2689_v41, %v784_v9  ;;  %v788_v30 = vpop.f32.mrf.mxu1 }
 0x132   : > { %v2953_v49 = vpop.eup %2351  ;;  %v2167_v34 = vpack.c.bf16 %v1681_v16, %v1680_v26  ;;  %v1521_v24 = vmul.f32 %v2350_v17, %v2751_v53  ;;  %v704_v53 = vpop.f32.mrf.mxu0  ;;  %2371 = vpow2.f32 %v1252_v40  ;;  %v1144_v10 = vand.u32 2147483647, %v2965_v61 }
 0x133   : > { %v1396_v58 = vadd.f32 1.0, %v2953_v49  ;;  %2373 = vpow2.f32 %v1316_v59  ;;  %v1254_v12 = vmul.f32 1.442695, %v1176_v3  ;;  %v2980_v13 = vadd.f32 %v2689_v41, %v704_v53  ;;  %v790_v47 = vpop.f32.mrf.mxu1 }
 0x134   : > { %v2354_v28 = vpop.eup %2353  ;;  %1933 = vst [vmem:[%s2851_s7 + $0x18] sm:$0xff] %v2167_v34  ;;  %v1713_v50 = vmul.f32 %v1649_v35, %v1521_v24  ;;  %v1208_v14 = vsub.f32 0.0, %v1144_v10  ;;  %v708_v15 = vpop.f32.mrf.mxu0  ;;  %v1650_v26 = vsel %vm1586_vm2, 1.0, %v2898_v36  ;;  %v1145_v16 = vand.u32 2147483647, %v2985_v46 }
 0x135   : > { %v2356_v42 = vpop.eup %2355  ;;  %v1490_v0 = vmul.f32 %v2354_v28, %v2777_v20  ;;  %2375 = vrcp.f32 %v1396_v58  ;;  %v1113_v43 = vand.u32 2147483647, %v2980_v13  ;;  %v2996_v52 = vadd.f32 %v2687_v38, %v708_v15 }
 0x136   : > { %v2183_v62 = vpack.c.bf16 %v1713_v50, %v1712_v54  ;;  %v2358_v60 = vpop.eup %2357  ;;  %v1522_v20 = vmul.f32 %v2356_v42, %v2783_v22  ;;  %2377 = vpow2.f32 %v1254_v12  ;;  %v1318_v27 = vmul.f32 1.442695, %v1208_v14 }
 0x137   : > { %v2975_v11 = vpop.eup %2359  ;;  %v1491_v1 = vmul.f32 %v2358_v60, %v2786_v23  ;;  %v1682_v31 = vmul.f32 %v1618_v21, %v1490_v0  ;;  %v1177_v17 = vsub.f32 0.0, %v1113_v43  ;;  %v1651_v22 = vsel %vm1587_vm3, 1.0, %v2923_v63  ;;  %v792_v43 = vpop.f32.mrf.mxu1 }
 0x138   : > { %1949 = vst [vmem:[%s2851_s7 + $0x98] sm:$0xff] %v2183_v62  ;;  %v1365_v48 = vadd.f32 1.0, %v2975_v11  ;;  %v2362_v23 = vpop.eup %2361  ;;  %v1209_v7 = vsub.f32 0.0, %v1145_v16  ;;  %v1714_v34 = vmul.f32 %v1650_v26, %v1522_v20  ;;  %v1114_v37 = vand.u32 2147483647, %v2996_v52 }
 0x139   : > { %v1683_v5 = vmul.f32 %v1619_v6, %v1491_v1  ;;  %v2992_v4 = vpop.eup %2363  ;;  %v1523_v33 = vmul.f32 %v2362_v23, %v2805_v45  ;;  %v1256_v39 = vmul.f32 1.442695, %v1177_v17  ;;  %v3007_v40 = vadd.f32 %v2687_v38, %v788_v30  ;;  %v710_v45 = vpop.f32.mrf.mxu0 }
 0x13a   : > { %2379 = vrcp.f32 %v1365_v48  ;;  %v1397_v36 = vadd.f32 1.0, %v2992_v4  ;;  %v1320_v35 = vmul.f32 1.442695, %v1209_v7  ;;  %v1178_v50 = vsub.f32 0.0, %v1114_v37 }
 0x13b   : > { %v2168_v32 = vpack.c.bf16 %v1683_v5, %v1682_v31  ;;  %2381 = vpow2.f32 %v1318_v27  ;;  %v1715_v24 = vmul.f32 %v1651_v22, %v1523_v33  ;;  %v3004_v54 = vpop.eup %2365  ;;  %v1146_v58 = vand.u32 2147483647, %v3007_v40  ;;  %v712_v9 = vpop.f32.mrf.mxu0 }
 0x13c   : > { %2383 = vrcp.f32 %v1397_v36  ;;  %v1366_v44 = vadd.f32 1.0, %v3004_v54  ;;  %v3010_v28 = vpop.eup %2367  ;;  %v1258_v62 = vmul.f32 1.442695, %v1178_v50  ;;  %v3019_v3 = vadd.f32 %v2689_v41, %v710_v45 }
 0x13d   : > { %1934 = vst [vmem:[%s2851_s7 + $0x20] sm:$0xff] %v2168_v32  ;;  %v2184_v63 = vpack.c.bf16 %v1715_v24, %v1714_v34  ;;  %2385 = vpow2.f32 %v1256_v39  ;;  %v1398_v53 = vadd.f32 1.0, %v3010_v28  ;;  %v1210_v0 = vsub.f32 0.0, %v1146_v58  ;;  %v714_v23 = vpop.f32.mrf.mxu0 }
 0x13e   : > { %2387 = vpow2.f32 %v1320_v35  ;;  %v2370_v59 = vpop.eup %2369  ;;  %vm1588_vm5 = vcmp.ge.f32.partialorder %v2843_v29, 0.0  ;;  %v3026_v6 = vadd.f32 %v2689_v41, %v790_v47  ;;  %vm1557_vm6 = vcmp.ge.f32.partialorder %v2885_v25, 0.0 }
 0x13f   : > { %1950 = vst [vmem:[%s2851_s7 + $0xa0] sm:$0xff] %v2184_v63  ;;  %2389 = vrcp.f32 %v1366_v44  ;;  %v3015_v42 = vpop.eup %2371  ;;  %v1492_v1 = vmul.f32 %v2370_v59, %v2827_v8  ;;  %vm1589_vm7 = vcmp.ge.f32.partialorder %v2906_v51, 0.0  ;;  %v1322_v20 = vmul.f32 1.442695, %v1210_v0 }
 0x140   : > { %v3021_v60 = vpop.eup %2373  ;;  %2391 = vrcp.f32 %v1398_v53  ;;  %v1367_v21 = vadd.f32 1.0, %v3015_v42  ;;  %v1115_v48 = vand.u32 2147483647, %v3019_v3  ;;  %v1620_v15 = vsel %vm1556_vm4, 1.0, %v2938_v19  ;;  %v794_v53 = vpop.f32.mrf.mxu1 }
 0x141   : > { %v1399_v12 = vadd.f32 1.0, %v3021_v60  ;;  %2393 = vpow2.f32 %v1258_v62  ;;  %v1147_v31 = vand.u32 2147483647, %v3026_v6  ;;  %v3040_v5 = vadd.f32 %v2687_v38, %v712_v9 }
 0x142   : > { %v2376_v10 = vpop.eup %2375  ;;  %2395 = vrcp.f32 %v1367_v21  ;;  %v1621_v27 = vsel %vm1557_vm6, 1.0, %v2975_v11  ;;  %v1179_v32 = vsub.f32 0.0, %v1115_v48  ;;  %v1684_v33 = vmul.f32 %v1620_v15, %v1492_v1 }
 0x143   : > { %v3033_v14 = vpop.eup %2377  ;;  %2397 = vrcp.f32 %v1399_v12  ;;  %vm1558_vm8 = vcmp.ge.f32.partialorder %v2915_v55, 0.0  ;;  %v1211_v8 = vsub.f32 0.0, %v1147_v31  ;;  %v1116_v19 = vand.u32 2147483647, %v3040_v5 }
 0x144   : > { %v1368_v16 = vadd.f32 1.0, %v3033_v14  ;;  %2399 = vpow2.f32 %v1322_v20  ;;  %v1524_v22 = vmul.f32 %v2376_v10, %v2843_v29  ;;  %vm1590_vm9 = vcmp.ge.f32.partialorder %v2918_v56, 0.0 }
 0x145   : > { %v1260_v36 = vmul.f32 1.442695, %v1179_v32  ;;  %v3052_v11 = vadd.f32 %v2687_v38, %v792_v43  ;;  %v3055_v7 = vadd.f32 %v2689_v41, %v714_v23  ;;  %vm1559_vm10 = vcmp.ge.f32.partialorder %v2921_v2, 0.0 }
 0x146   : > { %2401 = vrcp.f32 %v1368_v16  ;;  %v1324_v24 = vmul.f32 1.442695, %v1211_v8  ;;  %v1652_v37 = vsel %vm1588_vm5, 1.0, %v2953_v49  ;;  %v1180_v35 = vsub.f32 0.0, %v1116_v19 }
 0x147   : > { %v2380_v26 = vpop.eup %2379  ;;  %2403 = vpow2.f32 %v1260_v36  ;;  %v1148_v45 = vand.u32 2147483647, %v3052_v11  ;;  %v1117_v58 = vand.u32 2147483647, %v3055_v7  ;;  %v1653_v29 = vsel %vm1589_vm7, 1.0, %v2992_v4 }
 0x148   : > { %v1493_v17 = vmul.f32 %v2380_v26, %v2885_v25  ;;  %v3047_v30 = vpop.eup %2381  ;;  %v1262_v59 = vmul.f32 1.442695, %v1180_v35  ;;  %v1716_v0 = vmul.f32 %v1652_v37, %v1524_v22  ;;  %vm1591_vm11 = vcmp.ge.f32.partialorder %v2936_v18, 0.0  ;;  %v718_v26 = vpop.f32.mrf.mxu0 }
 0x149   : > { %v1400_v25 = vadd.f32 1.0, %v3047_v30  ;;  %v2384_v39 = vpop.eup %2383  ;;  %v1212_v10 = vsub.f32 0.0, %v1148_v45  ;;  %vm1560_vm12 = vcmp.ge.f32.partialorder %v2945_v57, 0.0  ;;  %v3079_v48 = vadd.f32 %v2689_v41, %v794_v53 }
 0x14a   : > { %v1685_v34 = vmul.f32 %v1621_v27, %v1493_v17  ;;  %v3063_v63 = vpop.eup %2385  ;;  %v1525_v50 = vmul.f32 %v2384_v39, %v2906_v51  ;;  %v1181_v51 = vsub.f32 0.0, %v1117_v58  ;;  %v1622_v31 = vsel %vm1558_vm8, 1.0, %v3004_v54  ;;  %v798_v17 = vpop.f32.mrf.mxu1 }
 0x14b   : > { %2405 = vrcp.f32 %v1400_v25  ;;  %v3067_v47 = vpop.eup %2387  ;;  %v1369_v49 = vadd.f32 1.0, %v3063_v63  ;;  %v1326_v20 = vmul.f32 1.442695, %v1212_v10  ;;  %v1654_v16 = vsel %vm1590_vm9, 1.0, %v3010_v28 }
 0x14c   : > { %v2169_v44 = vpack.c.bf16 %v1685_v34, %v1684_v33  ;;  %2407 = vpow2.f32 %v1324_v24  ;;  %v2390_v62 = vpop.eup %2389  ;;  %v1717_v9 = vmul.f32 %v1653_v29, %v1525_v50  ;;  %v1401_v21 = vadd.f32 1.0, %v3067_v47  ;;  %v800_v50 = vpop.f32.mrf.mxu1 }
 0x14d   : > { %v1494_v1 = vmul.f32 %v2390_v62, %v2915_v55  ;;  %2409 = vrcp.f32 %v1369_v49  ;;  %v2392_v4 = vpop.eup %2391  ;;  %v1264_v23 = vmul.f32 1.442695, %v1181_v51  ;;  %v1149_v33 = vand.u32 2147483647, %v3079_v48 }
 0x14e   : > { %1935 = vst [vmem:[%s2851_s7 + $0x28] sm:$0xff] %v2169_v44  ;;  %v2185_v12 = vpack.c.bf16 %v1717_v9, %v1716_v0  ;;  %2411 = vrcp.f32 %v1401_v21  ;;  %v3081_v15 = vpop.eup %2393  ;;  %v1526_v43 = vmul.f32 %v2392_v4, %v2918_v56  ;;  %v1623_v54 = vsel %vm1559_vm10, 1.0, %v3015_v42  ;;  %v720_v44 = vpop.f32.mrf.mxu0 }
 0x14f   : > { %2413 = vpow2.f32 %v1262_v59  ;;  %v2396_v27 = vpop.eup %2395  ;;  %v1370_v32 = vadd.f32 1.0, %v3081_v15  ;;  %v1655_v19 = vsel %vm1591_vm11, 1.0, %v3021_v60  ;;  %v1686_v28 = vmul.f32 %v1622_v31, %v1494_v1 }
 0x150   : > { %1951 = vst [vmem:[%s2851_s7 + $0xa8] sm:$0xff] %v2185_v12  ;;  %2415 = vpow2.f32 %v1326_v20  ;;  %v2398_v8 = vpop.eup %2397  ;;  %v1495_v55 = vmul.f32 %v2396_v27, %v2921_v2  ;;  %v1213_v36 = vsub.f32 0.0, %v1149_v33  ;;  %v3104_v34 = vadd.f32 %v2687_v38, %v718_v26 }
 0x151   : > { %2417 = vpow2.f32 %v1264_v23  ;;  %v3100_v56 = vpop.eup %2399  ;;  %v1527_v22 = vmul.f32 %v2398_v8, %v2936_v18  ;;  %v1718_v25 = vmul.f32 %v1654_v16, %v1526_v43  ;;  %v3108_v2 = vadd.f32 %v2687_v38, %v798_v17  ;;  %v722_v23 = vpop.f32.mrf.mxu0 }
 0x152   : > { %v1687_v24 = vmul.f32 %v1623_v54, %v1495_v55  ;;  %v1402_v39 = vadd.f32 1.0, %v3100_v56  ;;  %2419 = vrcp.f32 %v1370_v32  ;;  %v1328_v60 = vmul.f32 1.442695, %v1213_v36  ;;  %v802_v32 = vpop.f32.mrf.mxu1 }
 0x153   : > { %v1719_v42 = vmul.f32 %v1655_v19, %v1527_v22  ;;  %v1118_v37 = vand.u32 2147483647, %v3104_v34  ;;  %v2402_v35 = vpop.eup %2401  ;;  %vm1592_vm13 = vcmp.ge.f32.partialorder %v2965_v61, 0.0  ;;  %v1150_v18 = vand.u32 2147483647, %v3108_v2 }
 0x154   : > { %v2170_v45 = vpack.c.bf16 %v1687_v24, %v1686_v28  ;;  %2421 = vrcp.f32 %v1402_v39  ;;  %v3113_v58 = vpop.eup %2403  ;;  %vm1561_vm14 = vcmp.ge.f32.partialorder %v2980_v13, 0.0  ;;  %v1624_v53 = vsel %vm1560_vm12, 1.0, %v3033_v14  ;;  %v724_v39 = vpop.f32.mrf.mxu0 }
 0x155   : > { %v2186_v29 = vpack.c.bf16 %v1719_v42, %v1718_v25  ;;  %2423 = vpow2.f32 %v1328_v60  ;;  %v1182_v49 = vsub.f32 0.0, %v1118_v37  ;;  %vm1593_vm15 = vcmp.ge.f32.partialorder %v2985_v46, 0.0  ;;  %v804_v42 = vpop.f32.mrf.mxu1 }
 0x156   : > { %1936 = vst [vmem:[%s2851_s7 + $0x30] sm:$0xff] %v2170_v45  ;;  %v1371_v62 = vadd.f32 1.0, %v3113_v58  ;;  %v1214_v0 = vsub.f32 0.0, %v1150_v18  ;;  %v1496_v21 = vmul.f32 %v2402_v35, %v2945_v57  ;;  %v3127_v1 = vadd.f32 %v2689_v41, %v720_v44 }
 0x157   : > { %1952 = vst [vmem:[%s2851_s7 + $0xb0] sm:$0xff] %v2186_v29  ;;  %v1266_v10 = vmul.f32 1.442695, %v1182_v49  ;;  %v3130_v51 = vadd.f32 %v2689_v41, %v800_v50  ;;  %v1656_v14 = vsel %vm1592_vm13, 1.0, %v3047_v30  ;;  %v1625_v57 = vsel %vm1561_vm14, 1.0, %v3063_v63 }
 0x158   : > { %v2406_v59 = vpop.eup %2405  ;;  %2425 = vrcp.f32 %v1371_v62  ;;  %v1330_v12 = vmul.f32 1.442695, %v1214_v0  ;;  %v1119_v43 = vand.u32 2147483647, %v3127_v1  ;;  %v1657_v30 = vsel %vm1593_vm15, 1.0, %v3067_v47 }
 0x159   : > { %v3122_v9 = vpop.eup %2407  ;;  %v1528_v31 = vmul.f32 %v2406_v59, %v2965_v61  ;;  %2427 = vpow2.f32 %v1266_v10  ;;  %v1151_v16 = vand.u32 2147483647, %v3130_v51  ;;  %v1688_v33 = vmul.f32 %v1624_v53, %v1496_v21 }
 0x15a   : > { %v1403_v4 = vadd.f32 1.0, %v3122_v9  ;;  %v2410_v20 = vpop.eup %2409  ;;  %v1183_v17 = vsub.f32 0.0, %v1119_v43  ;;  %v3153_v19 = vadd.f32 %v2687_v38, %v722_v23  ;;  %vm1562_vm0 = vcmp.ge.f32.partialorder %v2996_v52, 0.0 }
 0x15b   : > { %v2412_v26 = vpop.eup %2411  ;;  %v1497_v27 = vmul.f32 %v2410_v20, %v2980_v13  ;;  %v1215_v54 = vsub.f32 0.0, %v1151_v16  ;;  %v1720_v28 = vmul.f32 %v1656_v14, %v1528_v31  ;;  %vm1594_vm1 = vcmp.ge.f32.partialorder %v3007_v40, 0.0 }
 0x15c   : > { %2429 = vrcp.f32 %v1403_v4  ;;  %v3146_v61 = vpop.eup %2413  ;;  %v1529_v63 = vmul.f32 %v2412_v26, %v2985_v46  ;;  %v1268_v25 = vmul.f32 1.442695, %v1183_v17  ;;  %vm1563_vm2 = vcmp.ge.f32.partialorder %v3019_v3, 0.0  ;;  %v728_v4 = vpop.f32.mrf.mxu0 }
 0x15d   : > { %2431 = vpow2.f32 %v1330_v12  ;;  %v3149_v8 = vpop.eup %2415  ;;  %v1689_v55 = vmul.f32 %v1625_v57, %v1497_v27  ;;  %v1372_v13 = vadd.f32 1.0, %v3146_v61  ;;  %v1332_v37 = vmul.f32 1.442695, %v1215_v54 }
 0x15e   : > { %v3155_v47 = vpop.eup %2417  ;;  %v1721_v22 = vmul.f32 %v1657_v30, %v1529_v63  ;;  %v1404_v36 = vadd.f32 1.0, %v3149_v8  ;;  %v1120_v45 = vand.u32 2147483647, %v3153_v19  ;;  %v3165_v18 = vadd.f32 %v2687_v38, %v802_v32 }
 0x15f   : > { %v2171_v46 = vpack.c.bf16 %v1689_v55, %v1688_v33  ;;  %2433 = vrcp.f32 %v1372_v13  ;;  %v1373_v24 = vadd.f32 1.0, %v3155_v47  ;;  %v2420_v35 = vpop.eup %2419  ;;  %vm1595_vm3 = vcmp.ge.f32.partialorder %v3026_v6, 0.0  ;;  %v730_v13 = vpop.f32.mrf.mxu0 }
 0x160   : > { %v2187_v60 = vpack.c.bf16 %v1721_v22, %v1720_v28  ;;  %2435 = vrcp.f32 %v1404_v36  ;;  %v3170_v50 = vadd.f32 %v2689_v41, %v724_v39  ;;  %v3173_v29 = vadd.f32 %v2689_v41, %v804_v42 }
 0x161   : > { %1937 = vst [vmem:[%s2851_s7 + $0x38] sm:$0xff] %v2171_v46  ;;  %2437 = vrcp.f32 %v1373_v24  ;;  %v2422_v44 = vpop.eup %2421  ;;  %v1626_v59 = vsel %vm1562_vm0, 1.0, %v3081_v15  ;;  %v1184_v53 = vsub.f32 0.0, %v1120_v45  ;;  %v1152_v62 = vand.u32 2147483647, %v3165_v18 }
 0x162   : > { %1953 = vst [vmem:[%s2851_s7 + $0xb8] sm:$0xff] %v2187_v60  ;;  %2439 = vpow2.f32 %v1268_v25  ;;  %v3175_v49 = vpop.eup %2423  ;;  %v1498_v0 = vmul.f32 %v2420_v35, %v2996_v52  ;;  %v1658_v21 = vsel %vm1594_vm1, 1.0, %v3100_v56  ;;  %v1121_v14 = vand.u32 2147483647, %v3170_v50 }
 0x163   : > { %2441 = vpow2.f32 %v1332_v37  ;;  %v1405_v10 = vadd.f32 1.0, %v3175_v49  ;;  %v1627_v12 = vsel %vm1563_vm2, 1.0, %v3113_v58  ;;  %v1659_v15 = vsel %vm1595_vm3, 1.0, %v3122_v9 }
 0x164   : > { %v1270_v20 = vmul.f32 1.442695, %v1184_v53  ;;  %v1216_v31 = vsub.f32 0.0, %v1152_v62  ;;  %v1530_v52 = vmul.f32 %v2422_v44, %v3007_v40  ;;  %v1185_v43 = vsub.f32 0.0, %v1121_v14  ;;  %v808_v40 = vpop.f32.mrf.mxu1 }
 0x165   : > { %v2426_v57 = vpop.eup %2425  ;;  %2443 = vrcp.f32 %v1405_v10  ;;  %v1153_v56 = vand.u32 2147483647, %v3173_v29  ;;  %v3197_v30 = vadd.f32 %v2687_v38, %v728_v4  ;;  %v1690_v9 = vmul.f32 %v1626_v59, %v1498_v0  ;;  %v732_v10 = vpop.f32.mrf.mxu0 }
 0x166   : > { %v3193_v23 = vpop.eup %2427  ;;  %v1499_v26 = vmul.f32 %v2426_v57, %v3019_v3  ;;  %2445 = vpow2.f32 %v1270_v20  ;;  %v1334_v27 = vmul.f32 1.442695, %v1216_v31  ;;  %v1272_v32 = vmul.f32 1.442695, %v1185_v43  ;;  %v810_v42 = vpop.f32.mrf.mxu1 }
 0x167   : > { %v1374_v16 = vadd.f32 1.0, %v3193_v23  ;;  %v1217_v33 = vsub.f32 0.0, %v1153_v56  ;;  %v1122_v3 = vand.u32 2147483647, %v3197_v30  ;;  %v1722_v54 = vmul.f32 %v1658_v21, %v1530_v52 }
 0x168   : > { %v1691_v17 = vmul.f32 %v1627_v12, %v1499_v26  ;;  %2447 = vpow2.f32 %v1334_v27  ;;  %vm1564_vm4 = vcmp.ge.f32.partialorder %v3040_v5, 0.0  ;;  %v3210_v39 = vadd.f32 %v2689_v41, %v730_v13  ;;  %v812_v31 = vpop.f32.mrf.mxu1 }
 0x169   : > { %v2430_v58 = vpop.eup %2429  ;;  %2449 = vrcp.f32 %v1374_v16  ;;  %v1336_v22 = vmul.f32 1.442695, %v1217_v33  ;;  %v1186_v46 = vsub.f32 0.0, %v1122_v3  ;;  %vm1596_vm5 = vcmp.ge.f32.partialorder %v3052_v11, 0.0 }
 0x16a   : > { %v3200_v63 = vpop.eup %2431  ;;  %v1531_v55 = vmul.f32 %v2430_v58, %v3026_v6  ;;  %v2172_v36 = vpack.c.bf16 %v1691_v17, %v1690_v9  ;;  %2451 = vpow2.f32 %v1272_v32  ;;  %v3207_v6 = vadd.f32 %v2687_v38, %v808_v40 }
 0x16b   : > { %v1406_v28 = vadd.f32 1.0, %v3200_v63  ;;  %v1274_v45 = vmul.f32 1.442695, %v1186_v46  ;;  %vm1565_vm6 = vcmp.ge.f32.partialorder %v3055_v7, 0.0  ;;  %v1123_v53 = vand.u32 2147483647, %v3210_v39 }
 0x16c   : > { %v1723_v25 = vmul.f32 %v1659_v15, %v1531_v55  ;;  %v2434_v24 = vpop.eup %2433  ;;  %1938 = vst [vmem:[%s2851_s7 + $0x40] sm:$0xff] %v2172_v36  ;;  %v1154_v59 = vand.u32 2147483647, %v3207_v6  ;;  %v1628_v0 = vsel %vm1564_vm4, 1.0, %v3146_v61  ;;  %vm1597_vm7 = vcmp.ge.f32.partialorder %v3079_v48, 0.0 }
 0x16d   : > { %2453 = vrcp.f32 %v1406_v28  ;;  %v2436_v60 = vpop.eup %2435  ;;  %v1500_v35 = vmul.f32 %v2434_v24, %v3040_v5  ;;  %v1629_v12 = vsel %vm1565_vm6, 1.0, %v3155_v47  ;;  %v3233_v43 = vadd.f32 %v2689_v41, %v810_v42  ;;  %v734_v28 = vpop.f32.mrf.mxu0 }
 0x16e   : > { %v2188_v37 = vpack.c.bf16 %v1723_v25, %v1722_v54  ;;  %2455 = vpow2.f32 %v1336_v22  ;;  %v2438_v44 = vpop.eup %2437  ;;  %v1532_v4 = vmul.f32 %v2436_v60, %v3052_v11  ;;  %v1218_v20 = vsub.f32 0.0, %v1154_v59  ;;  %v814_v42 = vpop.f32.mrf.mxu1 }
 0x16f   : > { %v3218_v62 = vpop.eup %2439  ;;  %v1501_v21 = vmul.f32 %v2438_v44, %v3055_v7  ;;  %2457 = vpow2.f32 %v1274_v45  ;;  %v1692_v57 = vmul.f32 %v1628_v0, %v1500_v35  ;;  %v1187_v7 = vsub.f32 0.0, %v1123_v53  ;;  %v738_v59 = vpop.f32.mrf.mxu0 }
 0x170   : > { %1954 = vst [vmem:[%s2851_s7 + $0xc0] sm:$0xff] %v2188_v37  ;;  %v3226_v14 = vpop.eup %2441  ;;  %v1375_v15 = vadd.f32 1.0, %v3218_v62  ;;  %v1338_v61 = vmul.f32 1.442695, %v1218_v20  ;;  %v3236_v56 = vadd.f32 %v2687_v38, %v732_v10  ;;  %v3239_v58 = vadd.f32 %v2687_v38, %v812_v31 }
 0x171   : > { %v1693_v52 = vmul.f32 %v1629_v12, %v1501_v21  ;;  %v1407_v5 = vadd.f32 1.0, %v3226_v14  ;;  %v1276_v27 = vmul.f32 1.442695, %v1187_v7  ;;  %v1660_v16 = vsel %vm1596_vm5, 1.0, %v3149_v8 }
 0x172   : > { %2459 = vrcp.f32 %v1375_v15  ;;  %v2444_v26 = vpop.eup %2443  ;;  %v1155_v33 = vand.u32 2147483647, %v3233_v43  ;;  %v1661_v40 = vsel %vm1597_vm7, 1.0, %v3175_v49  ;;  %v1124_v55 = vand.u32 2147483647, %v3236_v56  ;;  %v818_v15 = vpop.f32.mrf.mxu1 }
 0x173   : > { %v2173_v47 = vpack.c.bf16 %v1693_v52, %v1692_v57  ;;  %2461 = vrcp.f32 %v1407_v5  ;;  %v3241_v9 = vpop.eup %2445  ;;  %v1533_v32 = vmul.f32 %v2444_v26, %v3079_v48  ;;  %v1724_v13 = vmul.f32 %v1660_v16, %v1532_v4 }
 0x174   : > { %2463 = vpow2.f32 %v1338_v61  ;;  %v1376_v17 = vadd.f32 1.0, %v3241_v9  ;;  %v1219_v8 = vsub.f32 0.0, %v1155_v33  ;;  %v1156_v54 = vand.u32 2147483647, %v3239_v58  ;;  %v820_v33 = vpop.f32.mrf.mxu1 }
 0x175   : > { %1939 = vst [vmem:[%s2851_s7 + $0x48] sm:$0xff] %v2173_v47  ;;  %2465 = vpow2.f32 %v1276_v27  ;;  %v3254_v3 = vpop.eup %2447  ;;  %v1725_v11 = vmul.f32 %v1661_v40, %v1533_v32  ;;  %v1188_v48 = vsub.f32 0.0, %v1124_v55  ;;  %vm1566_vm8 = vcmp.ge.f32.partialorder %v3104_v34, 0.0  ;;  %v740_v47 = vpop.f32.mrf.mxu0 }
 0x176   : > { %v2450_v22 = vpop.eup %2449  ;;  %2467 = vrcp.f32 %v1376_v17  ;;  %v1408_v36 = vadd.f32 1.0, %v3254_v3  ;;  %v1340_v46 = vmul.f32 1.442695, %v1219_v8  ;;  %v1220_v24 = vsub.f32 0.0, %v1156_v54 }
 0x177   : > { %v3258_v49 = vpop.eup %2451  ;;  %v2189_v25 = vpack.c.bf16 %v1725_v11, %v1724_v13  ;;  %v1278_v35 = vmul.f32 1.442695, %v1188_v48  ;;  %vm1598_vm9 = vcmp.ge.f32.partialorder %v3108_v2, 0.0  ;;  %vm1567_vm10 = vcmp.ge.f32.partialorder %v3127_v1, 0.0 }
 0x178   : > { %2469 = vrcp.f32 %v1408_v36  ;;  %v1377_v37 = vadd.f32 1.0, %v3258_v49  ;;  %v1342_v44 = vmul.f32 1.442695, %v1220_v24  ;;  %v1630_v53 = vsel %vm1566_vm8, 1.0, %v3193_v23 }
 0x179   : > { %1955 = vst [vmem:[%s2851_s7 + $0xc8] sm:$0xff] %v2189_v25  ;;  %2471 = vpow2.f32 %v1340_v46  ;;  %vm1599_vm11 = vcmp.ge.f32.partialorder %v3130_v51, 0.0  ;;  %v1502_v10 = vmul.f32 %v2450_v22, %v3104_v34  ;;  %v3274_v4 = vadd.f32 %v2689_v41, %v734_v28 }
 0x17a   : > { %v2454_v60 = vpop.eup %2453  ;;  %2473 = vrcp.f32 %v1377_v37  ;;  %v3277_v12 = vadd.f32 %v2689_v41, %v814_v42  ;;  %v3282_v31 = vadd.f32 %v2687_v38, %v738_v59  ;;  %v1662_v34 = vsel %vm1598_vm9, 1.0, %v3200_v63 }
 0x17b   : > { %v3262_v45 = vpop.eup %2455  ;;  %2475 = vpow2.f32 %v1278_v35  ;;  %v1534_v20 = vmul.f32 %v2454_v60, %v3108_v2  ;;  %v1125_v57 = vand.u32 2147483647, %v3274_v4  ;;  %v1631_v7 = vsel %vm1567_vm10, 1.0, %v3218_v62 }
 0x17c   : > { %v1409_v0 = vadd.f32 1.0, %v3262_v45  ;;  %v3270_v21 = vpop.eup %2457  ;;  %v1157_v52 = vand.u32 2147483647, %v3277_v12  ;;  %v1663_v61 = vsel %vm1599_vm11, 1.0, %v3226_v14  ;;  %v1126_v26 = vand.u32 2147483647, %v3282_v31 }
 0x17d   : > { %v1378_v23 = vadd.f32 1.0, %v3270_v21  ;;  %v1189_v27 = vsub.f32 0.0, %v1125_v57  ;;  %v3298_v32 = vadd.f32 %v2687_v38, %v818_v15  ;;  %v1694_v62 = vmul.f32 %v1630_v53, %v1502_v10 }
 0x17e   : > { %2477 = vrcp.f32 %v1409_v0  ;;  %v1221_v16 = vsub.f32 0.0, %v1157_v52  ;;  %v1726_v17 = vmul.f32 %v1662_v34, %v1534_v20  ;;  %v1190_v14 = vsub.f32 0.0, %v1126_v26  ;;  %v742_v0 = vpop.f32.mrf.mxu0  ;;  %v822_v34 = vpop.f32.mrf.mxu1 }
 0x17f   : > { %2479 = vpow2.f32 %v1342_v44  ;;  %v2460_v5 = vpop.eup %2459  ;;  %v3307_v54 = vadd.f32 %v2689_v41, %v740_v47  ;;  %v3311_v48 = vadd.f32 %v2689_v41, %v820_v33  ;;  %v1158_v24 = vand.u32 2147483647, %v3298_v32 }
 0x180   : > { %2481 = vrcp.f32 %v1378_v23  ;;  %v2462_v2 = vpop.eup %2461  ;;  %v1503_v63 = vmul.f32 %v2460_v5, %v3127_v1  ;;  %v1280_v1 = vmul.f32 1.442695, %v1189_v27  ;;  %v1344_v36 = vmul.f32 1.442695, %v1221_v16  ;;  %v744_v16 = vpop.f32.mrf.mxu0 }
 0x181   : > { %v3300_v40 = vpop.eup %2463  ;;  %v1535_v55 = vmul.f32 %v2462_v2, %v3130_v51  ;;  %v1282_v46 = vmul.f32 1.442695, %v1190_v14  ;;  %vm1568_vm12 = vcmp.ge.f32.partialorder %v3153_v19, 0.0  ;;  %v1222_v35 = vsub.f32 0.0, %v1158_v24 }
 0x182   : > { %v3303_v13 = vpop.eup %2465  ;;  %v1695_v11 = vmul.f32 %v1631_v7, %v1503_v63  ;;  %v1410_v8 = vadd.f32 1.0, %v3300_v40  ;;  %v1127_v44 = vand.u32 2147483647, %v3307_v54  ;;  %vm1600_vm13 = vcmp.ge.f32.partialorder %v3165_v18, 0.0 }
 0x183   : > { %v1727_v28 = vmul.f32 %v1663_v61, %v1535_v55  ;;  %v1379_v22 = vadd.f32 1.0, %v3303_v13  ;;  %v2468_v51 = vpop.eup %2467  ;;  %vm1569_vm14 = vcmp.ge.f32.partialorder %v3170_v50, 0.0  ;;  %v1159_v53 = vand.u32 2147483647, %v3311_v48 }
 0x184   : > { %v2174_v25 = vpack.c.bf16 %v1695_v11, %v1694_v62  ;;  %2483 = vrcp.f32 %v1410_v8  ;;  %v1504_v37 = vmul.f32 %v2468_v51, %v3153_v19  ;;  %v1632_v15 = vsel %vm1568_vm12, 1.0, %v3241_v9 }
 0x185   : > { %v2190_v42 = vpack.c.bf16 %v1727_v28, %v1726_v17  ;;  %2485 = vrcp.f32 %v1379_v22  ;;  %v2470_v60 = vpop.eup %2469  ;;  %v1346_v23 = vmul.f32 1.442695, %v1222_v35  ;;  %v1191_v7 = vsub.f32 0.0, %v1127_v44  ;;  %v824_v17 = vpop.f32.mrf.mxu1 }
 0x186   : > { %1940 = vst [vmem:[%s2851_s7 + $0x50] sm:$0xff] %v2174_v25  ;;  %2487 = vpow2.f32 %v1280_v1  ;;  %v3318_v59 = vpop.eup %2471  ;;  %v1536_v52 = vmul.f32 %v2470_v60, %v3165_v18  ;;  %v1223_v61 = vsub.f32 0.0, %v1159_v53  ;;  %v1696_v47 = vmul.f32 %v1632_v15, %v1504_v37 }
 0x187   : > { %1956 = vst [vmem:[%s2851_s7 + $0xd0] sm:$0xff] %v2190_v42  ;;  %2489 = vpow2.f32 %v1344_v36  ;;  %v2474_v10 = vpop.eup %2473  ;;  %v1411_v20 = vadd.f32 1.0, %v3318_v59  ;;  %v1633_v19 = vsel %vm1569_vm14, 1.0, %v3258_v49  ;;  %vm1601_vm15 = vcmp.ge.f32.partialorder %v3173_v29, 0.0 }
 0x188   : > { %2491 = vpow2.f32 %v1282_v46  ;;  %v3328_v57 = vpop.eup %2475  ;;  %v1505_v5 = vmul.f32 %v2474_v10, %v3170_v50  ;;  %v1284_v27 = vmul.f32 1.442695, %v1191_v7  ;;  %v1664_v62 = vsel %vm1600_vm13, 1.0, %v3254_v3 }
 0x189   : > { %2493 = vrcp.f32 %v1411_v20  ;;  %v1665_v50 = vsel %vm1601_vm15, 1.0, %v3262_v45  ;;  %v1348_v49 = vmul.f32 1.442695, %v1223_v61  ;;  %v1728_v55 = vmul.f32 %v1664_v62, %v1536_v52 }
 0x18a   : > { %v1697_v2 = vmul.f32 %v1633_v19, %v1505_v5  ;;  %2495 = vpow2.f32 %v1346_v23  ;;  %v3345_v8 = vadd.f32 %v2687_v38, %v742_v0  ;;  %v3348_v1 = vadd.f32 %v2687_v38, %v822_v34 }
 0x18b   : > { %v2478_v26 = vpop.eup %2477  ;;  %2497 = vpow2.f32 %v1284_v27  ;;  %v3351_v18 = vadd.f32 %v2689_v41, %v744_v16  ;;  %v3356_v28 = vadd.f32 %v2689_v41, %v824_v17  ;;  %vm1570_vm0 = vcmp.ge.f32.partialorder %v3197_v30, 0.0 }
 0x18c   : > { %v3336_v9 = vpop.eup %2479  ;;  %v1537_v63 = vmul.f32 %v2478_v26, %v3173_v29  ;;  %v2175_v14 = vpack.c.bf16 %v1697_v2, %v1696_v47  ;;  %v1380_v29 = vadd.f32 1.0, %v3328_v57  ;;  %2499 = vpow2.f32 %v1348_v49 }
 0x18d   : > { %v2482_v33 = vpop.eup %2481  ;;  %v1412_v45 = vadd.f32 1.0, %v3336_v9  ;;  %v1128_v36 = vand.u32 2147483647, %v3345_v8  ;;  %v1160_v51 = vand.u32 2147483647, %v3348_v1  ;;  %v1634_v37 = vsel %vm1570_vm0, 1.0, %v3270_v21 }
 0x18e   : > { %v1729_v11 = vmul.f32 %v1665_v50, %v1537_v63  ;;  %1941 = vst [vmem:[%s2851_s7 + $0x58] sm:$0xff] %v2175_v14  ;;  %v1506_v22 = vmul.f32 %v2482_v33, %v3197_v30  ;;  %v1129_v38 = vand.u32 2147483647, %v3351_v18  ;;  %2501 = vrcp.f32 %v1380_v29 }
 0x18f   : > { %v1192_v24 = vsub.f32 0.0, %v1128_v36  ;;  %v1224_v42 = vsub.f32 0.0, %v1160_v51  ;;  %v1161_v60 = vand.u32 2147483647, %v3356_v28  ;;  %vm1571_vm1 = vcmp.ge.f32.partialorder %v3210_v39, 0.0 }
 0x190   : > { %v2191_v3 = vpack.c.bf16 %v1729_v11, %v1728_v55  ;;  %2503 = vrcp.f32 %v1412_v45  ;;  %v1698_v53 = vmul.f32 %v1634_v37, %v1506_v22  ;;  %v1635_v30 = vsel %vm1571_vm1, 1.0, %v3303_v13 }
 0x191   : > { %v2484_v25 = vpop.eup %2483  ;;  %v1193_v10 = vsub.f32 0.0, %v1129_v38  ;;  %v1286_v52 = vmul.f32 1.442695, %v1192_v24  ;;  %v1350_v5 = vmul.f32 1.442695, %v1224_v42  ;;  %vm1602_vm2 = vcmp.ge.f32.partialorder %v3207_v6, 0.0 }
 0x192   : > { %1957 = vst [vmem:[%s2851_s7 + $0xd8] sm:$0xff] %v2191_v3  ;;  %v2486_v46 = vpop.eup %2485  ;;  %v1538_v20 = vmul.f32 %v2484_v25, %v3207_v6  ;;  %vm1603_vm3 = vcmp.ge.f32.partialorder %v3233_v43, 0.0  ;;  %v1666_v19 = vsel %vm1602_vm2, 1.0, %v3300_v40  ;;  %vm1572_vm4 = vcmp.ge.f32.partialorder %v3236_v56, 0.0 }
 0x193   : > { %v2488_v41 = vpop.eup %2487  ;;  %v1507_v35 = vmul.f32 %v2486_v46, %v3210_v39  ;;  %v1225_v39 = vsub.f32 0.0, %v1161_v60  ;;  %v1288_v47 = vmul.f32 1.442695, %v1193_v10  ;;  %v1667_v2 = vsel %vm1603_vm3, 1.0, %v3318_v59 }
 0x194   : > { %v2490_v44 = vpop.eup %2489  ;;  %v1381_v0 = vadd.f32 1.0, %v2488_v41  ;;  %v1730_v27 = vmul.f32 %v1666_v19, %v1538_v20  ;;  %vm1604_vm5 = vcmp.ge.f32.partialorder %v3239_v58, 0.0  ;;  %vm1573_vm6 = vcmp.ge.f32.partialorder %v3274_v4, 0.0 }
 0x195   : > { %v3369_v15 = vpop.eup %2491  ;;  %v1699_v23 = vmul.f32 %v1635_v30, %v1507_v35  ;;  %v1413_v34 = vadd.f32 1.0, %v2490_v44  ;;  %v1352_v33 = vmul.f32 1.442695, %v1225_v39  ;;  %v1636_v45 = vsel %vm1572_vm4, 1.0, %v3328_v57 }
 0x196   : > { %2505 = vrcp.f32 %v1381_v0  ;;  %v1382_v21 = vadd.f32 1.0, %v3369_v15  ;;  %v2494_v7 = vpop.eup %2493  ;;  %v1637_v22 = vsel %vm1573_vm6, 1.0, %v2488_v41  ;;  %vm1605_vm7 = vcmp.ge.f32.partialorder %v3277_v12, 0.0 }
 0x197   : > { %v2176_v61 = vpack.c.bf16 %v1699_v23, %v1698_v53  ;;  %2507 = vrcp.f32 %v1413_v34  ;;  %v3374_v13 = vpop.eup %2495  ;;  %v1539_v26 = vmul.f32 %v2494_v7, %v3233_v43  ;;  %v1668_v38 = vsel %vm1604_vm5, 1.0, %v3336_v9 }
 0x198   : > { %2509 = vrcp.f32 %v1382_v21  ;;  %v1414_v63 = vadd.f32 1.0, %v3374_v13  ;;  %v2498_v6 = vpop.eup %2497  ;;  %v1669_v46 = vsel %vm1605_vm7, 1.0, %v2490_v44  ;;  %vm1574_vm8 = vcmp.ge.f32.partialorder %v3282_v31, 0.0 }
 0x199   : > { %1942 = vst [vmem:[%s2851_s7 + $0x60] sm:$0xff] %v2176_v61  ;;  %2511 = vpow2.f32 %v1286_v52  ;;  %v1731_v16 = vmul.f32 %v1667_v2, %v1539_v26  ;;  %v1383_v62 = vadd.f32 1.0, %v2498_v6  ;;  %v2500_v50 = vpop.eup %2499  ;;  %vm1606_vm9 = vcmp.ge.f32.partialorder %v3298_v32, 0.0 }
 0x19a   : > { %2513 = vpow2.f32 %v1350_v5  ;;  %v1415_v49 = vadd.f32 1.0, %v2500_v50  ;;  %vm1575_vm10 = vcmp.ge.f32.partialorder %v3307_v54, 0.0  ;;  %v1638_v20 = vsel %vm1574_vm8, 1.0, %v3369_v15 }
 0x19b   : > { %2515 = vrcp.f32 %v1414_v63  ;;  %v2192_v43 = vpack.c.bf16 %v1731_v16, %v1730_v27  ;;  %v2502_v40 = vpop.eup %2501  ;;  %v1639_v23 = vsel %vm1575_vm10, 1.0, %v2498_v6  ;;  %vm1607_vm11 = vcmp.ge.f32.partialorder %v3311_v48, 0.0 }
 0x19c   : > { %2517 = vpow2.f32 %v1288_v47  ;;  %v1508_v17 = vmul.f32 %v2502_v40, %v3236_v56  ;;  %v1671_v5 = vsel %vm1607_vm11, 1.0, %v2500_v50  ;;  %vm1576_vm12 = vcmp.ge.f32.partialorder %v3345_v8, 0.0 }
 0x19d   : > { %2519 = vrcp.f32 %v1383_v62  ;;  %1958 = vst [vmem:[%s2851_s7 + $0xe0] sm:$0xff] %v2192_v43  ;;  %v2504_v59 = vpop.eup %2503  ;;  %vm1577_vm13 = vcmp.ge.f32.partialorder %v3351_v18, 0.0  ;;  %vm1608_vm14 = vcmp.ge.f32.partialorder %v3348_v1, 0.0  ;;  %vm1609_vm15 = vcmp.ge.f32.partialorder %v3356_v28, 0.0 }
 0x19e   : > { %2521 = vpow2.f32 %v1352_v33  ;;  %v1540_v14 = vmul.f32 %v2504_v59, %v3239_v58  ;;  %v1700_v25 = vmul.f32 %v1636_v45, %v1508_v17 }
 0x19f   : > { %2523 = vrcp.f32 %v1415_v49 }
 0x1a0   : > { %v1732_v24 = vmul.f32 %v1668_v38, %v1540_v14 }
 0x1a3   : > { %v2506_v55 = vpop.eup %2505 }
 0x1a4   : > { %v2508_v11 = vpop.eup %2507  ;;  %v1509_v29 = vmul.f32 %v2506_v55, %v3274_v4 }
 0x1a5   : > { %v2510_v3 = vpop.eup %2509  ;;  %v1541_v36 = vmul.f32 %v2508_v11, %v3277_v12 }
 0x1a6   : > { %v2512_v51 = vpop.eup %2511  ;;  %v1701_v56 = vmul.f32 %v1637_v22, %v1509_v29  ;;  %v1510_v53 = vmul.f32 %v2510_v3, %v3282_v31 }
 0x1a7   : > { %v2514_v58 = vpop.eup %2513  ;;  %v1733_v42 = vmul.f32 %v1669_v46, %v1541_v36  ;;  %v1384_v4 = vadd.f32 1.0, %v2512_v51  ;;  %v1640_v63 = vsel %vm1576_vm12, 1.0, %v2512_v51 }
 0x1a8   : > { %v2516_v60 = vpop.eup %2515  ;;  %v2177_v37 = vpack.c.bf16 %v1701_v56, %v1700_v25  ;;  %v1416_v57 = vadd.f32 1.0, %v2514_v58  ;;  %v1702_v34 = vmul.f32 %v1638_v20, %v1510_v53 }
 0x1a9   : > { %v2518_v41 = vpop.eup %2517  ;;  %v2193_v35 = vpack.c.bf16 %v1733_v42, %v1732_v24  ;;  %2525 = vrcp.f32 %v1384_v4  ;;  %v1542_v30 = vmul.f32 %v2516_v60, %v3298_v32  ;;  %v1670_v32 = vsel %vm1606_vm9, 1.0, %v3374_v13 }
 0x1aa   : > { %v2520_v12 = vpop.eup %2519  ;;  %1943 = vst [vmem:[%s2851_s7 + $0x68] sm:$0xff] %v2177_v37  ;;  %2527 = vrcp.f32 %v1416_v57  ;;  %v1385_v9 = vadd.f32 1.0, %v2518_v41  ;;  %v1641_v6 = vsel %vm1577_vm13, 1.0, %v2518_v41 }
 0x1ab   : > { %v2522_v44 = vpop.eup %2521  ;;  %1959 = vst [vmem:[%s2851_s7 + $0xe8] sm:$0xff] %v2193_v35  ;;  %v1511_v0 = vmul.f32 %v2520_v12, %v3307_v54  ;;  %v1734_v39 = vmul.f32 %v1670_v32, %v1542_v30 }
 0x1ac   : > { %v2524_v10 = vpop.eup %2523  ;;  %2529 = vrcp.f32 %v1385_v9  ;;  %v1417_v31 = vadd.f32 1.0, %v2522_v44  ;;  %v1673_v62 = vsel %vm1609_vm15, 1.0, %v2522_v44 }
 0x1ad   : > { %v1703_v52 = vmul.f32 %v1639_v23, %v1511_v0  ;;  %v1543_v21 = vmul.f32 %v2524_v10, %v3311_v48 }
 0x1ae   : > { %2531 = vrcp.f32 %v1417_v31 }
 0x1af   : > { %v2178_v54 = vpack.c.bf16 %v1703_v52, %v1702_v34  ;;  %v1735_v7 = vmul.f32 %v1671_v5, %v1543_v21 }
 0x1b1   : > { %1944 = vst [vmem:[%s2851_s7 + $0x70] sm:$0xff] %v2178_v54  ;;  %v2194_v61 = vpack.c.bf16 %v1735_v7, %v1734_v39 }
 0x1b3   : > { %1960 = vst [vmem:[%s2851_s7 + $0xf0] sm:$0xff] %v2194_v61 }
 0x1b6   : > { %v2526_v15 = vpop.eup %2525 }
 0x1b7   : > { %v2528_v26 = vpop.eup %2527  ;;  %v1512_v47 = vmul.f32 %v2526_v15, %v3345_v8  ;;  %v1672_v8 = vsel %vm1608_vm14, 1.0, %v2514_v58 }
 0x1b8   : > { %v1544_v2 = vmul.f32 %v2528_v26, %v3348_v1 }
 0x1b9   : > { %v2530_v19 = vpop.eup %2529  ;;  %v1704_v27 = vmul.f32 %v1640_v63, %v1512_v47 }
 0x1ba   : > { %v1513_v48 = vmul.f32 %v2530_v19, %v3351_v18  ;;  %v1736_v50 = vmul.f32 %v1672_v8, %v1544_v2 }
 0x1bb   : > { %v2532_v13 = vpop.eup %2531 }
 0x1bc   : > { %v1705_v16 = vmul.f32 %v1641_v6, %v1513_v48  ;;  %v1545_v33 = vmul.f32 %v2532_v13, %v3356_v28 }
 0x1be   : > { %v2179_v43 = vpack.c.bf16 %v1705_v16, %v1704_v27  ;;  %v1737_v49 = vmul.f32 %v1673_v62, %v1545_v33 }
 0x1c0   : > { %1945 = vst [vmem:[%s2851_s7 + $0x78] sm:$0xff] %v2179_v43  ;;  %v2195_v40 = vpack.c.bf16 %v1737_v49, %v1736_v50 }
 0x1c2   : > { %1961 = vst [vmem:[%s2851_s7 + $0xf8] sm:$0xff] %v2195_v40 }
 0x1c3 PF: > { %s13_s14 = sadd.s32 1, %s2555_s14   ;;  %s3430_s12 = smov %s2551_s13 }
 0x1c4   : > { %p10_p5 = scmp.ge.s32.totalorder %s13_s14, 4   ;;  %s3431_s13 = smov %s3433_s15 }
 0x1c6   :  { %12 = sbr.rel (!%p10_p5) target bundleno = 2 (0x2), region = 76 }

// kernel: _lambda_.9
= control target key start
LH: loop header
LB: loop body
LE: loop exit
PB: predicated region body
PF: predicated region fallthrough
CT: control target
= control target key end

     0   :  { %s1915_s12 = smov 0   ;;  %s1917_s13 = smov 0   ;;  %s2358_s0 = inlined_call_operand.vmem [shape: bf16[512,128], index: 0, kind: input, shape index: {}]   ;;  %s2359_s1 = inlined_call_operand.vmem [shape: bf16[128,128], index: 1, kind: input, shape index: {}]   ;;  %s2360_s2 = inlined_call_operand.vmem [shape: f32[1,128], index: 2, kind: input, shape index: {}]   ;;  %s2361_s3 = inlined_call_operand.vmem [shape: bf16[512,128], index: 3, kind: output, shape index: {}]  }
   0x1   :  { %s1919_s14 = smov 0  }
   0x2 LB: > { %s32_s15 = sadd.s32 1, %s1889_s13  ;;  %p1416_p0 = scmp.ge.s32.totalorder %s1893_s14, 1  ;;  %s1893_s14 = sphi %s1919_s14, %s13_s14   ;;  %s1889_s13 = sphi %s1917_s13, %s2363_s13   ;;  %s1885_s12 = sphi %s1915_s12, %s2362_s12  }
   0x3   : > { %p34_p1 = scmp.ge.s32.totalorder %s32_s15, 2  ;;  %p188_p2 = scmp.lt.s32.totalorder %s1893_s14, 3 }
   0x5   : > { %s2365_s15 = smov (%p34_p1, %s32_s15), 0  ;;  %p189_p3 = pnand %p1416_p0, %p188_p2 }
   0x6   : > { %s1417_s18 = sshll.u32 (!%p189_p3), %s1885_s12, 5 }
   0x7   : > { %192 = sbr.rel (%p189_p3) target bundleno = 356 (0x164), region = 32  ;;  %p230_p4 = scmp.lt.s32.totalorder (!%p189_p3), %s1417_s18, 63 }
   0xc   : > { %v1719_v0 = vld [vmem:[%s2359_s1 + $0x38] sm:$0xff]   ;;  %v1720_v1 = vld [vmem:[%s2359_s1 + $0x30] sm:$0xff]   ;;  %s2367_s18 = smov (!%p230_p4, %s1417_s18), 63  ;;  %v1721_v2 = vld [vmem:[%s2359_s1 + $0x28] sm:$0xff]  }
   0xd   : > { %1631 = vmatprep.subr.bf16.mxu0 %v1719_v0  ;;  %1679 = vmatprep.subr.bf16.mxu1 %v1719_v0  ;;  %s1418_s23 = sshll.u32 %s2367_s18, 2  ;;  %v1722_v3 = vld [vmem:[%s2359_s1 + $0x20] sm:$0xff]   ;;  %v1723_v6 = vld [vmem:[%s2359_s1 + $0x18] sm:$0xff]   ;;  %v1724_v7 = vld [vmem:[%s2359_s1 + $0x10] sm:$0xff]  }
   0xe   : > { %1632 = vmatpush3.bf16.msra.mxu0 %v1719_v0  ;;  %1687 = vmatpush3.bf16.msra.mxu1 %v1719_v0  ;;  %s1950_s26 = scalar_lea.vmem %s2358_s0, %s1418_s23  ;;  %v1725_v8 = vld [vmem:[%s2359_s1 + $0x8] sm:$0xff]   ;;  %v1726_v9 = vld [vmem:[%s2359_s1] sm:$0xff]   ;;  %s2160_s17 = scalar_lea.vmem %s2361_s3, %s1418_s23 }
   0xf   : > { %1633 = vmatprep.subr.bf16.mxu0 %v1720_v1  ;;  %1680 = vmatprep.subr.bf16.mxu1 %v1720_v1  ;;  %v1727_v4 = vld [vmem:[%s1950_s26] sm:$0xff]   ;;  %v1729_v10 = vld [vmem:[%s1950_s26 + $0x8] sm:$0xff]   ;;  %v1731_v12 = vld [vmem:[%s1950_s26 + $0x10] sm:$0xff]  }
  0x10   : > { %v1728_v5 = vld [vmem:[%s1950_s26 + $0x40] sm:$0xff]   ;;  %1647 = vmatprep.mubr.bf16.mxu0 %v1727_v4  ;;  %v1730_v11 = vld [vmem:[%s1950_s26 + $0x48] sm:$0xff]   ;;  %v1732_v13 = vld [vmem:[%s1950_s26 + $0x50] sm:$0xff]  }
  0x11   : > { %1663 = vmatprep.mubr.bf16.mxu1 %v1728_v5  ;;  %v1733_v14 = vld [vmem:[%s1950_s26 + $0x18] sm:$0xff]   ;;  %v1735_v16 = vld [vmem:[%s1950_s26 + $0x20] sm:$0xff]   ;;  %v1737_v18 = vld [vmem:[%s1950_s26 + $0x28] sm:$0xff]  }
  0x12   : > { %1634 = vmatpush3.bf16.msra.mxu0 %v1720_v1  ;;  %1688 = vmatpush3.bf16.msra.mxu1 %v1720_v1  ;;  %v1734_v15 = vld [vmem:[%s1950_s26 + $0x58] sm:$0xff]   ;;  %v1736_v17 = vld [vmem:[%s1950_s26 + $0x60] sm:$0xff]   ;;  %v1738_v19 = vld [vmem:[%s1950_s26 + $0x68] sm:$0xff]  }
  0x13   : > { %1635 = vmatprep.subr.bf16.mxu0 %v1721_v2  ;;  %1681 = vmatprep.subr.bf16.mxu1 %v1721_v2  ;;  %v1739_v20 = vld [vmem:[%s1950_s26 + $0x30] sm:$0xff]   ;;  %v1741_v22 = vld [vmem:[%s1950_s26 + $0x38] sm:$0xff]   ;;  %v1986_v24 = vld [vmem:[%s2360_s2] ss:$0 sm:$0xff] }
  0x14   : > { %v1740_v21 = vld [vmem:[%s1950_s26 + $0x70] sm:$0xff]   ;;  %v1742_v23 = vld [vmem:[%s1950_s26 + $0x78] sm:$0xff]  }
  0x16   : > { %1636 = vmatpush3.bf16.msra.mxu0 %v1721_v2  ;;  %1689 = vmatpush3.bf16.msra.mxu1 %v1721_v2 }
  0x17   : > { %1637 = vmatprep.subr.bf16.mxu0 %v1722_v3  ;;  %1682 = vmatprep.subr.bf16.mxu1 %v1722_v3 }
  0x1a   : > { %1638 = vmatpush3.bf16.msra.mxu0 %v1722_v3  ;;  %1690 = vmatpush3.bf16.msra.mxu1 %v1722_v3 }
  0x1b   : > { %1639 = vmatprep.subr.bf16.mxu0 %v1723_v6  ;;  %1683 = vmatprep.subr.bf16.mxu1 %v1723_v6 }
  0x1e   : > { %1640 = vmatpush3.bf16.msra.mxu0 %v1723_v6  ;;  %1691 = vmatpush3.bf16.msra.mxu1 %v1723_v6 }
  0x1f   : > { %1641 = vmatprep.subr.bf16.mxu0 %v1724_v7  ;;  %1684 = vmatprep.subr.bf16.mxu1 %v1724_v7 }
  0x22   : > { %1642 = vmatpush3.bf16.msra.mxu0 %v1724_v7  ;;  %1692 = vmatpush3.bf16.msra.mxu1 %v1724_v7 }
  0x23   : > { %1643 = vmatprep.subr.bf16.mxu0 %v1725_v8  ;;  %1685 = vmatprep.subr.bf16.mxu1 %v1725_v8 }
  0x26   : > { %1644 = vmatpush3.bf16.msra.mxu0 %v1725_v8  ;;  %1693 = vmatpush3.bf16.msra.mxu1 %v1725_v8 }
  0x27   : > { %1645 = vmatprep.subr.bf16.mxu0 %v1726_v9  ;;  %1686 = vmatprep.subr.bf16.mxu1 %v1726_v9 }
  0x2a   : > { %1646 = vmatpush3.bf16.msra.mxu0 %v1726_v9  ;;  %1694 = vmatpush3.bf16.msra.mxu1 %v1726_v9 }
  0x2d   : > { %1648 = vmatmul.mubr.bf16.vlgmr.msra.gmra.mxu0 %v1729_v10  ;;  %1664 = vmatmul.mubr.bf16.vlgmr.msra.gmra.mxu1 %v1730_v11 }
  0x2e   : > { %1651 = vmatprep.mubr.bf16.mxu0 %v1731_v12  ;;  %1667 = vmatprep.mubr.bf16.mxu1 %v1732_v13 }
  0x35   : > { %1652 = vmatmul.mubr.bf16.gmra.mxu0 %v1733_v14  ;;  %1668 = vmatmul.mubr.bf16.gmra.mxu1 %v1734_v15 }
  0x36   : > { %1655 = vmatprep.mubr.bf16.mxu0 %v1735_v16  ;;  %1671 = vmatprep.mubr.bf16.mxu1 %v1736_v17 }
  0x3d   : > { %1656 = vmatmul.mubr.bf16.gmra.mxu0 %v1737_v18  ;;  %1672 = vmatmul.mubr.bf16.gmra.mxu1 %v1738_v19 }
  0x3e   : > { %1659 = vmatprep.mubr.bf16.mxu0 %v1739_v20  ;;  %1675 = vmatprep.mubr.bf16.mxu1 %v1740_v21 }
  0x45   : > { %1660 = vmatmul.mubr.bf16.gmra.mxu0 %v1741_v22  ;;  %1676 = vmatmul.mubr.bf16.gmra.mxu1 %v1742_v23 }
  0xed   : > { %v1649_v25 = vpop.f32.mrf.mxu0  ;;  %v1665_v26 = vpop.f32.mrf.mxu1 }
  0xee   : > { %v1989_v27 = vadd.f32 %v1649_v25, %v1986_v24  ;;  %v1992_v28 = vadd.f32 %v1665_v26, %v1986_v24 }
  0xef   : > { %v554_v29 = vpop.f32.mrf.mxu0  ;;  %v618_v30 = vpop.f32.mrf.mxu1 }
  0xf0   : > { %v821_v31 = vand.u32 2147483647, %v1989_v27  ;;  %v837_v32 = vand.u32 2147483647, %v1992_v28  ;;  %v1997_v33 = vadd.f32 %v1986_v24, %v554_v29  ;;  %v2000_v34 = vadd.f32 %v1986_v24, %v618_v30 }
  0xf1   : > { %v1650_v35 = vpop.f32.mrf.mxu0  ;;  %v1666_v36 = vpop.f32.mrf.mxu1  ;;  %vm1045_vm0 = vcmp.ge.f32.partialorder %v1989_v27, 0.0  ;;  %vm1061_vm1 = vcmp.ge.f32.partialorder %v1992_v28, 0.0 }
  0xf2   : > { %v853_v37 = vsub.f32 0.0, %v821_v31  ;;  %v869_v38 = vsub.f32 0.0, %v837_v32  ;;  %v2003_v39 = vadd.f32 %v1650_v35, %v1986_v24  ;;  %v2006_v40 = vadd.f32 %v1666_v36, %v1986_v24 }
  0xf3   : > { %v819_v41 = vand.u32 2147483647, %v1997_v33  ;;  %v835_v42 = vand.u32 2147483647, %v2000_v34  ;;  %v557_v43 = vpop.f32.mrf.mxu0  ;;  %v621_v44 = vpop.f32.mrf.mxu1  ;;  %vm1043_vm2 = vcmp.ge.f32.partialorder %v1997_v33, 0.0  ;;  %vm1059_vm3 = vcmp.ge.f32.partialorder %v2000_v34, 0.0 }
  0xf4   : > { %v887_v45 = vmul.f32 1.442695, %v853_v37  ;;  %v919_v46 = vmul.f32 1.442695, %v869_v38  ;;  %v822_v47 = vand.u32 2147483647, %v2003_v39  ;;  %v2012_v48 = vadd.f32 %v1986_v24, %v557_v43 }
  0xf5   : > { %v851_v49 = vsub.f32 0.0, %v819_v41  ;;  %v867_v50 = vsub.f32 0.0, %v835_v42  ;;  %v838_v51 = vand.u32 2147483647, %v2006_v40  ;;  %v1653_v52 = vpop.f32.mrf.mxu0  ;;  %v1669_v53 = vpop.f32.mrf.mxu1  ;;  %v2017_v62 = vadd.f32 %v1986_v24, %v621_v44 }
  0xf6   : > { %1743 = vpow2.f32 %v887_v45  ;;  %v854_v54 = vsub.f32 0.0, %v822_v47  ;;  %v820_v55 = vand.u32 2147483647, %v2012_v48  ;;  %v2020_v1 = vadd.f32 %v1653_v52, %v1986_v24 }
  0xf7   : > { %1745 = vpow2.f32 %v919_v46  ;;  %v883_v56 = vmul.f32 1.442695, %v851_v49  ;;  %v915_v57 = vmul.f32 1.442695, %v867_v50  ;;  %v870_v58 = vsub.f32 0.0, %v838_v51  ;;  %v570_v59 = vpop.f32.mrf.mxu0  ;;  %v634_v63 = vpop.f32.mrf.mxu1 }
  0xf8   : > { %v889_v60 = vmul.f32 1.442695, %v854_v54  ;;  %v852_v61 = vsub.f32 0.0, %v820_v55  ;;  %v2023_v2 = vadd.f32 %v1669_v53, %v1986_v24  ;;  %v836_v4 = vand.u32 2147483647, %v2017_v62 }
  0xf9   : > { %1747 = vpow2.f32 %v883_v56  ;;  %v921_v0 = vmul.f32 1.442695, %v870_v58  ;;  %v825_v5 = vand.u32 2147483647, %v2020_v1  ;;  %v1654_v7 = vpop.f32.mrf.mxu0  ;;  %v2029_v9 = vadd.f32 %v1986_v24, %v570_v59  ;;  %v1670_v10 = vpop.f32.mrf.mxu1 }
  0xfa   : > { %1749 = vpow2.f32 %v915_v57  ;;  %v885_v3 = vmul.f32 1.442695, %v852_v61  ;;  %v841_v6 = vand.u32 2147483647, %v2023_v2  ;;  %v868_v8 = vsub.f32 0.0, %v836_v4 }
  0xfb   : > { %1751 = vpow2.f32 %v889_v60  ;;  %v857_v11 = vsub.f32 0.0, %v825_v5  ;;  %v2032_v13 = vadd.f32 %v1986_v24, %v634_v63  ;;  %v823_v15 = vand.u32 2147483647, %v2029_v9  ;;  %v573_v23 = vpop.f32.mrf.mxu0  ;;  %v637_v25 = vpop.f32.mrf.mxu1 }
  0xfc   : > { %1753 = vpow2.f32 %v921_v0  ;;  %v873_v12 = vsub.f32 0.0, %v841_v6  ;;  %v917_v14 = vmul.f32 1.442695, %v868_v8  ;;  %v2036_v16 = vadd.f32 %v1654_v7, %v1986_v24 }
  0xfd   : > { %1755 = vpow2.f32 %v885_v3  ;;  %v895_v17 = vmul.f32 1.442695, %v857_v11  ;;  %v839_v19 = vand.u32 2147483647, %v2032_v13  ;;  %v2040_v20 = vadd.f32 %v1670_v10, %v1986_v24  ;;  %v1657_v47 = vpop.f32.mrf.mxu0  ;;  %v1673_v60 = vpop.f32.mrf.mxu1 }
  0xfe   : > { %v927_v18 = vmul.f32 1.442695, %v873_v12  ;;  %1757 = vpow2.f32 %v917_v14  ;;  %v855_v21 = vsub.f32 0.0, %v823_v15  ;;  %v826_v22 = vand.u32 2147483647, %v2036_v16 }
  0xff   : > { %1759 = vpow2.f32 %v895_v17  ;;  %v871_v26 = vsub.f32 0.0, %v839_v19  ;;  %v842_v31 = vand.u32 2147483647, %v2040_v20  ;;  %v2047_v36 = vadd.f32 %v1986_v24, %v573_v23  ;;  %v586_v61 = vpop.f32.mrf.mxu0  ;;  %v650_v12 = vpop.f32.mrf.mxu1 }
 0x100   : > { %1761 = vpow2.f32 %v927_v18  ;;  %v891_v29 = vmul.f32 1.442695, %v855_v21  ;;  %v858_v30 = vsub.f32 0.0, %v826_v22  ;;  %v2050_v37 = vadd.f32 %v1986_v24, %v637_v25 }
 0x101   : > { %v923_v35 = vmul.f32 1.442695, %v871_v26  ;;  %v874_v45 = vsub.f32 0.0, %v842_v31  ;;  %v824_v46 = vand.u32 2147483647, %v2047_v36  ;;  %v2075_v4 = vadd.f32 %v1657_v47, %v1986_v24  ;;  %v1658_v26 = vpop.f32.mrf.mxu0 }
 0x102   : > { %1763 = vpow2.f32 %v891_v29  ;;  %v897_v42 = vmul.f32 1.442695, %v858_v30  ;;  %v840_v51 = vand.u32 2147483647, %v2050_v37  ;;  %v2081_v6 = vadd.f32 %v1673_v60, %v1986_v24 }
 0x103   : > { %v2044_v32 = vpop.eup %1743  ;;  %1765 = vpow2.f32 %v923_v35  ;;  %v856_v54 = vsub.f32 0.0, %v824_v46  ;;  %v929_v59 = vmul.f32 1.442695, %v874_v45  ;;  %v2084_v7 = vadd.f32 %v1986_v24, %v586_v61 }
 0x104   : > { %v2052_v38 = vpop.eup %1745  ;;  %v949_v41 = vadd.f32 1.0, %v2044_v32  ;;  %v872_v3 = vsub.f32 0.0, %v840_v51  ;;  %v829_v11 = vand.u32 2147483647, %v2075_v4  ;;  %vm1046_vm4 = vcmp.ge.f32.partialorder %v2003_v39, 0.0 }
 0x105   : > { %v965_v43 = vadd.f32 1.0, %v2052_v38  ;;  %v893_v0 = vmul.f32 1.442695, %v856_v54  ;;  %vm1062_vm5 = vcmp.ge.f32.partialorder %v2006_v40, 0.0  ;;  %v845_v22 = vand.u32 2147483647, %v2081_v6 }
 0x106   : > { %v2056_v44 = vpop.eup %1747  ;;  %1767 = vrcp.f32 %v949_v41  ;;  %v925_v17 = vmul.f32 1.442695, %v872_v3  ;;  %v861_v19 = vsub.f32 0.0, %v829_v11  ;;  %v827_v23 = vand.u32 2147483647, %v2084_v7 }
 0x107   : > { %v2059_v49 = vpop.eup %1749  ;;  %1769 = vrcp.f32 %v965_v43  ;;  %v947_v50 = vadd.f32 1.0, %v2056_v44  ;;  %v2103_v25 = vadd.f32 %v1986_v24, %v650_v12  ;;  %v1077_v30 = vsel %vm1045_vm0, 1.0, %v2044_v32 }
 0x108   : > { %v2063_v52 = vpop.eup %1751  ;;  %v963_v53 = vadd.f32 1.0, %v2059_v49  ;;  %1771 = vpow2.f32 %v897_v42  ;;  %vm1044_vm6 = vcmp.ge.f32.partialorder %v2012_v48, 0.0  ;;  %v903_v42 = vmul.f32 1.442695, %v861_v19 }
 0x109   : > { %v2066_v55 = vpop.eup %1753  ;;  %1773 = vrcp.f32 %v947_v50  ;;  %v950_v56 = vadd.f32 1.0, %v2063_v52  ;;  %v877_v43 = vsub.f32 0.0, %v845_v22  ;;  %v1093_v46 = vsel %vm1061_vm1, 1.0, %v2052_v38  ;;  %v1674_v50 = vpop.f32.mrf.mxu1 }
 0x10a   : > { %v2069_v57 = vpop.eup %1755  ;;  %1775 = vrcp.f32 %v963_v53  ;;  %v966_v58 = vadd.f32 1.0, %v2066_v55  ;;  %v1075_v32 = vsel %vm1043_vm2, 1.0, %v2056_v44  ;;  %v2120_v47 = vadd.f32 %v1658_v26, %v1986_v24 }
 0x10b   : > { %1777 = vrcp.f32 %v950_v56  ;;  %v948_v63 = vadd.f32 1.0, %v2069_v57  ;;  %v2077_v5 = vpop.eup %1757  ;;  %v859_v54 = vsub.f32 0.0, %v827_v23  ;;  %v843_v56 = vand.u32 2147483647, %v2103_v25 }
 0x10c   : > { %1779 = vrcp.f32 %v966_v58  ;;  %v2086_v8 = vpop.eup %1759  ;;  %v964_v10 = vadd.f32 1.0, %v2077_v5  ;;  %vm1060_vm7 = vcmp.ge.f32.partialorder %v2017_v62, 0.0  ;;  %v1091_v61 = vsel %vm1059_vm3, 1.0, %v2059_v49 }
 0x10d   : > { %1781 = vrcp.f32 %v948_v63  ;;  %v2091_v14 = vpop.eup %1761  ;;  %v953_v15 = vadd.f32 1.0, %v2086_v8  ;;  %v2136_v63 = vadd.f32 %v1674_v50, %v1986_v24  ;;  %v1094_v3 = vsel %vm1062_vm5, 1.0, %v2066_v55 }
 0x10e   : > { %1783 = vpow2.f32 %v929_v59  ;;  %v969_v18 = vadd.f32 1.0, %v2091_v14  ;;  %v935_v59 = vmul.f32 1.442695, %v877_v43  ;;  %v875_v12 = vsub.f32 0.0, %v843_v56 }
 0x10f   : > { %1785 = vpow2.f32 %v893_v0  ;;  %v2097_v21 = vpop.eup %1763  ;;  %v899_v19 = vmul.f32 1.442695, %v859_v54  ;;  %v846_v26 = vand.u32 2147483647, %v2136_v63  ;;  %v1092_v56 = vsel %vm1060_vm7, 1.0, %v2077_v5 }
 0x110   : > { %1787 = vrcp.f32 %v964_v10  ;;  %v2105_v29 = vpop.eup %1765  ;;  %v951_v31 = vadd.f32 1.0, %v2097_v21  ;;  %v1076_v10 = vsel %vm1044_vm6, 1.0, %v2069_v57  ;;  %vm1049_vm8 = vcmp.ge.f32.partialorder %v2020_v1, 0.0 }
 0x111   : > { %1789 = vrcp.f32 %v953_v15  ;;  %v967_v41 = vadd.f32 1.0, %v2105_v29  ;;  %v830_v15 = vand.u32 2147483647, %v2120_v47  ;;  %vm1065_vm9 = vcmp.ge.f32.partialorder %v2023_v2, 0.0 }
 0x112   : > { %1791 = vpow2.f32 %v925_v17  ;;  %vm1047_vm10 = vcmp.ge.f32.partialorder %v2029_v9, 0.0  ;;  %vm1063_vm11 = vcmp.ge.f32.partialorder %v2032_v13, 0.0  ;;  %vm1050_vm12 = vcmp.ge.f32.partialorder %v2036_v16, 0.0 }
 0x113   : > { %v1768_v35 = vpop.eup %1767  ;;  %1793 = vrcp.f32 %v969_v18  ;;  %v862_v23 = vsub.f32 0.0, %v830_v15  ;;  %vm1066_vm13 = vcmp.ge.f32.partialorder %v2040_v20, 0.0  ;;  %vm1048_vm14 = vcmp.ge.f32.partialorder %v2047_v36, 0.0 }
 0x114   : > { %v1770_v45 = vpop.eup %1769  ;;  %v1013_v53 = vmul.f32 %v1768_v35, %v1989_v27  ;;  %1795 = vrcp.f32 %v951_v31  ;;  %v1078_v27 = vsel %vm1046_vm4, 1.0, %v2063_v52  ;;  %vm1064_vm15 = vcmp.ge.f32.partialorder %v2050_v37, 0.0 }
 0x115   : > { %v2122_v51 = vpop.eup %1771  ;;  %v1029_v38 = vmul.f32 %v1770_v45, %v1992_v28  ;;  %1797 = vrcp.f32 %v967_v41  ;;  %v931_v45 = vmul.f32 1.442695, %v875_v12  ;;  %v905_v50 = vmul.f32 1.442695, %v862_v23 }
 0x116   : > { %v1774_v58 = vpop.eup %1773  ;;  %v954_v44 = vadd.f32 1.0, %v2122_v51  ;;  %1799 = vpow2.f32 %v903_v42  ;;  %v1109_v11 = vmul.f32 %v1077_v30, %v1013_v53  ;;  %vm1053_vm0 = vcmp.ge.f32.partialorder %v2075_v4, 0.0 }
 0x117   : > { %v1776_v60 = vpop.eup %1775  ;;  %v1011_v0 = vmul.f32 %v1774_v58, %v1997_v33  ;;  %v1125_v18 = vmul.f32 %v1093_v46, %v1029_v38  ;;  %v589_v46 = vpop.f32.mrf.mxu0  ;;  %v878_v58 = vsub.f32 0.0, %v846_v26  ;;  %v1095_v26 = vsel %vm1063_vm11, 1.0, %v2105_v29 }
 0x118   : > { %v1778_v28 = vpop.eup %1777  ;;  %1801 = vrcp.f32 %v954_v44  ;;  %v1027_v31 = vmul.f32 %v1776_v60, %v2000_v34  ;;  %v653_v60 = vpop.f32.mrf.mxu1  ;;  %vm1054_vm1 = vcmp.ge.f32.partialorder %v2120_v47, 0.0  ;;  %vm1069_vm2 = vcmp.ge.f32.partialorder %v2081_v6, 0.0 }
 0x119   : > { %v1780_v49 = vpop.eup %1779  ;;  %v1014_v52 = vmul.f32 %v1778_v28, %v2003_v39  ;;  %1803 = vpow2.f32 %v935_v59  ;;  %v1107_v39 = vmul.f32 %v1075_v32, %v1011_v0  ;;  %v1661_v5 = vpop.f32.mrf.mxu0  ;;  %vm1070_vm3 = vcmp.ge.f32.partialorder %v2136_v63, 0.0 }
 0x11a   : > { %v1782_v17 = vpop.eup %1781  ;;  %v1030_v33 = vmul.f32 %v1780_v49, %v2006_v40  ;;  %v1123_v44 = vmul.f32 %v1091_v61, %v1027_v31  ;;  %v2178_v61 = vadd.f32 %v1986_v24, %v589_v46  ;;  %v2191_v12 = vadd.f32 %v1661_v5, %v1986_v24 }
 0x11b   : > { %v2148_v55 = vpop.eup %1783  ;;  %v1110_v22 = vmul.f32 %v1078_v27, %v1014_v52  ;;  %v1012_v57 = vmul.f32 %v1782_v17, %v2012_v48  ;;  %v1081_v17 = vsel %vm1049_vm8, 1.0, %v2086_v8  ;;  %vm1051_vm4 = vcmp.ge.f32.partialorder %v2084_v7, 0.0 }
 0x11c   : > { %v2152_v30 = vpop.eup %1785  ;;  %v1126_v40 = vmul.f32 %v1094_v3, %v1030_v33  ;;  %v970_v35 = vadd.f32 1.0, %v2148_v55  ;;  %v828_v33 = vand.u32 2147483647, %v2178_v61  ;;  %vm1067_vm5 = vcmp.ge.f32.partialorder %v2103_v25, 0.0 }
 0x11d   : > { %v1788_v41 = vpop.eup %1787  ;;  %v1520_v48 = vpack.c.bf16 %v1110_v22, %v1109_v11  ;;  %v1108_v42 = vmul.f32 %v1076_v10, %v1012_v57  ;;  %v952_v43 = vadd.f32 1.0, %v2152_v30  ;;  %v2183_v11 = vadd.f32 %v1986_v24, %v653_v60 }
 0x11e   : > { %v1560_v32 = vpack.c.bf16 %v1126_v40, %v1125_v18  ;;  %v1028_v34 = vmul.f32 %v1788_v41, %v2017_v62  ;;  %1805 = vrcp.f32 %v970_v35  ;;  %v1790_v53 = vpop.eup %1789  ;;  %v937_v62 = vmul.f32 1.442695, %v878_v58 }
 0x11f   : > { %1592 = vst [vmem:[%s2160_s17 + $0x8] sm:$0xff] %v1520_v48   ;;  %v1515_v54 = vpack.c.bf16 %v1108_v42, %v1107_v39  ;;  %1807 = vrcp.f32 %v952_v43  ;;  %v2169_v38 = vpop.eup %1791  ;;  %v1017_v49 = vmul.f32 %v1790_v53, %v2020_v1  ;;  %v1097_v18 = vsel %vm1065_vm9, 1.0, %v2091_v14 }
 0x120   : > { %1600 = vst [vmem:[%s2160_s17 + $0x48] sm:$0xff] %v1560_v32   ;;  %v1124_v59 = vmul.f32 %v1092_v56, %v1028_v34  ;;  %1809 = vpow2.f32 %v905_v50  ;;  %v1794_v27 = vpop.eup %1793  ;;  %v968_v28 = vadd.f32 1.0, %v2169_v38  ;;  %v1079_v57 = vsel %vm1047_vm10, 1.0, %v2097_v21 }
 0x121   : > { %1516 = vst [vmem:[%s2160_s17] sm:$0xff] %v1515_v54   ;;  %1811 = vpow2.f32 %v899_v19  ;;  %v1796_v0 = vpop.eup %1795  ;;  %v1677_v19 = vpop.f32.mrf.mxu1  ;;  %v1033_v22 = vmul.f32 %v1794_v27, %v2023_v2  ;;  %v844_v1 = vand.u32 2147483647, %v2183_v11  ;;  %v1113_v14 = vmul.f32 %v1081_v17, %v1017_v49 }
 0x122   : > { %v1555_v3 = vpack.c.bf16 %v1124_v59, %v1123_v44  ;;  %1813 = vpow2.f32 %v931_v45  ;;  %v1798_v10 = vpop.eup %1797  ;;  %v1082_v2 = vsel %vm1050_vm12, 1.0, %v2122_v51  ;;  %v860_v39 = vsub.f32 0.0, %v828_v33  ;;  %v602_v51 = vpop.f32.mrf.mxu0 }
 0x123   : > { %1815 = vrcp.f32 %v968_v28  ;;  %v2185_v52 = vpop.eup %1799  ;;  %v876_v40 = vsub.f32 0.0, %v844_v1  ;;  %v833_v35 = vand.u32 2147483647, %v2191_v12  ;;  %v1098_v41 = vsel %vm1066_vm13, 1.0, %v2148_v55  ;;  %v666_v42 = vpop.f32.mrf.mxu1 }
 0x124   : > { %1599 = vst [vmem:[%s2160_s17 + $0x40] sm:$0xff] %v1555_v3   ;;  %1817 = vpow2.f32 %v937_v62  ;;  %v957_v21 = vadd.f32 1.0, %v2185_v52  ;;  %v1080_v29 = vsel %vm1048_vm14, 1.0, %v2152_v30  ;;  %v901_v48 = vmul.f32 1.442695, %v860_v39  ;;  %v1662_v27 = vpop.f32.mrf.mxu0 }
 0x125   : > { %v1802_v15 = vpop.eup %1801  ;;  %v1129_v43 = vmul.f32 %v1097_v18, %v1033_v22  ;;  %v1015_v45 = vmul.f32 %v1796_v0, %v2029_v9  ;;  %v933_v32 = vmul.f32 1.442695, %v876_v40  ;;  %v865_v55 = vsub.f32 0.0, %v833_v35  ;;  %v1678_v28 = vpop.f32.mrf.mxu1 }
 0x126   : > { %v1018_v23 = vmul.f32 %v1802_v15, %v2036_v16  ;;  %v2208_v8 = vpop.eup %1803  ;;  %v2225_v16 = vadd.f32 %v1677_v19, %v1986_v24  ;;  %1819 = vpow2.f32 %v901_v48  ;;  %v2233_v56 = vadd.f32 %v1986_v24, %v602_v51 }
 0x127   : > { %v973_v50 = vadd.f32 1.0, %v2208_v8  ;;  %1821 = vrcp.f32 %v957_v21  ;;  %v2236_v58 = vadd.f32 %v1986_v24, %v666_v42  ;;  %v1031_v44 = vmul.f32 %v1798_v10, %v2032_v13 }
 0x128   : > { %v1114_v31 = vmul.f32 %v1082_v2, %v1018_v23  ;;  %v849_v53 = vand.u32 2147483647, %v2225_v16  ;;  %1823 = vpow2.f32 %v933_v32  ;;  %v911_v0 = vmul.f32 1.442695, %v865_v55  ;;  %v669_v2 = vpop.f32.mrf.mxu1 }
 0x129   : > { %v831_v3 = vand.u32 2147483647, %v2233_v56  ;;  %v1111_v15 = vmul.f32 %v1079_v57, %v1015_v45  ;;  %v1096_v13 = vsel %vm1064_vm15, 1.0, %v2169_v38  ;;  %1825 = vrcp.f32 %v973_v50 }
 0x12a   : > { %v1530_v46 = vpack.c.bf16 %v1114_v31, %v1113_v14  ;;  %v881_v60 = vsub.f32 0.0, %v849_v53  ;;  %v847_v33 = vand.u32 2147483647, %v2236_v58  ;;  %v1127_v22 = vmul.f32 %v1095_v26, %v1031_v44  ;;  %v605_v14 = vpop.f32.mrf.mxu0 }
 0x12b   : > { %v1806_v34 = vpop.eup %1805  ;;  %v863_v18 = vsub.f32 0.0, %v831_v3  ;;  %v2260_v35 = vadd.f32 %v1662_v27, %v1986_v24  ;;  %v2263_v26 = vadd.f32 %v1678_v28, %v1986_v24  ;;  %vm1052_vm6 = vcmp.ge.f32.partialorder %v2178_v61, 0.0 }
 0x12c   : > { %v1808_v54 = vpop.eup %1807  ;;  %1594 = vst [vmem:[%s2160_s17 + $0x18] sm:$0xff] %v1530_v46   ;;  %v1034_v30 = vmul.f32 %v1806_v34, %v2040_v20  ;;  %v943_v1 = vmul.f32 1.442695, %v881_v60  ;;  %v879_v31 = vsub.f32 0.0, %v847_v33  ;;  %vm1068_vm7 = vcmp.ge.f32.partialorder %v2183_v11, 0.0 }
 0x12d   : > { %v2238_v9 = vpop.eup %1809  ;;  %v1016_v59 = vmul.f32 %v1808_v54, %v2047_v36  ;;  %v907_v40 = vmul.f32 1.442695, %v863_v18  ;;  %v834_v42 = vand.u32 2147483647, %v2260_v35  ;;  %vm1057_vm8 = vcmp.ge.f32.partialorder %v2191_v12, 0.0 }
 0x12e   : > { %v2242_v62 = vpop.eup %1811  ;;  %v1130_v20 = vmul.f32 %v1098_v41, %v1034_v30  ;;  %v958_v5 = vadd.f32 1.0, %v2238_v9  ;;  %v2267_v41 = vadd.f32 %v1986_v24, %v605_v14  ;;  %v939_v51 = vmul.f32 1.442695, %v879_v31 }
 0x12f   : > { %v2246_v49 = vpop.eup %1813  ;;  %v1112_v17 = vmul.f32 %v1080_v29, %v1016_v59  ;;  %v955_v38 = vadd.f32 1.0, %v2242_v62  ;;  %v2270_v29 = vadd.f32 %v1986_v24, %v669_v2  ;;  %v866_v45 = vsub.f32 0.0, %v834_v42 }
 0x130   : > { %v1816_v36 = vpop.eup %1815  ;;  %v1570_v10 = vpack.c.bf16 %v1130_v20, %v1129_v43  ;;  %1827 = vrcp.f32 %v958_v5  ;;  %v850_v43 = vand.u32 2147483647, %v2263_v26  ;;  %v832_v34 = vand.u32 2147483647, %v2267_v41 }
 0x131   : > { %v2252_v19 = vpop.eup %1817  ;;  %v1525_v23 = vpack.c.bf16 %v1112_v17, %v1111_v15  ;;  %v1032_v57 = vmul.f32 %v1816_v36, %v2050_v37  ;;  %1829 = vpow2.f32 %v911_v0  ;;  %v971_v37 = vadd.f32 1.0, %v2246_v49 }
 0x132   : > { %1602 = vst [vmem:[%s2160_s17 + $0x58] sm:$0xff] %v1570_v10   ;;  %v974_v39 = vadd.f32 1.0, %v2252_v19  ;;  %v882_v32 = vsub.f32 0.0, %v850_v43  ;;  %v848_v24 = vand.u32 2147483647, %v2270_v29  ;;  %v864_v44 = vsub.f32 0.0, %v832_v34 }
 0x133   : > { %1593 = vst [vmem:[%s2160_s17 + $0x10] sm:$0xff] %v1525_v23   ;;  %v1128_v21 = vmul.f32 %v1096_v13, %v1032_v57  ;;  %v2275_v46 = vpop.eup %1819  ;;  %v913_v53 = vmul.f32 1.442695, %v866_v45  ;;  %v1085_v17 = vsel %vm1053_vm0, 1.0, %v2185_v52  ;;  %v1086_v13 = vsel %vm1054_vm1, 1.0, %v2238_v9 }
 0x134   : > { %1831 = vrcp.f32 %v974_v39  ;;  %v1822_v50 = vpop.eup %1821  ;;  %v956_v55 = vadd.f32 1.0, %v2275_v46  ;;  %v945_v30 = vmul.f32 1.442695, %v882_v32  ;;  %v880_v59 = vsub.f32 0.0, %v848_v24 }
 0x135   : > { %v1565_v48 = vpack.c.bf16 %v1128_v21, %v1127_v22  ;;  %1833 = vpow2.f32 %v943_v1  ;;  %v2280_v54 = vpop.eup %1823  ;;  %v1021_v28 = vmul.f32 %v1822_v50, %v2075_v4  ;;  %v909_v20 = vmul.f32 1.442695, %v864_v44 }
 0x136   : > { %1835 = vrcp.f32 %v955_v38  ;;  %v972_v60 = vadd.f32 1.0, %v2280_v54  ;;  %v1826_v27 = vpop.eup %1825  ;;  %v941_v3 = vmul.f32 1.442695, %v880_v59  ;;  %v1101_v9 = vsel %vm1069_vm2, 1.0, %v2208_v8 }
 0x137   : > { %1601 = vst [vmem:[%s2160_s17 + $0x50] sm:$0xff] %v1565_v48   ;;  %1837 = vpow2.f32 %v907_v40  ;;  %v1117_v36 = vmul.f32 %v1085_v17, %v1021_v28  ;;  %v1037_v10 = vmul.f32 %v1826_v27, %v2081_v6  ;;  %v1102_v23 = vsel %vm1070_vm3, 1.0, %v2252_v19 }
 0x138   : > { %1839 = vrcp.f32 %v971_v37  ;;  %v1083_v42 = vsel %vm1051_vm4, 1.0, %v2242_v62  ;;  %v1084_v43 = vsel %vm1052_vm6, 1.0, %v2275_v46  ;;  %v1100_v50 = vsel %vm1068_vm7, 1.0, %v2280_v54 }
 0x139   : > { %1841 = vpow2.f32 %v939_v51  ;;  %v1133_v1 = vmul.f32 %v1101_v9, %v1037_v10  ;;  %vm1073_vm9 = vcmp.ge.f32.partialorder %v2225_v16, 0.0  ;;  %vm1058_vm10 = vcmp.ge.f32.partialorder %v2260_v35, 0.0 }
 0x13a   : > { %1843 = vrcp.f32 %v956_v55  ;;  %vm1074_vm11 = vcmp.ge.f32.partialorder %v2263_v26, 0.0  ;;  %vm1055_vm12 = vcmp.ge.f32.partialorder %v2233_v56, 0.0  ;;  %vm1056_vm13 = vcmp.ge.f32.partialorder %v2267_v41, 0.0 }
 0x13b   : > { %1845 = vpow2.f32 %v913_v53  ;;  %vm1071_vm14 = vcmp.ge.f32.partialorder %v2236_v58, 0.0  ;;  %vm1072_vm15 = vcmp.ge.f32.partialorder %v2270_v29, 0.0 }
 0x13c   : > { %1847 = vrcp.f32 %v972_v60 }
 0x13d   : > { %v1828_v5 = vpop.eup %1827  ;;  %1849 = vpow2.f32 %v945_v30 }
 0x13e   : > { %v1022_v0 = vmul.f32 %v1828_v5, %v2120_v47  ;;  %v2287_v15 = vpop.eup %1829  ;;  %1851 = vpow2.f32 %v909_v20 }
 0x13f   : > { %1853 = vpow2.f32 %v941_v3  ;;  %v961_v6 = vadd.f32 1.0, %v2287_v15  ;;  %v1089_v17 = vsel %vm1057_vm8, 1.0, %v2287_v15 }
 0x140   : > { %v1118_v18 = vmul.f32 %v1086_v13, %v1022_v0 }
 0x141   : > { %v1832_v4 = vpop.eup %1831  ;;  %1855 = vrcp.f32 %v961_v6 }
 0x142   : > { %v2293_v33 = vpop.eup %1833  ;;  %v1540_v47 = vpack.c.bf16 %v1118_v18, %v1117_v36  ;;  %v1038_v22 = vmul.f32 %v1832_v4, %v2136_v63 }
 0x143   : > { %v1836_v52 = vpop.eup %1835  ;;  %v977_v38 = vadd.f32 1.0, %v2293_v33  ;;  %v1105_v13 = vsel %vm1073_vm9, 1.0, %v2293_v33 }
 0x144   : > { %v2299_v57 = vpop.eup %1837  ;;  %1596 = vst [vmem:[%s2160_s17 + $0x28] sm:$0xff] %v1540_v47   ;;  %v1134_v14 = vmul.f32 %v1102_v23, %v1038_v22  ;;  %v1019_v31 = vmul.f32 %v1836_v52, %v2084_v7 }
 0x145   : > { %v1840_v2 = vpop.eup %1839  ;;  %v959_v8 = vadd.f32 1.0, %v2299_v57  ;;  %1857 = vrcp.f32 %v977_v38  ;;  %v1087_v23 = vsel %vm1055_vm12, 1.0, %v2299_v57 }
 0x146   : > { %v2304_v39 = vpop.eup %1841  ;;  %v1580_v63 = vpack.c.bf16 %v1134_v14, %v1133_v1  ;;  %v1035_v40 = vmul.f32 %v1840_v2, %v2103_v25  ;;  %v1115_v32 = vmul.f32 %v1083_v42, %v1019_v31 }
 0x147   : > { %v1844_v21 = vpop.eup %1843  ;;  %v975_v48 = vadd.f32 1.0, %v2304_v39  ;;  %1859 = vrcp.f32 %v959_v8  ;;  %v1103_v2 = vsel %vm1071_vm14, 1.0, %v2304_v39 }
 0x148   : > { %1604 = vst [vmem:[%s2160_s17 + $0x68] sm:$0xff] %v1580_v63   ;;  %v1846_v19 = vpop.eup %1845  ;;  %v1020_v37 = vmul.f32 %v1844_v21, %v2178_v61  ;;  %v1099_v61 = vsel %vm1067_vm5, 1.0, %v2246_v49 }
 0x149   : > { %v1848_v51 = vpop.eup %1847  ;;  %v962_v7 = vadd.f32 1.0, %v1846_v19  ;;  %v1131_v55 = vmul.f32 %v1099_v61, %v1035_v40  ;;  %v1090_v36 = vsel %vm1058_vm10, 1.0, %v1846_v19 }
 0x14a   : > { %v1850_v45 = vpop.eup %1849  ;;  %v1116_v34 = vmul.f32 %v1084_v43, %v1020_v37  ;;  %v1036_v24 = vmul.f32 %v1848_v51, %v2183_v11 }
 0x14b   : > { %1861 = vrcp.f32 %v962_v7  ;;  %v978_v62 = vadd.f32 1.0, %v1850_v45  ;;  %v1852_v46 = vpop.eup %1851 }
 0x14c   : > { %v1535_v53 = vpack.c.bf16 %v1116_v34, %v1115_v32  ;;  %v1132_v30 = vmul.f32 %v1100_v50, %v1036_v24  ;;  %1863 = vrcp.f32 %v975_v48  ;;  %v960_v44 = vadd.f32 1.0, %v1852_v46  ;;  %v1854_v59 = vpop.eup %1853 }
 0x14d   : > { %1865 = vrcp.f32 %v978_v62  ;;  %v976_v60 = vadd.f32 1.0, %v1854_v59  ;;  %v1104_v38 = vsel %vm1072_vm15, 1.0, %v1854_v59 }
 0x14e   : > { %1595 = vst [vmem:[%s2160_s17 + $0x20] sm:$0xff] %v1535_v53   ;;  %v1575_v11 = vpack.c.bf16 %v1132_v30, %v1131_v55  ;;  %1867 = vrcp.f32 %v960_v44  ;;  %v1856_v25 = vpop.eup %1855 }
 0x14f   : > { %1869 = vrcp.f32 %v976_v60  ;;  %v1025_v54 = vmul.f32 %v1856_v25, %v2191_v12 }
 0x150   : > { %1603 = vst [vmem:[%s2160_s17 + $0x60] sm:$0xff] %v1575_v11  }
 0x151   : > { %v1121_v10 = vmul.f32 %v1089_v17, %v1025_v54 }
 0x152   : > { %v1858_v49 = vpop.eup %1857 }
 0x153   : > { %v1041_v20 = vmul.f32 %v1858_v49, %v2225_v16 }
 0x154   : > { %v1860_v27 = vpop.eup %1859 }
 0x155   : > { %v1023_v18 = vmul.f32 %v1860_v27, %v2233_v56  ;;  %v1137_v47 = vmul.f32 %v1105_v13, %v1041_v20 }
 0x157   : > { %v1119_v56 = vmul.f32 %v1087_v23, %v1023_v18 }
 0x158   : > { %v1862_v28 = vpop.eup %1861 }
 0x159   : > { %v1864_v5 = vpop.eup %1863  ;;  %v1026_v0 = vmul.f32 %v1862_v28, %v2260_v35  ;;  %v1106_v35 = vsel %vm1074_vm11, 1.0, %v1850_v45 }
 0x15a   : > { %v1866_v3 = vpop.eup %1865  ;;  %v1039_v15 = vmul.f32 %v1864_v5, %v2236_v58 }
 0x15b   : > { %v1122_v4 = vmul.f32 %v1090_v36, %v1026_v0  ;;  %v1042_v12 = vmul.f32 %v1866_v3, %v2263_v26  ;;  %v1868_v16 = vpop.eup %1867  ;;  %v1088_v26 = vsel %vm1056_vm13, 1.0, %v1852_v46 }
 0x15c   : > { %v1024_v52 = vmul.f32 %v1868_v16, %v2267_v41  ;;  %v1870_v9 = vpop.eup %1869  ;;  %v1135_v41 = vmul.f32 %v1103_v2, %v1039_v15 }
 0x15d   : > { %v1550_v33 = vpack.c.bf16 %v1122_v4, %v1121_v10  ;;  %v1138_v22 = vmul.f32 %v1106_v35, %v1042_v12  ;;  %v1040_v6 = vmul.f32 %v1870_v9, %v2270_v29 }
 0x15e   : > { %v1120_v14 = vmul.f32 %v1088_v26, %v1024_v52 }
 0x15f   : > { %1598 = vst [vmem:[%s2160_s17 + $0x38] sm:$0xff] %v1550_v33   ;;  %v1590_v1 = vpack.c.bf16 %v1138_v22, %v1137_v47  ;;  %v1136_v31 = vmul.f32 %v1104_v38, %v1040_v6 }
 0x160   : > { %v1545_v63 = vpack.c.bf16 %v1120_v14, %v1119_v56 }
 0x161   : > { %1606 = vst [vmem:[%s2160_s17 + $0x78] sm:$0xff] %v1590_v1   ;;  %v1585_v57 = vpack.c.bf16 %v1136_v31, %v1135_v41 }
 0x162   : > { %1597 = vst [vmem:[%s2160_s17 + $0x30] sm:$0xff] %v1545_v63  }
 0x163   : > { %1605 = vst [vmem:[%s2160_s17 + $0x70] sm:$0xff] %v1585_v57  }
 0x164 PF: > { %s13_s14 = sadd.s32 1, %s1893_s14   ;;  %s2362_s12 = smov %s1889_s13 }
 0x165   : > { %p10_p5 = scmp.ge.s32.totalorder %s13_s14, 4   ;;  %s2363_s13 = smov %s2365_s15 }
 0x167   :  { %12 = sbr.rel (!%p10_p5) target bundleno = 2 (0x2), region = 76 }

// kernel: _lambda_.8
= control target key start
LH: loop header
LB: loop body
LE: loop exit
PB: predicated region body
PF: predicated region fallthrough
CT: control target
= control target key end

     0   :  { %s5392_s15 = smov 0   ;;  %s5394_s16 = smov 0   ;;  %s7238_s0 = inlined_call_operand.vmem [shape: bf16[2,18,24,128], index: 0, kind: input, shape index: {}]   ;;  %s7239_s1 = inlined_call_operand.vmem [shape: bf16[9,128,128], index: 1, kind: input, shape index: {}]   ;;  %s7240_s2 = inlined_call_operand.vmem [shape: f32[1,128], index: 2, kind: input, shape index: {}]   ;;  %s7241_s3 = inlined_call_operand.vmem [shape: bf16[2,16,16,256], index: 3, kind: input, shape index: {}]   ;;  %s7242_s4 = inlined_call_operand.vmem [shape: bf16[2,16,16,128], index: 4, kind: output, shape index: {}]  }
   0x1   :  { %s5396_s17 = smov 0   ;;  %s5398_s18 = smov 0  }
   0x2   :  { %s5400_s19 = smov 0  }
   0x3 LB: > { %s26_s20 = sadd.s32 1, %s5361_s18  ;;  %p120_p1 = scmp.ne.s32.totalorder %s5353_s16, %s5349_s15  ;;  %s5365_s19 = sphi %s5400_s19, %s14_s19   ;;  %s5361_s18 = sphi %s5398_s18, %s7384_s18   ;;  %s5357_s17 = sphi %s5396_s17, %s7383_s17   ;;  %s5353_s16 = sphi %s5394_s16, %s7382_s16   ;;  %s5349_s15 = sphi %s5392_s15, %s7381_s15  }
   0x4   : > { %p28_p0 = scmp.ge.s32.totalorder %s26_s20, 2  ;;  %p121_p2 = scmp.eq.s32.totalorder %s5365_s19, 0 }
   0x5   : > { %s113_s22 = sadd.s32 1, %s5353_s16  ;;  %p3913_p5 = scmp.ge.s32.totalorder %s5365_s19, 2 }
   0x6   : > { %s7386_s20 = smov (%p28_p0, %s26_s20), 0  ;;  %p122_p3 = por %p121_p2, %p120_p1 }
   0x7   : > { %s108_s21 = ssub.s32 %s5361_s18, %s7386_s20  ;;  %187 = sbr.rel (%p3913_p5) target bundleno = 37 (0x25), region = 24 }
   0x8   : > { %p111_p4 = scmp.eq.s32.totalorder %s108_s21, 0 }
   0xa   : > { %s5427_s23 = scalar_select %p111_p4, %s5353_s16, %s113_s22  }
   0xc   : > { %198 = sbr.rel (!%p122_p3) target bundleno = 37 (0x25), region = 32  ;;  %s200_s24 = sand.u32 (%p122_p3), 1, %s5353_s16  }
   0xd   : > { %s4175_s25 = sshll.u32 (%p122_p3), %s5361_s18, 8  ;;  %s3914_s26 = sshll.u32 (%p122_p3), %s200_s24, 7 }
   0xe   : > { %s5435_s29 = scalar_lea.vmem (%p122_p3), %s7241_s3, %s4175_s25  ;;  %s5439_s30 = scalar_lea.vmem (%p122_p3), [#allocation2], %s3914_s26 }
   0xf   : > { %v223_v0 = vld [vmem:[%s5435_s29] sm:$0xf] (%p122_p3)  ;;  %v225_v1 = vld [vmem:[%s5435_s29 + $0x8] sm:$0xf] (%p122_p3)  ;;  %v227_v2 = vld [vmem:[%s5435_s29 + $0x10] sm:$0xf] (%p122_p3) }
  0x10   : > { %224 = vst [vmem:[%s5439_s30] sm:$0xf] (%p122_p3), %v223_v0  ;;  %226 = vst [vmem:[%s5439_s30 + $0x4] sm:$0xf] (%p122_p3), %v225_v1  ;;  %v229_v3 = vld [vmem:[%s5435_s29 + $0x18] sm:$0xf] (%p122_p3) }
  0x11   : > { %v231_v4 = vld [vmem:[%s5435_s29 + $0x20] sm:$0xf]  ;;  %228 = vst [vmem:[%s5439_s30 + $0x8] sm:$0xf] %v227_v2  ;;  %230 = vst [vmem:[%s5439_s30 + $0xc] sm:$0xf] %v229_v3 }
  0x12   : > { %232 = vst [vmem:[%s5439_s30 + $0x10] sm:$0xf] %v231_v4  ;;  %v233_v5 = vld [vmem:[%s5435_s29 + $0x28] sm:$0xf]  ;;  %v235_v6 = vld [vmem:[%s5435_s29 + $0x30] sm:$0xf] }
  0x13   : > { %v237_v7 = vld [vmem:[%s5435_s29 + $0x38] sm:$0xf]  ;;  %234 = vst [vmem:[%s5439_s30 + $0x14] sm:$0xf] %v233_v5  ;;  %236 = vst [vmem:[%s5439_s30 + $0x18] sm:$0xf] %v235_v6 }
  0x14   : > { %238 = vst [vmem:[%s5439_s30 + $0x1c] sm:$0xf] %v237_v7  ;;  %v239_v8 = vld [vmem:[%s5435_s29 + $0x40] sm:$0xf]  ;;  %v241_v9 = vld [vmem:[%s5435_s29 + $0x48] sm:$0xf] }
  0x15   : > { %v243_v10 = vld [vmem:[%s5435_s29 + $0x50] sm:$0xf]  ;;  %240 = vst [vmem:[%s5439_s30 + $0x20] sm:$0xf] %v239_v8  ;;  %242 = vst [vmem:[%s5439_s30 + $0x24] sm:$0xf] %v241_v9 }
  0x16   : > { %244 = vst [vmem:[%s5439_s30 + $0x28] sm:$0xf] %v243_v10  ;;  %v245_v11 = vld [vmem:[%s5435_s29 + $0x58] sm:$0xf]  ;;  %v247_v12 = vld [vmem:[%s5435_s29 + $0x60] sm:$0xf] }
  0x17   : > { %v249_v13 = vld [vmem:[%s5435_s29 + $0x68] sm:$0xf]  ;;  %246 = vst [vmem:[%s5439_s30 + $0x2c] sm:$0xf] %v245_v11  ;;  %248 = vst [vmem:[%s5439_s30 + $0x30] sm:$0xf] %v247_v12 }
  0x18   : > { %250 = vst [vmem:[%s5439_s30 + $0x34] sm:$0xf] %v249_v13  ;;  %v251_v14 = vld [vmem:[%s5435_s29 + $0x70] sm:$0xf]  ;;  %v253_v15 = vld [vmem:[%s5435_s29 + $0x78] sm:$0xf] }
  0x19   : > { %v255_v16 = vld [vmem:[%s5435_s29 + $0x80] sm:$0xf]  ;;  %252 = vst [vmem:[%s5439_s30 + $0x38] sm:$0xf] %v251_v14  ;;  %254 = vst [vmem:[%s5439_s30 + $0x3c] sm:$0xf] %v253_v15 }
  0x1a   : > { %256 = vst [vmem:[%s5439_s30 + $0x40] sm:$0xf] %v255_v16  ;;  %v257_v17 = vld [vmem:[%s5435_s29 + $0x88] sm:$0xf]  ;;  %v259_v18 = vld [vmem:[%s5435_s29 + $0x90] sm:$0xf] }
  0x1b   : > { %v261_v19 = vld [vmem:[%s5435_s29 + $0x98] sm:$0xf]  ;;  %258 = vst [vmem:[%s5439_s30 + $0x44] sm:$0xf] %v257_v17  ;;  %260 = vst [vmem:[%s5439_s30 + $0x48] sm:$0xf] %v259_v18 }
  0x1c   : > { %262 = vst [vmem:[%s5439_s30 + $0x4c] sm:$0xf] %v261_v19  ;;  %v263_v20 = vld [vmem:[%s5435_s29 + $0xa0] sm:$0xf]  ;;  %v265_v21 = vld [vmem:[%s5435_s29 + $0xa8] sm:$0xf] }
  0x1d   : > { %v267_v22 = vld [vmem:[%s5435_s29 + $0xb0] sm:$0xf]  ;;  %264 = vst [vmem:[%s5439_s30 + $0x50] sm:$0xf] %v263_v20  ;;  %266 = vst [vmem:[%s5439_s30 + $0x54] sm:$0xf] %v265_v21 }
  0x1e   : > { %268 = vst [vmem:[%s5439_s30 + $0x58] sm:$0xf] %v267_v22  ;;  %v269_v23 = vld [vmem:[%s5435_s29 + $0xb8] sm:$0xf]  ;;  %v271_v24 = vld [vmem:[%s5435_s29 + $0xc0] sm:$0xf] }
  0x1f   : > { %v273_v25 = vld [vmem:[%s5435_s29 + $0xc8] sm:$0xf]  ;;  %270 = vst [vmem:[%s5439_s30 + $0x5c] sm:$0xf] %v269_v23  ;;  %272 = vst [vmem:[%s5439_s30 + $0x60] sm:$0xf] %v271_v24 }
  0x20   : > { %274 = vst [vmem:[%s5439_s30 + $0x64] sm:$0xf] %v273_v25  ;;  %v275_v26 = vld [vmem:[%s5435_s29 + $0xd0] sm:$0xf]  ;;  %v277_v27 = vld [vmem:[%s5435_s29 + $0xd8] sm:$0xf] }
  0x21   : > { %v279_v28 = vld [vmem:[%s5435_s29 + $0xe0] sm:$0xf]  ;;  %276 = vst [vmem:[%s5439_s30 + $0x68] sm:$0xf] %v275_v26  ;;  %278 = vst [vmem:[%s5439_s30 + $0x6c] sm:$0xf] %v277_v27 }
  0x22   : > { %280 = vst [vmem:[%s5439_s30 + $0x70] sm:$0xf] %v279_v28  ;;  %v281_v29 = vld [vmem:[%s5435_s29 + $0xe8] sm:$0xf]  ;;  %v283_v30 = vld [vmem:[%s5435_s29 + $0xf0] sm:$0xf] }
  0x23   : > { %v285_v31 = vld [vmem:[%s5435_s29 + $0xf8] sm:$0xf]  ;;  %282 = vst [vmem:[%s5439_s30 + $0x74] sm:$0xf] %v281_v29  ;;  %284 = vst [vmem:[%s5439_s30 + $0x78] sm:$0xf] %v283_v30 }
  0x24   : > { %286 = vst [vmem:[%s5439_s30 + $0x7c] sm:$0xf] %v285_v31 }
  0x25 PF: > { %p3917_p6 = scmp.ge.s32.totalorder %s5365_s19, 1  ;;  %p373_p7 = scmp.lt.s32.totalorder %s5365_s19, 3 }
  0x27   : > { %p374_p8 = pnand %p3917_p6, %p373_p7 }
  0x29   : > { %377 = sbr.rel (%p374_p8) target bundleno = 646 (0x286), region = 73 }
  0x2e   : > { %v5088_v32 = vld [vmem:[%s7239_s1 + $0x78] sm:$0xff]   ;;  %p420_p9 = scmp.lt.s32.totalorder %s5357_s17, 1  ;;  %v5089_v33 = vld [vmem:[%s7239_s1 + $0x70] sm:$0xff]   ;;  %v5090_v34 = vld [vmem:[%s7239_s1 + $0x68] sm:$0xff]   ;;  %vm629_vm0 = vcmask 1046528   ;;  %vm1193_vm1 = vcmask 1045504  }
  0x2f   : > { %4599 = vmatprep.subr.bf16.mxu0 %v5088_v32  ;;  %5031 = vmatprep.subr.bf16.mxu1 %v5088_v32  ;;  %v5091_v35 = vld [vmem:[%s7239_s1 + $0x60] sm:$0xff]   ;;  %v5092_v53 = vld [vmem:[%s7239_s1 + $0x58] sm:$0xff]   ;;  %v5093_v4 = vld [vmem:[%s7239_s1 + $0x50] sm:$0xff]  }
  0x30   : > { %s7388_s17 = smov (!%p420_p9, %s5357_s17), 1  ;;  %4600 = vmatpush3.bf16.msra.mxu0 %v5088_v32  ;;  %5039 = vmatpush3.bf16.msra.mxu1 %v5088_v32  ;;  %v5094_v14 = vld [vmem:[%s7239_s1 + $0x48] sm:$0xff]  }
  0x31   : > { %4601 = vmatprep.subr.bf16.mxu0 %v5089_v33  ;;  %5032 = vmatprep.subr.bf16.mxu1 %v5089_v33  ;;  %s5047_s11 = smul.u32 216, %s7388_s17 }
  0x33   : > { %s5522_s14 = scalar_lea.vmem %s7238_s0, %s5047_s11  ;;  %s4176_s11 = sshll.u32 %s7388_s17, 7 }
  0x34   : > { %4602 = vmatpush3.bf16.msra.mxu0 %v5089_v33  ;;  %5040 = vmatpush3.bf16.msra.mxu1 %v5089_v33  ;;  %v5528_v36 = vld [vmem:[%s5522_s14] sm:$0xff]   ;;  %v5531_v37 = vld [vmem:[%s5522_s14 + $0x8] ss:$12 sps:$4 sm:$0xff]   ;;  %v5544_v44 = vld [vmem:[%s5522_s14 + $0xc] sm:$0xff]   ;;  %s6926_s13 = scalar_lea.vmem %s7242_s4, %s4176_s11 }
  0x35   : > { %4603 = vmatprep.subr.bf16.mxu0 %v5090_v34  ;;  %5033 = vmatprep.subr.bf16.mxu1 %v5090_v34  ;;  %v5534_v38 = vld [vmem:[%s5522_s14 + $0x60] sm:$0xff]   ;;  %v495_v39 = vunpack.c.l.bf16 %v5528_v36  ;;  %v496_v40 = vunpack.c.h.bf16 %v5528_v36  ;;  %v497_v41 = vunpack.c.l.bf16 %v5531_v37  ;;  %v5540_v42 = vld [vmem:[%s5522_s14 + $0x68] ss:$12 sps:$4 sm:$0xff]   ;;  %v498_v47 = vunpack.c.l.bf16 %v5544_v44  ;;  %v5569_v59 = vld [vmem:[%s5522_s14 + $0x6c] sm:$0xff]  }
  0x36   : > { %v7260_v43 = vunpack.c.l.bf16 %v5534_v38  ;;  %v7259_v45 = vunpack.c.h.bf16 %v5534_v38  ;;  %v7256_v46 = vunpack.c.l.bf16 %v5540_v42  ;;  %v499_v48 = vunpack.c.h.bf16 %v5544_v44  ;;  %v5580_v2 = vld [vmem:[%s5522_s14 + $0x18] sm:$0xff]   ;;  %v5583_v3 = vld [vmem:[%s5522_s14 + $0x20] ss:$12 sps:$4 sm:$0xff]   ;;  %v5621_v23 = vld [vmem:[%s5522_s14 + $0x24] sm:$0xff]  }
  0x37   : > { %v630_v49 = vrot.slane %v495_v39, 1  ;;  %v631_v50 = vrot.slane %v496_v40, 1  ;;  %v633_v51 = vrot.slane %v497_v41, 1  ;;  %v7279_v56 = vunpack.c.h.bf16 %v5531_v37  ;;  %v5594_v9 = vld [vmem:[%s5522_s14 + $0x78] sm:$0xff]   ;;  %v5601_v13 = vld [vmem:[%s5522_s14 + $0x80] ss:$12 sps:$4 sm:$0xff]  }
  0x38   : > { %4604 = vmatpush3.bf16.msra.mxu0 %v5090_v34  ;;  %5041 = vmatpush3.bf16.msra.mxu1 %v5090_v34  ;;  %v670_v52 = vrot.slane %v7260_v43, 1  ;;  %v671_v54 = vrot.slane %v7259_v45, 1  ;;  %v673_v55 = vrot.slane %v7256_v46, 1  ;;  %v635_v0 = vrot.slane %v498_v47, 1  ;;  %v5627_v27 = vld [vmem:[%s5522_s14 + $0x84] sm:$0xff]  }
  0x39   : > { %4605 = vmatprep.subr.bf16.mxu0 %v5091_v35  ;;  %5034 = vmatprep.subr.bf16.mxu1 %v5091_v35  ;;  %v632_v57 = vsel %vm629_vm0, %v630_v49, %v631_v50  ;;  %v634_v58 = vsel %vm629_vm0, %v631_v50, %v633_v51  ;;  %v636_v1 = vrot.slane %v499_v48, 1  ;;  %v638_v5 = vrot.slane %v7279_v56, 1  ;;  %v5095_v49 = vld [vmem:[%s7239_s1 + $0x40] sm:$0xff]   ;;  %v5730_v46 = vld [vmem:[%s5522_s14 + $0x50] ss:$12 sps:$4 sm:$0xff]  }
  0x3a   : > { %v742_v60 = vpack.c.bf16 %v634_v58, %v632_v57  ;;  %v672_v61 = vsel %vm629_vm0, %v670_v52, %v671_v54  ;;  %v674_v62 = vsel %vm629_vm0, %v671_v54, %v673_v55  ;;  %v7255_v6 = vunpack.c.l.bf16 %v5569_v59  ;;  %v5646_v52 = vld [vmem:[%s5522_s14 + $0x30] sm:$0xff]  }
  0x3b   : > { %v5573_v63 = vpack.c.bf16 %v674_v62, %v672_v61  ;;  %v7254_v7 = vunpack.c.h.bf16 %v5569_v59  ;;  %v7253_v8 = vunpack.c.h.bf16 %v5540_v42  ;;  %v7276_v10 = vunpack.c.l.bf16 %v5580_v2  ;;  %v5655_v58 = vld [vmem:[%s5522_s14 + $0x90] sm:$0xff]  }
  0x3c   : > { %4606 = vmatpush3.bf16.msra.mxu0 %v5091_v35  ;;  %5042 = vmatpush3.bf16.msra.mxu1 %v5091_v35  ;;  %v7271_v11 = vunpack.c.h.bf16 %v5580_v2  ;;  %v7270_v12 = vunpack.c.l.bf16 %v5583_v3  ;;  %v675_v15 = vrot.slane %v7255_v6, 1  ;;  %v7245_v18 = vunpack.c.l.bf16 %v5594_v9 }
  0x3d   : > { %4607 = vmatprep.subr.bf16.mxu0 %v5092_v53  ;;  %5035 = vmatprep.subr.bf16.mxu1 %v5092_v53  ;;  %v676_v16 = vrot.slane %v7254_v7, 1  ;;  %v678_v17 = vrot.slane %v7253_v8, 1  ;;  %v640_v19 = vrot.slane %v7276_v10, 1  ;;  %v7244_v22 = vunpack.c.h.bf16 %v5594_v9  ;;  %v5723_v8 = vld [vmem:[%s5522_s14 + $0x48] sm:$0xff]   ;;  %v5104_v10 = vld [vmem:[%s7239_s1 + $0x18] sm:$0xff]  }
  0x3e   : > { %4615 = vmatprep.mubr.bf16.mxu0 %v742_v60  ;;  %4631 = vmatprep.mubr.bf16.mxu1 %v5573_v63  ;;  %v641_v20 = vrot.slane %v7271_v11, 1  ;;  %v643_v21 = vrot.slane %v7270_v12, 1  ;;  %v637_v24 = vsel %vm629_vm0, %v635_v0, %v636_v1  ;;  %v639_v25 = vsel %vm629_vm0, %v636_v1, %v638_v5  ;;  %v5665_v1 = vld [vmem:[%s5522_s14 + $0x98] ss:$12 sps:$4 sm:$0xff]  }
  0x3f   : > { %v7243_v26 = vunpack.c.l.bf16 %v5601_v13  ;;  %v677_v28 = vsel %vm629_vm0, %v675_v15, %v676_v16  ;;  %v679_v29 = vsel %vm629_vm0, %v676_v16, %v678_v17  ;;  %v680_v30 = vrot.slane %v7245_v18, 1  ;;  %v5097_v5 = vld [vmem:[%s7239_s1 + $0xb8] sm:$0xff]   ;;  %v5098_v18 = vld [vmem:[%s7239_s1 + $0x30] sm:$0xff]  }
  0x40   : > { %4608 = vmatpush3.bf16.msra.mxu0 %v5092_v53  ;;  %5043 = vmatpush3.bf16.msra.mxu1 %v5092_v53  ;;  %v681_v31 = vrot.slane %v7244_v22, 1  ;;  %v642_v32 = vsel %vm629_vm0, %v640_v19, %v641_v20  ;;  %v644_v33 = vsel %vm629_vm0, %v641_v20, %v643_v21  ;;  %v7264_v35 = vunpack.c.l.bf16 %v5621_v23  ;;  %v5649_v53 = vld [vmem:[%s5522_s14 + $0x38] ss:$12 sps:$4 sm:$0xff]   ;;  %v5679_v20 = vld [vmem:[%s5522_s14 + $0x3c] sm:$0xff]  }
  0x41   : > { %4609 = vmatprep.subr.bf16.mxu0 %v5093_v4  ;;  %5036 = vmatprep.subr.bf16.mxu1 %v5093_v4  ;;  %v683_v34 = vrot.slane %v7243_v26, 1  ;;  %v7263_v50 = vunpack.c.h.bf16 %v5621_v23  ;;  %v7261_v51 = vunpack.c.h.bf16 %v5583_v3  ;;  %v7248_v54 = vunpack.c.l.bf16 %v5627_v27  ;;  %v5702_v22 = vld [vmem:[%s5522_s14 + $0x9c] sm:$0xff]  }
  0x42   : > { %v7247_v55 = vunpack.c.h.bf16 %v5627_v27  ;;  %v7246_v57 = vunpack.c.h.bf16 %v5601_v13  ;;  %v5657_v60 = vpack.c.bf16 %v639_v25, %v637_v24  ;;  %v5659_v61 = vpack.c.bf16 %v679_v29, %v677_v28 }
  0x43   : > { %v5661_v62 = vpack.c.bf16 %v644_v33, %v642_v32  ;;  %v682_v0 = vsel %vm629_vm0, %v680_v30, %v681_v31  ;;  %v684_v15 = vsel %vm629_vm0, %v681_v31, %v683_v34  ;;  %v645_v16 = vrot.slane %v7264_v35, 1 }
  0x44   : > { %4610 = vmatpush3.bf16.msra.mxu0 %v5093_v4  ;;  %5044 = vmatpush3.bf16.msra.mxu1 %v5093_v4  ;;  %v5096_v4 = vld [vmem:[%s7239_s1 + $0x38] sm:$0xff]   ;;  %v7251_v17 = vunpack.c.l.bf16 %v5646_v52  ;;  %v7250_v19 = vunpack.c.h.bf16 %v5646_v52  ;;  %v646_v21 = vrot.slane %v7263_v50, 1  ;;  %v648_v24 = vrot.slane %v7261_v51, 1  ;;  %v5738_v51 = vld [vmem:[%s5522_s14 + $0xa8] sm:$0xff]  }
  0x45   : > { %4611 = vmatprep.subr.bf16.mxu0 %v5094_v14  ;;  %5037 = vmatprep.subr.bf16.mxu1 %v5094_v14  ;;  %v7249_v25 = vunpack.c.l.bf16 %v5649_v53  ;;  %v7252_v28 = vunpack.c.l.bf16 %v5655_v58  ;;  %v685_v29 = vrot.slane %v7248_v54, 1  ;;  %v686_v30 = vrot.slane %v7247_v55, 1 }
  0x46   : > { %v650_v31 = vrot.slane %v7251_v17, 1  ;;  %v651_v32 = vrot.slane %v7250_v19, 1  ;;  %v7257_v34 = vunpack.c.h.bf16 %v5655_v58  ;;  %v7258_v26 = vunpack.c.l.bf16 %v5665_v1  ;;  %v5099_v19 = vld [vmem:[%s7239_s1 + $0xb0] sm:$0xff]  }
  0x47   : > { %v653_v33 = vrot.slane %v7249_v25, 1  ;;  %v690_v55 = vrot.slane %v7252_v28, 1  ;;  %v7262_v54 = vunpack.c.l.bf16 %v5679_v20  ;;  %v7266_v25 = vunpack.c.h.bf16 %v5679_v20 }
  0x48   : > { %4612 = vmatpush3.bf16.msra.mxu0 %v5094_v14  ;;  %5045 = vmatpush3.bf16.msra.mxu1 %v5094_v14  ;;  %v688_v14 = vrot.slane %v7246_v57, 1  ;;  %v5707_v57 = vpack.c.bf16 %v684_v15, %v682_v0  ;;  %v647_v17 = vsel %vm629_vm0, %v645_v16, %v646_v21  ;;  %v691_v0 = vrot.slane %v7257_v34, 1 }
  0x49   : > { %4613 = vmatprep.subr.bf16.mxu0 %v5095_v49  ;;  %5038 = vmatprep.subr.bf16.mxu1 %v5095_v49  ;;  %v693_v15 = vrot.slane %v7258_v26, 1  ;;  %v7265_v28 = vunpack.c.h.bf16 %v5649_v53  ;;  %v687_v7 = vsel %vm629_vm0, %v685_v29, %v686_v30  ;;  %v7269_v6 = vunpack.c.l.bf16 %v5702_v22  ;;  %v5101_v29 = vld [vmem:[%s7239_s1 + $0xa8] sm:$0xff]  }
  0x4a   : > { %v689_v16 = vsel %vm629_vm0, %v686_v30, %v688_v14  ;;  %v652_v34 = vsel %vm629_vm0, %v650_v31, %v651_v32  ;;  %v654_v26 = vsel %vm629_vm0, %v651_v32, %v653_v33  ;;  %v655_v45 = vrot.slane %v7262_v54, 1 }
  0x4b   : > { %v7268_v43 = vunpack.c.h.bf16 %v5702_v22  ;;  %v692_v30 = vsel %vm629_vm0, %v690_v55, %v691_v0  ;;  %v694_v14 = vsel %vm629_vm0, %v691_v0, %v693_v15  ;;  %v656_v31 = vrot.slane %v7266_v25, 1  ;;  %v5102_v25 = vld [vmem:[%s7239_s1 + $0x20] sm:$0xff]  }
  0x4c   : > { %4614 = vmatpush3.bf16.msra.mxu0 %v5095_v49  ;;  %5046 = vmatpush3.bf16.msra.mxu1 %v5095_v49  ;;  %v649_v49 = vsel %vm629_vm0, %v646_v21, %v648_v24  ;;  %v5741_v21 = vld [vmem:[%s5522_s14 + $0xb0] ss:$12 sps:$4 sm:$0xff]   ;;  %v5100_v24 = vld [vmem:[%s7239_s1 + $0x28] sm:$0xff]   ;;  %v7267_v32 = vunpack.c.h.bf16 %v5665_v1  ;;  %v658_v33 = vrot.slane %v7265_v28, 1  ;;  %v695_v54 = vrot.slane %v7269_v6, 1 }
  0x4d   : > { %4647 = vmatprep.subr.bf16.mxu1 %v5096_v4  ;;  %4695 = vmatprep.subr.bf16.mxu0 %v5097_v5  ;;  %v7275_v50 = vunpack.c.l.bf16 %v5723_v8  ;;  %v7272_v35 = vunpack.c.h.bf16 %v5723_v8  ;;  %v696_v55 = vrot.slane %v7268_v43, 1  ;;  %v7273_v0 = vunpack.c.l.bf16 %v5738_v51 }
  0x4e   : > { %v5770_v15 = vpack.c.bf16 %v649_v49, %v647_v17  ;;  %v5772_v28 = vpack.c.bf16 %v689_v16, %v687_v7  ;;  %v5780_v43 = vpack.c.bf16 %v654_v26, %v652_v34  ;;  %v5782_v6 = vpack.c.bf16 %v694_v14, %v692_v30  ;;  %v5787_v17 = vld [vmem:[%s5522_s14 + $0x54] sm:$0xff]  }
  0x4f   : > { %4616 = vmatmul.mubr.bf16.vlgmr.msra.gmra.mxu0 %v5657_v60  ;;  %4632 = vmatmul.mubr.bf16.vlgmr.msra.gmra.mxu1 %v5659_v61  ;;  %v7278_v12 = vunpack.c.h.bf16 %v5738_v51  ;;  %v7277_v11 = vunpack.c.l.bf16 %v5741_v21  ;;  %v5790_v7 = vld [vmem:[%s5522_s14 + $0xb4] sm:$0xff]   ;;  %v657_v49 = vsel %vm629_vm0, %v655_v45, %v656_v31  ;;  %v659_v16 = vsel %vm629_vm0, %v656_v31, %v658_v33 }
  0x50   : > { %4648 = vmatpush3.bf16.msra.mxu1 %v5096_v4  ;;  %4696 = vmatpush3.bf16.msra.mxu0 %v5097_v5  ;;  %v698_v4 = vrot.slane %v7267_v32, 1  ;;  %v7274_v5 = vunpack.c.l.bf16 %v5730_v46  ;;  %v5103_v32 = vld [vmem:[%s7239_s1 + $0xa0] sm:$0xff]   ;;  %v660_v26 = vrot.slane %v7275_v50, 1  ;;  %v661_v34 = vrot.slane %v7272_v35, 1 }
  0x51   : > { %4649 = vmatprep.subr.bf16.mxu1 %v5098_v18  ;;  %4697 = vmatprep.subr.bf16.mxu0 %v5099_v19  ;;  %v697_v30 = vsel %vm629_vm0, %v695_v54, %v696_v55  ;;  %v700_v45 = vrot.slane %v7273_v0, 1  ;;  %v7282_v31 = vunpack.c.h.bf16 %v5787_v17  ;;  %v7281_v33 = vunpack.c.h.bf16 %v5730_v46 }
  0x52   : > { %4619 = vmatprep.mubr.bf16.mxu0 %v5661_v62  ;;  %4635 = vmatprep.mubr.bf16.mxu1 %v5707_v57  ;;  %v699_v14 = vsel %vm629_vm0, %v696_v55, %v698_v4  ;;  %v7283_v35 = vunpack.c.l.bf16 %v5790_v7  ;;  %v701_v54 = vrot.slane %v7278_v12, 1  ;;  %v703_v55 = vrot.slane %v7277_v11, 1  ;;  %v5105_v11 = vld [vmem:[%s7239_s1 + $0x98] sm:$0xff]  }
  0x53   : > { %v541_v4 = vunpack.c.h.bf16 %v5790_v7  ;;  %v7284_v0 = vunpack.c.h.bf16 %v5741_v21  ;;  %v5818_v50 = vpack.c.bf16 %v699_v14, %v697_v30  ;;  %v5106_v30 = vld [vmem:[%s7239_s1 + $0x10] sm:$0xff]   ;;  %v662_v14 = vsel %vm629_vm0, %v660_v26, %v661_v34 }
  0x54   : > { %4650 = vmatpush3.bf16.msra.mxu1 %v5098_v18  ;;  %4698 = vmatpush3.bf16.msra.mxu0 %v5099_v19  ;;  %v663_v18 = vrot.slane %v7274_v5, 1  ;;  %v7280_v19 = vunpack.c.l.bf16 %v5787_v17  ;;  %v5816_v5 = vpack.c.bf16 %v659_v16, %v657_v49  ;;  %v668_v49 = vrot.slane %v7281_v33, 1  ;;  %v5107_v26 = vld [vmem:[%s7239_s1 + $0x90] sm:$0xff]  }
  0x55   : > { %4651 = vmatprep.subr.bf16.mxu1 %v5100_v24  ;;  %4699 = vmatprep.subr.bf16.mxu0 %v5101_v29  ;;  %v705_v16 = vrot.slane %v7283_v35, 1  ;;  %v702_v56 = vsel %vm629_vm0, %v700_v45, %v701_v54  ;;  %v706_v33 = vrot.slane %v541_v4, 1  ;;  %v1197_v45 = vrot.slane %v497_v41, 2 }
  0x56   : > { %v664_v12 = vsel %vm629_vm0, %v661_v34, %v663_v18  ;;  %v1195_v18 = vrot.slane %v496_v40, 2  ;;  %v5109_v40 = vld [vmem:[%s7239_s1 + $0x88] sm:$0xff]   ;;  %v1200_v41 = vrot.slane %v499_v48, 2 }
  0x57   : > { %4620 = vmatmul.mubr.bf16.gmra.mxu0 %v5770_v15  ;;  %4636 = vmatmul.mubr.bf16.gmra.mxu1 %v5772_v28  ;;  %v5850_v35 = vpack.c.bf16 %v664_v12, %v662_v14  ;;  %v707_v12 = vsel %vm629_vm0, %v705_v16, %v706_v33  ;;  %v5111_v16 = vld [vmem:[%s7239_s1 + $0x80] sm:$0xff]   ;;  %v7292_v14 = vunpack.c.l.bf16 %v5583_v3 }
  0x58   : > { %4652 = vmatpush3.bf16.msra.mxu1 %v5100_v24  ;;  %4700 = vmatpush3.bf16.msra.mxu0 %v5101_v29  ;;  %v665_v24 = vrot.slane %v7280_v19, 1  ;;  %v666_v29 = vrot.slane %v7282_v31, 1  ;;  %v704_v19 = vsel %vm629_vm0, %v701_v54, %v703_v55  ;;  %v708_v31 = vrot.slane %v7284_v0, 1  ;;  %v5108_v54 = vld [vmem:[%s7239_s1 + $0x8] sm:$0xff]  }
  0x59   : > { %4653 = vmatprep.subr.bf16.mxu1 %v5102_v25  ;;  %4701 = vmatprep.subr.bf16.mxu0 %v5103_v32  ;;  %v5852_v34 = vpack.c.bf16 %v704_v19, %v702_v56  ;;  %v1198_v55 = vsel %vm1193_vm1, %v1195_v18, %v1197_v45 }
  0x5a   : > { %4623 = vmatprep.mubr.bf16.mxu0 %v5780_v43  ;;  %4639 = vmatprep.mubr.bf16.mxu1 %v5782_v6  ;;  %v669_v56 = vsel %vm629_vm0, %v666_v29, %v668_v49  ;;  %v709_v19 = vsel %vm629_vm0, %v706_v33, %v708_v31  ;;  %v5110_v49 = vld [vmem:[%s7239_s1] sm:$0xff]  }
  0x5b   : > { %v5882_v33 = vpack.c.bf16 %v709_v19, %v707_v12  ;;  %v5114_v19 = vld [vmem:[%s7239_s1 + $0xf8] sm:$0xff]  }
  0x5c   : > { %4654 = vmatpush3.bf16.msra.mxu1 %v5102_v25  ;;  %4702 = vmatpush3.bf16.msra.mxu0 %v5103_v32  ;;  %v667_v25 = vsel %vm629_vm0, %v665_v24, %v666_v29  ;;  %v1194_v32 = vrot.slane %v495_v39, 2  ;;  %v1199_v39 = vrot.slane %v498_v47, 2  ;;  %v7290_v24 = vunpack.c.l.bf16 %v5580_v2 }
  0x5d   : > { %4655 = vmatprep.subr.bf16.mxu1 %v5104_v10  ;;  %4703 = vmatprep.subr.bf16.mxu0 %v5105_v11  ;;  %v5880_v31 = vpack.c.bf16 %v669_v56, %v667_v25  ;;  %v7293_v25 = vunpack.c.l.bf16 %v5621_v23 }
  0x5e   : > { %v1196_v47 = vsel %vm1193_vm1, %v1194_v32, %v1195_v18  ;;  %v1204_v48 = vrot.slane %v7290_v24, 2  ;;  %v7294_v18 = vunpack.c.h.bf16 %v5621_v23  ;;  %v1201_v56 = vsel %vm1193_vm1, %v1199_v39, %v1200_v41 }
  0x5f   : > { %4624 = vmatmul.mubr.bf16.gmra.mxu0 %v5816_v5  ;;  %4640 = vmatmul.mubr.bf16.gmra.mxu1 %v5818_v50  ;;  %v1209_v32 = vrot.slane %v7293_v25, 2  ;;  %v7298_v39 = vunpack.c.l.bf16 %v5540_v42 }
  0x60   : > { %4656 = vmatpush3.bf16.msra.mxu1 %v5104_v10  ;;  %4704 = vmatpush3.bf16.msra.mxu0 %v5105_v11  ;;  %v7289_v10 = vunpack.c.h.bf16 %v5531_v37  ;;  %v7291_v37 = vunpack.c.h.bf16 %v5580_v2  ;;  %v1210_v45 = vrot.slane %v7294_v18, 2  ;;  %v7299_v18 = vunpack.c.l.bf16 %v5569_v59 }
  0x61   : > { %4657 = vmatprep.subr.bf16.mxu1 %v5106_v30  ;;  %4705 = vmatprep.subr.bf16.mxu0 %v5107_v26 }
  0x62   : > { %v1202_v11 = vrot.slane %v7289_v10, 2  ;;  %4627 = vmatprep.mubr.bf16.mxu0 %v5850_v35  ;;  %4643 = vmatprep.mubr.bf16.mxu1 %v5852_v34  ;;  %v1205_v29 = vrot.slane %v7291_v37, 2  ;;  %v7295_v10 = vunpack.c.h.bf16 %v5583_v3  ;;  %v5115_v3 = vld [vmem:[%s7239_s1 + $0x138] sm:$0xff]  }
  0x64   : > { %4658 = vmatpush3.bf16.msra.mxu1 %v5106_v30  ;;  %4706 = vmatpush3.bf16.msra.mxu0 %v5107_v26  ;;  %v1207_v30 = vrot.slane %v7292_v14, 2  ;;  %v1306_v26 = vpack.c.bf16 %v1198_v55, %v1196_v47  ;;  %v1203_v12 = vsel %vm1193_vm1, %v1200_v41, %v1202_v11  ;;  %v1212_v47 = vrot.slane %v7295_v10, 2 }
  0x65   : > { %4659 = vmatprep.subr.bf16.mxu1 %v5108_v54  ;;  %4707 = vmatprep.subr.bf16.mxu0 %v5109_v40  ;;  %v7296_v55 = vunpack.c.l.bf16 %v5534_v38  ;;  %v1206_v37 = vsel %vm1193_vm1, %v1204_v48, %v1205_v29  ;;  %v7297_v14 = vunpack.c.h.bf16 %v5534_v38  ;;  %v1237_v41 = vrot.slane %v7298_v39, 2 }
  0x66   : > { %v1208_v11 = vsel %vm1193_vm1, %v1205_v29, %v1207_v30  ;;  %v7301_v38 = vunpack.c.h.bf16 %v5540_v42  ;;  %v7303_v30 = vunpack.c.h.bf16 %v5646_v52 }
  0x67   : > { %4628 = vmatmul.mubr.bf16.gmra.mxu0 %v5880_v31  ;;  %4644 = vmatmul.mubr.bf16.gmra.mxu1 %v5882_v33  ;;  %v1234_v24 = vrot.slane %v7296_v55, 2  ;;  %v1235_v25 = vrot.slane %v7297_v14, 2  ;;  %v5929_v55 = vpack.c.bf16 %v1203_v12, %v1201_v56  ;;  %v7302_v14 = vunpack.c.l.bf16 %v5646_v52 }
  0x68   : > { %4660 = vmatpush3.bf16.msra.mxu1 %v5108_v54  ;;  %4708 = vmatpush3.bf16.msra.mxu0 %v5109_v40  ;;  %v1239_v54 = vrot.slane %v7299_v18, 2  ;;  %v7300_v40 = vunpack.c.h.bf16 %v5569_v59  ;;  %v1242_v10 = vrot.slane %v7301_v38, 2  ;;  %v1215_v18 = vrot.slane %v7303_v30, 2 }
  0x69   : > { %4661 = vmatprep.subr.bf16.mxu1 %v5110_v49  ;;  %4709 = vmatprep.subr.bf16.mxu0 %v5111_v16  ;;  %v1214_v39 = vrot.slane %v7302_v14, 2  ;;  %v1236_v0 = vsel %vm1193_vm1, %v1234_v24, %v1235_v25  ;;  %v1238_v29 = vsel %vm1193_vm1, %v1235_v25, %v1237_v41  ;;  %v7305_v24 = vunpack.c.l.bf16 %v5627_v27 }
  0x6a   : > { %v1240_v48 = vrot.slane %v7300_v40, 2  ;;  %4663 = vmatprep.mubr.bf16.mxu1 %v5528_v36  ;;  %4711 = vmatprep.mubr.bf16.mxu0 %v1306_v26  ;;  %v5937_v59 = vpack.c.bf16 %v1238_v29, %v1236_v0  ;;  %v5941_v36 = vpack.c.bf16 %v1208_v11, %v1206_v37  ;;  %v7304_v26 = vunpack.c.l.bf16 %v5649_v53  ;;  %v5118_v11 = vld [vmem:[%s7239_s1 + $0xf0] sm:$0xff]  }
  0x6b   : > { %v1249_v25 = vrot.slane %v7305_v24, 2  ;;  %v1211_v0 = vsel %vm1193_vm1, %v1209_v32, %v1210_v45  ;;  %v1213_v41 = vsel %vm1193_vm1, %v1210_v45, %v1212_v47  ;;  %v5122_v32 = vld [vmem:[%s7239_s1 + $0xe8] sm:$0xff]   ;;  %v7308_v14 = vunpack.c.l.bf16 %v5679_v20 }
  0x6c   : > { %v1241_v42 = vsel %vm1193_vm1, %v1239_v54, %v1240_v48  ;;  %v1243_v40 = vsel %vm1193_vm1, %v1240_v48, %v1242_v10  ;;  %4662 = vmatpush3.bf16.msra.mxu1 %v5110_v49  ;;  %4710 = vmatpush3.bf16.msra.mxu0 %v5111_v16  ;;  %v1217_v56 = vrot.slane %v7304_v26, 2  ;;  %v7306_v54 = vunpack.c.h.bf16 %v5627_v27  ;;  %v5119_v48 = vld [vmem:[%s7239_s1 + $0x130] sm:$0xff]   ;;  %v5123_v45 = vld [vmem:[%s7239_s1 + $0x128] sm:$0xff]  }
  0x6d   : > { %v5945_v12 = vpack.c.bf16 %v1243_v40, %v1241_v42  ;;  %4743 = vmatprep.subr.bf16.mxu1 %v5114_v19  ;;  %4791 = vmatprep.subr.bf16.mxu0 %v5115_v3  ;;  %v7307_v16 = vunpack.c.h.bf16 %v5601_v13  ;;  %v5971_v10 = vpack.c.bf16 %v1213_v41, %v1211_v0  ;;  %v1219_v29 = vrot.slane %v7308_v14, 2 }
  0x6e   : > { %v1250_v49 = vrot.slane %v7306_v54, 2  ;;  %v7309_v42 = vunpack.c.l.bf16 %v5702_v22  ;;  %v1216_v26 = vsel %vm1193_vm1, %v1214_v39, %v1215_v18  ;;  %v1218_v24 = vsel %vm1193_vm1, %v1215_v18, %v1217_v56 }
  0x6f   : > { %v1252_v37 = vrot.slane %v7307_v16, 2  ;;  %4664 = vmatmul.mubr.bf16.vlgmr.msra.gmra.mxu1 %v5544_v44  ;;  %4712 = vmatmul.mubr.bf16.vlgmr.msra.gmra.mxu0 %v5929_v55  ;;  %v7312_v41 = vunpack.c.h.bf16 %v5679_v20  ;;  %v7315_v39 = vunpack.c.h.bf16 %v5723_v8  ;;  %v7316_v14 = vunpack.c.l.bf16 %v5790_v7 }
  0x70   : > { %v1251_v47 = vsel %vm1193_vm1, %v1249_v25, %v1250_v49  ;;  %4744 = vmatpush3.bf16.msra.mxu1 %v5114_v19  ;;  %4792 = vmatpush3.bf16.msra.mxu0 %v5115_v3  ;;  %v1259_v40 = vrot.slane %v7309_v42, 2  ;;  %v7310_v19 = vunpack.c.h.bf16 %v5702_v22  ;;  %v7311_v25 = vunpack.c.h.bf16 %v5665_v1 }
  0x71   : > { %v1253_v38 = vsel %vm1193_vm1, %v1250_v49, %v1252_v37  ;;  %4667 = vmatprep.mubr.bf16.mxu1 %v5580_v2  ;;  %4715 = vmatprep.mubr.bf16.mxu0 %v5941_v36  ;;  %v1220_v54 = vrot.slane %v7312_v41, 2  ;;  %v7313_v49 = vunpack.c.h.bf16 %v5649_v53  ;;  %v7314_v37 = vunpack.c.l.bf16 %v5723_v8 }
  0x72   : > { %v5975_v30 = vpack.c.bf16 %v1253_v38, %v1251_v47  ;;  %v1260_v3 = vrot.slane %v7310_v19, 2  ;;  %v1262_v0 = vrot.slane %v7311_v25, 2  ;;  %4745 = vmatprep.subr.bf16.mxu1 %v5118_v11  ;;  %4793 = vmatprep.subr.bf16.mxu0 %v5119_v48  ;;  %v1225_v18 = vrot.slane %v7315_v39, 2 }
  0x73   : > { %v1222_v16 = vrot.slane %v7313_v49, 2  ;;  %v1224_v47 = vrot.slane %v7314_v37, 2  ;;  %v1269_v42 = vrot.slane %v7316_v14, 2  ;;  %v1270_v19 = vrot.slane %v541_v4, 2  ;;  %v5126_v49 = vld [vmem:[%s7239_s1 + $0xe0] sm:$0xff]  }
  0x74   : > { %v1261_v56 = vsel %vm1193_vm1, %v1259_v40, %v1260_v3  ;;  %v1263_v38 = vsel %vm1193_vm1, %v1260_v3, %v1262_v0  ;;  %4746 = vmatpush3.bf16.msra.mxu1 %v5118_v11  ;;  %4794 = vmatpush3.bf16.msra.mxu0 %v5119_v48  ;;  %v6001_v53 = vpack.c.bf16 %v1218_v24, %v1216_v26  ;;  %v7317_v25 = vunpack.c.l.bf16 %v5730_v46  ;;  %v5127_v11 = vld [vmem:[%s7239_s1 + $0x120] sm:$0xff]  }
  0x75   : > { %v6008_v40 = vpack.c.bf16 %v1263_v38, %v1261_v56  ;;  %v7318_v3 = vunpack.c.h.bf16 %v5741_v21  ;;  %4747 = vmatprep.subr.bf16.mxu1 %v5122_v32  ;;  %4795 = vmatprep.subr.bf16.mxu0 %v5123_v45  ;;  %v1271_v4 = vsel %vm1193_vm1, %v1269_v42, %v1270_v19  ;;  %v1221_v26 = vsel %vm1193_vm1, %v1219_v29, %v1220_v54  ;;  %v5130_v29 = vld [vmem:[%s7239_s1 + $0xd8] sm:$0xff]  }
  0x76   : > { %v1227_v41 = vrot.slane %v7317_v25, 2  ;;  %v1223_v37 = vsel %vm1193_vm1, %v1220_v54, %v1222_v16  ;;  %v7319_v39 = vunpack.c.l.bf16 %v5787_v17  ;;  %v7320_v38 = vunpack.c.h.bf16 %v5787_v17  ;;  %v5131_v25 = vld [vmem:[%s7239_s1 + $0x118] sm:$0xff]  }
  0x77   : > { %v1272_v0 = vrot.slane %v7318_v3, 2  ;;  %4668 = vmatmul.mubr.bf16.gmra.mxu1 %v5621_v23  ;;  %4716 = vmatmul.mubr.bf16.gmra.mxu0 %v5971_v10  ;;  %v7321_v42 = vunpack.c.h.bf16 %v5730_v46  ;;  %v1226_v54 = vsel %vm1193_vm1, %v1224_v47, %v1225_v18  ;;  %v6039_v3 = vpack.c.bf16 %v1223_v37, %v1221_v26  ;;  %v5138_v47 = vld [vmem:[%s7239_s1 + $0xc8] sm:$0xff]  }
  0x78   : > { %4671 = vmatprep.mubr.bf16.mxu1 %v5646_v52  ;;  %4719 = vmatprep.mubr.bf16.mxu0 %v6001_v53  ;;  %v1229_v56 = vrot.slane %v7319_v39, 2  ;;  %v1230_v14 = vrot.slane %v7320_v38, 2  ;;  %v1228_v16 = vsel %vm1193_vm1, %v1225_v18, %v1227_v41  ;;  %v5139_v18 = vld [vmem:[%s7239_s1 + $0x108] sm:$0xff]   ;;  %v7323_v26 = vunpack.c.h.bf16 %v5594_v9  ;;  %v5142_v38 = vld [vmem:[%s7239_s1 + $0xc0] sm:$0xff]  }
  0x79   : > { %v1273_v48 = vsel %vm1193_vm1, %v1270_v19, %v1272_v0  ;;  %v1232_v19 = vrot.slane %v7321_v42, 2  ;;  %4748 = vmatpush3.bf16.msra.mxu1 %v5122_v32  ;;  %4796 = vmatpush3.bf16.msra.mxu0 %v5123_v45  ;;  %v6041_v46 = vpack.c.bf16 %v1228_v16, %v1226_v54  ;;  %v5134_v0 = vld [vmem:[%s7239_s1 + $0xd0] sm:$0xff]   ;;  %v7324_v39 = vunpack.c.l.bf16 %v5601_v13 }
  0x7a   : > { %v6020_v24 = vpack.c.bf16 %v1273_v48, %v1271_v4  ;;  %4749 = vmatprep.subr.bf16.mxu1 %v5126_v49  ;;  %4797 = vmatprep.subr.bf16.mxu0 %v5127_v11  ;;  %v5135_v4 = vld [vmem:[%s7239_s1 + $0x110] sm:$0xff]   ;;  %v1231_v32 = vsel %vm1193_vm1, %v1229_v56, %v1230_v14  ;;  %v1245_v37 = vrot.slane %v7323_v26, 2  ;;  %v7325_v16 = vunpack.c.l.bf16 %v5655_v58 }
  0x7b   : > { %v1233_v45 = vsel %vm1193_vm1, %v1230_v14, %v1232_v19  ;;  %v1247_v56 = vrot.slane %v7324_v39, 2  ;;  %v5143_v14 = vld [vmem:[%s7239_s1 + $0x100] sm:$0xff]   ;;  %v5144_v19 = vld [vmem:[%s7239_s1 + $0x178] sm:$0xff]  }
  0x7c   : > { %v6061_v41 = vpack.c.bf16 %v1233_v45, %v1231_v32  ;;  %v7327_v45 = vunpack.c.l.bf16 %v5665_v1 }
  0x7d   : > { %4750 = vmatpush3.bf16.msra.mxu1 %v5126_v49  ;;  %4798 = vmatpush3.bf16.msra.mxu0 %v5127_v11  ;;  %v6064_v49 = vld [vmem:[%s5522_s14 + $0x60] sm:$0xff]   ;;  %v7322_v11 = vunpack.c.l.bf16 %v5594_v9  ;;  %v1248_v42 = vsel %vm1193_vm1, %v1245_v37, %v1247_v56  ;;  %v7330_v56 = vunpack.c.l.bf16 %v5741_v21 }
  0x7e   : > { %4751 = vmatprep.subr.bf16.mxu1 %v5130_v29  ;;  %4799 = vmatprep.subr.bf16.mxu0 %v5131_v25 }
  0x7f   : > { %4672 = vmatmul.mubr.bf16.gmra.mxu1 %v5679_v20  ;;  %4720 = vmatmul.mubr.bf16.gmra.mxu0 %v6039_v3  ;;  %v1244_v48 = vrot.slane %v7322_v11, 2 }
  0x80   : > { %4675 = vmatprep.mubr.bf16.mxu1 %v5723_v8  ;;  %4723 = vmatprep.mubr.bf16.mxu0 %v6041_v46 }
  0x81   : > { %4752 = vmatpush3.bf16.msra.mxu1 %v5130_v29  ;;  %4800 = vmatpush3.bf16.msra.mxu0 %v5131_v25  ;;  %v1246_v13 = vsel %vm1193_vm1, %v1244_v48, %v1245_v37  ;;  %v5145_v29 = vld [vmem:[%s7239_s1 + $0x1b8] sm:$0xff]   ;;  %v6091_v25 = vld [vmem:[%s5522_s14 + $0x6c] sm:$0xff]   ;;  %v7328_v48 = vunpack.c.l.bf16 %v5738_v51  ;;  %v7329_v37 = vunpack.c.h.bf16 %v5738_v51 }
  0x82   : > { %4753 = vmatprep.subr.bf16.mxu1 %v5134_v0  ;;  %4801 = vmatprep.subr.bf16.mxu0 %v5135_v4  ;;  %v6093_v54 = vpack.c.bf16 %v1248_v42, %v1246_v13  ;;  %v6122_v42 = vld [vmem:[%s5522_s14 + $0xc0] sm:$0xff]  }
  0x83   : > { %v1264_v26 = vrot.slane %v7328_v48, 2  ;;  %v1265_v39 = vrot.slane %v7329_v37, 2  ;;  %v543_v21 = vunpack.c.l.bf16 %v6122_v42  ;;  %v5146_v37 = vld [vmem:[%s7239_s1 + $0x170] sm:$0xff]  }
  0x85   : > { %4754 = vmatpush3.bf16.msra.mxu1 %v5134_v0  ;;  %4802 = vmatpush3.bf16.msra.mxu0 %v5135_v4  ;;  %v1254_v0 = vrot.slane %v7325_v16, 2  ;;  %v7326_v4 = vunpack.c.h.bf16 %v5655_v58 }
  0x86   : > { %4755 = vmatprep.subr.bf16.mxu1 %v5138_v47  ;;  %4803 = vmatprep.subr.bf16.mxu0 %v5139_v18 }
  0x87   : > { %4676 = vmatmul.mubr.bf16.gmra.mxu1 %v5787_v17  ;;  %4724 = vmatmul.mubr.bf16.gmra.mxu0 %v6061_v41  ;;  %v1255_v32 = vrot.slane %v7326_v4, 2  ;;  %v544_v4 = vunpack.c.h.bf16 %v6122_v42 }
  0x88   : > { %4679 = vmatprep.mubr.bf16.mxu1 %v6064_v49  ;;  %4727 = vmatprep.mubr.bf16.mxu0 %v5937_v59 }
  0x89   : > { %4756 = vmatpush3.bf16.msra.mxu1 %v5138_v47  ;;  %4804 = vmatpush3.bf16.msra.mxu0 %v5139_v18  ;;  %v1257_v47 = vrot.slane %v7327_v45, 2  ;;  %v1256_v18 = vsel %vm1193_vm1, %v1254_v0, %v1255_v32  ;;  %v6127_v0 = vld [vmem:[%s5522_s14 + $0xc8] sm:$0xf]  ;;  %v2109_v45 = vrot.slane %v544_v4, 2 }
  0x8a   : > { %4757 = vmatprep.subr.bf16.mxu1 %v5142_v38  ;;  %4805 = vmatprep.subr.bf16.mxu0 %v5143_v14 }
  0x8b   : > { %v1258_v11 = vsel %vm1193_vm1, %v1255_v32, %v1257_v47  ;;  %v2108_v32 = vrot.slane %v543_v21, 2  ;;  %v545_v47 = vunpack.c.l.bf16 %v6127_v0  ;;  %v5163_v0 = vld [vmem:[%s7239_s1 + $0x1f0] sm:$0xff]  }
  0x8c   : > { %v6107_v1 = vpack.c.bf16 %v1258_v11, %v1256_v18 }
  0x8d   : > { %4758 = vmatpush3.bf16.msra.mxu1 %v5142_v38  ;;  %4806 = vmatpush3.bf16.msra.mxu0 %v5143_v14  ;;  %v1267_v38 = vrot.slane %v7330_v56, 2  ;;  %v1266_v14 = vsel %vm1193_vm1, %v1264_v26, %v1265_v39  ;;  %v2111_v18 = vrot.slane %v545_v47, 2  ;;  %v2110_v11 = vsel %vm1193_vm1, %v2108_v32, %v2109_v45  ;;  %v5152_v56 = vld [vmem:[%s7239_s1 + $0x158] sm:$0xff]   ;;  %v5156_v32 = vld [vmem:[%s7239_s1 + $0x148] sm:$0xff]  }
  0x8e   : > { %4839 = vmatprep.subr.bf16.mxu1 %v5144_v19  ;;  %4887 = vmatprep.subr.bf16.mxu0 %v5145_v29 }
  0x8f   : > { %4680 = vmatmul.mubr.bf16.gmra.mxu1 %v6091_v25  ;;  %4728 = vmatmul.mubr.bf16.gmra.mxu0 %v5945_v12  ;;  %v1268_v13 = vsel %vm1193_vm1, %v1265_v39, %v1267_v38  ;;  %v2112_v48 = vsel %vm1193_vm1, %v2109_v45, %v2111_v18  ;;  %v5147_v39 = vld [vmem:[%s7239_s1 + $0x1b0] sm:$0xff]   ;;  %v5153_v38 = vld [vmem:[%s7239_s1 + $0x198] sm:$0xff]   ;;  %v5157_v45 = vld [vmem:[%s7239_s1 + $0x188] sm:$0xff]  }
  0x90   : > { %4683 = vmatprep.mubr.bf16.mxu1 %v5594_v9  ;;  %4731 = vmatprep.mubr.bf16.mxu0 %v6093_v54  ;;  %v6124_v16 = vpack.c.bf16 %v1268_v13, %v1266_v14  ;;  %v6144_v26 = vpack.c.bf16 %v2112_v48, %v2110_v11  ;;  %v5154_v14 = vld [vmem:[%s7239_s1 + $0x150] sm:$0xff]   ;;  %v5159_v18 = vld [vmem:[%s7239_s1 + $0x140] sm:$0xff]   ;;  %v5161_v48 = vld [vmem:[%s7239_s1 + $0x1f8] sm:$0xff]  }
  0x91   : > { %v5155_v13 = vld [vmem:[%s7239_s1 + $0x190] sm:$0xff]   ;;  %v5160_v11 = vld [vmem:[%s7239_s1 + $0x180] sm:$0xff]  }
  0x92   : > { %7331 = vst [vmem:[#allocation3_spill] sm:$0xff] %v6144_v26 }
  0x97   : > { %4684 = vmatmul.mubr.bf16.gmra.mxu1 %v5627_v27  ;;  %4732 = vmatmul.mubr.bf16.gmra.mxu0 %v5975_v30 }
  0x98   : > { %4687 = vmatprep.mubr.bf16.mxu1 %v5655_v58  ;;  %4735 = vmatprep.mubr.bf16.mxu0 %v6107_v1 }
  0x9f   : > { %4688 = vmatmul.mubr.bf16.gmra.mxu1 %v5702_v22  ;;  %4736 = vmatmul.mubr.bf16.gmra.mxu0 %v6008_v40 }
  0xa0   : > { %4691 = vmatprep.mubr.bf16.mxu1 %v5738_v51  ;;  %4739 = vmatprep.mubr.bf16.mxu0 %v6124_v16 }
  0xa7   : > { %4692 = vmatmul.mubr.bf16.gmra.mxu1 %v5790_v7  ;;  %4740 = vmatmul.mubr.bf16.gmra.mxu0 %v6020_v24 }
  0xa8   : > { %4759 = vmatprep.mubr.bf16.mxu1 %v5544_v44  ;;  %4807 = vmatprep.mubr.bf16.mxu0 %v5657_v60  ;;  %v5148_v44 = vld [vmem:[%s7239_s1 + $0x168] sm:$0xff]  }
  0xa9   : > { %v5149_v60 = vld [vmem:[%s7239_s1 + $0x1a8] sm:$0xff]  }
  0xaf   : > { %4760 = vmatmul.mubr.bf16.vlgmr.msra.gmra.mxu1 %v5580_v2  ;;  %4808 = vmatmul.mubr.bf16.vlgmr.msra.gmra.mxu0 %v5661_v62 }
  0xb0   : > { %4840 = vmatpush3.bf16.msra.mxu1 %v5144_v19  ;;  %4888 = vmatpush3.bf16.msra.mxu0 %v5145_v29  ;;  %v5150_v19 = vld [vmem:[%s7239_s1 + $0x160] sm:$0xff]  }
  0xb1   : > { %4763 = vmatprep.mubr.bf16.mxu1 %v5621_v23  ;;  %4811 = vmatprep.mubr.bf16.mxu0 %v5770_v15  ;;  %v5151_v29 = vld [vmem:[%s7239_s1 + $0x1a0] sm:$0xff]  }
  0xb2   : > { %4841 = vmatprep.subr.bf16.mxu1 %v5146_v37  ;;  %4889 = vmatprep.subr.bf16.mxu0 %v5147_v39 }
  0xb4   : > { %4842 = vmatpush3.bf16.msra.mxu1 %v5146_v37  ;;  %4890 = vmatpush3.bf16.msra.mxu0 %v5147_v39  ;;  %v5162_v37 = vld [vmem:[%s7239_s1 + $0x238] sm:$0xff]   ;;  %v1842_v39 = vrot.slane %v543_v21, 1  ;;  %v5164_v21 = vld [vmem:[%s7239_s1 + $0x230] sm:$0xff]  }
  0xb5   : > { %4843 = vmatprep.subr.bf16.mxu1 %v5148_v44  ;;  %4891 = vmatprep.subr.bf16.mxu0 %v5149_v60 }
  0xb7   : > { %4764 = vmatmul.mubr.bf16.gmra.mxu1 %v5646_v52  ;;  %4812 = vmatmul.mubr.bf16.gmra.mxu0 %v5780_v43 }
  0xb8   : > { %4767 = vmatprep.mubr.bf16.mxu1 %v5679_v20  ;;  %4815 = vmatprep.mubr.bf16.mxu0 %v5816_v5 }
  0xb9   : > { %4844 = vmatpush3.bf16.msra.mxu1 %v5148_v44  ;;  %4892 = vmatpush3.bf16.msra.mxu0 %v5149_v60  ;;  %v1843_v44 = vrot.slane %v544_v4, 1  ;;  %v1845_v60 = vrot.slane %v545_v47, 1  ;;  %v5169_v4 = vld [vmem:[%s7239_s1 + $0x1d8] sm:$0xff]  }
  0xba   : > { %4845 = vmatprep.subr.bf16.mxu1 %v5150_v19  ;;  %4893 = vmatprep.subr.bf16.mxu0 %v5151_v29  ;;  %v5170_v47 = vld [vmem:[%s7239_s1 + $0x218] sm:$0xff]  }
  0xbd   : > { %4846 = vmatpush3.bf16.msra.mxu1 %v5150_v19  ;;  %4894 = vmatpush3.bf16.msra.mxu0 %v5151_v29  ;;  %v1844_v19 = vsel %vm629_vm0, %v1842_v39, %v1843_v44  ;;  %v1846_v29 = vsel %vm629_vm0, %v1843_v44, %v1845_v60 }
  0xbe   : > { %4847 = vmatprep.subr.bf16.mxu1 %v5152_v56  ;;  %4895 = vmatprep.subr.bf16.mxu0 %v5153_v38 }
  0xbf   : > { %4768 = vmatmul.mubr.bf16.gmra.mxu1 %v5723_v8  ;;  %4816 = vmatmul.mubr.bf16.gmra.mxu0 %v5850_v35 }
  0xc0   : > { %4771 = vmatprep.mubr.bf16.mxu1 %v5787_v17  ;;  %4819 = vmatprep.mubr.bf16.mxu0 %v5880_v31 }
  0xc1   : > { %4848 = vmatpush3.bf16.msra.mxu1 %v5152_v56  ;;  %4896 = vmatpush3.bf16.msra.mxu0 %v5153_v38  ;;  %v6234_v56 = vpack.c.bf16 %v1846_v29, %v1844_v19  ;;  %v5173_v38 = vld [vmem:[%s7239_s1 + $0x1c8] sm:$0xff]  }
  0xc2   : > { %4849 = vmatprep.subr.bf16.mxu1 %v5154_v14  ;;  %4897 = vmatprep.subr.bf16.mxu0 %v5155_v13 }
  0xc3   : > { %7332 = vst [vmem:[#allocation4_spill] sm:$0xff] %v6234_v56 }
  0xc5   : > { %4850 = vmatpush3.bf16.msra.mxu1 %v5154_v14  ;;  %4898 = vmatpush3.bf16.msra.mxu0 %v5155_v13  ;;  %v5174_v14 = vld [vmem:[%s7239_s1 + $0x208] sm:$0xff]  }
  0xc6   : > { %4851 = vmatprep.subr.bf16.mxu1 %v5156_v32  ;;  %4899 = vmatprep.subr.bf16.mxu0 %v5157_v45 }
  0xc7   : > { %4772 = vmatmul.mubr.bf16.gmra.mxu1 %v6064_v49  ;;  %4820 = vmatmul.mubr.bf16.gmra.mxu0 %v5573_v63 }
  0xc8   : > { %4775 = vmatprep.mubr.bf16.mxu1 %v6091_v25  ;;  %4823 = vmatprep.mubr.bf16.mxu0 %v5659_v61 }
  0xc9   : > { %4852 = vmatpush3.bf16.msra.mxu1 %v5156_v32  ;;  %4900 = vmatpush3.bf16.msra.mxu0 %v5157_v45 }
  0xca   : > { %4853 = vmatprep.subr.bf16.mxu1 %v5159_v18  ;;  %4901 = vmatprep.subr.bf16.mxu0 %v5160_v11 }
  0xcd   : > { %4854 = vmatpush3.bf16.msra.mxu1 %v5159_v18  ;;  %4902 = vmatpush3.bf16.msra.mxu0 %v5160_v11 }
  0xce   : > { %4935 = vmatprep.subr.bf16.mxu1 %v5161_v48  ;;  %4983 = vmatprep.subr.bf16.mxu0 %v5162_v37 }
  0xcf   : > { %4776 = vmatmul.mubr.bf16.gmra.mxu1 %v5594_v9  ;;  %4824 = vmatmul.mubr.bf16.gmra.mxu0 %v5707_v57 }
  0xd0   : > { %4779 = vmatprep.mubr.bf16.mxu1 %v5627_v27  ;;  %4827 = vmatprep.mubr.bf16.mxu0 %v5772_v28 }
  0xd7   : > { %4780 = vmatmul.mubr.bf16.gmra.mxu1 %v5655_v58  ;;  %4828 = vmatmul.mubr.bf16.gmra.mxu0 %v5782_v6 }
  0xd8   : > { %4783 = vmatprep.mubr.bf16.mxu1 %v5702_v22  ;;  %4831 = vmatprep.mubr.bf16.mxu0 %v5818_v50 }
  0xdf   : > { %4784 = vmatmul.mubr.bf16.gmra.mxu1 %v5738_v51  ;;  %4832 = vmatmul.mubr.bf16.gmra.mxu0 %v5852_v34 }
  0xe0   : > { %4787 = vmatprep.mubr.bf16.mxu1 %v5790_v7  ;;  %4835 = vmatprep.mubr.bf16.mxu0 %v5882_v33 }
  0xe7   : > { %4788 = vmatmul.mubr.bf16.gmra.mxu1 %v6122_v42  ;;  %4836 = vmatmul.mubr.bf16.gmra.mxu0 %v6234_v56 }
  0xe8   : > { %4855 = vmatprep.mubr.bf16.mxu1 %v5929_v55  ;;  %4903 = vmatprep.mubr.bf16.mxu0 %v5580_v2  ;;  %v5165_v2 = vld [vmem:[%s7239_s1 + $0x1e8] sm:$0xff]  }
  0xe9   : > { %v5166_v55 = vld [vmem:[%s7239_s1 + $0x228] sm:$0xff]  }
  0xef   : > { %4856 = vmatmul.mubr.bf16.vlgmr.msra.gmra.mxu1 %v5941_v36  ;;  %4904 = vmatmul.mubr.bf16.vlgmr.msra.gmra.mxu0 %v5621_v23  ;;  %v5167_v23 = vld [vmem:[%s7239_s1 + $0x1e0] sm:$0xff]  }
  0xf0   : > { %4936 = vmatpush3.bf16.msra.mxu1 %v5161_v48  ;;  %4984 = vmatpush3.bf16.msra.mxu0 %v5162_v37 }
  0xf1   : > { %4859 = vmatprep.mubr.bf16.mxu1 %v5971_v10  ;;  %4907 = vmatprep.mubr.bf16.mxu0 %v5646_v52  ;;  %v5168_v52 = vld [vmem:[%s7239_s1 + $0x220] sm:$0xff]  }
  0xf2   : > { %4937 = vmatprep.subr.bf16.mxu1 %v5163_v0  ;;  %4985 = vmatprep.subr.bf16.mxu0 %v5164_v21 }
  0xf4   : > { %4938 = vmatpush3.bf16.msra.mxu1 %v5163_v0  ;;  %4986 = vmatpush3.bf16.msra.mxu0 %v5164_v21 }
  0xf5   : > { %4939 = vmatprep.subr.bf16.mxu1 %v5165_v2  ;;  %4987 = vmatprep.subr.bf16.mxu0 %v5166_v55 }
  0xf7   : > { %4860 = vmatmul.mubr.bf16.gmra.mxu1 %v6001_v53  ;;  %4908 = vmatmul.mubr.bf16.gmra.mxu0 %v5679_v20  ;;  %v5172_v20 = vld [vmem:[%s7239_s1 + $0x210] sm:$0xff]  }
  0xf8   : > { %4863 = vmatprep.mubr.bf16.mxu1 %v6039_v3  ;;  %4911 = vmatprep.mubr.bf16.mxu0 %v5723_v8  ;;  %v5171_v8 = vld [vmem:[%s7239_s1 + $0x1d0] sm:$0xff]  }
  0xf9   : > { %4940 = vmatpush3.bf16.msra.mxu1 %v5165_v2  ;;  %4988 = vmatpush3.bf16.msra.mxu0 %v5166_v55 }
  0xfa   : > { %4941 = vmatprep.subr.bf16.mxu1 %v5167_v23  ;;  %4989 = vmatprep.subr.bf16.mxu0 %v5168_v52 }
  0xfd   : > { %4942 = vmatpush3.bf16.msra.mxu1 %v5167_v23  ;;  %4990 = vmatpush3.bf16.msra.mxu0 %v5168_v52 }
  0xfe   : > { %4943 = vmatprep.subr.bf16.mxu1 %v5169_v4  ;;  %4991 = vmatprep.subr.bf16.mxu0 %v5170_v47 }
  0xff   : > { %4864 = vmatmul.mubr.bf16.gmra.mxu1 %v6041_v46  ;;  %4912 = vmatmul.mubr.bf16.gmra.mxu0 %v5787_v17  ;;  %v5176_v17 = vld [vmem:[%s7239_s1 + $0x1c0] sm:$0xff]  }
 0x100   : > { %4867 = vmatprep.mubr.bf16.mxu1 %v6061_v41  ;;  %4915 = vmatprep.mubr.bf16.mxu0 %v6064_v49  ;;  %v5177_v49 = vld [vmem:[%s7239_s1 + $0x200] sm:$0xff]  }
 0x101   : > { %4944 = vmatpush3.bf16.msra.mxu1 %v5169_v4  ;;  %4992 = vmatpush3.bf16.msra.mxu0 %v5170_v47 }
 0x102   : > { %4945 = vmatprep.subr.bf16.mxu1 %v5171_v8  ;;  %4993 = vmatprep.subr.bf16.mxu0 %v5172_v20 }
 0x105   : > { %4946 = vmatpush3.bf16.msra.mxu1 %v5171_v8  ;;  %4994 = vmatpush3.bf16.msra.mxu0 %v5172_v20 }
 0x106   : > { %4947 = vmatprep.subr.bf16.mxu1 %v5173_v38  ;;  %4995 = vmatprep.subr.bf16.mxu0 %v5174_v14 }
 0x107   : > { %4868 = vmatmul.mubr.bf16.gmra.mxu1 %v5937_v59  ;;  %4916 = vmatmul.mubr.bf16.gmra.mxu0 %v6091_v25 }
 0x108   : > { %4871 = vmatprep.mubr.bf16.mxu1 %v5945_v12  ;;  %4919 = vmatprep.mubr.bf16.mxu0 %v5594_v9 }
 0x109   : > { %4948 = vmatpush3.bf16.msra.mxu1 %v5173_v38  ;;  %4996 = vmatpush3.bf16.msra.mxu0 %v5174_v14 }
 0x10a   : > { %4949 = vmatprep.subr.bf16.mxu1 %v5176_v17  ;;  %4997 = vmatprep.subr.bf16.mxu0 %v5177_v49 }
 0x10d   : > { %4950 = vmatpush3.bf16.msra.mxu1 %v5176_v17  ;;  %4998 = vmatpush3.bf16.msra.mxu0 %v5177_v49 }
 0x10f   : > { %v4617_v13 = vpop.f32.mrf.mxu0  ;;  %v6298_v32 = vpop.f32.mrf.mxu1  ;;  %4872 = vmatmul.mubr.bf16.gmra.mxu1 %v6093_v54  ;;  %4920 = vmatmul.mubr.bf16.gmra.mxu0 %v5627_v27 }
 0x110   : > { %4875 = vmatprep.mubr.bf16.mxu1 %v5975_v30  ;;  %4923 = vmatprep.mubr.bf16.mxu0 %v5655_v58 }
 0x111   : > { %v857_v25 = vpop.f32.mrf.mxu0  ;;  %v6304_v45 = vpop.f32.mrf.mxu1 }
 0x113   : > { %v4618_v9 = vpop.f32.mrf.mxu0  ;;  %v6306_v18 = vpop.f32.mrf.mxu1 }
 0x115   : > { %v860_v11 = vpop.f32.mrf.mxu0  ;;  %v6308_v48 = vpop.f32.mrf.mxu1 }
 0x117   : > { %v4621_v37 = vpop.f32.mrf.mxu0  ;;  %v6310_v39 = vpop.f32.mrf.mxu1  ;;  %4876 = vmatmul.mubr.bf16.gmra.mxu1 %v6107_v1  ;;  %4924 = vmatmul.mubr.bf16.gmra.mxu0 %v5702_v22  ;;  %v6335_v22 = vld [vmem:[%s5522_s14 + $0xcc] sm:$0xff]  }
 0x118   : > { %4879 = vmatprep.mubr.bf16.mxu1 %v6008_v40  ;;  %4927 = vmatprep.mubr.bf16.mxu0 %v5738_v51 }
 0x119   : > { %v873_v27 = vpop.f32.mrf.mxu0  ;;  %v6316_v58 = vpop.f32.mrf.mxu1 }
 0x11b   : > { %v6318_v44 = vpop.f32.mrf.mxu0  ;;  %v6320_v60 = vpop.f32.mrf.mxu1 }
 0x11d   : > { %v6322_v19 = vpop.f32.mrf.mxu0  ;;  %v6324_v29 = vpop.f32.mrf.mxu1 }
 0x11f   : > { %v6326_v0 = vpop.f32.mrf.mxu0  ;;  %v6328_v21 = vpop.f32.mrf.mxu1  ;;  %4880 = vmatmul.mubr.bf16.gmra.mxu1 %v6124_v16  ;;  %4928 = vmatmul.mubr.bf16.gmra.mxu0 %v5790_v7 }
 0x120   : > { %7333 = vst [vmem:[#allocation5_spill] sm:$0xff] %v6328_v21  ;;  %4883 = vmatprep.mubr.bf16.mxu1 %v6020_v24  ;;  %4931 = vmatprep.mubr.bf16.mxu0 %v6122_v42 }
 0x121   : > { %v6337_v51 = vpop.f32.mrf.mxu0  ;;  %v6339_v2 = vpop.f32.mrf.mxu1 }
 0x122   : > { %7334 = vst [vmem:[#allocation6_spill] sm:$0xff] %v6339_v2 }
 0x123   : > { %v6341_v55 = vpop.f32.mrf.mxu0  ;;  %v6343_v23 = vpop.f32.mrf.mxu1 }
 0x124   : > { %7335 = vst [vmem:[#allocation7_spill] sm:$0xff] %v6343_v23 }
 0x125   : > { %v6345_v52 = vpop.f32.mrf.mxu0  ;;  %v6347_v4 = vpop.f32.mrf.mxu1 }
 0x126   : > { %7336 = vst [vmem:[#allocation8_spill] sm:$0xff] %v6347_v4 }
 0x127   : > { %v6349_v47 = vpop.f32.mrf.mxu0  ;;  %v6351_v7 = vpop.f32.mrf.mxu1  ;;  %4884 = vmatmul.mubr.bf16.gmra.mxu1 %v6144_v26  ;;  %4932 = vmatmul.mubr.bf16.gmra.mxu0 %v6335_v22 }
 0x128   : > { %7337 = vst [vmem:[#allocation9_spill] sm:$0xff] %v6351_v7  ;;  %4951 = vmatprep.mubr.bf16.mxu1 %v5661_v62  ;;  %4999 = vmatprep.mubr.bf16.mxu0 %v5941_v36 }
 0x129   : > { %v6357_v42 = vpop.f32.mrf.mxu0  ;;  %v6359_v8 = vpop.f32.mrf.mxu1 }
 0x12a   : > { %7338 = vst [vmem:[#allocation10_spill] sm:$0xff] %v6359_v8 }
 0x12b   : > { %v6361_v20 = vpop.f32.mrf.mxu0  ;;  %v6363_v38 = vpop.f32.mrf.mxu1 }
 0x12c   : > { %7339 = vst [vmem:[#allocation11_spill] sm:$0xff] %v6363_v38 }
 0x12d   : > { %v6365_v14 = vpop.f32.mrf.mxu0  ;;  %v6367_v17 = vpop.f32.mrf.mxu1 }
 0x12e   : > { %7340 = vst [vmem:[#allocation12_spill] sm:$0xff] %v6367_v17 }
 0x12f   : > { %v4665_v49 = vpop.f32.mrf.mxu1  ;;  %v4713_v7 = vpop.f32.mrf.mxu0  ;;  %4952 = vmatmul.mubr.bf16.vlgmr.msra.gmra.mxu1 %v5770_v15  ;;  %5000 = vmatmul.mubr.bf16.vlgmr.msra.gmra.mxu0 %v5971_v10 }
 0x130   : > { %v1075_v62 = vadd.f32 %v4665_v49, %v4617_v13  ;;  %4955 = vmatprep.mubr.bf16.mxu1 %v5780_v43  ;;  %5003 = vmatprep.mubr.bf16.mxu0 %v6001_v53 }
 0x131   : > { %v1066_v36 = vpop.f32.mrf.mxu1  ;;  %v1421_v8 = vpop.f32.mrf.mxu0 }
 0x132   : > { %v6373_v4 = vadd.f32 %v4713_v7, %v1075_v62  ;;  %v1067_v38 = vadd.f32 %v1066_v36, %v857_v25 }
 0x133   : > { %v4666_v23 = vpop.f32.mrf.mxu1  ;;  %v4714_v2 = vpop.f32.mrf.mxu0 }
 0x134   : > { %v6375_v26 = vadd.f32 %v1421_v8, %v1067_v38  ;;  %v1078_v17 = vadd.f32 %v4666_v23, %v4618_v9 }
 0x135   : > { %v1069_v56 = vpop.f32.mrf.mxu1  ;;  %v1424_v21 = vpop.f32.mrf.mxu0 }
 0x136   : > { %v6377_v15 = vadd.f32 %v4714_v2, %v1078_v17  ;;  %v1070_v10 = vadd.f32 %v1069_v56, %v860_v11 }
 0x137   : > { %v4669_v13 = vpop.f32.mrf.mxu1  ;;  %v4717_v49 = vpop.f32.mrf.mxu0  ;;  %4956 = vmatmul.mubr.bf16.gmra.mxu1 %v5816_v5  ;;  %5004 = vmatmul.mubr.bf16.gmra.mxu0 %v6039_v3 }
 0x138   : > { %v6381_v43 = vadd.f32 %v1424_v21, %v1070_v10  ;;  %v1091_v53 = vadd.f32 %v4669_v13, %v4621_v37  ;;  %4959 = vmatprep.mubr.bf16.mxu1 %v5850_v35  ;;  %5007 = vmatprep.mubr.bf16.mxu0 %v6041_v46 }
 0x139   : > { %v1082_v25 = vpop.f32.mrf.mxu1  ;;  %v1437_v9 = vpop.f32.mrf.mxu0 }
 0x13a   : > { %v6385_v23 = vadd.f32 %v4717_v49, %v1091_v53  ;;  %v1083_v2 = vadd.f32 %v1082_v25, %v873_v27 }
 0x13b   : > { %v4670_v7 = vpop.f32.mrf.mxu1  ;;  %v4718_v56 = vpop.f32.mrf.mxu0 }
 0x13c   : > { %v6387_v11 = vadd.f32 %v1437_v9, %v1083_v2  ;;  %v1094_v5 = vadd.f32 %v4670_v7, %v6318_v44 }
 0x13d   : > { %v1085_v8 = vpop.f32.mrf.mxu1  ;;  %v1440_v3 = vpop.f32.mrf.mxu0 }
 0x13e   : > { %v6390_v21 = vadd.f32 %v4718_v56, %v1094_v5  ;;  %v1086_v37 = vadd.f32 %v1085_v8, %v6322_v19 }
 0x13f   : > { %v4673_v35 = vpop.f32.mrf.mxu1  ;;  %v4721_v38 = vpop.f32.mrf.mxu0  ;;  %4960 = vmatmul.mubr.bf16.gmra.mxu1 %v5880_v31  ;;  %5008 = vmatmul.mubr.bf16.gmra.mxu0 %v6061_v41 }
 0x140   : > { %v6395_v46 = vadd.f32 %v1440_v3, %v1086_v37  ;;  %v1107_v27 = vadd.f32 %v4673_v35, %v6326_v0  ;;  %4963 = vmatprep.mubr.bf16.mxu1 %v5573_v63  ;;  %5011 = vmatprep.mubr.bf16.mxu0 %v5937_v59 }
 0x141   : > { %v1098_v44 = vpop.f32.mrf.mxu1  ;;  %v1453_v17 = vpop.f32.mrf.mxu0 }
 0x142   : > { %v6400_v62 = vadd.f32 %v4721_v38, %v1107_v27  ;;  %v1099_v19 = vadd.f32 %v1098_v44, %v6337_v51 }
 0x143   : > { %v4674_v36 = vpop.f32.mrf.mxu1  ;;  %v4722_v10 = vpop.f32.mrf.mxu0 }
 0x144   : > { %v6403_v13 = vadd.f32 %v1453_v17, %v1099_v19  ;;  %v1110_v31 = vadd.f32 %v4674_v36, %v6341_v55 }
 0x145   : > { %v1101_v41 = vpop.f32.mrf.mxu1  ;;  %v1456_v49 = vpop.f32.mrf.mxu0 }
 0x146   : > { %v6406_v53 = vadd.f32 %v4722_v10, %v1110_v31  ;;  %v1102_v63 = vadd.f32 %v1101_v41, %v6345_v52  ;;  %v547_v10 = vunpack.c.h.bf16 %v6335_v22 }
 0x147   : > { %v4677_v0 = vpop.f32.mrf.mxu1  ;;  %v4725_v59 = vpop.f32.mrf.mxu0  ;;  %4964 = vmatmul.mubr.bf16.gmra.mxu1 %v5659_v61  ;;  %5012 = vmatmul.mubr.bf16.gmra.mxu0 %v5945_v12 }
 0x148   : > { %v6411_v25 = vadd.f32 %v1456_v49, %v1102_v63  ;;  %v1123_v51 = vadd.f32 %v4677_v0, %v6349_v47  ;;  %4967 = vmatprep.mubr.bf16.mxu1 %v5707_v57  ;;  %5015 = vmatprep.mubr.bf16.mxu0 %v6093_v54 }
 0x149   : > { %v1114_v55 = vpop.f32.mrf.mxu1  ;;  %v1469_v9 = vpop.f32.mrf.mxu0 }
 0x14a   : > { %v6416_v2 = vadd.f32 %v4725_v59, %v1123_v51  ;;  %v1115_v52 = vadd.f32 %v1114_v55, %v6357_v42  ;;  %v2637_v51 = vrot.slane %v547_v10, 1  ;;  %v2903_v55 = vrot.slane %v547_v10, 2  ;;  %v7345_v10 = vld [vmem:[#allocation7_spill] sm:$0xff] }
 0x14b   : > { %v4678_v7 = vpop.f32.mrf.mxu1  ;;  %v4726_v56 = vpop.f32.mrf.mxu0 }
 0x14c   : > { %v6419_v5 = vadd.f32 %v1469_v9, %v1115_v52  ;;  %v1126_v61 = vadd.f32 %v4678_v7, %v6361_v20 }
 0x14d   : > { %v1117_v12 = vpop.f32.mrf.mxu1  ;;  %v1472_v8 = vpop.f32.mrf.mxu0 }
 0x14e   : > { %v6422_v3 = vadd.f32 %v4726_v56, %v1126_v61  ;;  %v1118_v57 = vadd.f32 %v1117_v12, %v6365_v14 }
 0x14f   : > { %v4681_v47 = vpop.f32.mrf.mxu1  ;;  %v4729_v54 = vpop.f32.mrf.mxu0  ;;  %4968 = vmatmul.mubr.bf16.gmra.mxu1 %v5772_v28  ;;  %5016 = vmatmul.mubr.bf16.gmra.mxu0 %v5975_v30  ;;  %v494_v30 = vld [vmem:[%s5522_s14 + $0xd4] sm:$0xf]  ;;  %s380_s14 = sand.u32 1, %s5349_s15  }
 0x150   : > { %v6427_v42 = vadd.f32 %v1472_v8, %v1118_v57  ;;  %v1139_v37 = vadd.f32 %v4681_v47, %v6298_v32  ;;  %4971 = vmatprep.mubr.bf16.mxu1 %v5782_v6  ;;  %5019 = vmatprep.mubr.bf16.mxu0 %v6107_v1  ;;  %v546_v32 = vunpack.c.l.bf16 %v6335_v22  ;;  %s3918_s8 = sshll.u32 %s380_s14, 7 }
 0x151   : > { %v1130_v20 = vpop.f32.mrf.mxu1  ;;  %v1485_v35 = vpop.f32.mrf.mxu0  ;;  %s6708_s10 = scalar_lea.vmem [#allocation2], %s3918_s8 }
 0x152   : > { %v6432_v38 = vadd.f32 %v4729_v54, %v1139_v37  ;;  %v1131_v14 = vadd.f32 %v1130_v20, %v6304_v45  ;;  %v548_v45 = vunpack.c.l.bf16 %v494_v30  ;;  %v7341_v37 = vld [vmem:[#allocation5_spill] sm:$0xff] }
 0x153   : > { %v4682_v27 = vpop.f32.mrf.mxu1  ;;  %v4730_v44 = vpop.f32.mrf.mxu0 }
 0x154   : > { %v6435_v17 = vadd.f32 %v1485_v35, %v1131_v14  ;;  %v1142_v28 = vadd.f32 %v4682_v27, %v6306_v18  ;;  %v2639_v52 = vrot.slane %v548_v45, 1  ;;  %v7342_v35 = vld [vmem:[#allocation4_spill] sm:$0xff]  ;;  %v7343_v14 = vld [vmem:[#allocation3_spill] sm:$0xff] }
 0x155   : > { %v1133_v19 = vpop.f32.mrf.mxu1  ;;  %v1488_v36 = vpop.f32.mrf.mxu0 }
 0x156   : > { %v6440_v6 = vadd.f32 %v4730_v44, %v1142_v28  ;;  %v1134_v1 = vadd.f32 %v1133_v19, %v6308_v48  ;;  %v2636_v48 = vrot.slane %v546_v32, 1  ;;  %v2640_v47 = vsel %vm629_vm0, %v2637_v51, %v2639_v52 }
 0x157   : > { %v4685_v31 = vpop.f32.mrf.mxu1  ;;  %v4733_v41 = vpop.f32.mrf.mxu0  ;;  %4972 = vmatmul.mubr.bf16.gmra.mxu1 %v5818_v50  ;;  %5020 = vmatmul.mubr.bf16.gmra.mxu0 %v6008_v40  ;;  %v2902_v50 = vrot.slane %v546_v32, 2 }
 0x158   : > { %v6446_v49 = vadd.f32 %v1488_v36, %v1134_v1  ;;  %v1155_v18 = vadd.f32 %v4685_v31, %v6310_v39  ;;  %4975 = vmatprep.mubr.bf16.mxu1 %v5852_v34  ;;  %5023 = vmatprep.mubr.bf16.mxu0 %v6124_v16  ;;  %v2905_v34 = vrot.slane %v548_v45, 2 }
 0x159   : > { %v1146_v63 = vpop.f32.mrf.mxu1  ;;  %v1501_v0 = vpop.f32.mrf.mxu0  ;;  %v2904_v54 = vsel %vm1193_vm1, %v2902_v50, %v2903_v55  ;;  %v7347_v50 = vld [vmem:[#allocation9_spill] sm:$0xff] }
 0x15a   : > { %v6451_v59 = vadd.f32 %v4733_v41, %v1155_v18  ;;  %v1147_v22 = vadd.f32 %v1146_v63, %v6316_v58  ;;  %v2638_v58 = vsel %vm629_vm0, %v2636_v48, %v2637_v51  ;;  %v7346_v63 = vld [vmem:[#allocation8_spill] sm:$0xff] }
 0x15b   : > { %v4686_v40 = vpop.f32.mrf.mxu1  ;;  %v4734_v9 = vpop.f32.mrf.mxu0  ;;  %v2643_v36 = vpack.c.bf16 %v2640_v47, %v2638_v58 }
 0x15c   : > { %v6454_v7 = vadd.f32 %v1501_v0, %v1147_v22  ;;  %v1158_v39 = vadd.f32 %v4686_v40, %v6320_v60 }
 0x15d   : > { %v1149_v56 = vpop.f32.mrf.mxu1  ;;  %v1504_v16 = vpop.f32.mrf.mxu0 }
 0x15e   : > { %v6457_v61 = vadd.f32 %v4734_v9, %v1158_v39  ;;  %v1150_v12 = vadd.f32 %v1149_v56, %v6324_v29  ;;  %v2906_v29 = vsel %vm1193_vm1, %v2903_v55, %v2905_v34  ;;  %v7348_v39 = vld [vmem:[#allocation10_spill] sm:$0xff] }
 0x15f   : > { %v4689_v8 = vpop.f32.mrf.mxu1  ;;  %v4737_v57 = vpop.f32.mrf.mxu0  ;;  %4976 = vmatmul.mubr.bf16.gmra.mxu1 %v5882_v33  ;;  %5024 = vmatmul.mubr.bf16.gmra.mxu0 %v6020_v24  ;;  %v7344_v24 = vld [vmem:[#allocation6_spill] sm:$0xff]  ;;  %v2909_v32 = vpack.c.bf16 %v2906_v29, %v2904_v54 }
 0x160   : > { %v6465_v60 = vadd.f32 %v1504_v16, %v1150_v12  ;;  %v1171_v20 = vadd.f32 %v4689_v8, %v7341_v37  ;;  %4979 = vmatprep.mubr.bf16.mxu1 %v7342_v35  ;;  %5027 = vmatprep.mubr.bf16.mxu0 %v7343_v14  ;;  %v7349_v8 = vld [vmem:[#allocation11_spill] sm:$0xff]  ;;  %v7350_v37 = vld [vmem:[#allocation12_spill] sm:$0xff] }
 0x161   : > { %v1162_v27 = vpop.f32.mrf.mxu1  ;;  %v1517_v33 = vpop.f32.mrf.mxu0 }
 0x162   : > { %v6471_v44 = vadd.f32 %v4737_v57, %v1171_v20  ;;  %v1163_v28 = vadd.f32 %v1162_v27, %v7344_v24 }
 0x163   : > { %v4690_v30 = vpop.f32.mrf.mxu1  ;;  %v4738_v19 = vpop.f32.mrf.mxu0 }
 0x164   : > { %v6474_v1 = vadd.f32 %v1517_v33, %v1163_v28  ;;  %v1174_v31 = vadd.f32 %v4690_v30, %v7345_v10 }
 0x165   : > { %v1165_v41 = vpop.f32.mrf.mxu1  ;;  %v1520_v45 = vpop.f32.mrf.mxu0 }
 0x166   : > { %v6477_v18 = vadd.f32 %v4738_v19, %v1174_v31  ;;  %v1166_v0 = vadd.f32 %v1165_v41, %v7346_v63 }
 0x167   : > { %v4693_v48 = vpop.f32.mrf.mxu1  ;;  %v4741_v22 = vpop.f32.mrf.mxu0  ;;  %4980 = vmatmul.mubr.bf16.gmra.mxu1 %v2643_v36  ;;  %5028 = vmatmul.mubr.bf16.gmra.mxu0 %v2909_v32 }
 0x168   : > { %v6480_v51 = vadd.f32 %v1520_v45, %v1166_v0  ;;  %v1187_v55 = vadd.f32 %v4693_v48, %v7347_v50 }
 0x169   : > { %v1178_v40 = vpop.f32.mrf.mxu1  ;;  %v1533_v9 = vpop.f32.mrf.mxu0 }
 0x16a   : > { %v6483_v52 = vadd.f32 %v4741_v22, %v1187_v55  ;;  %v1179_v34 = vadd.f32 %v1178_v40, %v7348_v39 }
 0x16b   : > { %v4694_v56 = vpop.f32.mrf.mxu1  ;;  %v4742_v16 = vpop.f32.mrf.mxu0 }
 0x16c   : > { %v6486_v12 = vadd.f32 %v1533_v9, %v1179_v34  ;;  %v1190_v57 = vadd.f32 %v4694_v56, %v7349_v8 }
 0x16d   : > { %v1181_v58 = vpop.f32.mrf.mxu1  ;;  %v1536_v47 = vpop.f32.mrf.mxu0 }
 0x16e   : > { %v6489_v54 = vadd.f32 %v4742_v16, %v1190_v57  ;;  %v1182_v20 = vadd.f32 %v1181_v58, %v7350_v37 }
 0x16f   : > { %v4761_v35 = vpop.f32.mrf.mxu1  ;;  %v4809_v14 = vpop.f32.mrf.mxu0 }
 0x170   : > { %v6492_v29 = vadd.f32 %v1536_v47, %v1182_v20  ;;  %v1809_v27 = vadd.f32 %v4761_v35, %v6373_v4 }
 0x171   : > { %v1680_v33 = vpop.f32.mrf.mxu1  ;;  %v1949_v24 = vpop.f32.mrf.mxu0 }
 0x172   : > { %v6495_v28 = vadd.f32 %v4809_v14, %v1809_v27  ;;  %v1807_v30 = vadd.f32 %v1680_v33, %v6375_v26 }
 0x173   : > { %v4762_v19 = vpop.f32.mrf.mxu1  ;;  %v4810_v36 = vpop.f32.mrf.mxu0 }
 0x174   : > { %v6498_v32 = vadd.f32 %v1949_v24, %v1807_v30  ;;  %v1810_v10 = vadd.f32 %v4762_v19, %v6377_v15 }
 0x175   : > { %v1683_v31 = vpop.f32.mrf.mxu1  ;;  %v1952_v41 = vpop.f32.mrf.mxu0 }
 0x176   : > { %v6501_v45 = vadd.f32 %v4810_v36, %v1810_v10  ;;  %v1808_v63 = vadd.f32 %v1683_v31, %v6381_v43 }
 0x177   : > { %v4765_v0 = vpop.f32.mrf.mxu1  ;;  %v4813_v4 = vpop.f32.mrf.mxu0 }
 0x178   : > { %v6504_v48 = vadd.f32 %v1952_v41, %v1808_v63  ;;  %v1813_v22 = vadd.f32 %v4765_v0, %v6385_v23 }
 0x179   : > { %v1696_v50 = vpop.f32.mrf.mxu1  ;;  %v1965_v26 = vpop.f32.mrf.mxu0 }
 0x17a   : > { %v6507_v55 = vadd.f32 %v4813_v4, %v1813_v22  ;;  %v1811_v40 = vadd.f32 %v1696_v50, %v6387_v11 }
 0x17b   : > { %v4766_v9 = vpop.f32.mrf.mxu1  ;;  %v4814_v15 = vpop.f32.mrf.mxu0 }
 0x17c   : > { %v6510_v39 = vadd.f32 %v1965_v26, %v1811_v40  ;;  %v1814_v34 = vadd.f32 %v4766_v9, %v6390_v21 }
 0x17d   : > { %v1699_v56 = vpop.f32.mrf.mxu1  ;;  %v1968_v43 = vpop.f32.mrf.mxu0 }
 0x17e   : > { %v6513_v16 = vadd.f32 %v4814_v15, %v1814_v34  ;;  %v1812_v8 = vadd.f32 %v1699_v56, %v6395_v46 }
 0x17f   : > { %v4769_v57 = vpop.f32.mrf.mxu1  ;;  %v4817_v23 = vpop.f32.mrf.mxu0 }
 0x180   : > { %v6516_v58 = vadd.f32 %v1968_v43, %v1812_v8  ;;  %v1817_v47 = vadd.f32 %v4769_v57, %v6400_v62 }
 0x181   : > { %v1712_v37 = vpop.f32.mrf.mxu1  ;;  %v1981_v11 = vpop.f32.mrf.mxu0 }
 0x182   : > { %v6519_v20 = vadd.f32 %v4817_v23, %v1817_v47  ;;  %v1815_v35 = vadd.f32 %v1712_v37, %v6403_v13 }
 0x183   : > { %v4770_v14 = vpop.f32.mrf.mxu1  ;;  %v4818_v21 = vpop.f32.mrf.mxu0 }
 0x184   : > { %v6522_v27 = vadd.f32 %v1981_v11, %v1815_v35  ;;  %v1818_v33 = vadd.f32 %v4770_v14, %v6406_v53 }
 0x185   : > { %v1715_v24 = vpop.f32.mrf.mxu1  ;;  %v1984_v46 = vpop.f32.mrf.mxu0 }
 0x186   : > { %v6525_v30 = vadd.f32 %v4818_v21, %v1818_v33  ;;  %v1816_v19 = vadd.f32 %v1715_v24, %v6411_v25 }
 0x187   : > { %v4773_v36 = vpop.f32.mrf.mxu1  ;;  %v4821_v62 = vpop.f32.mrf.mxu0 }
 0x188   : > { %v6528_v10 = vadd.f32 %v1984_v46, %v1816_v19  ;;  %v1821_v31 = vadd.f32 %v4773_v36, %v6416_v2 }
 0x189   : > { %v1728_v41 = vpop.f32.mrf.mxu1  ;;  %v1997_v13 = vpop.f32.mrf.mxu0 }
 0x18a   : > { %v6531_v63 = vadd.f32 %v4821_v62, %v1821_v31  ;;  %v1819_v0 = vadd.f32 %v1728_v41, %v6419_v5 }
 0x18b   : > { %v4774_v4 = vpop.f32.mrf.mxu1  ;;  %v4822_v53 = vpop.f32.mrf.mxu0 }
 0x18c   : > { %v6534_v22 = vadd.f32 %v1997_v13, %v1819_v0  ;;  %v1822_v50 = vadd.f32 %v4774_v4, %v6422_v3 }
 0x18d   : > { %v1731_v26 = vpop.f32.mrf.mxu1  ;;  %v2000_v25 = vpop.f32.mrf.mxu0 }
 0x18e   : > { %v6537_v40 = vadd.f32 %v4822_v53, %v1822_v50  ;;  %v1820_v9 = vadd.f32 %v1731_v26, %v6427_v42 }
 0x18f   : > { %v4777_v15 = vpop.f32.mrf.mxu1  ;;  %v4825_v2 = vpop.f32.mrf.mxu0 }
 0x190   : > { %v6540_v34 = vadd.f32 %v2000_v25, %v1820_v9  ;;  %v1825_v56 = vadd.f32 %v4777_v15, %v6432_v38 }
 0x191   : > { %v1744_v43 = vpop.f32.mrf.mxu1  ;;  %v2013_v5 = vpop.f32.mrf.mxu0 }
 0x192   : > { %v6543_v8 = vadd.f32 %v4825_v2, %v1825_v56  ;;  %v1823_v57 = vadd.f32 %v1744_v43, %v6435_v17 }
 0x193   : > { %v4778_v23 = vpop.f32.mrf.mxu1  ;;  %v4826_v3 = vpop.f32.mrf.mxu0 }
 0x194   : > { %v6546_v47 = vadd.f32 %v2013_v5, %v1823_v57  ;;  %v1826_v37 = vadd.f32 %v4778_v23, %v6440_v6 }
 0x195   : > { %v1747_v11 = vpop.f32.mrf.mxu1  ;;  %v2016_v42 = vpop.f32.mrf.mxu0 }
 0x196   : > { %v6549_v35 = vadd.f32 %v4826_v3, %v1826_v37  ;;  %v1824_v14 = vadd.f32 %v1747_v11, %v6446_v49 }
 0x197   : > { %v4781_v21 = vpop.f32.mrf.mxu1  ;;  %v4829_v38 = vpop.f32.mrf.mxu0 }
 0x198   : > { %v6552_v33 = vadd.f32 %v2016_v42, %v1824_v14  ;;  %v1829_v24 = vadd.f32 %v4781_v21, %v6451_v59 }
 0x199   : > { %v1760_v46 = vpop.f32.mrf.mxu1  ;;  %v2029_v17 = vpop.f32.mrf.mxu0 }
 0x19a   : > { %v6555_v19 = vadd.f32 %v4829_v38, %v1829_v24  ;;  %v1827_v36 = vadd.f32 %v1760_v46, %v6454_v7 }
 0x19b   : > { %v4782_v62 = vpop.f32.mrf.mxu1  ;;  %v4830_v6 = vpop.f32.mrf.mxu0 }
 0x19c   : > { %v6558_v31 = vadd.f32 %v2029_v17, %v1827_v36  ;;  %v1830_v41 = vadd.f32 %v4782_v62, %v6457_v61 }
 0x19d   : > { %v1763_v13 = vpop.f32.mrf.mxu1  ;;  %v2032_v49 = vpop.f32.mrf.mxu0 }
 0x19e   : > { %v6561_v0 = vadd.f32 %v4830_v6, %v1830_v41  ;;  %v1828_v4 = vadd.f32 %v1763_v13, %v6465_v60 }
 0x19f   : > { %v4785_v53 = vpop.f32.mrf.mxu1  ;;  %v4833_v59 = vpop.f32.mrf.mxu0 }
 0x1a0   : > { %v6564_v50 = vadd.f32 %v2032_v49, %v1828_v4  ;;  %v1833_v26 = vadd.f32 %v4785_v53, %v6471_v44 }
 0x1a1   : > { %v1776_v25 = vpop.f32.mrf.mxu1  ;;  %v2045_v7 = vpop.f32.mrf.mxu0 }
 0x1a2   : > { %v6567_v9 = vadd.f32 %v4833_v59, %v1833_v26  ;;  %v1831_v15 = vadd.f32 %v1776_v25, %v6474_v1 }
 0x1a3   : > { %v4786_v2 = vpop.f32.mrf.mxu1  ;;  %v4834_v61 = vpop.f32.mrf.mxu0 }
 0x1a4   : > { %v6570_v56 = vadd.f32 %v2045_v7, %v1831_v15  ;;  %v1834_v43 = vadd.f32 %v4786_v2, %v6477_v18 }
 0x1a5   : > { %v1779_v5 = vpop.f32.mrf.mxu1  ;;  %v2048_v60 = vpop.f32.mrf.mxu0 }
 0x1a6   : > { %v6573_v57 = vadd.f32 %v4834_v61, %v1834_v43  ;;  %v1832_v23 = vadd.f32 %v1779_v5, %v6480_v51 }
 0x1a7   : > { %v4789_v3 = vpop.f32.mrf.mxu1  ;;  %v4837_v44 = vpop.f32.mrf.mxu0 }
 0x1a8   : > { %v6576_v37 = vadd.f32 %v2048_v60, %v1832_v23  ;;  %v1837_v11 = vadd.f32 %v4789_v3, %v6483_v52 }
 0x1a9   : > { %v1792_v42 = vpop.f32.mrf.mxu1  ;;  %v2061_v1 = vpop.f32.mrf.mxu0 }
 0x1aa   : > { %v6579_v14 = vadd.f32 %v4837_v44, %v1837_v11  ;;  %v1835_v21 = vadd.f32 %v1792_v42, %v6486_v12 }
 0x1ab   : > { %v4790_v38 = vpop.f32.mrf.mxu1  ;;  %v4838_v18 = vpop.f32.mrf.mxu0 }
 0x1ac   : > { %v6582_v24 = vadd.f32 %v2061_v1, %v1835_v21  ;;  %v1838_v46 = vadd.f32 %v4790_v38, %v6489_v54 }
 0x1ad   : > { %v1795_v17 = vpop.f32.mrf.mxu1  ;;  %v2064_v51 = vpop.f32.mrf.mxu0 }
 0x1ae   : > { %v6585_v36 = vadd.f32 %v4838_v18, %v1838_v46  ;;  %v1836_v62 = vadd.f32 %v1795_v17, %v6492_v29 }
 0x1af   : > { %v4857_v6 = vpop.f32.mrf.mxu1  ;;  %v4905_v52 = vpop.f32.mrf.mxu0 }
 0x1b0   : > { %v6588_v41 = vadd.f32 %v2064_v51, %v1836_v62  ;;  %v2344_v13 = vadd.f32 %v4857_v6, %v6495_v28 }
 0x1b1   : > { %v2215_v49 = vpop.f32.mrf.mxu1  ;;  %v2474_v12 = vpop.f32.mrf.mxu0 }
 0x1b2   : > { %v6591_v4 = vadd.f32 %v4905_v52, %v2344_v13  ;;  %v2342_v53 = vadd.f32 %v2215_v49, %v6498_v32 }
 0x1b3   : > { %v6594_v59 = vpop.f32.mrf.mxu1  ;;  %v6596_v54 = vpop.f32.mrf.mxu0 }
 0x1b4   : > { %v6598_v26 = vadd.f32 %v2474_v12, %v2342_v53 }
 0x1b5   : > { %v6600_v25 = vpop.f32.mrf.mxu1  ;;  %v6602_v29 = vpop.f32.mrf.mxu0 }
 0x1b7   : > { %v4861_v7 = vpop.f32.mrf.mxu1  ;;  %v4909_v15 = vpop.f32.mrf.mxu0 }
 0x1b8   : > { %v2348_v28 = vadd.f32 %v4861_v7, %v6507_v55 }
 0x1b9   : > { %v2231_v2 = vpop.f32.mrf.mxu1  ;;  %v2490_v61 = vpop.f32.mrf.mxu0 }
 0x1ba   : > { %v6605_v43 = vadd.f32 %v4909_v15, %v2348_v28  ;;  %v2346_v32 = vadd.f32 %v2231_v2, %v6510_v39 }
 0x1bb   : > { %v6608_v5 = vpop.f32.mrf.mxu1  ;;  %v6610_v60 = vpop.f32.mrf.mxu0 }
 0x1bc   : > { %v6612_v23 = vadd.f32 %v2490_v61, %v2346_v32 }
 0x1bd   : > { %v6614_v3 = vpop.f32.mrf.mxu1  ;;  %v6616_v44 = vpop.f32.mrf.mxu0 }
 0x1bf   : > { %v4865_v11 = vpop.f32.mrf.mxu1  ;;  %v4913_v42 = vpop.f32.mrf.mxu0 }
 0x1c0   : > { %v2352_v55 = vadd.f32 %v4865_v11, %v6519_v20 }
 0x1c1   : > { %v2247_v1 = vpop.f32.mrf.mxu1  ;;  %v2506_v21 = vpop.f32.mrf.mxu0 }
 0x1c2   : > { %v6619_v38 = vadd.f32 %v4913_v42, %v2352_v55  ;;  %v2350_v39 = vadd.f32 %v2247_v1, %v6522_v27 }
 0x1c3   : > { %v6622_v18 = vpop.f32.mrf.mxu1  ;;  %v6624_v46 = vpop.f32.mrf.mxu0 }
 0x1c4   : > { %v6626_v17 = vadd.f32 %v2506_v21, %v2350_v39 }
 0x1c5   : > { %v6628_v51 = vpop.f32.mrf.mxu1  ;;  %v6630_v62 = vpop.f32.mrf.mxu0 }
 0x1c7   : > { %v4869_v6 = vpop.f32.mrf.mxu1  ;;  %v4917_v52 = vpop.f32.mrf.mxu0 }
 0x1c8   : > { %v2356_v20 = vadd.f32 %v4869_v6, %v6531_v63 }
 0x1c9   : > { %v2263_v13 = vpop.f32.mrf.mxu1  ;;  %v2522_v49 = vpop.f32.mrf.mxu0 }
 0x1ca   : > { %v6633_v12 = vadd.f32 %v4917_v52, %v2356_v20  ;;  %v2354_v27 = vadd.f32 %v2263_v13, %v6534_v22 }
 0x1cb   : > { %v4870_v53 = vpop.f32.mrf.mxu1  ;;  %v4918_v7 = vpop.f32.mrf.mxu0 }
 0x1cc   : > { %v6636_v15 = vadd.f32 %v2522_v49, %v2354_v27  ;;  %v2357_v28 = vadd.f32 %v4870_v53, %v6537_v40 }
 0x1cd   : > { %v2266_v2 = vpop.f32.mrf.mxu1  ;;  %v2525_v61 = vpop.f32.mrf.mxu0 }
 0x1ce   : > { %v6639_v32 = vadd.f32 %v4918_v7, %v2357_v28  ;;  %v2355_v11 = vadd.f32 %v2266_v2, %v6540_v34 }
 0x1cf   : > { %v4873_v42 = vpop.f32.mrf.mxu1  ;;  %v4921_v63 = vpop.f32.mrf.mxu0 }
 0x1d0   : > { %v6642_v55 = vadd.f32 %v2525_v61, %v2355_v11  ;;  %v2360_v1 = vadd.f32 %v4873_v42, %v6543_v8 }
 0x1d1   : > { %v2279_v21 = vpop.f32.mrf.mxu1  ;;  %v2538_v22 = vpop.f32.mrf.mxu0 }
 0x1d2   : > { %v6645_v39 = vadd.f32 %v4921_v63, %v2360_v1  ;;  %v2358_v6 = vadd.f32 %v2279_v21, %v6546_v47 }
 0x1d3   : > { %v4874_v52 = vpop.f32.mrf.mxu1  ;;  %v4922_v40 = vpop.f32.mrf.mxu0 }
 0x1d4   : > { %v6648_v20 = vadd.f32 %v2538_v22, %v2358_v6  ;;  %v2361_v13 = vadd.f32 %v4874_v52, %v6549_v35 }
 0x1d5   : > { %v2282_v49 = vpop.f32.mrf.mxu1  ;;  %v2541_v34 = vpop.f32.mrf.mxu0 }
 0x1d6   : > { %v6651_v27 = vadd.f32 %v4922_v40, %v2361_v13  ;;  %v2359_v53 = vadd.f32 %v2282_v49, %v6552_v33 }
 0x1d7   : > { %v4877_v7 = vpop.f32.mrf.mxu1  ;;  %v4925_v8 = vpop.f32.mrf.mxu0 }
 0x1d8   : > { %v6654_v28 = vadd.f32 %v2541_v34, %v2359_v53  ;;  %v2364_v2 = vadd.f32 %v4877_v7, %v6555_v19 }
 0x1d9   : > { %v2295_v61 = vpop.f32.mrf.mxu1  ;;  %v2554_v47 = vpop.f32.mrf.mxu0 }
 0x1da   : > { %v6657_v11 = vadd.f32 %v4925_v8, %v2364_v2  ;;  %v2362_v42 = vadd.f32 %v2295_v61, %v6558_v31 }
 0x1db   : > { %v4878_v63 = vpop.f32.mrf.mxu1  ;;  %v4926_v35 = vpop.f32.mrf.mxu0 }
 0x1dc   : > { %v6660_v1 = vadd.f32 %v2554_v47, %v2362_v42  ;;  %v2365_v21 = vadd.f32 %v4878_v63, %v6561_v0 }
 0x1dd   : > { %v2298_v22 = vpop.f32.mrf.mxu1  ;;  %v2557_v33 = vpop.f32.mrf.mxu0 }
 0x1de   : > { %v6663_v6 = vadd.f32 %v4926_v35, %v2365_v21  ;;  %v2363_v52 = vadd.f32 %v2298_v22, %v6564_v50 }
 0x1df   : > { %v4881_v40 = vpop.f32.mrf.mxu1  ;;  %v4929_v19 = vpop.f32.mrf.mxu0 }
 0x1e0   : > { %v6666_v13 = vadd.f32 %v2557_v33, %v2363_v52  ;;  %v2368_v49 = vadd.f32 %v4881_v40, %v6567_v9 }
 0x1e1   : > { %v2311_v34 = vpop.f32.mrf.mxu1  ;;  %v2570_v31 = vpop.f32.mrf.mxu0 }
 0x1e2   : > { %v6669_v53 = vadd.f32 %v4929_v19, %v2368_v49  ;;  %v2366_v7 = vadd.f32 %v2311_v34, %v6570_v56 }
 0x1e3   : > { %v4882_v8 = vpop.f32.mrf.mxu1  ;;  %v4930_v0 = vpop.f32.mrf.mxu0 }
 0x1e4   : > { %v6672_v2 = vadd.f32 %v2570_v31, %v2366_v7  ;;  %v2369_v61 = vadd.f32 %v4882_v8, %v6573_v57  ;;  %v2345_v7 = vadd.f32 %v6594_v59, %v6501_v45 }
 0x1e5   : > { %v2314_v50 = vpop.f32.mrf.mxu1  ;;  %v2573_v47 = vpop.f32.mrf.mxu0 }
 0x1e6   : > { %v6675_v42 = vadd.f32 %v4930_v0, %v2369_v61  ;;  %v2367_v63 = vadd.f32 %v2314_v50, %v6576_v37 }
 0x1e7   : > { %v4885_v9 = vpop.f32.mrf.mxu1  ;;  %v4933_v35 = vpop.f32.mrf.mxu0 }
 0x1e8   : > { %7351 = vst [vmem:[#allocation5_spill] sm:$0xff] %v6675_v42  ;;  %v6678_v21 = vadd.f32 %v2573_v47, %v2367_v63  ;;  %v2372_v22 = vadd.f32 %v4885_v9, %v6579_v14  ;;  %v2343_v47 = vadd.f32 %v6600_v25, %v6504_v48  ;;  %v2604_v63 = vadd.f32 %v6596_v54, %v2345_v7  ;;  %v6711_v48 = vld [vmem:[%s6708_s10 + $0x8] sm:$0xff]   ;;  %v6714_v25 = vld [vmem:[%s6708_s10] sm:$0xff]  }
 0x1e9   : > { %v2327_v56 = vpop.f32.mrf.mxu1  ;;  %v2586_v33 = vpop.f32.mrf.mxu0  ;;  %v2347_v7 = vadd.f32 %v6614_v3, %v6516_v58 }
 0x1ea   : > { %7352 = vst [vmem:[#allocation4_spill] sm:$0xff] %v6678_v21  ;;  %v6681_v52 = vadd.f32 %v4933_v35, %v2372_v22  ;;  %v2370_v40 = vadd.f32 %v2327_v56, %v6582_v24  ;;  %v2602_v54 = vadd.f32 %v6602_v29, %v2343_v47  ;;  %v6817_v29 = vld [vmem:[%s6708_s10 + $0x30] sm:$0xff]  }
 0x1eb   : > { %v4886_v19 = vpop.f32.mrf.mxu1  ;;  %v4934_v57 = vpop.f32.mrf.mxu0  ;;  %7357 = vst [vmem:[#allocation9_spill] sm:$0xff] %v6817_v29 }
 0x1ec   : > { %7353 = vst [vmem:[#allocation3_spill] sm:$0xff] %v6681_v52  ;;  %v6685_v49 = vadd.f32 %v2586_v33, %v2370_v40  ;;  %v2373_v34 = vadd.f32 %v4886_v19, %v6585_v36  ;;  %v6701_v36 = vld [vmem:[%s7240_s2] ss:$0 sm:$0xff]  ;;  %v2349_v19 = vadd.f32 %v6608_v5, %v6513_v16 }
 0x1ed   : > { %v2330_v37 = vpop.f32.mrf.mxu1  ;;  %v2589_v31 = vpop.f32.mrf.mxu0 }
 0x1ee   : > { %7354 = vst [vmem:[#allocation6_spill] sm:$0xff] %v6685_v49  ;;  %v6690_v8 = vadd.f32 %v4934_v57, %v2373_v34  ;;  %v2371_v14 = vadd.f32 %v2330_v37, %v6588_v41 }
 0x1ef   : > { %v4953_v0 = vpop.f32.mrf.mxu1  ;;  %v5001_v61 = vpop.f32.mrf.mxu0 }
 0x1f0   : > { %7355 = vst [vmem:[#allocation7_spill] sm:$0xff] %v6690_v8  ;;  %v6693_v24 = vadd.f32 %v2589_v31, %v2371_v14  ;;  %v2872_v50 = vadd.f32 %v4953_v0, %v6591_v4  ;;  %v6724_v31 = vld [vmem:[%s6708_s10 + $0x18] sm:$0xff]  }
 0x1f1   : > { %v2743_v45 = vpop.f32.mrf.mxu1  ;;  %v3009_v59 = vpop.f32.mrf.mxu0 }
 0x1f2   : > { %7356 = vst [vmem:[#allocation8_spill] sm:$0xff] %v6693_v24  ;;  %v3138_v41 = vadd.f32 %v5001_v61, %v2872_v50  ;;  %v2870_v9 = vadd.f32 %v2743_v45, %v6598_v26 }
 0x1f3   : > { %v4954_v35 = vpop.f32.mrf.mxu1  ;;  %v5002_v22 = vpop.f32.mrf.mxu0 }
 0x1f4   : > { %v6706_v56 = vadd.f32 %v6701_v36, %v3138_v41  ;;  %v3136_v4 = vadd.f32 %v3009_v59, %v2870_v9  ;;  %v2873_v33 = vadd.f32 %v4954_v35, %v2604_v63  ;;  %v2608_v35 = vadd.f32 %v6610_v60, %v2349_v19 }
 0x1f5   : > { %v2746_v40 = vpop.f32.mrf.mxu1  ;;  %v3012_v26 = vpop.f32.mrf.mxu0  ;;  %v2353_v60 = vadd.f32 %v6622_v18, %v6525_v30 }
 0x1f6   : > { %v3209_v57 = vand.u32 2147483647, %v6706_v56  ;;  %v6721_v34 = vadd.f32 %v6701_v36, %v3136_v4  ;;  %v3139_v37 = vadd.f32 %v5002_v22, %v2873_v33  ;;  %v2871_v0 = vadd.f32 %v2746_v40, %v2602_v54 }
 0x1f7   : > { %v4957_v61 = vpop.f32.mrf.mxu1  ;;  %v5005_v50 = vpop.f32.mrf.mxu0  ;;  %v2606_v54 = vadd.f32 %v6616_v44, %v2347_v7  ;;  %vm3433_vm2 = vcmp.ge.f32.partialorder %v6706_v56, 0.0 }
 0x1f8   : > { %v3241_v47 = vsub.f32 0.0, %v3209_v57  ;;  %v3207_v16 = vand.u32 2147483647, %v6721_v34  ;;  %v6732_v5 = vadd.f32 %v6701_v36, %v3139_v37  ;;  %v3137_v59 = vadd.f32 %v3012_v26, %v2871_v0 }
 0x1f9   : > { %v2876_v58 = vadd.f32 %v4957_v61, %v6605_v43  ;;  %v2759_v41 = vpop.f32.mrf.mxu1  ;;  %v3025_v9 = vpop.f32.mrf.mxu0  ;;  %vm3431_vm3 = vcmp.ge.f32.partialorder %v6721_v34, 0.0 }
 0x1fa   : > { %v3275_v22 = vmul.f32 1.442695, %v3241_v47  ;;  %v3239_v4 = vsub.f32 0.0, %v3207_v16  ;;  %v3210_v33 = vand.u32 2147483647, %v6732_v5  ;;  %v6742_v40 = vadd.f32 %v6701_v36, %v3137_v59 }
 0x1fb   : > { %v3142_v26 = vadd.f32 %v5005_v50, %v2876_v58  ;;  %v2874_v57 = vadd.f32 %v2759_v41, %v6612_v23  ;;  %v4958_v43 = vpop.f32.mrf.mxu1  ;;  %v5006_v37 = vpop.f32.mrf.mxu0  ;;  %v6752_v23 = vld [vmem:[%s6708_s10 + $0x10] sm:$0xff]   ;;  %v2351_v41 = vadd.f32 %v6628_v51, %v6528_v10  ;;  %vm3434_vm4 = vcmp.ge.f32.partialorder %v6732_v5, 0.0 }
 0x1fc   : > { %5196 = vpow2.f32 %v3275_v22  ;;  %v3271_v0 = vmul.f32 1.442695, %v3239_v4  ;;  %v3242_v61 = vsub.f32 0.0, %v3210_v33  ;;  %v2877_v3 = vadd.f32 %v4958_v43, %v2608_v35 }
 0x1fd   : > { %v3208_v19 = vand.u32 2147483647, %v6742_v40  ;;  %v6749_v44 = vadd.f32 %v6701_v36, %v3142_v26  ;;  %v3140_v7 = vadd.f32 %v3025_v9, %v2874_v57  ;;  %v2762_v47 = vpop.f32.mrf.mxu1  ;;  %v3028_v50 = vpop.f32.mrf.mxu0  ;;  %vm3432_vm5 = vcmp.ge.f32.partialorder %v6742_v40, 0.0 }
 0x1fe   : > { %5198 = vpow2.f32 %v3271_v0  ;;  %v3277_v16 = vmul.f32 1.442695, %v3242_v61  ;;  %v3143_v59 = vadd.f32 %v5006_v37, %v2877_v3  ;;  %v2875_v58 = vadd.f32 %v2762_v47, %v2606_v54 }
 0x1ff   : > { %v3240_v35 = vsub.f32 0.0, %v3208_v19  ;;  %v3213_v30 = vand.u32 2147483647, %v6749_v44  ;;  %v6758_v18 = vadd.f32 %v6701_v36, %v3140_v7  ;;  %v4961_v22 = vpop.f32.mrf.mxu1  ;;  %v5009_v4 = vpop.f32.mrf.mxu0  ;;  %v2612_v37 = vadd.f32 %v6624_v46, %v2353_v60 }
 0x200   : > { %5200 = vpow2.f32 %v3277_v16  ;;  %v6761_v9 = vadd.f32 %v6701_v36, %v3143_v59  ;;  %v3141_v33 = vadd.f32 %v3028_v50, %v2875_v58  ;;  %v2880_v26 = vadd.f32 %v4961_v22, %v6619_v38 }
 0x201   : > { %v3273_v3 = vmul.f32 1.442695, %v3240_v35  ;;  %v3245_v54 = vsub.f32 0.0, %v3213_v30  ;;  %v3211_v57 = vand.u32 2147483647, %v6758_v18  ;;  %v2775_v51 = vpop.f32.mrf.mxu1  ;;  %v3041_v43 = vpop.f32.mrf.mxu0  ;;  %v2610_v59 = vadd.f32 %v6630_v62, %v2351_v41  ;;  %v6780_v62 = vld [vmem:[%s6708_s10 + $0x28] sm:$0xff]  }
 0x202   : > { %v3214_v0 = vand.u32 2147483647, %v6761_v9  ;;  %v6769_v61 = vadd.f32 %v6701_v36, %v3141_v33  ;;  %v3146_v19 = vadd.f32 %v5009_v4, %v2880_v26  ;;  %v2878_v38 = vadd.f32 %v2775_v51, %v6626_v17 }
 0x203   : > { %5202 = vpow2.f32 %v3273_v3  ;;  %v3283_v7 = vmul.f32 1.442695, %v3245_v54  ;;  %v3243_v47 = vsub.f32 0.0, %v3211_v57  ;;  %v4962_v50 = vpop.f32.mrf.mxu1  ;;  %v5010_v16 = vpop.f32.mrf.mxu0  ;;  %vm3437_vm6 = vcmp.ge.f32.partialorder %v6749_v44, 0.0 }
 0x204   : > { %v3246_v58 = vsub.f32 0.0, %v3214_v0  ;;  %v3212_v35 = vand.u32 2147483647, %v6769_v61  ;;  %v6775_v46 = vadd.f32 %v6701_v36, %v3146_v19  ;;  %v3144_v30 = vadd.f32 %v3041_v43, %v2878_v38 }
 0x205   : > { %5204 = vpow2.f32 %v3283_v7  ;;  %v3279_v60 = vmul.f32 1.442695, %v3243_v47  ;;  %v2881_v22 = vadd.f32 %v4962_v50, %v2612_v37  ;;  %v2778_v4 = vpop.f32.mrf.mxu1  ;;  %v3044_v33 = vpop.f32.mrf.mxu0  ;;  %v6786_v7 = vld [vmem:[%s6708_s10 + $0x20] sm:$0xff]   ;;  %vm3435_vm7 = vcmp.ge.f32.partialorder %v6758_v18, 0.0 }
 0x206   : > { %v3285_v26 = vmul.f32 1.442695, %v3246_v58  ;;  %v3244_v3 = vsub.f32 0.0, %v3212_v35  ;;  %v3217_v54 = vand.u32 2147483647, %v6775_v46  ;;  %v6783_v41 = vadd.f32 %v6701_v36, %v3144_v30 }
 0x207   : > { %5206 = vpow2.f32 %v3279_v60  ;;  %v3147_v57 = vadd.f32 %v5010_v16, %v2881_v22  ;;  %v2879_v51 = vadd.f32 %v2778_v4, %v2610_v59  ;;  %v4965_v0 = vpop.f32.mrf.mxu1  ;;  %v5013_v43 = vpop.f32.mrf.mxu0  ;;  %vm3438_vm8 = vcmp.ge.f32.partialorder %v6761_v9, 0.0 }
 0x208   : > { %5208 = vpow2.f32 %v3285_v26  ;;  %v3281_v37 = vmul.f32 1.442695, %v3244_v3  ;;  %v3249_v19 = vsub.f32 0.0, %v3217_v54  ;;  %v2884_v47 = vadd.f32 %v4965_v0, %v6633_v12 }
 0x209   : > { %v6789_v38 = vpop.eup %5196  ;;  %v3215_v58 = vand.u32 2147483647, %v6783_v41  ;;  %v6794_v35 = vadd.f32 %v6701_v36, %v3147_v57  ;;  %v3145_v16 = vadd.f32 %v3044_v33, %v2879_v51  ;;  %v2791_v59 = vpop.f32.mrf.mxu1  ;;  %v6806_v57 = vld [vmem:[%s6708_s10 + $0x38] sm:$0xff]   ;;  %vm3436_vm9 = vcmp.ge.f32.partialorder %v6769_v61, 0.0 }
 0x20a   : > { %v3057_v60 = vpop.f32.mrf.mxu0  ;;  %v3337_v30 = vadd.f32 1.0, %v6789_v38  ;;  %5210 = vpow2.f32 %v3281_v37  ;;  %v3291_v22 = vmul.f32 1.442695, %v3249_v19  ;;  %v3150_v19 = vadd.f32 %v5013_v43, %v2884_v47 }
 0x20b   : > { %v6798_v12 = vpop.eup %5198  ;;  %v3247_v26 = vsub.f32 0.0, %v3215_v58  ;;  %v3218_v54 = vand.u32 2147483647, %v6794_v35  ;;  %v6803_v0 = vadd.f32 %v6701_v36, %v3145_v16  ;;  %v4966_v33 = vpop.f32.mrf.mxu1  ;;  %vm3441_vm10 = vcmp.ge.f32.partialorder %v6775_v46, 0.0 }
 0x20c   : > { %5212 = vrcp.f32 %v3337_v30  ;;  %v3335_v51 = vadd.f32 1.0, %v6798_v12  ;;  %v5014_v4 = vpop.f32.mrf.mxu0  ;;  %v6820_v37 = vadd.f32 %v6701_v36, %v3150_v19  ;;  %vm3439_vm11 = vcmp.ge.f32.partialorder %v6783_v41, 0.0 }
 0x20d   : > { %v6810_v50 = vpop.eup %5200  ;;  %5214 = vpow2.f32 %v3291_v22  ;;  %v3287_v58 = vmul.f32 1.442695, %v3247_v26  ;;  %v3250_v3 = vsub.f32 0.0, %v3218_v54  ;;  %v3216_v10 = vand.u32 2147483647, %v6803_v0  ;;  %v2794_v16 = vpop.f32.mrf.mxu1 }
 0x20e   : > { %5216 = vrcp.f32 %v3335_v51  ;;  %v3338_v17 = vadd.f32 1.0, %v6810_v50  ;;  %v2882_v54 = vadd.f32 %v2791_v59, %v6636_v15  ;;  %v2885_v51 = vadd.f32 %v4966_v33, %v6639_v32  ;;  %v3060_v45 = vpop.f32.mrf.mxu0 }
 0x20f   : > { %5218 = vpow2.f32 %v3287_v58  ;;  %v3293_v43 = vmul.f32 1.442695, %v3250_v3  ;;  %v3248_v47 = vsub.f32 0.0, %v3216_v10  ;;  %v4969_v22 = vpop.f32.mrf.mxu1  ;;  %v2883_v63 = vadd.f32 %v2794_v16, %v6642_v55 }
 0x210   : > { %v6822_v26 = vpop.eup %5202  ;;  %5220 = vrcp.f32 %v3338_v17  ;;  %v3221_v19 = vand.u32 2147483647, %v6820_v37  ;;  %v3148_v14 = vadd.f32 %v3057_v60, %v2882_v54  ;;  %v3151_v24 = vadd.f32 %v5014_v4, %v2885_v51  ;;  %v5017_v4 = vpop.f32.mrf.mxu0 }
 0x211   : > { %v3336_v30 = vadd.f32 1.0, %v6822_v26  ;;  %5222 = vpow2.f32 %v3293_v43  ;;  %v3289_v58 = vmul.f32 1.442695, %v3248_v47  ;;  %v6833_v15 = vpop.f32.mrf.mxu1  ;;  %v3149_v55 = vadd.f32 %v3060_v45, %v2883_v63 }
 0x212   : > { %v6829_v3 = vpop.eup %5204  ;;  %v3253_v16 = vsub.f32 0.0, %v3221_v19  ;;  %v6840_v43 = vadd.f32 %v6701_v36, %v3148_v14  ;;  %v6843_v60 = vadd.f32 %v6701_v36, %v3151_v24  ;;  %v2888_v49 = vadd.f32 %v4969_v22, %v6645_v39 }
 0x213   : > { %5224 = vrcp.f32 %v3336_v30  ;;  %v3341_v32 = vadd.f32 1.0, %v6829_v3  ;;  %v6850_v63 = vadd.f32 %v6701_v36, %v3149_v55  ;;  %v6855_v24 = vpop.f32.mrf.mxu1  ;;  %v3073_v55 = vpop.f32.mrf.mxu0  ;;  %v3466_v39 = vsel %vm3434_vm4, 1.0, %v6810_v50 }
 0x214   : > { %v6837_v33 = vpop.eup %5206  ;;  %5226 = vpow2.f32 %v3289_v58  ;;  %v3299_v14 = vmul.f32 1.442695, %v3253_v16  ;;  %v3219_v54 = vand.u32 2147483647, %v6840_v43  ;;  %v3222_v58 = vand.u32 2147483647, %v6843_v60 }
 0x215   : > { %v6845_v47 = vpop.eup %5208  ;;  %5228 = vrcp.f32 %v3341_v32  ;;  %v3339_v45 = vadd.f32 1.0, %v6837_v33  ;;  %v3220_v10 = vand.u32 2147483647, %v6850_v63  ;;  %v3154_v22 = vadd.f32 %v5017_v4, %v2888_v49 }
 0x216   : > { %v3342_v30 = vadd.f32 1.0, %v6845_v47  ;;  %v3251_v32 = vsub.f32 0.0, %v3219_v54  ;;  %v3254_v59 = vsub.f32 0.0, %v3222_v58  ;;  %v3465_v54 = vsel %vm3433_vm2, 1.0, %v6789_v38 }
 0x217   : > { %v6857_v51 = vpop.eup %5210  ;;  %5230 = vrcp.f32 %v3339_v45  ;;  %v3252_v21 = vsub.f32 0.0, %v3220_v10  ;;  %v3464_v50 = vsel %vm3432_vm5, 1.0, %v6822_v26  ;;  %v3467_v26 = vsel %vm3435_vm7, 1.0, %v6837_v33 }
 0x218   : > { %5232 = vrcp.f32 %v3342_v30  ;;  %v3340_v19 = vadd.f32 1.0, %v6857_v51  ;;  %v3295_v8 = vmul.f32 1.442695, %v3251_v32  ;;  %v6870_v30 = vpop.f32.mrf.mxu1  ;;  %v3301_v58 = vmul.f32 1.442695, %v3254_v59 }
 0x219   : > { %v5213_v16 = vpop.eup %5212  ;;  %5234 = vpow2.f32 %v3299_v14  ;;  %v3297_v59 = vmul.f32 1.442695, %v3252_v21  ;;  %v2886_v4 = vadd.f32 %v6833_v15, %v6648_v20  ;;  %v7359_v33 = vunpack.c.h.bf16 %v6711_v48 }
 0x21a   : > { %v6866_v17 = vpop.eup %5214  ;;  %v3401_v45 = vmul.f32 %v5213_v16, %v6706_v56  ;;  %5236 = vrcp.f32 %v3340_v19  ;;  %v3463_v19 = vsel %vm3431_vm3, 1.0, %v6798_v12  ;;  %v5018_v56 = vpop.f32.mrf.mxu0  ;;  %vm3442_vm12 = vcmp.ge.f32.partialorder %v6794_v35, 0.0 }
 0x21b   : > { %v5217_v52 = vpop.eup %5216  ;;  %v3345_v14 = vadd.f32 1.0, %v6866_v17  ;;  %5238 = vpow2.f32 %v3295_v8  ;;  %v6894_v49 = vpop.f32.mrf.mxu1  ;;  %v6902_v8 = vadd.f32 %v6701_v36, %v3154_v22  ;;  %v3152_v20 = vadd.f32 %v3073_v55, %v2886_v4 }
 0x21c   : > { %v6877_v29 = vpop.eup %5218  ;;  %v3399_v32 = vmul.f32 %v5217_v52, %v6721_v34  ;;  %v3497_v42 = vmul.f32 %v3465_v54, %v3401_v45  ;;  %v3469_v52 = vsel %vm3437_vm6, 1.0, %v6829_v3  ;;  %v6910_v3 = vpop.f32.mrf.mxu0  ;;  %v3470_v55 = vsel %vm3438_vm8, 1.0, %v6845_v47 }
 0x21d   : > { %v5221_v38 = vpop.eup %5220  ;;  %5240 = vrcp.f32 %v3345_v14  ;;  %v3343_v10 = vadd.f32 1.0, %v6877_v29  ;;  %v6921_v15 = vpop.f32.mrf.mxu1  ;;  %vm3440_vm13 = vcmp.ge.f32.partialorder %v6803_v0, 0.0  ;;  %vm3445_vm14 = vcmp.ge.f32.partialorder %v6820_v37, 0.0 }
 0x21e   : > { %v6887_v16 = vpop.eup %5222  ;;  %v3402_v12 = vmul.f32 %v5221_v38, %v6732_v5  ;;  %5242 = vpow2.f32 %v3301_v58  ;;  %v3495_v54 = vmul.f32 %v3463_v19, %v3399_v32  ;;  %v3225_v58 = vand.u32 2147483647, %v6902_v8 }
 0x21f   : > { %5244 = vrcp.f32 %v3343_v10  ;;  %v3346_v21 = vadd.f32 1.0, %v6887_v16  ;;  %vm3443_vm15 = vcmp.ge.f32.partialorder %v6840_v43, 0.0  ;;  %vm3446_vm0 = vcmp.ge.f32.partialorder %v6843_v60, 0.0 }
 0x220   : > { %v5225_v34 = vpop.eup %5224  ;;  %v3498_v5 = vmul.f32 %v3466_v39, %v3402_v12  ;;  %5246 = vpow2.f32 %v3297_v59  ;;  %v7358_v39 = vunpack.c.l.bf16 %v6711_v48  ;;  %v3257_v32 = vsub.f32 0.0, %v3225_v58 }
 0x221   : > { %v6912_v45 = vpop.eup %5226  ;;  %v3400_v14 = vmul.f32 %v5225_v34, %v6742_v40  ;;  %5248 = vrcp.f32 %v3346_v21  ;;  %v6936_v21 = vadd.f32 %v6701_v36, %v3152_v20  ;;  %v7360_v34 = vunpack.c.l.bf16 %v6714_v25 }
 0x222   : > { %v5229_v22 = vpop.eup %5228  ;;  %v3593_v38 = vadd.f32 %v7358_v39, %v3497_v42  ;;  %v3594_v10 = vadd.f32 %v7359_v33, %v3498_v5  ;;  %v3344_v59 = vadd.f32 1.0, %v6912_v45  ;;  %v2889_v42 = vadd.f32 %v6855_v24, %v6651_v27 }
 0x223   : > { %v3496_v40 = vmul.f32 %v3464_v50, %v3400_v14  ;;  %v3405_v19 = vmul.f32 %v5229_v22, %v6749_v44  ;;  %v6938_v50 = vpop.f32.mrf.mxu0  ;;  %v3591_v5 = vadd.f32 %v7360_v34, %v3495_v54  ;;  %v7361_v27 = vunpack.c.h.bf16 %v6714_v25 }
 0x224   : > { %v5231_v48 = vpop.eup %5230  ;;  %v4281_v12 = vpack.c.bf16 %v3594_v10, %v3593_v38  ;;  %5250 = vrcp.f32 %v3344_v59  ;;  %v3307_v47 = vmul.f32 1.442695, %v3257_v32  ;;  %v3223_v39 = vand.u32 2147483647, %v6936_v21  ;;  %v4974_v38 = vpop.f32.mrf.mxu1 }
 0x225   : > { %v5233_v44 = vpop.eup %5232  ;;  %v3592_v24 = vadd.f32 %v7361_v27, %v3496_v40  ;;  %v3403_v4 = vmul.f32 %v5231_v48, %v6758_v18  ;;  %v3501_v58 = vmul.f32 %v3469_v52, %v3405_v19  ;;  %v3155_v54 = vadd.f32 %v5018_v56, %v2889_v42  ;;  %v3089_v40 = vpop.f32.mrf.mxu0 }
 0x226   : > { %v6946_v14 = vpop.eup %5234  ;;  %4368 = vst [vmem:[%s6926_s13 + $0x8] sm:$0xff] %v4281_v12   ;;  %v3406_v22 = vmul.f32 %v5233_v44, %v6761_v9  ;;  %v3468_v18 = vsel %vm3436_vm9, 1.0, %v6857_v51  ;;  %v3473_v9 = vsel %vm3441_vm10, 1.0, %v6866_v17  ;;  %5252 = vpow2.f32 %v3307_v47  ;;  %v2826_v44 = vpop.f32.mrf.mxu1 }
 0x227   : > { %v5237_v25 = vpop.eup %5236  ;;  %v4276_v33 = vpack.c.bf16 %v3592_v24, %v3591_v5  ;;  %v3499_v10 = vmul.f32 %v3467_v26, %v3403_v4  ;;  %v3349_v59 = vadd.f32 1.0, %v6946_v14  ;;  %v3255_v26 = vsub.f32 0.0, %v3223_v39  ;;  %v5022_v39 = vpop.f32.mrf.mxu0 }
 0x228   : > { %v3502_v20 = vmul.f32 %v3470_v55, %v3406_v22  ;;  %v3404_v52 = vmul.f32 %v5237_v25, %v6769_v61  ;;  %v6960_v56 = vpop.eup %5238  ;;  %v6964_v19 = vadd.f32 %v6701_v36, %v3155_v54  ;;  %v2887_v51 = vadd.f32 %v6870_v30, %v6654_v28 }
 0x229   : > { %4277 = vst [vmem:[%s6926_s13] sm:$0xff] %v4276_v33   ;;  %5254 = vrcp.f32 %v3349_v59  ;;  %v7362_v61 = vunpack.c.l.bf16 %v6724_v31  ;;  %v7363_v48 = vunpack.c.h.bf16 %v6724_v31  ;;  %v3347_v55 = vadd.f32 1.0, %v6960_v56 }
 0x22a   : > { %v5241_v32 = vpop.eup %5240  ;;  %v3500_v12 = vmul.f32 %v3468_v18, %v3404_v52  ;;  %v7364_v5 = vunpack.c.l.bf16 %v6752_v23  ;;  %v3303_v28 = vmul.f32 1.442695, %v3255_v26  ;;  %v3226_v30 = vand.u32 2147483647, %v6964_v19 }
 0x22b   : > { %v3597_v42 = vadd.f32 %v7362_v61, %v3501_v58  ;;  %v3598_v17 = vadd.f32 %v7363_v48, %v3502_v20  ;;  %v6973_v34 = vpop.eup %5242  ;;  %v3409_v24 = vmul.f32 %v5241_v32, %v6775_v46  ;;  %v7365_v31 = vunpack.c.h.bf16 %v6752_v23  ;;  %v6993_v20 = vpop.f32.mrf.mxu1 }
 0x22c   : > { %v3595_v27 = vadd.f32 %v7364_v5, %v3499_v10  ;;  %v5245_v4 = vpop.eup %5244  ;;  %5256 = vrcp.f32 %v3347_v55  ;;  %v3350_v22 = vadd.f32 1.0, %v6973_v34  ;;  %v3471_v46 = vsel %vm3439_vm11, 1.0, %v6877_v29 }
 0x22d   : > { %v4291_v47 = vpack.c.bf16 %v3598_v17, %v3597_v42  ;;  %v3596_v58 = vadd.f32 %v7365_v31, %v3500_v12  ;;  %v6982_v54 = vpop.eup %5246  ;;  %v3505_v25 = vmul.f32 %v3473_v9, %v3409_v24  ;;  %v3407_v33 = vmul.f32 %v5245_v4, %v6783_v41  ;;  %v3092_v42 = vpop.f32.mrf.mxu0 }
 0x22e   : > { %5258 = vpow2.f32 %v3303_v28  ;;  %v5249_v10 = vpop.eup %5248  ;;  %v3474_v23 = vsel %vm3442_vm12, 1.0, %v6887_v16  ;;  %v3348_v59 = vadd.f32 1.0, %v6982_v54  ;;  %v7366_v52 = vunpack.c.l.bf16 %v6780_v62 }
 0x22f   : > { %4370 = vst [vmem:[%s6926_s13 + $0x18] sm:$0xff] %v4291_v47   ;;  %v4286_v18 = vpack.c.bf16 %v3596_v58, %v3595_v27  ;;  %5260 = vrcp.f32 %v3350_v22  ;;  %v3410_v26 = vmul.f32 %v5249_v10, %v6794_v35  ;;  %v3472_v29 = vsel %vm3440_vm13, 1.0, %v6912_v45  ;;  %v7014_v27 = vpop.f32.mrf.mxu1 }
 0x230   : > { %v3601_v9 = vadd.f32 %v7366_v52, %v3505_v25  ;;  %v3258_v41 = vsub.f32 0.0, %v3226_v30  ;;  %5262 = vrcp.f32 %v3348_v59  ;;  %v3153_v16 = vadd.f32 %v6910_v3, %v2887_v51 }
 0x231   : > { %4369 = vst [vmem:[%s6926_s13 + $0x10] sm:$0xff] %v4286_v18   ;;  %v2892_v32 = vadd.f32 %v6894_v49, %v6657_v11  ;;  %v2890_v61 = vadd.f32 %v6921_v15, %v6660_v1  ;;  %v5251_v48 = vpop.eup %5250  ;;  %v3503_v35 = vmul.f32 %v3471_v46, %v3407_v33  ;;  %v3506_v17 = vmul.f32 %v3474_v23, %v3410_v26  ;;  %v4978_v22 = vpop.f32.mrf.mxu1 }
 0x232   : > { %v3309_v12 = vmul.f32 1.442695, %v3258_v41  ;;  %v2893_v45 = vadd.f32 %v4974_v38, %v6663_v6  ;;  %v3408_v55 = vmul.f32 %v5251_v48, %v6803_v0  ;;  %v7011_v5 = vadd.f32 %v6701_v36, %v3153_v16 }
 0x233   : > { %v3158_v3 = vadd.f32 %v6938_v50, %v2892_v32  ;;  %v3156_v51 = vadd.f32 %v3089_v40, %v2890_v61  ;;  %v7367_v11 = vunpack.c.h.bf16 %v6780_v62  ;;  %v2891_v15 = vadd.f32 %v2826_v44, %v6666_v13  ;;  %v5025_v50 = vpop.f32.mrf.mxu0  ;;  %v7024_v38 = vpop.eup %5252 }
 0x234   : > { %5264 = vpow2.f32 %v3309_v12  ;;  %v3159_v49 = vadd.f32 %v5022_v39, %v2893_v45  ;;  %v3504_v24 = vmul.f32 %v3472_v29, %v3408_v55  ;;  %v3224_v6 = vand.u32 2147483647, %v7011_v5  ;;  %v2842_v32 = vpop.f32.mrf.mxu1 }
 0x235   : > { %v3602_v1 = vadd.f32 %v7367_v11, %v3506_v17  ;;  %v7022_v0 = vadd.f32 %v6701_v36, %v3158_v3  ;;  %v7028_v62 = vadd.f32 %v6701_v36, %v3156_v51  ;;  %v7368_v28 = vunpack.c.l.bf16 %v6786_v7  ;;  %v3105_v23 = vpop.f32.mrf.mxu0 }
 0x236   : > { %v7031_v13 = vadd.f32 %v6701_v36, %v3159_v49  ;;  %v5255_v44 = vpop.eup %5254  ;;  %v7369_v4 = vunpack.c.h.bf16 %v6786_v7  ;;  %v3256_v31 = vsub.f32 0.0, %v3224_v6  ;;  %v3157_v58 = vadd.f32 %v3092_v42, %v2891_v15  ;;  %v4981_v15 = vpop.f32.mrf.mxu1 }
 0x237   : > { %v4301_v40 = vpack.c.bf16 %v3602_v1, %v3601_v9  ;;  %v3599_v30 = vadd.f32 %v7368_v28, %v3503_v35  ;;  %v3413_v39 = vmul.f32 %v5255_v44, %v6820_v37  ;;  %v3353_v25 = vadd.f32 1.0, %v7024_v38  ;;  %v5026_v45 = vpop.f32.mrf.mxu0 }
 0x238   : > { %v3600_v47 = vadd.f32 %v7369_v4, %v3504_v24  ;;  %v3229_v33 = vand.u32 2147483647, %v7022_v0  ;;  %v3227_v46 = vand.u32 2147483647, %v7028_v62  ;;  %v3477_v18 = vsel %vm3445_vm14, 1.0, %v6946_v14 }
 0x239   : > { %4372 = vst [vmem:[%s6926_s13 + $0x28] sm:$0xff] %v4301_v40   ;;  %vm3444_vm1 = vcmp.ge.f32.partialorder %v6850_v63, 0.0  ;;  %v3305_v7 = vmul.f32 1.442695, %v3256_v31  ;;  %v5257_v59 = vpop.eup %5256  ;;  %v3475_v52 = vsel %vm3443_vm15, 1.0, %v6960_v56  ;;  %v3509_v16 = vmul.f32 %v3477_v18, %v3413_v39 }
 0x23a   : > { %v4296_v10 = vpack.c.bf16 %v3600_v47, %v3599_v30  ;;  %v3261_v9 = vsub.f32 0.0, %v3229_v33  ;;  %v3259_v26 = vsub.f32 0.0, %v3227_v46  ;;  %v3230_v29 = vand.u32 2147483647, %v7031_v13  ;;  %v3108_v47 = vpop.f32.mrf.mxu0 }
 0x23b   : > { %v7050_v41 = vpop.eup %5258  ;;  %v3411_v37 = vmul.f32 %v5257_v59, %v6840_v43  ;;  %5266 = vpow2.f32 %v3305_v7  ;;  %v7055_v14 = vadd.f32 %v6701_v36, %v3157_v58  ;;  %v3478_v56 = vsel %vm3446_vm0, 1.0, %v6973_v34  ;;  %v7377_v7 = vld [vmem:[#allocation3_spill] sm:$0xff] }
 0x23c   : > { %4371 = vst [vmem:[%s6926_s13 + $0x20] sm:$0xff] %v4296_v10   ;;  %v5261_v61 = vpop.eup %5260  ;;  %5268 = vrcp.f32 %v3353_v25  ;;  %v3351_v42 = vadd.f32 1.0, %v7050_v41  ;;  %v3315_v48 = vmul.f32 1.442695, %v3261_v9  ;;  %v3476_v43 = vsel %vm3444_vm1, 1.0, %v6982_v54  ;;  %v7376_v10 = vld [vmem:[#allocation4_spill] sm:$0xff] }
 0x23d   : > { %v3414_v35 = vmul.f32 %v5261_v61, %v6843_v60  ;;  %v3311_v17 = vmul.f32 1.442695, %v3259_v26  ;;  %v3262_v12 = vsub.f32 0.0, %v3230_v29  ;;  %v5263_v55 = vpop.eup %5262  ;;  %v3507_v3 = vmul.f32 %v3475_v52, %v3411_v37  ;;  %v5029_v26 = vpop.f32.mrf.mxu0 }
 0x23e   : > { %5270 = vrcp.f32 %v3351_v42  ;;  %v3228_v51 = vand.u32 2147483647, %v7055_v14  ;;  %v2896_v34 = vadd.f32 %v6993_v20, %v6669_v53  ;;  %v7370_v11 = vunpack.c.l.bf16 %v6806_v57  ;;  %v7372_v20 = vld [vmem:[#allocation5_spill] sm:$0xff]  ;;  %v7100_v42 = vld [vmem:[%s6708_s10 + $0x48] sm:$0xff]  }
 0x23f   : > { %v3510_v49 = vmul.f32 %v3478_v56, %v3414_v35  ;;  %v3412_v60 = vmul.f32 %v5263_v55, %v6850_v63  ;;  %5272 = vpow2.f32 %v3315_v48  ;;  %v3317_v54 = vmul.f32 1.442695, %v3262_v12  ;;  %v7373_v63 = vld [vmem:[#allocation9_spill] sm:$0xff] }
 0x240   : > { %v3605_v1 = vadd.f32 %v7370_v11, %v3509_v16  ;;  %5274 = vpow2.f32 %v3311_v17  ;;  %v3260_v24 = vsub.f32 0.0, %v3228_v51  ;;  %v3162_v6 = vadd.f32 %v5025_v50, %v2896_v34 }
 0x241   : > { %v7071_v40 = vpop.eup %5264  ;;  %v7371_v44 = vunpack.c.h.bf16 %v6806_v57  ;;  %v3508_v30 = vmul.f32 %v3476_v43, %v3412_v60  ;;  %v2894_v53 = vadd.f32 %v7014_v27, %v6672_v2  ;;  %v2897_v4 = vadd.f32 %v4978_v22, %v7372_v20  ;;  %v2855_v27 = vpop.f32.mrf.mxu1 }
 0x242   : > { %v7374_v31 = vunpack.c.l.bf16 %v7373_v63  ;;  %v3354_v39 = vadd.f32 1.0, %v7071_v40  ;;  %5276 = vpow2.f32 %v3317_v54  ;;  %v3313_v50 = vmul.f32 1.442695, %v3260_v24 }
 0x243   : > { %v3606_v28 = vadd.f32 %v7371_v44, %v3510_v49  ;;  %v7375_v33 = vunpack.c.h.bf16 %v7373_v63  ;;  %v7084_v46 = vadd.f32 %v6701_v36, %v3162_v6  ;;  %v3160_v2 = vadd.f32 %v3105_v23, %v2894_v53  ;;  %v4982_v56 = vpop.f32.mrf.mxu1 }
 0x244   : > { %v3603_v58 = vadd.f32 %v7374_v31, %v3507_v3  ;;  %5278 = vrcp.f32 %v3354_v39  ;;  %v3163_v22 = vadd.f32 %v5026_v45, %v2897_v4  ;;  %v2895_v18 = vadd.f32 %v2842_v32, %v7376_v10  ;;  %v7378_v45 = vld [vmem:[#allocation6_spill] sm:$0xff]  ;;  %v3121_v3 = vpop.f32.mrf.mxu0 }
 0x245   : > { %v4311_v25 = vpack.c.bf16 %v3606_v28, %v3605_v1  ;;  %v3604_v57 = vadd.f32 %v7375_v33, %v3508_v30  ;;  %v2900_v59 = vadd.f32 %v4981_v15, %v7377_v7  ;;  %5280 = vpow2.f32 %v3313_v50  ;;  %v7379_v1 = vld [vmem:[#allocation7_spill] sm:$0xff] }
 0x246   : > { %v3233_v9 = vand.u32 2147483647, %v7084_v46  ;;  %v7091_v29 = vadd.f32 %v6701_v36, %v3160_v2  ;;  %v7094_v16 = vadd.f32 %v6701_v36, %v3163_v22  ;;  %v3161_v23 = vadd.f32 %v3108_v47, %v2895_v18  ;;  %v5030_v63 = vpop.f32.mrf.mxu0 }
 0x247   : > { %4374 = vst [vmem:[%s6926_s13 + $0x38] sm:$0xff] %v4311_v25   ;;  %v4306_v52 = vpack.c.bf16 %v3604_v57, %v3603_v58  ;;  %v3166_v61 = vadd.f32 %v5029_v26, %v2900_v59  ;;  %v2898_v55 = vadd.f32 %v2855_v27, %v7378_v45  ;;  %v2901_v49 = vadd.f32 %v4982_v56, %v7379_v1  ;;  %v2858_v57 = vpop.f32.mrf.mxu1 }
 0x248   : > { %v3265_v37 = vsub.f32 0.0, %v3233_v9  ;;  %v7097_v32 = vpop.eup %5266  ;;  %v3231_v48 = vand.u32 2147483647, %v7091_v29  ;;  %v3234_v35 = vand.u32 2147483647, %v7094_v16  ;;  %v7107_v11 = vadd.f32 %v6701_v36, %v3161_v23 }
 0x249   : > { %4373 = vst [vmem:[%s6926_s13 + $0x30] sm:$0xff] %v4306_v52   ;;  %v5269_v43 = vpop.eup %5268  ;;  %v3352_v17 = vadd.f32 1.0, %v7097_v32  ;;  %v4247_v15 = vunpack.c.l.bf16 %v7100_v42  ;;  %v7112_v54 = vadd.f32 %v6701_v36, %v3166_v61  ;;  %v4248_v44 = vunpack.c.h.bf16 %v7100_v42  ;;  %v7380_v52 = vld [vmem:[#allocation8_spill] sm:$0xff]  ;;  %v4360_v61 = vld [vmem:[%s6708_s10 + $0x40] sm:$0xff]  }
 0x24a   : > { %v3323_v12 = vmul.f32 1.442695, %v3265_v37  ;;  %v3263_v51 = vsub.f32 0.0, %v3231_v48  ;;  %v3266_v34 = vsub.f32 0.0, %v3234_v35  ;;  %v3417_v6 = vmul.f32 %v5269_v43, %v6902_v8  ;;  %v3124_v35 = vpop.f32.mrf.mxu0 }
 0x24b   : > { %v5271_v60 = vpop.eup %5270  ;;  %5282 = vrcp.f32 %v3352_v17  ;;  %v3232_v4 = vand.u32 2147483647, %v7107_v11  ;;  %v3164_v47 = vadd.f32 %v3121_v3, %v2898_v55  ;;  %vm3449_vm2 = vcmp.ge.f32.partialorder %v6902_v8, 0.0  ;;  %v5326_v3 = vld [vmem:[%s7240_s2] ss:$0 sm:$0xff] }
 0x24c   : > { %v7114_v24 = vpop.eup %5272  ;;  %5284 = vpow2.f32 %v3323_v12  ;;  %v3319_v28 = vmul.f32 1.442695, %v3263_v51  ;;  %v3325_v20 = vmul.f32 1.442695, %v3266_v34  ;;  %v3167_v58 = vadd.f32 %v5030_v63, %v2901_v49 }
 0x24d   : > { %v7118_v30 = vpop.eup %5274  ;;  %v3357_v53 = vadd.f32 1.0, %v7114_v24  ;;  %v3481_v50 = vsel %vm3449_vm2, 1.0, %v7024_v38  ;;  %v3264_v25 = vsub.f32 0.0, %v3232_v4  ;;  %v3237_v33 = vand.u32 2147483647, %v7112_v54 }
 0x24e   : > { %v3355_v31 = vadd.f32 1.0, %v7118_v30  ;;  %5286 = vpow2.f32 %v3319_v28  ;;  %v3513_v2 = vmul.f32 %v3481_v50, %v3417_v6  ;;  %vm3450_vm3 = vcmp.ge.f32.partialorder %v6964_v19, 0.0 }
 0x24f   : > { %v7124_v39 = vpop.eup %5276  ;;  %5288 = vrcp.f32 %v3357_v53  ;;  %v3321_v22 = vmul.f32 1.442695, %v3264_v25  ;;  %v3269_v10 = vsub.f32 0.0, %v3237_v33  ;;  %v7131_v18 = vadd.f32 %v6701_v36, %v3164_v47  ;;  %v4363_v47 = vld [vmem:[%s6708_s10 + $0x58] sm:$0xff]  }
 0x250   : > { %5290 = vrcp.f32 %v3355_v31  ;;  %v3358_v8 = vadd.f32 1.0, %v7124_v39  ;;  %v7137_v59 = vadd.f32 %v6701_v36, %v3167_v58  ;;  %v2899_v9 = vadd.f32 %v2858_v57, %v7380_v52  ;;  %v4362_v52 = vld [vmem:[%s6708_s10 + $0x50] sm:$0xff]  }
 0x251   : > { %v5279_v27 = vpop.eup %5278  ;;  %5292 = vpow2.f32 %v3325_v20  ;;  %v3482_v26 = vsel %vm3450_vm3, 1.0, %v7071_v40  ;;  %v3331_v37 = vmul.f32 1.442695, %v3269_v10  ;;  %v3235_v42 = vand.u32 2147483647, %v7131_v18 }
 0x252   : > { %v7133_v38 = vpop.eup %5280  ;;  %v3418_v7 = vmul.f32 %v5279_v27, %v6964_v19  ;;  %5294 = vrcp.f32 %v3358_v8  ;;  %v3238_v48 = vand.u32 2147483647, %v7137_v59  ;;  %v3609_v19 = vadd.f32 %v4247_v15, %v3513_v2 }
 0x253   : > { %v3356_v23 = vadd.f32 1.0, %v7133_v38  ;;  %5296 = vpow2.f32 %v3321_v22  ;;  %v3415_v43 = vmul.f32 %v5271_v60, %v6936_v21  ;;  %v3165_v36 = vadd.f32 %v3124_v35, %v2899_v9 }
 0x254   : > { %v3514_v56 = vmul.f32 %v3482_v26, %v3418_v7  ;;  %v3267_v12 = vsub.f32 0.0, %v3235_v42  ;;  %v3270_v40 = vsub.f32 0.0, %v3238_v48  ;;  %vm3447_vm4 = vcmp.ge.f32.partialorder %v6936_v21, 0.0 }
 0x255   : > { %5298 = vrcp.f32 %v3356_v23  ;;  %v4243_v45 = vunpack.c.l.bf16 %v4360_v61  ;;  %v4244_v55 = vunpack.c.h.bf16 %v4360_v61  ;;  %v7150_v51 = vadd.f32 %v5326_v3, %v3165_v36 }
 0x256   : > { %v3610_v17 = vadd.f32 %v4248_v44, %v3514_v56  ;;  %5300 = vpow2.f32 %v3331_v37  ;;  %v3479_v1 = vsel %vm3447_vm4, 1.0, %v7050_v41  ;;  %v3327_v60 = vmul.f32 1.442695, %v3267_v12 }
 0x257   : > { %v3333_v15 = vmul.f32 1.442695, %v3270_v40  ;;  %v3511_v44 = vmul.f32 %v3479_v1, %v3415_v43  ;;  %vm3448_vm5 = vcmp.ge.f32.partialorder %v7011_v5, 0.0  ;;  %v3236_v28 = vand.u32 2147483647, %v7150_v51 }
 0x258   : > { %v5283_v34 = vpop.eup %5282  ;;  %v4321_v49 = vpack.c.bf16 %v3610_v17, %v3609_v19  ;;  %v3480_v53 = vsel %vm3448_vm5, 1.0, %v7097_v32  ;;  %5302 = vpow2.f32 %v3327_v60  ;;  %vm3453_vm6 = vcmp.ge.f32.partialorder %v7022_v0, 0.0  ;;  %v4365_v60 = vld [vmem:[%s6708_s10 + $0x68] sm:$0xff]  }
 0x259   : > { %v7153_v6 = vpop.eup %5284  ;;  %v3416_v21 = vmul.f32 %v5283_v34, %v7011_v5  ;;  %5304 = vpow2.f32 %v3333_v15  ;;  %v3268_v63 = vsub.f32 0.0, %v3236_v28  ;;  %v3607_v50 = vadd.f32 %v4243_v45, %v3511_v44  ;;  %v4364_v44 = vld [vmem:[%s6708_s10 + $0x60] sm:$0xff]  }
 0x25a   : > { %4376 = vst [vmem:[%s6926_s13 + $0x48] sm:$0xff] %v4321_v49   ;;  %v3361_v20 = vadd.f32 1.0, %v7153_v6  ;;  %v4255_v2 = vunpack.c.l.bf16 %v4363_v47  ;;  %v4256_v8 = vunpack.c.h.bf16 %v4363_v47  ;;  %v3485_v10 = vsel %vm3453_vm6, 1.0, %v7114_v24 }
 0x25b   : > { %v7161_v4 = vpop.eup %5286  ;;  %v3512_v41 = vmul.f32 %v3480_v53, %v3416_v21  ;;  %v3329_v32 = vmul.f32 1.442695, %v3268_v63  ;;  %vm3454_vm7 = vcmp.ge.f32.partialorder %v7031_v13, 0.0  ;;  %vm3451_vm8 = vcmp.ge.f32.partialorder %v7028_v62, 0.0 }
 0x25c   : > { %v5289_v31 = vpop.eup %5288  ;;  %5306 = vrcp.f32 %v3361_v20  ;;  %v3359_v58 = vadd.f32 1.0, %v7161_v4  ;;  %v3483_v56 = vsel %vm3451_vm8, 1.0, %v7118_v30  ;;  %v4251_v42 = vunpack.c.l.bf16 %v4362_v52 }
 0x25d   : > { %v5291_v5 = vpop.eup %5290  ;;  %v3608_v25 = vadd.f32 %v4244_v55, %v3512_v41  ;;  %v3421_v33 = vmul.f32 %v5289_v31, %v7022_v0  ;;  %v3486_v0 = vsel %vm3454_vm7, 1.0, %v7124_v39  ;;  %v4252_v35 = vunpack.c.h.bf16 %v4362_v52  ;;  %v4367_v52 = vld [vmem:[%s6708_s10 + $0x78] sm:$0xff]  }
 0x25e   : > { %v7166_v57 = vpop.eup %5292  ;;  %5308 = vrcp.f32 %v3359_v58  ;;  %v3419_v7 = vmul.f32 %v5291_v5, %v7028_v62  ;;  %vm3452_vm9 = vcmp.ge.f32.partialorder %v7055_v14, 0.0  ;;  %vm3457_vm10 = vcmp.ge.f32.partialorder %v7084_v46, 0.0 }
 0x25f   : > { %v5295_v27 = vpop.eup %5294  ;;  %v4316_v22 = vpack.c.bf16 %v3608_v25, %v3607_v50  ;;  %v3362_v9 = vadd.f32 1.0, %v7166_v57  ;;  %v3517_v23 = vmul.f32 %v3485_v10, %v3421_v33  ;;  %5310 = vpow2.f32 %v3329_v32 }
 0x260   : > { %v7173_v26 = vpop.eup %5296  ;;  %v3422_v37 = vmul.f32 %v5295_v27, %v7031_v13  ;;  %v3515_v43 = vmul.f32 %v3483_v56, %v3419_v7  ;;  %v3484_v36 = vsel %vm3452_vm9, 1.0, %v7133_v38  ;;  %v4263_v28 = vunpack.c.l.bf16 %v4365_v60 }
 0x261   : > { %4375 = vst [vmem:[%s6926_s13 + $0x40] sm:$0xff] %v4316_v22   ;;  %5312 = vrcp.f32 %v3362_v9  ;;  %v3360_v24 = vadd.f32 1.0, %v7173_v26  ;;  %v3613_v62 = vadd.f32 %v4255_v2, %v3517_v23  ;;  %v3489_v41 = vsel %vm3457_vm10, 1.0, %v7153_v6 }
 0x262   : > { %v5299_v61 = vpop.eup %5298  ;;  %v3518_v48 = vmul.f32 %v3486_v0, %v3422_v37  ;;  %v3611_v45 = vadd.f32 %v4251_v42, %v3515_v43  ;;  %v4259_v47 = vunpack.c.l.bf16 %v4364_v44  ;;  %v4264_v63 = vunpack.c.h.bf16 %v4365_v60  ;;  %v4366_v42 = vld [vmem:[%s6708_s10 + $0x70] sm:$0xff]  }
 0x263   : > { %v7182_v19 = vpop.eup %5300  ;;  %v3420_v13 = vmul.f32 %v5299_v61, %v7055_v14  ;;  %5314 = vrcp.f32 %v3360_v24  ;;  %vm3455_vm11 = vcmp.ge.f32.partialorder %v7091_v29, 0.0  ;;  %vm3458_vm12 = vcmp.ge.f32.partialorder %v7094_v16, 0.0 }
 0x264   : > { %v3614_v39 = vadd.f32 %v4256_v8, %v3518_v48  ;;  %v3365_v17 = vadd.f32 1.0, %v7182_v19  ;;  %v3487_v25 = vsel %vm3455_vm11, 1.0, %v7161_v4  ;;  %v4260_v33 = vunpack.c.h.bf16 %v4364_v44 }
 0x265   : > { %v3516_v30 = vmul.f32 %v3484_v36, %v3420_v13  ;;  %v7188_v40 = vpop.eup %5302  ;;  %vm3456_vm13 = vcmp.ge.f32.partialorder %v7107_v11, 0.0  ;;  %vm3461_vm14 = vcmp.ge.f32.partialorder %v7112_v54, 0.0  ;;  %v4271_v37 = vunpack.c.l.bf16 %v4367_v52 }
 0x266   : > { %v4331_v12 = vpack.c.bf16 %v3614_v39, %v3613_v62  ;;  %5316 = vrcp.f32 %v3365_v17  ;;  %v5305_v3 = vpop.eup %5304  ;;  %v3363_v14 = vadd.f32 1.0, %v7188_v40  ;;  %vm3462_vm15 = vcmp.ge.f32.partialorder %v7137_v59, 0.0 }
 0x267   : > { %v3612_v55 = vadd.f32 %v4252_v35, %v3516_v30  ;;  %v3366_v49 = vadd.f32 1.0, %v5305_v3  ;;  %v4272_v61 = vunpack.c.h.bf16 %v4367_v52  ;;  %v3494_v48 = vsel %vm3462_vm15, 1.0, %v5305_v3 }
 0x268   : > { %4378 = vst [vmem:[%s6926_s13 + $0x58] sm:$0xff] %v4331_v12   ;;  %5318 = vrcp.f32 %v3363_v14  ;;  %vm3459_vm0 = vcmp.ge.f32.partialorder %v7131_v18, 0.0  ;;  %v4267_v13 = vunpack.c.l.bf16 %v4366_v42  ;;  %vm3460_vm1 = vcmp.ge.f32.partialorder %v7150_v51, 0.0 }
 0x269   : > { %v5307_v34 = vpop.eup %5306  ;;  %v4326_v1 = vpack.c.bf16 %v3612_v55, %v3611_v45  ;;  %5320 = vrcp.f32 %v3366_v49 }
 0x26a   : > { %v3425_v15 = vmul.f32 %v5307_v34, %v7084_v46  ;;  %v3490_v46 = vsel %vm3458_vm12, 1.0, %v7166_v57 }
 0x26b   : > { %v5309_v38 = vpop.eup %5308  ;;  %4377 = vst [vmem:[%s6926_s13 + $0x50] sm:$0xff] %v4326_v1  }
 0x26c   : > { %v5311_v21 = vpop.eup %5310  ;;  %v3423_v53 = vmul.f32 %v5309_v38, %v7091_v29  ;;  %v3521_v58 = vmul.f32 %v3489_v41, %v3425_v15  ;;  %v3488_v29 = vsel %vm3456_vm13, 1.0, %v7173_v26  ;;  %v3493_v26 = vsel %vm3461_vm14, 1.0, %v7182_v19 }
 0x26d   : > { %v3364_v31 = vadd.f32 1.0, %v5311_v21  ;;  %v3491_v19 = vsel %vm3459_vm0, 1.0, %v7188_v40  ;;  %v3492_v30 = vsel %vm3460_vm1, 1.0, %v5311_v21 }
 0x26e   : > { %v5313_v20 = vpop.eup %5312  ;;  %v3519_v6 = vmul.f32 %v3487_v25, %v3423_v53 }
 0x26f   : > { %v3426_v5 = vmul.f32 %v5313_v20, %v7094_v16  ;;  %5322 = vrcp.f32 %v3364_v31  ;;  %v3617_v16 = vadd.f32 %v4263_v28, %v3521_v58 }
 0x270   : > { %v5315_v50 = vpop.eup %5314  ;;  %v3615_v4 = vadd.f32 %v4259_v47, %v3519_v6 }
 0x271   : > { %v3522_v32 = vmul.f32 %v3490_v46, %v3426_v5  ;;  %v3424_v2 = vmul.f32 %v5315_v50, %v7107_v11 }
 0x273   : > { %v5317_v8 = vpop.eup %5316  ;;  %v3618_v27 = vadd.f32 %v4264_v63, %v3522_v32  ;;  %v3520_v22 = vmul.f32 %v3488_v29, %v3424_v2 }
 0x274   : > { %v3429_v7 = vmul.f32 %v5317_v8, %v7112_v54 }
 0x275   : > { %v4341_v10 = vpack.c.bf16 %v3618_v27, %v3617_v16  ;;  %v3616_v57 = vadd.f32 %v4260_v33, %v3520_v22  ;;  %v5319_v9 = vpop.eup %5318 }
 0x276   : > { %v5321_v11 = vpop.eup %5320  ;;  %v3525_v0 = vmul.f32 %v3493_v26, %v3429_v7  ;;  %v3427_v56 = vmul.f32 %v5319_v9, %v7131_v18 }
 0x277   : > { %4380 = vst [vmem:[%s6926_s13 + $0x68] sm:$0xff] %v4341_v10   ;;  %v4336_v23 = vpack.c.bf16 %v3616_v57, %v3615_v4  ;;  %v3430_v24 = vmul.f32 %v5321_v11, %v7137_v59  ;;  %v4268_v59 = vunpack.c.h.bf16 %v4366_v42 }
 0x278   : > { %v3621_v43 = vadd.f32 %v4271_v37, %v3525_v0  ;;  %v3523_v39 = vmul.f32 %v3491_v19, %v3427_v56 }
 0x279   : > { %4379 = vst [vmem:[%s6926_s13 + $0x60] sm:$0xff] %v4336_v23   ;;  %v3526_v35 = vmul.f32 %v3494_v48, %v3430_v24 }
 0x27a   : > { %v3619_v45 = vadd.f32 %v4267_v13, %v3523_v39 }
 0x27b   : > { %v3622_v62 = vadd.f32 %v4272_v61, %v3526_v35 }
 0x27c   : > { %v5323_v54 = vpop.eup %5322 }
 0x27d   : > { %v3428_v36 = vmul.f32 %v5323_v54, %v7150_v51  ;;  %v4351_v17 = vpack.c.bf16 %v3622_v62, %v3621_v43 }
 0x27f   : > { %v3524_v12 = vmul.f32 %v3492_v30, %v3428_v36  ;;  %4382 = vst [vmem:[%s6926_s13 + $0x78] sm:$0xff] %v4351_v17  }
 0x281   : > { %v3620_v55 = vadd.f32 %v4268_v59, %v3524_v12 }
 0x283   : > { %v4346_v18 = vpack.c.bf16 %v3620_v55, %v3619_v45 }
 0x285   : > { %4381 = vst [vmem:[%s6926_s13 + $0x70] sm:$0xff] %v4346_v18  }
 0x286 PF: > { %s14_s19 = sadd.s32 1, %s5365_s19   ;;  %s7381_s15 = smov %s5353_s16 }
 0x287   : > { %p11_p10 = scmp.ge.s32.totalorder %s14_s19, 4   ;;  %s7382_s16 = smov %s5427_s23 }
 0x288   : > { %s7383_s17 = smov %s5361_s18  ;;  %s7384_s18 = smov %s7386_s20 }
 0x289   :  { %13 = sbr.rel (!%p11_p10) target bundleno = 3 (0x3), region = 129 }

// kernel: _lambda_.11
= control target key start
LH: loop header
LB: loop body
LE: loop exit
PB: predicated region body
PF: predicated region fallthrough
CT: control target
= control target key end

     0   :  { %s2539_s18 = smov 0   ;;  %s2541_s19 = smov 0   ;;  %s3162_s0 = inlined_call_operand.vmem [shape: bf16[512,128], index: 0, kind: input, shape index: {}]   ;;  %s3163_s1 = inlined_call_operand.vmem [shape: bf16[512,256], index: 1, kind: input, shape index: {}]   ;;  %s3164_s2 = inlined_call_operand.vmem [shape: bf16[128,128], index: 2, kind: input, shape index: {}]   ;;  %s3165_s3 = inlined_call_operand.vmem [shape: bf16[128,128], index: 3, kind: input, shape index: {}]   ;;  %s3166_s4 = inlined_call_operand.vmem [shape: f32[1,128], index: 4, kind: input, shape index: {}]   ;;  %s3167_s5 = inlined_call_operand.vmem [shape: bf16[512,128], index: 5, kind: output, shape index: {}]  }
   0x1   :  { %s2543_s20 = smov 0   ;;  %s2545_s21 = smov 0  }
   0x2   :  { %s2547_s22 = smov 0  }
   0x3 LB: > { %s27_s23 = sadd.s32 1, %s2503_s21  ;;  %p67_p1 = scmp.ne.s32.totalorder %s2495_s19, %s2491_s18  ;;  %s2507_s22 = sphi %s2547_s22, %s15_s22   ;;  %s2503_s21 = sphi %s2545_s21, %s3171_s21   ;;  %s2499_s20 = sphi %s2543_s20, %s3170_s20   ;;  %s2495_s19 = sphi %s2541_s19, %s3169_s19   ;;  %s2491_s18 = sphi %s2539_s18, %s3168_s18  }
   0x4   : > { %p29_p0 = scmp.ge.s32.totalorder %s27_s23, 2  ;;  %p68_p2 = scmp.eq.s32.totalorder %s2507_s22, 0 }
   0x5   : > { %s60_s25 = sadd.s32 1, %s2495_s19  ;;  %p1856_p5 = scmp.ge.s32.totalorder %s2507_s22, 2 }
   0x6   : > { %s3173_s23 = smov (%p29_p0, %s27_s23), 0  ;;  %p69_p3 = por %p68_p2, %p67_p1 }
   0x7   : > { %s57_s24 = ssub.s32 %s2503_s21, %s3173_s23  ;;  %219 = sbr.rel (%p1856_p5) target bundleno = 37 (0x25), region = 28 }
   0x8   : > { %p58_p4 = scmp.eq.s32.totalorder %s57_s24, 0 }
   0xa   : > { %s2574_s26 = scalar_select %p58_p4, %s2495_s19, %s60_s25  }
   0xc   : > { %231 = sbr.rel (!%p69_p3) target bundleno = 37 (0x25), region = 36  ;;  %s233_s27 = sand.u32 (%p69_p3), 1, %s2495_s19  }
   0xd   : > { %s1981_s28 = sshll.u32 (%p69_p3), %s2503_s21, 8  ;;  %s1857_s29 = sshll.u32 (%p69_p3), %s233_s27, 7 }
   0xe   : > { %s2582_s7 = scalar_lea.vmem (%p69_p3), %s3163_s1, %s1981_s28  ;;  %s2586_s8 = scalar_lea.vmem (%p69_p3), [#allocation2], %s1857_s29 }
   0xf   : > { %v1860_v0 = vld [vmem:[%s2582_s7 + $0x4] sm:$0xf] (%p69_p3)  ;;  %v1861_v1 = vld [vmem:[%s2582_s7 + $0xc] sm:$0xf] (%p69_p3)  ;;  %v1862_v2 = vld [vmem:[%s2582_s7 + $0x14] sm:$0xf] (%p69_p3) }
  0x10   : > { %258 = vst [vmem:[%s2586_s8] sm:$0xf] (%p69_p3), %v1860_v0  ;;  %260 = vst [vmem:[%s2586_s8 + $0x4] sm:$0xf] (%p69_p3), %v1861_v1  ;;  %v1863_v3 = vld [vmem:[%s2582_s7 + $0x1c] sm:$0xf] (%p69_p3) }
  0x11   : > { %v1864_v4 = vld [vmem:[%s2582_s7 + $0x24] sm:$0xf]  ;;  %262 = vst [vmem:[%s2586_s8 + $0x8] sm:$0xf] %v1862_v2  ;;  %264 = vst [vmem:[%s2586_s8 + $0xc] sm:$0xf] %v1863_v3 }
  0x12   : > { %266 = vst [vmem:[%s2586_s8 + $0x10] sm:$0xf] %v1864_v4  ;;  %v1865_v5 = vld [vmem:[%s2582_s7 + $0x2c] sm:$0xf]  ;;  %v1866_v6 = vld [vmem:[%s2582_s7 + $0x34] sm:$0xf] }
  0x13   : > { %v1867_v7 = vld [vmem:[%s2582_s7 + $0x3c] sm:$0xf]  ;;  %268 = vst [vmem:[%s2586_s8 + $0x14] sm:$0xf] %v1865_v5  ;;  %270 = vst [vmem:[%s2586_s8 + $0x18] sm:$0xf] %v1866_v6 }
  0x14   : > { %272 = vst [vmem:[%s2586_s8 + $0x1c] sm:$0xf] %v1867_v7  ;;  %v1868_v8 = vld [vmem:[%s2582_s7 + $0x44] sm:$0xf]  ;;  %v1869_v9 = vld [vmem:[%s2582_s7 + $0x4c] sm:$0xf] }
  0x15   : > { %v1870_v10 = vld [vmem:[%s2582_s7 + $0x54] sm:$0xf]  ;;  %274 = vst [vmem:[%s2586_s8 + $0x20] sm:$0xf] %v1868_v8  ;;  %276 = vst [vmem:[%s2586_s8 + $0x24] sm:$0xf] %v1869_v9 }
  0x16   : > { %278 = vst [vmem:[%s2586_s8 + $0x28] sm:$0xf] %v1870_v10  ;;  %v1871_v11 = vld [vmem:[%s2582_s7 + $0x5c] sm:$0xf]  ;;  %v1872_v12 = vld [vmem:[%s2582_s7 + $0x64] sm:$0xf] }
  0x17   : > { %v1873_v13 = vld [vmem:[%s2582_s7 + $0x6c] sm:$0xf]  ;;  %280 = vst [vmem:[%s2586_s8 + $0x2c] sm:$0xf] %v1871_v11  ;;  %282 = vst [vmem:[%s2586_s8 + $0x30] sm:$0xf] %v1872_v12 }
  0x18   : > { %284 = vst [vmem:[%s2586_s8 + $0x34] sm:$0xf] %v1873_v13  ;;  %v1874_v14 = vld [vmem:[%s2582_s7 + $0x74] sm:$0xf]  ;;  %v1875_v15 = vld [vmem:[%s2582_s7 + $0x7c] sm:$0xf] }
  0x19   : > { %v1876_v16 = vld [vmem:[%s2582_s7 + $0x84] sm:$0xf]  ;;  %286 = vst [vmem:[%s2586_s8 + $0x38] sm:$0xf] %v1874_v14  ;;  %288 = vst [vmem:[%s2586_s8 + $0x3c] sm:$0xf] %v1875_v15 }
  0x1a   : > { %290 = vst [vmem:[%s2586_s8 + $0x40] sm:$0xf] %v1876_v16  ;;  %v1877_v17 = vld [vmem:[%s2582_s7 + $0x8c] sm:$0xf]  ;;  %v1878_v18 = vld [vmem:[%s2582_s7 + $0x94] sm:$0xf] }
  0x1b   : > { %v1879_v19 = vld [vmem:[%s2582_s7 + $0x9c] sm:$0xf]  ;;  %292 = vst [vmem:[%s2586_s8 + $0x44] sm:$0xf] %v1877_v17  ;;  %294 = vst [vmem:[%s2586_s8 + $0x48] sm:$0xf] %v1878_v18 }
  0x1c   : > { %296 = vst [vmem:[%s2586_s8 + $0x4c] sm:$0xf] %v1879_v19  ;;  %v1880_v20 = vld [vmem:[%s2582_s7 + $0xa4] sm:$0xf]  ;;  %v1881_v21 = vld [vmem:[%s2582_s7 + $0xac] sm:$0xf] }
  0x1d   : > { %v1882_v22 = vld [vmem:[%s2582_s7 + $0xb4] sm:$0xf]  ;;  %298 = vst [vmem:[%s2586_s8 + $0x50] sm:$0xf] %v1880_v20  ;;  %300 = vst [vmem:[%s2586_s8 + $0x54] sm:$0xf] %v1881_v21 }
  0x1e   : > { %302 = vst [vmem:[%s2586_s8 + $0x58] sm:$0xf] %v1882_v22  ;;  %v1883_v23 = vld [vmem:[%s2582_s7 + $0xbc] sm:$0xf]  ;;  %v1884_v24 = vld [vmem:[%s2582_s7 + $0xc4] sm:$0xf] }
  0x1f   : > { %v1885_v25 = vld [vmem:[%s2582_s7 + $0xcc] sm:$0xf]  ;;  %304 = vst [vmem:[%s2586_s8 + $0x5c] sm:$0xf] %v1883_v23  ;;  %306 = vst [vmem:[%s2586_s8 + $0x60] sm:$0xf] %v1884_v24 }
  0x20   : > { %308 = vst [vmem:[%s2586_s8 + $0x64] sm:$0xf] %v1885_v25  ;;  %v1886_v26 = vld [vmem:[%s2582_s7 + $0xd4] sm:$0xf]  ;;  %v1887_v27 = vld [vmem:[%s2582_s7 + $0xdc] sm:$0xf] }
  0x21   : > { %v1888_v28 = vld [vmem:[%s2582_s7 + $0xe4] sm:$0xf]  ;;  %310 = vst [vmem:[%s2586_s8 + $0x68] sm:$0xf] %v1886_v26  ;;  %312 = vst [vmem:[%s2586_s8 + $0x6c] sm:$0xf] %v1887_v27 }
  0x22   : > { %314 = vst [vmem:[%s2586_s8 + $0x70] sm:$0xf] %v1888_v28  ;;  %v1889_v29 = vld [vmem:[%s2582_s7 + $0xec] sm:$0xf]  ;;  %v1890_v30 = vld [vmem:[%s2582_s7 + $0xf4] sm:$0xf] }
  0x23   : > { %v1891_v31 = vld [vmem:[%s2582_s7 + $0xfc] sm:$0xf]  ;;  %316 = vst [vmem:[%s2586_s8 + $0x74] sm:$0xf] %v1889_v29  ;;  %318 = vst [vmem:[%s2586_s8 + $0x78] sm:$0xf] %v1890_v30 }
  0x24   : > { %320 = vst [vmem:[%s2586_s8 + $0x7c] sm:$0xf] %v1891_v31 }
  0x25 PF: > { %p1892_p6 = scmp.ge.s32.totalorder %s2507_s22, 1  ;;  %p407_p7 = scmp.lt.s32.totalorder %s2507_s22, 3 }
  0x27   : > { %p408_p8 = pnand %p1892_p6, %p407_p7 }
  0x28   : > { %s1894_s17 = sshll.u32 (!%p408_p8), %s2499_s20, 5  ;;  %s414_s29 = sand.u32 (!%p408_p8), 1, %s2491_s18  }
  0x29   : > { %411 = sbr.rel (%p408_p8) target bundleno = 406 (0x196), region = 77  ;;  %p461_p9 = scmp.lt.s32.totalorder (!%p408_p8), %s1894_s17, 63 }
  0x2a   : > { %s1893_s8 = sshll.u32 (!%p408_p8), %s414_s29, 7 }
  0x2b   : > { %s2700_s28 = scalar_lea.vmem (!%p408_p8), [#allocation2], %s1893_s8 }
  0x2e   : > { %v2293_v32 = vld [vmem:[%s3165_s3 + $0x38] sm:$0xff]   ;;  %v2295_v34 = vld [vmem:[%s3165_s3 + $0x30] sm:$0xff]   ;;  %v2297_v36 = vld [vmem:[%s3165_s3 + $0x28] sm:$0xff]   ;;  %s3175_s17 = smov (!%p461_p9, %s1894_s17), 63 }
  0x2f   : > { %v2294_v33 = vld [vmem:[%s3164_s2 + $0x38] sm:$0xff]   ;;  %2157 = vmatprep.subr.bf16.mxu0 %v2293_v32  ;;  %v2296_v35 = vld [vmem:[%s3164_s2 + $0x30] sm:$0xff]   ;;  %v2298_v37 = vld [vmem:[%s3164_s2 + $0x28] sm:$0xff]   ;;  %s1895_s9 = sshll.u32 %s3175_s17, 2 }
  0x30   : > { %2205 = vmatprep.subr.bf16.mxu1 %v2294_v33  ;;  %2158 = vmatpush3.bf16.msra.mxu0 %v2293_v32  ;;  %v2299_v38 = vld [vmem:[%s3165_s3 + $0x20] sm:$0xff]   ;;  %v2301_v40 = vld [vmem:[%s3165_s3 + $0x18] sm:$0xff]   ;;  %v2303_v42 = vld [vmem:[%s3165_s3 + $0x10] sm:$0xff]   ;;  %s2695_s24 = scalar_lea.vmem %s3162_s0, %s1895_s9  ;;  %s2903_s15 = scalar_lea.vmem %s3167_s5, %s1895_s9 }
  0x31   : > { %2206 = vmatpush3.bf16.msra.mxu1 %v2294_v33  ;;  %2159 = vmatprep.subr.bf16.mxu0 %v2295_v34  ;;  %v2300_v39 = vld [vmem:[%s3164_s2 + $0x20] sm:$0xff]   ;;  %v2302_v41 = vld [vmem:[%s3164_s2 + $0x18] sm:$0xff]   ;;  %v2304_v43 = vld [vmem:[%s3164_s2 + $0x10] sm:$0xff]  }
  0x32   : > { %2207 = vmatprep.subr.bf16.mxu1 %v2296_v35  ;;  %v2309_v44 = vld [vmem:[%s2700_s28] sm:$0xff]   ;;  %v2305_v46 = vld [vmem:[%s3165_s3 + $0x8] sm:$0xff]   ;;  %v2313_v52 = vld [vmem:[%s2700_s28 + $0x10] sm:$0xff]  }
  0x33   : > { %v2310_v45 = vld [vmem:[%s2695_s24] sm:$0xff]   ;;  %2173 = vmatprep.mubr.bf16.mxu0 %v2309_v44  ;;  %v2306_v47 = vld [vmem:[%s3164_s2 + $0x8] sm:$0xff]   ;;  %v2314_v53 = vld [vmem:[%s2695_s24 + $0x10] sm:$0xff]  }
  0x34   : > { %2160 = vmatpush3.bf16.msra.mxu0 %v2295_v34  ;;  %2221 = vmatprep.mubr.bf16.mxu1 %v2310_v45  ;;  %v2307_v48 = vld [vmem:[%s3165_s3] sm:$0xff]   ;;  %v2311_v50 = vld [vmem:[%s2700_s28 + $0x8] sm:$0xff]   ;;  %v2315_v54 = vld [vmem:[%s2700_s28 + $0x18] sm:$0xff]  }
  0x35   : > { %2208 = vmatpush3.bf16.msra.mxu1 %v2296_v35  ;;  %2161 = vmatprep.subr.bf16.mxu0 %v2297_v36  ;;  %v2308_v49 = vld [vmem:[%s3164_s2] sm:$0xff]   ;;  %v2312_v51 = vld [vmem:[%s2695_s24 + $0x8] sm:$0xff]   ;;  %v2316_v55 = vld [vmem:[%s2695_s24 + $0x18] sm:$0xff]  }
  0x36   : > { %2209 = vmatprep.subr.bf16.mxu1 %v2298_v37  ;;  %v2317_v56 = vld [vmem:[%s2700_s28 + $0x20] sm:$0xff]   ;;  %v2319_v58 = vld [vmem:[%s2700_s28 + $0x28] sm:$0xff]   ;;  %v2321_v60 = vld [vmem:[%s2700_s28 + $0x30] sm:$0xff]  }
  0x37   : > { %v2318_v57 = vld [vmem:[%s2695_s24 + $0x20] sm:$0xff]   ;;  %v2320_v59 = vld [vmem:[%s2695_s24 + $0x28] sm:$0xff]   ;;  %v2322_v61 = vld [vmem:[%s2695_s24 + $0x30] sm:$0xff]  }
  0x38   : > { %2162 = vmatpush3.bf16.msra.mxu0 %v2297_v36  ;;  %v2323_v62 = vld [vmem:[%s2700_s28 + $0x38] sm:$0xff]   ;;  %v2325_v0 = vld [vmem:[%s2700_s28 + $0x40] sm:$0xff]   ;;  %v2327_v2 = vld [vmem:[%s2700_s28 + $0x48] sm:$0xff]  }
  0x39   : > { %2210 = vmatpush3.bf16.msra.mxu1 %v2298_v37  ;;  %2163 = vmatprep.subr.bf16.mxu0 %v2299_v38  ;;  %v2324_v63 = vld [vmem:[%s2695_s24 + $0x38] sm:$0xff]   ;;  %v2326_v1 = vld [vmem:[%s2695_s24 + $0x40] sm:$0xff]   ;;  %v2328_v3 = vld [vmem:[%s2695_s24 + $0x48] sm:$0xff]  }
  0x3a   : > { %2211 = vmatprep.subr.bf16.mxu1 %v2300_v39  ;;  %v2329_v4 = vld [vmem:[%s2700_s28 + $0x50] sm:$0xff]   ;;  %v2331_v6 = vld [vmem:[%s2700_s28 + $0x58] sm:$0xff]   ;;  %v2333_v8 = vld [vmem:[%s2700_s28 + $0x60] sm:$0xff]  }
  0x3b   : > { %v2330_v5 = vld [vmem:[%s2695_s24 + $0x50] sm:$0xff]   ;;  %v2332_v7 = vld [vmem:[%s2695_s24 + $0x58] sm:$0xff]   ;;  %v2334_v9 = vld [vmem:[%s2695_s24 + $0x60] sm:$0xff]  }
  0x3c   : > { %2164 = vmatpush3.bf16.msra.mxu0 %v2299_v38  ;;  %v2335_v10 = vld [vmem:[%s2700_s28 + $0x68] sm:$0xff]   ;;  %v2337_v12 = vld [vmem:[%s2700_s28 + $0x70] sm:$0xff]   ;;  %v2339_v14 = vld [vmem:[%s2700_s28 + $0x78] sm:$0xff]  }
  0x3d   : > { %2212 = vmatpush3.bf16.msra.mxu1 %v2300_v39  ;;  %2165 = vmatprep.subr.bf16.mxu0 %v2301_v40  ;;  %v2336_v11 = vld [vmem:[%s2695_s24 + $0x68] sm:$0xff]   ;;  %v2338_v13 = vld [vmem:[%s2695_s24 + $0x70] sm:$0xff]   ;;  %v2340_v15 = vld [vmem:[%s2695_s24 + $0x78] sm:$0xff]  }
  0x3e   : > { %2213 = vmatprep.subr.bf16.mxu1 %v2302_v41  ;;  %v2749_v18 = vld [vmem:[%s3166_s4] ss:$0 sm:$0xff] }
  0x40   : > { %2166 = vmatpush3.bf16.msra.mxu0 %v2301_v40 }
  0x41   : > { %2214 = vmatpush3.bf16.msra.mxu1 %v2302_v41  ;;  %2167 = vmatprep.subr.bf16.mxu0 %v2303_v42 }
  0x42   : > { %2215 = vmatprep.subr.bf16.mxu1 %v2304_v43 }
  0x44   : > { %2168 = vmatpush3.bf16.msra.mxu0 %v2303_v42 }
  0x45   : > { %2216 = vmatpush3.bf16.msra.mxu1 %v2304_v43  ;;  %2169 = vmatprep.subr.bf16.mxu0 %v2305_v46 }
  0x46   : > { %2217 = vmatprep.subr.bf16.mxu1 %v2306_v47 }
  0x48   : > { %2170 = vmatpush3.bf16.msra.mxu0 %v2305_v46 }
  0x49   : > { %2218 = vmatpush3.bf16.msra.mxu1 %v2306_v47  ;;  %2171 = vmatprep.subr.bf16.mxu0 %v2307_v48 }
  0x4a   : > { %2219 = vmatprep.subr.bf16.mxu1 %v2308_v49 }
  0x4c   : > { %2172 = vmatpush3.bf16.msra.mxu0 %v2307_v48 }
  0x4d   : > { %2220 = vmatpush3.bf16.msra.mxu1 %v2308_v49 }
  0x4f   : > { %2174 = vmatmul.mubr.bf16.vlgmr.msra.gmra.mxu0 %v2311_v50 }
  0x50   : > { %2222 = vmatmul.mubr.bf16.vlgmr.msra.gmra.mxu1 %v2312_v51  ;;  %2177 = vmatprep.mubr.bf16.mxu0 %v2313_v52 }
  0x51   : > { %2225 = vmatprep.mubr.bf16.mxu1 %v2314_v53 }
  0x57   : > { %2178 = vmatmul.mubr.bf16.gmra.mxu0 %v2315_v54 }
  0x58   : > { %2226 = vmatmul.mubr.bf16.gmra.mxu1 %v2316_v55  ;;  %2181 = vmatprep.mubr.bf16.mxu0 %v2317_v56 }
  0x59   : > { %2229 = vmatprep.mubr.bf16.mxu1 %v2318_v57 }
  0x5f   : > { %2182 = vmatmul.mubr.bf16.gmra.mxu0 %v2319_v58 }
  0x60   : > { %2230 = vmatmul.mubr.bf16.gmra.mxu1 %v2320_v59  ;;  %2185 = vmatprep.mubr.bf16.mxu0 %v2321_v60 }
  0x61   : > { %2233 = vmatprep.mubr.bf16.mxu1 %v2322_v61 }
  0x67   : > { %2186 = vmatmul.mubr.bf16.gmra.mxu0 %v2323_v62 }
  0x68   : > { %2234 = vmatmul.mubr.bf16.gmra.mxu1 %v2324_v63  ;;  %2189 = vmatprep.mubr.bf16.mxu0 %v2325_v0 }
  0x69   : > { %2237 = vmatprep.mubr.bf16.mxu1 %v2326_v1 }
  0x6f   : > { %2190 = vmatmul.mubr.bf16.gmra.mxu0 %v2327_v2 }
  0x70   : > { %2238 = vmatmul.mubr.bf16.gmra.mxu1 %v2328_v3  ;;  %2193 = vmatprep.mubr.bf16.mxu0 %v2329_v4 }
  0x71   : > { %2241 = vmatprep.mubr.bf16.mxu1 %v2330_v5 }
  0x77   : > { %2194 = vmatmul.mubr.bf16.gmra.mxu0 %v2331_v6 }
  0x78   : > { %2242 = vmatmul.mubr.bf16.gmra.mxu1 %v2332_v7  ;;  %2197 = vmatprep.mubr.bf16.mxu0 %v2333_v8 }
  0x79   : > { %2245 = vmatprep.mubr.bf16.mxu1 %v2334_v9 }
  0x7f   : > { %2198 = vmatmul.mubr.bf16.gmra.mxu0 %v2335_v10 }
  0x80   : > { %2246 = vmatmul.mubr.bf16.gmra.mxu1 %v2336_v11  ;;  %2201 = vmatprep.mubr.bf16.mxu0 %v2337_v12 }
  0x81   : > { %2249 = vmatprep.mubr.bf16.mxu1 %v2338_v13 }
  0x87   : > { %2202 = vmatmul.mubr.bf16.gmra.mxu0 %v2339_v14 }
  0x88   : > { %2250 = vmatmul.mubr.bf16.gmra.mxu1 %v2340_v15 }
 0x10f   : > { %v2175_v16 = vpop.f32.mrf.mxu0 }
 0x110   : > { %v2223_v17 = vpop.f32.mrf.mxu1 }
 0x111   : > { %v1076_v19 = vadd.f32 %v2223_v17, %v2175_v16  ;;  %v762_v20 = vpop.f32.mrf.mxu0 }
 0x112   : > { %v1067_v21 = vpop.f32.mrf.mxu1 }
 0x113   : > { %v2752_v22 = vadd.f32 %v2749_v18, %v1076_v19  ;;  %v1068_v23 = vadd.f32 %v1067_v21, %v762_v20  ;;  %v2176_v24 = vpop.f32.mrf.mxu0 }
 0x114   : > { %v2224_v25 = vpop.f32.mrf.mxu1 }
 0x115   : > { %v1235_v26 = vand.u32 2147483647, %v2752_v22  ;;  %v2756_v27 = vadd.f32 %v2749_v18, %v1068_v23  ;;  %v1079_v28 = vadd.f32 %v2224_v25, %v2176_v24  ;;  %v765_v29 = vpop.f32.mrf.mxu0  ;;  %vm1459_vm0 = vcmp.ge.f32.partialorder %v2752_v22, 0.0 }
 0x116   : > { %v1070_v30 = vpop.f32.mrf.mxu1 }
 0x117   : > { %v1267_v31 = vsub.f32 0.0, %v1235_v26  ;;  %v1233_v32 = vand.u32 2147483647, %v2756_v27  ;;  %v2760_v33 = vadd.f32 %v2749_v18, %v1079_v28  ;;  %v2179_v34 = vpop.f32.mrf.mxu0  ;;  %v1071_v35 = vadd.f32 %v1070_v30, %v765_v29 }
 0x118   : > { %v2227_v36 = vpop.f32.mrf.mxu1  ;;  %vm1457_vm1 = vcmp.ge.f32.partialorder %v2756_v27, 0.0 }
 0x119   : > { %v1301_v37 = vmul.f32 1.442695, %v1267_v31  ;;  %v1265_v38 = vsub.f32 0.0, %v1233_v32  ;;  %v1236_v39 = vand.u32 2147483647, %v2760_v33  ;;  %v778_v40 = vpop.f32.mrf.mxu0  ;;  %v2764_v41 = vadd.f32 %v2749_v18, %v1071_v35 }
 0x11a   : > { %v1092_v42 = vadd.f32 %v2227_v36, %v2179_v34  ;;  %v1083_v43 = vpop.f32.mrf.mxu1  ;;  %vm1460_vm2 = vcmp.ge.f32.partialorder %v2760_v33, 0.0 }
 0x11b   : > { %2341 = vpow2.f32 %v1301_v37  ;;  %v1297_v44 = vmul.f32 1.442695, %v1265_v38  ;;  %v1268_v45 = vsub.f32 0.0, %v1236_v39  ;;  %v1084_v46 = vadd.f32 %v1083_v43, %v778_v40  ;;  %v2180_v47 = vpop.f32.mrf.mxu0 }
 0x11c   : > { %v1234_v48 = vand.u32 2147483647, %v2764_v41  ;;  %v2768_v49 = vadd.f32 %v2749_v18, %v1092_v42  ;;  %v2228_v50 = vpop.f32.mrf.mxu1  ;;  %vm1458_vm3 = vcmp.ge.f32.partialorder %v2764_v41, 0.0 }
 0x11d   : > { %2343 = vpow2.f32 %v1297_v44  ;;  %v1303_v51 = vmul.f32 1.442695, %v1268_v45  ;;  %v2771_v52 = vadd.f32 %v2749_v18, %v1084_v46  ;;  %v1095_v53 = vadd.f32 %v2228_v50, %v2180_v47  ;;  %v781_v54 = vpop.f32.mrf.mxu0 }
 0x11e   : > { %v1266_v55 = vsub.f32 0.0, %v1234_v48  ;;  %v1239_v56 = vand.u32 2147483647, %v2768_v49  ;;  %v1086_v57 = vpop.f32.mrf.mxu1  ;;  %vm1463_vm4 = vcmp.ge.f32.partialorder %v2768_v49, 0.0 }
 0x11f   : > { %2345 = vpow2.f32 %v1303_v51  ;;  %v1237_v58 = vand.u32 2147483647, %v2771_v52  ;;  %v2776_v59 = vadd.f32 %v2749_v18, %v1095_v53  ;;  %v2183_v60 = vpop.f32.mrf.mxu0  ;;  %v1087_v63 = vadd.f32 %v1086_v57, %v781_v54 }
 0x120   : > { %v1299_v61 = vmul.f32 1.442695, %v1266_v55  ;;  %v1271_v62 = vsub.f32 0.0, %v1239_v56  ;;  %v2231_v0 = vpop.f32.mrf.mxu1  ;;  %vm1461_vm5 = vcmp.ge.f32.partialorder %v2771_v52, 0.0 }
 0x121   : > { %v1269_v1 = vsub.f32 0.0, %v1237_v58  ;;  %v1240_v2 = vand.u32 2147483647, %v2776_v59  ;;  %v1108_v3 = vadd.f32 %v2231_v0, %v2183_v60  ;;  %v794_v4 = vpop.f32.mrf.mxu0  ;;  %v2780_v6 = vadd.f32 %v2749_v18, %v1087_v63 }
 0x122   : > { %2347 = vpow2.f32 %v1299_v61  ;;  %v1309_v5 = vmul.f32 1.442695, %v1271_v62  ;;  %v1099_v7 = vpop.f32.mrf.mxu1  ;;  %vm1464_vm6 = vcmp.ge.f32.partialorder %v2776_v59, 0.0 }
 0x123   : > { %v1305_v8 = vmul.f32 1.442695, %v1269_v1  ;;  %v1272_v9 = vsub.f32 0.0, %v1240_v2  ;;  %v2783_v10 = vadd.f32 %v2749_v18, %v1108_v3  ;;  %v1100_v11 = vadd.f32 %v1099_v7, %v794_v4  ;;  %v2184_v12 = vpop.f32.mrf.mxu0 }
 0x124   : > { %2349 = vpow2.f32 %v1309_v5  ;;  %v1238_v13 = vand.u32 2147483647, %v2780_v6  ;;  %v2232_v14 = vpop.f32.mrf.mxu1  ;;  %vm1462_vm7 = vcmp.ge.f32.partialorder %v2780_v6, 0.0 }
 0x125   : > { %2351 = vpow2.f32 %v1305_v8  ;;  %v1311_v15 = vmul.f32 1.442695, %v1272_v9  ;;  %v1243_v16 = vand.u32 2147483647, %v2783_v10  ;;  %v797_v17 = vpop.f32.mrf.mxu0  ;;  %v2788_v20 = vadd.f32 %v2749_v18, %v1100_v11 }
 0x126   : > { %v1270_v19 = vsub.f32 0.0, %v1238_v13  ;;  %v1111_v21 = vadd.f32 %v2232_v14, %v2184_v12  ;;  %v1102_v23 = vpop.f32.mrf.mxu1  ;;  %vm1467_vm8 = vcmp.ge.f32.partialorder %v2783_v10, 0.0 }
 0x127   : > { %2353 = vpow2.f32 %v1311_v15  ;;  %v1275_v24 = vsub.f32 0.0, %v1243_v16  ;;  %v1103_v25 = vadd.f32 %v1102_v23, %v797_v17  ;;  %v2187_v26 = vpop.f32.mrf.mxu0  ;;  %v1241_v30 = vand.u32 2147483647, %v2788_v20 }
 0x128   : > { %v2790_v28 = vpop.eup %2341  ;;  %v1307_v29 = vmul.f32 1.442695, %v1270_v19  ;;  %v2794_v31 = vadd.f32 %v2749_v18, %v1111_v21  ;;  %v2235_v32 = vpop.f32.mrf.mxu1  ;;  %vm1465_vm9 = vcmp.ge.f32.partialorder %v2788_v20, 0.0 }
 0x129   : > { %v1363_v34 = vadd.f32 1.0, %v2790_v28  ;;  %v1317_v35 = vmul.f32 1.442695, %v1275_v24  ;;  %v2798_v36 = vadd.f32 %v2749_v18, %v1103_v25  ;;  %v810_v37 = vpop.f32.mrf.mxu0  ;;  %v1273_v39 = vsub.f32 0.0, %v1241_v30 }
 0x12a   : > { %v2800_v38 = vpop.eup %2343  ;;  %2355 = vpow2.f32 %v1307_v29  ;;  %v1244_v40 = vand.u32 2147483647, %v2794_v31  ;;  %v1115_v42 = vpop.f32.mrf.mxu1  ;;  %v1124_v56 = vadd.f32 %v2235_v32, %v2187_v26  ;;  %vm1468_vm10 = vcmp.ge.f32.partialorder %v2794_v31, 0.0 }
 0x12b   : > { %2357 = vrcp.f32 %v1363_v34  ;;  %v1361_v43 = vadd.f32 1.0, %v2800_v38  ;;  %v1242_v44 = vand.u32 2147483647, %v2798_v36  ;;  %v2188_v45 = vpop.f32.mrf.mxu0  ;;  %v1313_v47 = vmul.f32 1.442695, %v1273_v39 }
 0x12c   : > { %v2805_v46 = vpop.eup %2345  ;;  %2359 = vpow2.f32 %v1317_v35  ;;  %v1276_v48 = vsub.f32 0.0, %v1244_v40  ;;  %v2236_v50 = vpop.f32.mrf.mxu1  ;;  %v1116_v57 = vadd.f32 %v1115_v42, %v810_v37  ;;  %v2812_v2 = vadd.f32 %v2749_v18, %v1124_v56 }
 0x12d   : > { %2361 = vrcp.f32 %v1361_v43  ;;  %v1364_v51 = vadd.f32 1.0, %v2805_v46  ;;  %v1274_v53 = vsub.f32 0.0, %v1242_v44  ;;  %v813_v54 = vpop.f32.mrf.mxu0  ;;  %v1127_v62 = vadd.f32 %v2236_v50, %v2188_v45 }
 0x12e   : > { %2363 = vpow2.f32 %v1313_v47  ;;  %v1319_v55 = vmul.f32 1.442695, %v1276_v48  ;;  %v1118_v58 = vpop.f32.mrf.mxu1  ;;  %v2817_v5 = vadd.f32 %v2749_v18, %v1116_v57  ;;  %v1247_v12 = vand.u32 2147483647, %v2812_v2 }
 0x12f   : > { %v2808_v60 = vpop.eup %2347  ;;  %2365 = vrcp.f32 %v1364_v51  ;;  %v1315_v61 = vmul.f32 1.442695, %v1274_v53  ;;  %v1119_v63 = vadd.f32 %v1118_v58, %v813_v54  ;;  %v2191_v0 = vpop.f32.mrf.mxu0  ;;  %v2820_v7 = vadd.f32 %v2749_v18, %v1127_v62 }
 0x130   : > { %v1362_v1 = vadd.f32 1.0, %v2808_v60  ;;  %2367 = vpow2.f32 %v1319_v55  ;;  %v2239_v3 = vpop.f32.mrf.mxu1  ;;  %v1245_v16 = vand.u32 2147483647, %v2817_v5  ;;  %v1279_v21 = vsub.f32 0.0, %v1247_v12 }
 0x131   : > { %v2814_v4 = vpop.eup %2349  ;;  %2369 = vpow2.f32 %v1315_v61  ;;  %v826_v8 = vpop.f32.mrf.mxu0  ;;  %v2827_v13 = vadd.f32 %v2749_v18, %v1119_v63  ;;  %v1248_v23 = vand.u32 2147483647, %v2820_v7  ;;  %v1140_v40 = vadd.f32 %v2239_v3, %v2191_v0 }
 0x132   : > { %v2822_v9 = vpop.eup %2351  ;;  %2371 = vrcp.f32 %v1362_v1  ;;  %v1367_v11 = vadd.f32 1.0, %v2814_v4  ;;  %v1131_v14 = vpop.f32.mrf.mxu1  ;;  %v1277_v26 = vsub.f32 0.0, %v1245_v16  ;;  %v1325_v30 = vmul.f32 1.442695, %v1279_v21 }
 0x133   : > { %v1365_v15 = vadd.f32 1.0, %v2822_v9  ;;  %v2831_v17 = vpop.f32.mrf.mxu0  ;;  %v1280_v32 = vsub.f32 0.0, %v1248_v23  ;;  %v1246_v34 = vand.u32 2147483647, %v2827_v13  ;;  %v2857_v51 = vadd.f32 %v2749_v18, %v1140_v40 }
 0x134   : > { %v2833_v19 = vpop.eup %2353  ;;  %2373 = vrcp.f32 %v1367_v11  ;;  %v2836_v24 = vpop.f32.mrf.mxu1  ;;  %v1321_v39 = vmul.f32 1.442695, %v1277_v26  ;;  %v1132_v62 = vadd.f32 %v1131_v14, %v826_v8  ;;  %v1491_v0 = vsel %vm1459_vm0, 1.0, %v2790_v28 }
 0x135   : > { %v1368_v25 = vadd.f32 1.0, %v2833_v19  ;;  %v2839_v29 = vpop.f32.mrf.mxu0  ;;  %2375 = vrcp.f32 %v1365_v15  ;;  %v1327_v45 = vmul.f32 1.442695, %v1280_v32  ;;  %v1278_v50 = vsub.f32 0.0, %v1246_v34 }
 0x136   : > { %v2842_v35 = vpop.f32.mrf.mxu1  ;;  %v1251_v3 = vand.u32 2147483647, %v2857_v51  ;;  %v1489_v12 = vsel %vm1457_vm1, 1.0, %v2800_v38  ;;  %v1492_v8 = vsel %vm1460_vm2, 1.0, %v2805_v46  ;;  %v2896_v26 = vadd.f32 %v2749_v18, %v1132_v62 }
 0x137   : > { %v2844_v37 = vpop.eup %2355  ;;  %2377 = vrcp.f32 %v1368_v25  ;;  %v2847_v42 = vpop.f32.mrf.mxu0  ;;  %v1323_v61 = vmul.f32 1.442695, %v1278_v50  ;;  %v1143_v32 = vadd.f32 %v2836_v24, %v2831_v17  ;;  %v1490_v40 = vsel %vm1458_vm3, 1.0, %v2808_v60 }
 0x138   : > { %v2358_v43 = vpop.eup %2357  ;;  %v1366_v44 = vadd.f32 1.0, %v2844_v37  ;;  %2379 = vpow2.f32 %v1325_v30  ;;  %v2851_v47 = vpop.f32.mrf.mxu1  ;;  %v1283_v21 = vsub.f32 0.0, %v1251_v3  ;;  %v1495_v60 = vsel %vm1463_vm4, 1.0, %v2814_v4 }
 0x139   : > { %v2853_v48 = vpop.eup %2359  ;;  %2381 = vpow2.f32 %v1321_v39  ;;  %v2859_v53 = vpop.f32.mrf.mxu0  ;;  %v1427_v58 = vmul.f32 %v2358_v43, %v2752_v22  ;;  %v1249_v43 = vand.u32 2147483647, %v2896_v26  ;;  %v2919_v17 = vadd.f32 %v2749_v18, %v1143_v32 }
 0x13a   : > { %v2362_v54 = vpop.eup %2361  ;;  %2383 = vrcp.f32 %v1366_v44  ;;  %v1371_v55 = vadd.f32 1.0, %v2853_v48  ;;  %v2864_v56 = vpop.f32.mrf.mxu1  ;;  %v1333_v30 = vmul.f32 1.442695, %v1283_v21  ;;  %vm1466_vm11 = vcmp.ge.f32.partialorder %v2798_v36, 0.0 }
 0x13b   : > { %v2866_v57 = vpop.eup %2363  ;;  %2385 = vpow2.f32 %v1327_v45  ;;  %v2886_v22 = vpop.f32.mrf.mxu0  ;;  %v1425_v16 = vmul.f32 %v2362_v54, %v2756_v27  ;;  %v1523_v25 = vmul.f32 %v1491_v0, %v1427_v58  ;;  %v1135_v58 = vadd.f32 %v2842_v35, %v2839_v29 }
 0x13c   : > { %v2366_v63 = vpop.eup %2365  ;;  %2387 = vrcp.f32 %v1371_v55  ;;  %v1369_v1 = vadd.f32 1.0, %v2866_v57  ;;  %v2888_v28 = vpop.f32.mrf.mxu1  ;;  %v1281_v55 = vsub.f32 0.0, %v1249_v43  ;;  %v1496_v0 = vsel %vm1464_vm6, 1.0, %v2833_v19 }
 0x13d   : > { %v2876_v11 = vpop.eup %2367  ;;  %v1428_v15 = vmul.f32 %v2366_v63, %v2760_v33  ;;  %2389 = vpow2.f32 %v1323_v61  ;;  %v2912_v44 = vpop.f32.mrf.mxu0  ;;  %v1521_v50 = vmul.f32 %v1489_v12, %v1425_v16  ;;  %v1493_v63 = vsel %vm1461_vm5, 1.0, %v2822_v9 }
 0x13e   : > { %v2890_v14 = vpop.eup %2369  ;;  %2391 = vrcp.f32 %v1369_v1  ;;  %v1372_v38 = vadd.f32 1.0, %v2876_v11  ;;  %v2914_v45 = vpop.f32.mrf.mxu1  ;;  %v1329_v29 = vmul.f32 1.442695, %v1281_v55  ;;  %v2941_v35 = vadd.f32 %v2749_v18, %v1135_v58 }
 0x13f   : > { %v2372_v23 = vpop.eup %2371  ;;  %v1524_v33 = vmul.f32 %v1492_v8, %v1428_v15  ;;  %v1370_v46 = vadd.f32 1.0, %v2890_v14  ;;  %v1156_v9 = vadd.f32 %v2851_v47, %v2847_v42  ;;  %v2945_v3 = vpop.f32.mrf.mxu0  ;;  %vm1471_vm12 = vcmp.ge.f32.partialorder %v2812_v2, 0.0 }
 0x140   : > { %v1426_v27 = vmul.f32 %v2372_v23, %v2764_v41  ;;  %2393 = vrcp.f32 %v1372_v38  ;;  %v2947_v19 = vpop.f32.mrf.mxu1  ;;  %vm1469_vm13 = vcmp.ge.f32.partialorder %v2817_v5, 0.0  ;;  %vm1472_vm14 = vcmp.ge.f32.partialorder %v2820_v7, 0.0 }
 0x141   : > { %v2374_v34 = vpop.eup %2373  ;;  %v2022_v39 = vpack.c.bf16 %v1524_v33, %v1523_v25  ;;  %2395 = vrcp.f32 %v1370_v46  ;;  %v1250_v33 = vand.u32 2147483647, %v2941_v35  ;;  %v858_v32 = vpop.f32.mrf.mxu0  ;;  %vm1470_vm15 = vcmp.ge.f32.partialorder %v2827_v13, 0.0 }
 0x142   : > { %v1522_v54 = vmul.f32 %v1490_v40, %v1426_v27  ;;  %2397 = vpow2.f32 %v1333_v30  ;;  %v2376_v24 = vpop.eup %2375  ;;  %v1431_v41 = vmul.f32 %v2374_v34, %v2768_v49  ;;  %v1252_v49 = vand.u32 2147483647, %v2919_v17  ;;  %v1163_v34 = vpop.f32.mrf.mxu1 }
 0x143   : > { %2094 = vst [vmem:[%s2903_s15 + $0x8] sm:$0xff] %v2022_v39   ;;  %v1429_v15 = vmul.f32 %v2376_v24, %v2771_v52  ;;  %2399 = vpow2.f32 %v1329_v29  ;;  %v2964_v30 = vadd.f32 %v2749_v18, %v1156_v9  ;;  %v1497_v24 = vsel %vm1465_vm9, 1.0, %v2866_v57 }
 0x144   : > { %v2378_v61 = vpop.eup %2377  ;;  %v2017_v62 = vpack.c.bf16 %v1522_v54, %v1521_v50  ;;  %v1284_v16 = vsub.f32 0.0, %v1252_v49  ;;  %v1527_v21 = vmul.f32 %v1495_v60, %v1431_v41  ;;  %v1499_v54 = vsel %vm1467_vm8, 1.0, %v2853_v48  ;;  %v2248_v49 = vpop.f32.mrf.mxu1 }
 0x145   : > { %v2936_v4 = vpop.eup %2379  ;;  %v1432_v1 = vmul.f32 %v2378_v61, %v2776_v59  ;;  %v1494_v59 = vsel %vm1462_vm7, 1.0, %v2844_v37  ;;  %v1525_v40 = vmul.f32 %v1493_v63, %v1429_v15  ;;  %v1500_v63 = vsel %vm1468_vm10, 1.0, %v2876_v11 }
 0x146   : > { %v2949_v12 = vpop.eup %2381  ;;  %2018 = vst [vmem:[%s2903_s15] sm:$0xff] %v2017_v62   ;;  %v1375_v8 = vadd.f32 1.0, %v2936_v4  ;;  %v1335_v52 = vmul.f32 1.442695, %v1284_v16  ;;  %v1255_v48 = vand.u32 2147483647, %v2964_v30  ;;  %v1148_v57 = vadd.f32 %v2864_v56, %v2859_v53 }
 0x147   : > { %v2384_v38 = vpop.eup %2383  ;;  %v1528_v23 = vmul.f32 %v1496_v0, %v1432_v1  ;;  %v1373_v42 = vadd.f32 1.0, %v2949_v12  ;;  %v2985_v0 = vpop.f32.mrf.mxu0  ;;  %v1498_v1 = vsel %vm1466_vm11, 1.0, %v2890_v14  ;;  %v1159_v11 = vadd.f32 %v2888_v28, %v2886_v22 }
 0x148   : > { %v2958_v47 = vpop.eup %2385  ;;  %v1430_v25 = vmul.f32 %v2384_v38, %v2780_v6  ;;  %2401 = vrcp.f32 %v1375_v8  ;;  %v1282_v6 = vsub.f32 0.0, %v1250_v33  ;;  %v1287_v53 = vsub.f32 0.0, %v1255_v48 }
 0x149   : > { %v2388_v46 = vpop.eup %2387  ;;  %v2032_v37 = vpack.c.bf16 %v1528_v23, %v1527_v21  ;;  %2403 = vrcp.f32 %v1373_v42  ;;  %v1376_v27 = vadd.f32 1.0, %v2958_v47  ;;  %v2998_v56 = vadd.f32 %v2749_v18, %v1148_v57  ;;  %v861_v38 = vpop.f32.mrf.mxu0 }
 0x14a   : > { %v2966_v39 = vpop.eup %2389  ;;  %v1526_v43 = vmul.f32 %v1494_v59, %v1430_v25  ;;  %2405 = vpow2.f32 %v1335_v52  ;;  %v1435_v55 = vmul.f32 %v2388_v46, %v2783_v10  ;;  %v1331_v61 = vmul.f32 1.442695, %v1282_v6  ;;  %v1166_v21 = vpop.f32.mrf.mxu1 }
 0x14b   : > { %v2392_v50 = vpop.eup %2391  ;;  %2096 = vst [vmem:[%s2903_s15 + $0x18] sm:$0xff] %v2032_v37   ;;  %2407 = vrcp.f32 %v1376_v27  ;;  %v1374_v41 = vadd.f32 1.0, %v2966_v39  ;;  %v1151_v15 = vadd.f32 %v2914_v45, %v2912_v44  ;;  %v3003_v14 = vadd.f32 %v2749_v18, %v1159_v11 }
 0x14c   : > { %v2027_v60 = vpack.c.bf16 %v1526_v43, %v1525_v40  ;;  %v1433_v58 = vmul.f32 %v2392_v50, %v2788_v20  ;;  %v1341_v28 = vmul.f32 1.442695, %v1287_v53  ;;  %v1172_v46 = vadd.f32 %v2947_v19, %v2945_v3  ;;  %v2203_v50 = vpop.f32.mrf.mxu0 }
 0x14d   : > { %v2394_v62 = vpop.eup %2393  ;;  %2409 = vrcp.f32 %v1374_v41  ;;  %v1256_v44 = vand.u32 2147483647, %v3003_v14  ;;  %v3011_v25 = vadd.f32 %v2749_v18, %v1151_v15  ;;  %v1164_v37 = vadd.f32 %v1163_v34, %v858_v32 }
 0x14e   : > { %v2396_v10 = vpop.eup %2395  ;;  %2095 = vst [vmem:[%s2903_s15 + $0x10] sm:$0xff] %v2027_v60   ;;  %v1436_v20 = vmul.f32 %v2394_v62, %v2794_v31  ;;  %2411 = vpow2.f32 %v1331_v61  ;;  %v1531_v31 = vmul.f32 %v1499_v54, %v1435_v55  ;;  %v1529_v59 = vmul.f32 %v1497_v24, %v1433_v58  ;;  %v2251_v54 = vpop.f32.mrf.mxu1 }
 0x14f   : > { %v2994_v29 = vpop.eup %2397  ;;  %v1434_v9 = vmul.f32 %v2396_v10, %v2798_v36  ;;  %v1253_v36 = vand.u32 2147483647, %v2998_v56  ;;  %2413 = vpow2.f32 %v1341_v28  ;;  %v1288_v33 = vsub.f32 0.0, %v1256_v44  ;;  %v874_v57 = vpop.f32.mrf.mxu0 }
 0x150   : > { %v1532_v8 = vmul.f32 %v1500_v63, %v1436_v20  ;;  %v1379_v22 = vadd.f32 1.0, %v2994_v29  ;;  %v3013_v52 = vpop.eup %2399  ;;  %v1254_v6 = vand.u32 2147483647, %v3011_v25  ;;  %v1503_v41 = vsel %vm1471_vm12, 1.0, %v2936_v4  ;;  %v1179_v10 = vpop.f32.mrf.mxu1 }
 0x151   : > { %v1530_v16 = vmul.f32 %v1498_v1, %v1434_v9  ;;  %v1285_v42 = vsub.f32 0.0, %v1253_v36  ;;  %v1377_v40 = vadd.f32 1.0, %v3013_v52  ;;  %v1501_v3 = vsel %vm1469_vm13, 1.0, %v2949_v12 }
 0x152   : > { %v2042_v23 = vpack.c.bf16 %v1532_v8, %v1531_v31  ;;  %2415 = vrcp.f32 %v1379_v22  ;;  %v1343_v19 = vmul.f32 1.442695, %v1288_v33  ;;  %v3029_v32 = vadd.f32 %v2749_v18, %v1172_v46  ;;  %v2204_v22 = vpop.f32.mrf.mxu0  ;;  %v2252_v28 = vpop.f32.mrf.mxu1 }
 0x153   : > { %v2037_v45 = vpack.c.bf16 %v1530_v16, %v1529_v59  ;;  %v1337_v43 = vmul.f32 1.442695, %v1285_v42  ;;  %2417 = vrcp.f32 %v1377_v40  ;;  %v1286_v55 = vsub.f32 0.0, %v1254_v6 }
 0x154   : > { %2098 = vst [vmem:[%s2903_s15 + $0x28] sm:$0xff] %v2042_v23   ;;  %v3035_v58 = vadd.f32 %v2749_v18, %v1164_v37  ;;  %v1504_v12 = vsel %vm1472_vm14, 1.0, %v2958_v47  ;;  %v1259_v1 = vand.u32 2147483647, %v3029_v32  ;;  %v1167_v16 = vadd.f32 %v1166_v21, %v861_v38  ;;  %v1182_v40 = vpop.f32.mrf.mxu1 }
 0x155   : > { %v2402_v27 = vpop.eup %2401  ;;  %2097 = vst [vmem:[%s2903_s15 + $0x20] sm:$0xff] %v2037_v45   ;;  %2419 = vpow2.f32 %v1337_v43  ;;  %v1339_v48 = vmul.f32 1.442695, %v1286_v55  ;;  %v1180_v38 = vadd.f32 %v1179_v10, %v874_v57  ;;  %vm1475_vm0 = vcmp.ge.f32.partialorder %v2857_v51, 0.0 }
 0x156   : > { %v2404_v24 = vpop.eup %2403  ;;  %v1439_v60 = vmul.f32 %v2402_v27, %v2812_v2  ;;  %2421 = vpow2.f32 %v1343_v19  ;;  %v1175_v2 = vadd.f32 %v2248_v49, %v2985_v0  ;;  %v1257_v47 = vand.u32 2147483647, %v3035_v58  ;;  %v877_v27 = vpop.f32.mrf.mxu0 }
 0x157   : > { %v3031_v34 = vpop.eup %2405  ;;  %v1437_v4 = vmul.f32 %v2404_v24, %v2817_v5  ;;  %v1502_v5 = vsel %vm1470_vm15, 1.0, %v2966_v39  ;;  %v1291_v15 = vsub.f32 0.0, %v1259_v1  ;;  %v3059_v42 = vadd.f32 %v2749_v18, %v1167_v16 }
 0x158   : > { %v2408_v61 = vpop.eup %2407  ;;  %v1380_v62 = vadd.f32 1.0, %v3031_v34  ;;  %v1535_v9 = vmul.f32 %v1503_v41, %v1439_v60  ;;  %v1289_v31 = vsub.f32 0.0, %v1257_v47  ;;  %v3054_v8 = vadd.f32 %v2749_v18, %v1175_v2 }
 0x159   : > { %v1440_v63 = vmul.f32 %v2408_v61, %v2820_v7  ;;  %v1533_v0 = vmul.f32 %v1501_v3, %v1437_v4  ;;  %v1349_v36 = vmul.f32 1.442695, %v1291_v15  ;;  %v1258_v6 = vand.u32 2147483647, %v3059_v42 }
 0x15a   : > { %v2410_v20 = vpop.eup %2409  ;;  %2423 = vrcp.f32 %v1380_v62  ;;  %v1345_v23 = vmul.f32 1.442695, %v1289_v31  ;;  %v1260_v45 = vand.u32 2147483647, %v3054_v8  ;;  %v3071_v24 = vadd.f32 %v2749_v18, %v1180_v38 }
 0x15b   : > { %v3049_v11 = vpop.eup %2411  ;;  %v1536_v7 = vmul.f32 %v1504_v12, %v1440_v63  ;;  %v1438_v53 = vmul.f32 %v2410_v20, %v2827_v13  ;;  %2425 = vpow2.f32 %v1339_v48  ;;  %v1188_v13 = vadd.f32 %v2251_v54, %v2203_v50 }
 0x15c   : > { %v1378_v49 = vadd.f32 1.0, %v3049_v11  ;;  %v3061_v33 = vpop.eup %2413  ;;  %v1292_v37 = vsub.f32 0.0, %v1260_v45  ;;  %v1290_v3 = vsub.f32 0.0, %v1258_v6  ;;  %v1191_v60 = vadd.f32 %v2252_v28, %v2204_v22 }
 0x15d   : > { %v2052_v59 = vpack.c.bf16 %v1536_v7, %v1535_v9  ;;  %v1534_v39 = vmul.f32 %v1502_v5, %v1438_v53  ;;  %v3064_v46 = vadd.f32 %v2749_v18, %v1188_v13  ;;  %v1383_v21 = vadd.f32 1.0, %v3061_v33 }
 0x15e   : > { %2427 = vrcp.f32 %v1378_v49  ;;  %v1351_v54 = vmul.f32 1.442695, %v1292_v37  ;;  %v1183_v55 = vadd.f32 %v1182_v40, %v877_v27  ;;  %v1261_v12 = vand.u32 2147483647, %v3071_v24 }
 0x15f   : > { %2100 = vst [vmem:[%s2903_s15 + $0x38] sm:$0xff] %v2052_v59   ;;  %v2047_v44 = vpack.c.bf16 %v1534_v39, %v1533_v0  ;;  %2429 = vpow2.f32 %v1349_v36  ;;  %v2416_v43 = vpop.eup %2415  ;;  %v1263_v50 = vand.u32 2147483647, %v3064_v46  ;;  %v1507_v63 = vsel %vm1475_vm0, 1.0, %v2994_v29 }
 0x160   : > { %2431 = vpow2.f32 %v1345_v23  ;;  %v2418_v41 = vpop.eup %2417  ;;  %v1443_v4 = vmul.f32 %v2416_v43, %v2857_v51  ;;  %vm1476_vm1 = vcmp.ge.f32.partialorder %v2919_v17, 0.0  ;;  %v1347_v2 = vmul.f32 1.442695, %v1290_v3 }
 0x161   : > { %2099 = vst [vmem:[%s2903_s15 + $0x30] sm:$0xff] %v2047_v44   ;;  %2433 = vrcp.f32 %v1383_v21  ;;  %v1295_v19 = vsub.f32 0.0, %v1263_v50  ;;  %v1508_v10 = vsel %vm1476_vm1, 1.0, %v3031_v34  ;;  %v1293_v1 = vsub.f32 0.0, %v1261_v12 }
 0x162   : > { %v3073_v61 = vpop.eup %2419  ;;  %2435 = vpow2.f32 %v1351_v54  ;;  %v3089_v9 = vadd.f32 %v2749_v18, %v1191_v60  ;;  %v3092_v29 = vadd.f32 %v2749_v18, %v1183_v55  ;;  %v1539_v7 = vmul.f32 %v1507_v63, %v1443_v4 }
 0x163   : > { %v3078_v62 = vpop.eup %2421  ;;  %v1381_v48 = vadd.f32 1.0, %v3073_v61  ;;  %v1357_v5 = vmul.f32 1.442695, %v1295_v19  ;;  %v1353_v34 = vmul.f32 1.442695, %v1293_v1  ;;  %v1441_v0 = vmul.f32 %v2418_v41, %v2896_v26 }
 0x164   : > { %v1384_v20 = vadd.f32 1.0, %v3078_v62  ;;  %v1264_v15 = vand.u32 2147483647, %v3089_v9  ;;  %vm1473_vm2 = vcmp.ge.f32.partialorder %v2896_v26, 0.0  ;;  %vm1474_vm3 = vcmp.ge.f32.partialorder %v2941_v35, 0.0 }
 0x165   : > { %2437 = vrcp.f32 %v1381_v48  ;;  %v1262_v18 = vand.u32 2147483647, %v3092_v29  ;;  %v1505_v22 = vsel %vm1473_vm2, 1.0, %v3013_v52  ;;  %v1506_v28 = vsel %vm1474_vm3, 1.0, %v3049_v11 }
 0x166   : > { %2439 = vrcp.f32 %v1384_v20  ;;  %v1296_v39 = vsub.f32 0.0, %v1264_v15  ;;  %v1537_v26 = vmul.f32 %v1505_v22, %v1441_v0  ;;  %vm1479_vm4 = vcmp.ge.f32.partialorder %v2964_v30, 0.0 }
 0x167   : > { %v2424_v57 = vpop.eup %2423  ;;  %2441 = vpow2.f32 %v1347_v2  ;;  %v1294_v36 = vsub.f32 0.0, %v1262_v18  ;;  %vm1480_vm5 = vcmp.ge.f32.partialorder %v3003_v14, 0.0  ;;  %v1511_v3 = vsel %vm1479_vm4, 1.0, %v3061_v33 }
 0x168   : > { %v3085_v51 = vpop.eup %2425  ;;  %v1444_v47 = vmul.f32 %v2424_v57, %v2919_v17  ;;  %v1359_v44 = vmul.f32 1.442695, %v1296_v39  ;;  %vm1477_vm6 = vcmp.ge.f32.partialorder %v2998_v56, 0.0  ;;  %v1512_v19 = vsel %vm1480_vm5, 1.0, %v3078_v62 }
 0x169   : > { %v1382_v53 = vadd.f32 1.0, %v3085_v51  ;;  %vm1478_vm7 = vcmp.ge.f32.partialorder %v3011_v25, 0.0  ;;  %vm1483_vm8 = vcmp.ge.f32.partialorder %v3029_v32, 0.0  ;;  %vm1484_vm9 = vcmp.ge.f32.partialorder %v3054_v8, 0.0 }
 0x16a   : > { %v1540_v49 = vmul.f32 %v1508_v10, %v1444_v47  ;;  %v1510_v48 = vsel %vm1478_vm7, 1.0, %v3085_v51  ;;  %vm1481_vm10 = vcmp.ge.f32.partialorder %v3035_v58, 0.0  ;;  %vm1482_vm11 = vcmp.ge.f32.partialorder %v3059_v42, 0.0 }
 0x16b   : > { %v2428_v17 = vpop.eup %2427  ;;  %2443 = vrcp.f32 %v1382_v53  ;;  %vm1487_vm12 = vcmp.ge.f32.partialorder %v3064_v46, 0.0  ;;  %vm1485_vm13 = vcmp.ge.f32.partialorder %v3071_v24, 0.0  ;;  %vm1488_vm14 = vcmp.ge.f32.partialorder %v3089_v9, 0.0 }
 0x16c   : > { %v2062_v31 = vpack.c.bf16 %v1540_v49, %v1539_v7  ;;  %v1442_v59 = vmul.f32 %v2428_v17, %v2941_v35  ;;  %2445 = vpow2.f32 %v1357_v5  ;;  %v3101_v16 = vpop.eup %2429  ;;  %v1355_v35 = vmul.f32 1.442695, %v1294_v36 }
 0x16d   : > { %2447 = vpow2.f32 %v1353_v34  ;;  %v1387_v13 = vadd.f32 1.0, %v3101_v16  ;;  %v3107_v45 = vpop.eup %2431  ;;  %v1515_v34 = vsel %vm1483_vm8, 1.0, %v3101_v16  ;;  %vm1486_vm15 = vcmp.ge.f32.partialorder %v3092_v29, 0.0 }
 0x16e   : > { %2102 = vst [vmem:[%s2903_s15 + $0x48] sm:$0xff] %v2062_v31   ;;  %v1538_v23 = vmul.f32 %v1506_v28, %v1442_v59  ;;  %v2434_v38 = vpop.eup %2433  ;;  %v1385_v52 = vadd.f32 1.0, %v3107_v45 }
 0x16f   : > { %2449 = vrcp.f32 %v1387_v13  ;;  %v2436_v37 = vpop.eup %2435  ;;  %v1447_v40 = vmul.f32 %v2434_v38, %v2964_v30 }
 0x170   : > { %v2057_v21 = vpack.c.bf16 %v1538_v23, %v1537_v26  ;;  %2451 = vpow2.f32 %v1359_v44  ;;  %v1388_v11 = vadd.f32 1.0, %v2436_v37  ;;  %v1516_v0 = vsel %vm1484_vm9, 1.0, %v2436_v37 }
 0x171   : > { %2453 = vpow2.f32 %v1355_v35  ;;  %v1543_v4 = vmul.f32 %v1511_v3, %v1447_v40 }
 0x172   : > { %2101 = vst [vmem:[%s2903_s15 + $0x40] sm:$0xff] %v2057_v21   ;;  %v2438_v27 = vpop.eup %2437  ;;  %2455 = vrcp.f32 %v1388_v11 }
 0x173   : > { %v2440_v43 = vpop.eup %2439  ;;  %2457 = vrcp.f32 %v1385_v52  ;;  %v1445_v50 = vmul.f32 %v2438_v27, %v2998_v56 }
 0x174   : > { %v2442_v6 = vpop.eup %2441  ;;  %v1448_v54 = vmul.f32 %v2440_v43, %v3003_v14  ;;  %v1509_v14 = vsel %vm1477_vm6, 1.0, %v3073_v61 }
 0x175   : > { %v1386_v60 = vadd.f32 1.0, %v2442_v6  ;;  %v1541_v56 = vmul.f32 %v1509_v14, %v1445_v50 }
 0x176   : > { %v1544_v12 = vmul.f32 %v1512_v19, %v1448_v54 }
 0x177   : > { %2459 = vrcp.f32 %v1386_v60 }
 0x178   : > { %v2444_v41 = vpop.eup %2443  ;;  %v2072_v2 = vpack.c.bf16 %v1544_v12, %v1543_v4 }
 0x179   : > { %v2446_v55 = vpop.eup %2445  ;;  %v1446_v30 = vmul.f32 %v2444_v41, %v3011_v25 }
 0x17a   : > { %v2448_v63 = vpop.eup %2447  ;;  %v1391_v33 = vadd.f32 1.0, %v2446_v55  ;;  %2104 = vst [vmem:[%s2903_s15 + $0x58] sm:$0xff] %v2072_v2   ;;  %v1519_v44 = vsel %vm1487_vm12, 1.0, %v2446_v55 }
 0x17b   : > { %v1542_v62 = vmul.f32 %v1510_v48, %v1446_v30  ;;  %v1389_v57 = vadd.f32 1.0, %v2448_v63  ;;  %v1517_v21 = vsel %vm1485_vm13, 1.0, %v2448_v63 }
 0x17c   : > { %v2450_v20 = vpop.eup %2449  ;;  %2461 = vrcp.f32 %v1391_v33 }
 0x17d   : > { %v2067_v10 = vpack.c.bf16 %v1542_v62, %v1541_v56  ;;  %v2452_v5 = vpop.eup %2451  ;;  %2463 = vrcp.f32 %v1389_v57  ;;  %v1451_v47 = vmul.f32 %v2450_v20, %v3029_v32  ;;  %v1513_v32 = vsel %vm1481_vm10, 1.0, %v3107_v45 }
 0x17e   : > { %v2454_v1 = vpop.eup %2453  ;;  %v1392_v25 = vadd.f32 1.0, %v2452_v5  ;;  %v1520_v45 = vsel %vm1488_vm14, 1.0, %v2452_v5 }
 0x17f   : > { %2103 = vst [vmem:[%s2903_s15 + $0x50] sm:$0xff] %v2067_v10   ;;  %v1390_v61 = vadd.f32 1.0, %v2454_v1  ;;  %v2456_v7 = vpop.eup %2455  ;;  %v1547_v49 = vmul.f32 %v1515_v34, %v1451_v47  ;;  %v1518_v52 = vsel %vm1486_vm15, 1.0, %v2454_v1 }
 0x180   : > { %2465 = vrcp.f32 %v1392_v25  ;;  %v2458_v51 = vpop.eup %2457  ;;  %v1452_v53 = vmul.f32 %v2456_v7, %v3054_v8  ;;  %v1514_v8 = vsel %vm1482_vm11, 1.0, %v2442_v6 }
 0x181   : > { %2467 = vrcp.f32 %v1390_v61  ;;  %v1449_v17 = vmul.f32 %v2458_v51, %v3035_v58 }
 0x182   : > { %v1548_v15 = vmul.f32 %v1516_v0, %v1452_v53 }
 0x183   : > { %v1545_v39 = vmul.f32 %v1513_v32, %v1449_v17 }
 0x184   : > { %v2460_v18 = vpop.eup %2459  ;;  %v2082_v31 = vpack.c.bf16 %v1548_v15, %v1547_v49 }
 0x185   : > { %v1450_v59 = vmul.f32 %v2460_v18, %v3059_v42 }
 0x186   : > { %2106 = vst [vmem:[%s2903_s15 + $0x68] sm:$0xff] %v2082_v31  }
 0x187   : > { %v1546_v16 = vmul.f32 %v1514_v8, %v1450_v59 }
 0x189   : > { %v2462_v22 = vpop.eup %2461  ;;  %v2077_v36 = vpack.c.bf16 %v1546_v16, %v1545_v39 }
 0x18a   : > { %v2464_v28 = vpop.eup %2463  ;;  %v1455_v26 = vmul.f32 %v2462_v22, %v3064_v46 }
 0x18b   : > { %2105 = vst [vmem:[%s2903_s15 + $0x60] sm:$0xff] %v2077_v36   ;;  %v1453_v13 = vmul.f32 %v2464_v28, %v3071_v24 }
 0x18c   : > { %v1551_v38 = vmul.f32 %v1519_v44, %v1455_v26 }
 0x18d   : > { %v2466_v23 = vpop.eup %2465  ;;  %v1549_v11 = vmul.f32 %v1517_v21, %v1453_v13 }
 0x18e   : > { %v2468_v58 = vpop.eup %2467  ;;  %v1456_v42 = vmul.f32 %v2466_v23, %v3089_v9 }
 0x18f   : > { %v1454_v35 = vmul.f32 %v2468_v58, %v3092_v29 }
 0x190   : > { %v1552_v37 = vmul.f32 %v1520_v45, %v1456_v42 }
 0x191   : > { %v1550_v46 = vmul.f32 %v1518_v52, %v1454_v35 }
 0x192   : > { %v2092_v27 = vpack.c.bf16 %v1552_v37, %v1551_v38 }
 0x193   : > { %v2087_v40 = vpack.c.bf16 %v1550_v46, %v1549_v11 }
 0x194   : > { %2108 = vst [vmem:[%s2903_s15 + $0x78] sm:$0xff] %v2092_v27  }
 0x195   : > { %2107 = vst [vmem:[%s2903_s15 + $0x70] sm:$0xff] %v2087_v40  }
 0x196 PF: > { %s15_s22 = sadd.s32 1, %s2507_s22   ;;  %s3168_s18 = smov %s2495_s19 }
 0x197   : > { %p12_p10 = scmp.ge.s32.totalorder %s15_s22, 4   ;;  %s3169_s19 = smov %s2574_s26 }
 0x198   : > { %s3170_s20 = smov %s2503_s21  ;;  %s3171_s21 = smov %s3173_s23 }
 0x199   :  { %14 = sbr.rel (!%p12_p10) target bundleno = 3 (0x3), region = 128 }

// kernel: _lambda_.10
= control target key start
LH: loop header
LB: loop body
LE: loop exit
PB: predicated region body
PF: predicated region fallthrough
CT: control target
= control target key end

     0   :  { %s5196_s15 = smov 0   ;;  %s5198_s16 = smov 0   ;;  %s6945_s0 = inlined_call_operand.vmem [shape: bf16[2,18,24,128], index: 0, kind: input, shape index: {}]   ;;  %s6946_s1 = inlined_call_operand.vmem [shape: bf16[9,128,128], index: 1, kind: input, shape index: {}]   ;;  %s6947_s2 = inlined_call_operand.vmem [shape: f32[1,128], index: 2, kind: input, shape index: {}]   ;;  %s6948_s3 = inlined_call_operand.vmem [shape: bf16[2,16,16,128], index: 3, kind: input, shape index: {}]   ;;  %s6949_s4 = inlined_call_operand.vmem [shape: bf16[2,16,16,128], index: 4, kind: output, shape index: {}]  }
   0x1   :  { %s5200_s17 = smov 0  }
   0x2 LB: > { %s26_s18 = sadd.s32 1, %s5165_s16  ;;  %p3752_p0 = scmp.ge.s32.totalorder %s5169_s17, 1  ;;  %s5169_s17 = sphi %s5200_s17, %s14_s17   ;;  %s5165_s16 = sphi %s5198_s16, %s7091_s16   ;;  %s5161_s15 = sphi %s5196_s15, %s7090_s15  }
   0x3   : > { %p28_p1 = scmp.ge.s32.totalorder %s26_s18, 2  ;;  %p208_p2 = scmp.lt.s32.totalorder %s5169_s17, 3 }
   0x5   : > { %s7093_s18 = smov (%p28_p1, %s26_s18), 0  ;;  %p209_p3 = pnand %p3752_p0, %p208_p2 }
   0x7   : > { %212 = sbr.rel (%p209_p3) target bundleno = 612 (0x264), region = 36 }
   0xc   : > { %v4908_v0 = vld [vmem:[%s6946_s1 + $0x78] sm:$0xff]   ;;  %p252_p4 = scmp.lt.s32.totalorder %s5161_s15, 1  ;;  %v4909_v1 = vld [vmem:[%s6946_s1 + $0x70] sm:$0xff]   ;;  %v4910_v2 = vld [vmem:[%s6946_s1 + $0x68] sm:$0xff]   ;;  %vm469_vm0 = vcmask 1046528   ;;  %vm1033_vm1 = vcmask 1045504  }
   0xd   : > { %4435 = vmatprep.subr.bf16.mxu0 %v4908_v0  ;;  %4867 = vmatprep.subr.bf16.mxu1 %v4908_v0  ;;  %v4911_v3 = vld [vmem:[%s6946_s1 + $0x60] sm:$0xff]   ;;  %v4912_v21 = vld [vmem:[%s6946_s1 + $0x58] sm:$0xff]   ;;  %v4913_v36 = vld [vmem:[%s6946_s1 + $0x50] sm:$0xff]  }
   0xe   : > { %s7095_s15 = smov (!%p252_p4, %s5161_s15), 1  ;;  %4436 = vmatpush3.bf16.msra.mxu0 %v4908_v0  ;;  %4875 = vmatpush3.bf16.msra.mxu1 %v4908_v0  ;;  %v4914_v46 = vld [vmem:[%s6946_s1 + $0x48] sm:$0xff]  }
   0xf   : > { %4437 = vmatprep.subr.bf16.mxu0 %v4909_v1  ;;  %4868 = vmatprep.subr.bf16.mxu1 %v4909_v1  ;;  %s4883_s25 = smul.u32 216, %s7095_s15 }
  0x11   : > { %s5229_s28 = scalar_lea.vmem %s6945_s0, %s4883_s25 }
  0x12   : > { %4438 = vmatpush3.bf16.msra.mxu0 %v4909_v1  ;;  %4876 = vmatpush3.bf16.msra.mxu1 %v4909_v1  ;;  %v5235_v4 = vld [vmem:[%s5229_s28] sm:$0xff]   ;;  %v5238_v5 = vld [vmem:[%s5229_s28 + $0x8] ss:$12 sps:$4 sm:$0xff]   ;;  %v5251_v12 = vld [vmem:[%s5229_s28 + $0xc] sm:$0xff]  }
  0x13   : > { %4439 = vmatprep.subr.bf16.mxu0 %v4910_v2  ;;  %4869 = vmatprep.subr.bf16.mxu1 %v4910_v2  ;;  %v5241_v6 = vld [vmem:[%s5229_s28 + $0x60] sm:$0xff]   ;;  %v335_v7 = vunpack.c.l.bf16 %v5235_v4  ;;  %v336_v8 = vunpack.c.h.bf16 %v5235_v4  ;;  %v337_v9 = vunpack.c.l.bf16 %v5238_v5  ;;  %v5247_v10 = vld [vmem:[%s5229_s28 + $0x68] ss:$12 sps:$4 sm:$0xff]   ;;  %v338_v15 = vunpack.c.l.bf16 %v5251_v12  ;;  %v5276_v27 = vld [vmem:[%s5229_s28 + $0x6c] sm:$0xff]  }
  0x14   : > { %v6967_v11 = vunpack.c.l.bf16 %v5241_v6  ;;  %v6966_v13 = vunpack.c.h.bf16 %v5241_v6  ;;  %v6963_v14 = vunpack.c.l.bf16 %v5247_v10  ;;  %v339_v16 = vunpack.c.h.bf16 %v5251_v12  ;;  %v5287_v34 = vld [vmem:[%s5229_s28 + $0x18] sm:$0xff]   ;;  %v5290_v35 = vld [vmem:[%s5229_s28 + $0x20] ss:$12 sps:$4 sm:$0xff]   ;;  %v5328_v55 = vld [vmem:[%s5229_s28 + $0x24] sm:$0xff]  }
  0x15   : > { %v470_v17 = vrot.slane %v335_v7, 1  ;;  %v471_v18 = vrot.slane %v336_v8, 1  ;;  %v473_v19 = vrot.slane %v337_v9, 1  ;;  %v6986_v24 = vunpack.c.h.bf16 %v5238_v5  ;;  %v5301_v41 = vld [vmem:[%s5229_s28 + $0x78] sm:$0xff]   ;;  %v5308_v45 = vld [vmem:[%s5229_s28 + $0x80] ss:$12 sps:$4 sm:$0xff]  }
  0x16   : > { %4440 = vmatpush3.bf16.msra.mxu0 %v4910_v2  ;;  %4877 = vmatpush3.bf16.msra.mxu1 %v4910_v2  ;;  %v510_v20 = vrot.slane %v6967_v11, 1  ;;  %v511_v22 = vrot.slane %v6966_v13, 1  ;;  %v513_v23 = vrot.slane %v6963_v14, 1  ;;  %v475_v32 = vrot.slane %v338_v15, 1  ;;  %v5334_v59 = vld [vmem:[%s5229_s28 + $0x84] sm:$0xff]  }
  0x17   : > { %4441 = vmatprep.subr.bf16.mxu0 %v4911_v3  ;;  %4870 = vmatprep.subr.bf16.mxu1 %v4911_v3  ;;  %v472_v25 = vsel %vm469_vm0, %v470_v17, %v471_v18  ;;  %v474_v26 = vsel %vm469_vm0, %v471_v18, %v473_v19  ;;  %v476_v33 = vrot.slane %v339_v16, 1  ;;  %v478_v37 = vrot.slane %v6986_v24, 1  ;;  %v4915_v17 = vld [vmem:[%s6946_s1 + $0x40] sm:$0xff]   ;;  %v5437_v14 = vld [vmem:[%s5229_s28 + $0x50] ss:$12 sps:$4 sm:$0xff]  }
  0x18   : > { %v582_v28 = vpack.c.bf16 %v474_v26, %v472_v25  ;;  %v512_v29 = vsel %vm469_vm0, %v510_v20, %v511_v22  ;;  %v514_v30 = vsel %vm469_vm0, %v511_v22, %v513_v23  ;;  %v6962_v38 = vunpack.c.l.bf16 %v5276_v27  ;;  %v5353_v20 = vld [vmem:[%s5229_s28 + $0x30] sm:$0xff]  }
  0x19   : > { %v5280_v31 = vpack.c.bf16 %v514_v30, %v512_v29  ;;  %v6961_v39 = vunpack.c.h.bf16 %v5276_v27  ;;  %v6960_v40 = vunpack.c.h.bf16 %v5247_v10  ;;  %v6983_v42 = vunpack.c.l.bf16 %v5287_v34  ;;  %v5362_v26 = vld [vmem:[%s5229_s28 + $0x90] sm:$0xff]  }
  0x1a   : > { %4442 = vmatpush3.bf16.msra.mxu0 %v4911_v3  ;;  %4878 = vmatpush3.bf16.msra.mxu1 %v4911_v3  ;;  %v6978_v43 = vunpack.c.h.bf16 %v5287_v34  ;;  %v6977_v44 = vunpack.c.l.bf16 %v5290_v35  ;;  %v515_v47 = vrot.slane %v6962_v38, 1  ;;  %v6952_v50 = vunpack.c.l.bf16 %v5301_v41 }
  0x1b   : > { %4443 = vmatprep.subr.bf16.mxu0 %v4912_v21  ;;  %4871 = vmatprep.subr.bf16.mxu1 %v4912_v21  ;;  %v516_v48 = vrot.slane %v6961_v39, 1  ;;  %v518_v49 = vrot.slane %v6960_v40, 1  ;;  %v480_v51 = vrot.slane %v6983_v42, 1  ;;  %v6951_v54 = vunpack.c.h.bf16 %v5301_v41  ;;  %v5430_v40 = vld [vmem:[%s5229_s28 + $0x48] sm:$0xff]   ;;  %v4924_v42 = vld [vmem:[%s6946_s1 + $0x18] sm:$0xff]  }
  0x1c   : > { %4451 = vmatprep.mubr.bf16.mxu0 %v582_v28  ;;  %4467 = vmatprep.mubr.bf16.mxu1 %v5280_v31  ;;  %v481_v52 = vrot.slane %v6978_v43, 1  ;;  %v483_v53 = vrot.slane %v6977_v44, 1  ;;  %v477_v56 = vsel %vm469_vm0, %v475_v32, %v476_v33  ;;  %v479_v57 = vsel %vm469_vm0, %v476_v33, %v478_v37  ;;  %v5372_v33 = vld [vmem:[%s5229_s28 + $0x98] ss:$12 sps:$4 sm:$0xff]  }
  0x1d   : > { %v6950_v58 = vunpack.c.l.bf16 %v5308_v45  ;;  %v517_v60 = vsel %vm469_vm0, %v515_v47, %v516_v48  ;;  %v519_v61 = vsel %vm469_vm0, %v516_v48, %v518_v49  ;;  %v520_v62 = vrot.slane %v6952_v50, 1  ;;  %v4917_v37 = vld [vmem:[%s6946_s1 + $0xb8] sm:$0xff]   ;;  %v4918_v50 = vld [vmem:[%s6946_s1 + $0x30] sm:$0xff]  }
  0x1e   : > { %4444 = vmatpush3.bf16.msra.mxu0 %v4912_v21  ;;  %4879 = vmatpush3.bf16.msra.mxu1 %v4912_v21  ;;  %v521_v63 = vrot.slane %v6951_v54, 1  ;;  %v482_v0 = vsel %vm469_vm0, %v480_v51, %v481_v52  ;;  %v484_v1 = vsel %vm469_vm0, %v481_v52, %v483_v53  ;;  %v6971_v3 = vunpack.c.l.bf16 %v5328_v55  ;;  %v5356_v21 = vld [vmem:[%s5229_s28 + $0x38] ss:$12 sps:$4 sm:$0xff]   ;;  %v5386_v52 = vld [vmem:[%s5229_s28 + $0x3c] sm:$0xff]  }
  0x1f   : > { %4445 = vmatprep.subr.bf16.mxu0 %v4913_v36  ;;  %4872 = vmatprep.subr.bf16.mxu1 %v4913_v36  ;;  %v523_v2 = vrot.slane %v6950_v58, 1  ;;  %v6970_v18 = vunpack.c.h.bf16 %v5328_v55  ;;  %v6968_v19 = vunpack.c.h.bf16 %v5290_v35  ;;  %v6955_v22 = vunpack.c.l.bf16 %v5334_v59  ;;  %v5409_v54 = vld [vmem:[%s5229_s28 + $0x9c] sm:$0xff]  }
  0x20   : > { %v6954_v23 = vunpack.c.h.bf16 %v5334_v59  ;;  %v6953_v25 = vunpack.c.h.bf16 %v5308_v45  ;;  %v5364_v28 = vpack.c.bf16 %v479_v57, %v477_v56  ;;  %v5366_v29 = vpack.c.bf16 %v519_v61, %v517_v60 }
  0x21   : > { %v5368_v30 = vpack.c.bf16 %v484_v1, %v482_v0  ;;  %v522_v32 = vsel %vm469_vm0, %v520_v62, %v521_v63  ;;  %v524_v47 = vsel %vm469_vm0, %v521_v63, %v523_v2  ;;  %v485_v48 = vrot.slane %v6971_v3, 1 }
  0x22   : > { %4446 = vmatpush3.bf16.msra.mxu0 %v4913_v36  ;;  %4880 = vmatpush3.bf16.msra.mxu1 %v4913_v36  ;;  %v4916_v36 = vld [vmem:[%s6946_s1 + $0x38] sm:$0xff]   ;;  %v6958_v49 = vunpack.c.l.bf16 %v5353_v20  ;;  %v6957_v51 = vunpack.c.h.bf16 %v5353_v20  ;;  %v486_v53 = vrot.slane %v6970_v18, 1  ;;  %v488_v56 = vrot.slane %v6968_v19, 1  ;;  %v5445_v19 = vld [vmem:[%s5229_s28 + $0xa8] sm:$0xff]  }
  0x23   : > { %4447 = vmatprep.subr.bf16.mxu0 %v4914_v46  ;;  %4873 = vmatprep.subr.bf16.mxu1 %v4914_v46  ;;  %v6956_v57 = vunpack.c.l.bf16 %v5356_v21  ;;  %v6959_v60 = vunpack.c.l.bf16 %v5362_v26  ;;  %v525_v61 = vrot.slane %v6955_v22, 1  ;;  %v526_v62 = vrot.slane %v6954_v23, 1 }
  0x24   : > { %v490_v63 = vrot.slane %v6958_v49, 1  ;;  %v491_v0 = vrot.slane %v6957_v51, 1  ;;  %v6964_v2 = vunpack.c.h.bf16 %v5362_v26  ;;  %v6965_v58 = vunpack.c.l.bf16 %v5372_v33  ;;  %v4919_v51 = vld [vmem:[%s6946_s1 + $0xb0] sm:$0xff]  }
  0x25   : > { %v493_v1 = vrot.slane %v6956_v57, 1  ;;  %v530_v23 = vrot.slane %v6959_v60, 1  ;;  %v6969_v22 = vunpack.c.l.bf16 %v5386_v52  ;;  %v6973_v57 = vunpack.c.h.bf16 %v5386_v52 }
  0x26   : > { %4448 = vmatpush3.bf16.msra.mxu0 %v4914_v46  ;;  %4881 = vmatpush3.bf16.msra.mxu1 %v4914_v46  ;;  %v528_v46 = vrot.slane %v6953_v25, 1  ;;  %v5414_v25 = vpack.c.bf16 %v524_v47, %v522_v32  ;;  %v487_v49 = vsel %vm469_vm0, %v485_v48, %v486_v53  ;;  %v531_v32 = vrot.slane %v6964_v2, 1 }
  0x27   : > { %4449 = vmatprep.subr.bf16.mxu0 %v4915_v17  ;;  %4874 = vmatprep.subr.bf16.mxu1 %v4915_v17  ;;  %v533_v47 = vrot.slane %v6965_v58, 1  ;;  %v6972_v60 = vunpack.c.h.bf16 %v5356_v21  ;;  %v527_v39 = vsel %vm469_vm0, %v525_v61, %v526_v62  ;;  %v6976_v38 = vunpack.c.l.bf16 %v5409_v54  ;;  %v4921_v61 = vld [vmem:[%s6946_s1 + $0xa8] sm:$0xff]  }
  0x28   : > { %v529_v48 = vsel %vm469_vm0, %v526_v62, %v528_v46  ;;  %v492_v2 = vsel %vm469_vm0, %v490_v63, %v491_v0  ;;  %v494_v58 = vsel %vm469_vm0, %v491_v0, %v493_v1  ;;  %v495_v13 = vrot.slane %v6969_v22, 1 }
  0x29   : > { %v6975_v11 = vunpack.c.h.bf16 %v5409_v54  ;;  %v532_v62 = vsel %vm469_vm0, %v530_v23, %v531_v32  ;;  %v534_v46 = vsel %vm469_vm0, %v531_v32, %v533_v47  ;;  %v496_v63 = vrot.slane %v6973_v57, 1  ;;  %v4922_v57 = vld [vmem:[%s6946_s1 + $0x20] sm:$0xff]  }
  0x2a   : > { %4450 = vmatpush3.bf16.msra.mxu0 %v4915_v17  ;;  %4882 = vmatpush3.bf16.msra.mxu1 %v4915_v17  ;;  %v489_v17 = vsel %vm469_vm0, %v486_v53, %v488_v56  ;;  %v5448_v53 = vld [vmem:[%s5229_s28 + $0xb0] ss:$12 sps:$4 sm:$0xff]   ;;  %v4920_v56 = vld [vmem:[%s6946_s1 + $0x28] sm:$0xff]   ;;  %v6974_v0 = vunpack.c.h.bf16 %v5372_v33  ;;  %v498_v1 = vrot.slane %v6972_v60, 1  ;;  %v535_v22 = vrot.slane %v6976_v38, 1 }
  0x2b   : > { %4483 = vmatprep.subr.bf16.mxu1 %v4916_v36  ;;  %4531 = vmatprep.subr.bf16.mxu0 %v4917_v37  ;;  %v6982_v18 = vunpack.c.l.bf16 %v5430_v40  ;;  %v6979_v3 = vunpack.c.h.bf16 %v5430_v40  ;;  %v536_v23 = vrot.slane %v6975_v11, 1  ;;  %v6980_v32 = vunpack.c.l.bf16 %v5445_v19 }
  0x2c   : > { %v5477_v47 = vpack.c.bf16 %v489_v17, %v487_v49  ;;  %v5479_v60 = vpack.c.bf16 %v529_v48, %v527_v39  ;;  %v5487_v11 = vpack.c.bf16 %v494_v58, %v492_v2  ;;  %v5489_v38 = vpack.c.bf16 %v534_v46, %v532_v62  ;;  %v5494_v49 = vld [vmem:[%s5229_s28 + $0x54] sm:$0xff]  }
  0x2d   : > { %4452 = vmatmul.mubr.bf16.vlgmr.msra.gmra.mxu0 %v5364_v28  ;;  %4468 = vmatmul.mubr.bf16.vlgmr.msra.gmra.mxu1 %v5366_v29  ;;  %v6985_v44 = vunpack.c.h.bf16 %v5445_v19  ;;  %v6984_v43 = vunpack.c.l.bf16 %v5448_v53  ;;  %v5497_v39 = vld [vmem:[%s5229_s28 + $0xb4] sm:$0xff]   ;;  %v497_v17 = vsel %vm469_vm0, %v495_v13, %v496_v63  ;;  %v499_v48 = vsel %vm469_vm0, %v496_v63, %v498_v1 }
  0x2e   : > { %4484 = vmatpush3.bf16.msra.mxu1 %v4916_v36  ;;  %4532 = vmatpush3.bf16.msra.mxu0 %v4917_v37  ;;  %v538_v36 = vrot.slane %v6974_v0, 1  ;;  %v6981_v37 = vunpack.c.l.bf16 %v5437_v14  ;;  %v4923_v0 = vld [vmem:[%s6946_s1 + $0xa0] sm:$0xff]   ;;  %v500_v58 = vrot.slane %v6982_v18, 1  ;;  %v501_v2 = vrot.slane %v6979_v3, 1 }
  0x2f   : > { %4485 = vmatprep.subr.bf16.mxu1 %v4918_v50  ;;  %4533 = vmatprep.subr.bf16.mxu0 %v4919_v51  ;;  %v537_v62 = vsel %vm469_vm0, %v535_v22, %v536_v23  ;;  %v540_v13 = vrot.slane %v6980_v32, 1  ;;  %v6989_v63 = vunpack.c.h.bf16 %v5494_v49  ;;  %v6988_v1 = vunpack.c.h.bf16 %v5437_v14 }
  0x30   : > { %4455 = vmatprep.mubr.bf16.mxu0 %v5368_v30  ;;  %4471 = vmatprep.mubr.bf16.mxu1 %v5414_v25  ;;  %v539_v46 = vsel %vm469_vm0, %v536_v23, %v538_v36  ;;  %v6990_v3 = vunpack.c.l.bf16 %v5497_v39  ;;  %v541_v22 = vrot.slane %v6985_v44, 1  ;;  %v543_v23 = vrot.slane %v6984_v43, 1  ;;  %v4925_v43 = vld [vmem:[%s6946_s1 + $0x98] sm:$0xff]  }
  0x31   : > { %v381_v36 = vunpack.c.h.bf16 %v5497_v39  ;;  %v6991_v32 = vunpack.c.h.bf16 %v5448_v53  ;;  %v5525_v18 = vpack.c.bf16 %v539_v46, %v537_v62  ;;  %v4926_v62 = vld [vmem:[%s6946_s1 + $0x10] sm:$0xff]   ;;  %v502_v46 = vsel %vm469_vm0, %v500_v58, %v501_v2 }
  0x32   : > { %4486 = vmatpush3.bf16.msra.mxu1 %v4918_v50  ;;  %4534 = vmatpush3.bf16.msra.mxu0 %v4919_v51  ;;  %v503_v50 = vrot.slane %v6981_v37, 1  ;;  %v6987_v51 = vunpack.c.l.bf16 %v5494_v49  ;;  %v5523_v37 = vpack.c.bf16 %v499_v48, %v497_v17  ;;  %v508_v17 = vrot.slane %v6988_v1, 1  ;;  %v4927_v58 = vld [vmem:[%s6946_s1 + $0x90] sm:$0xff]  }
  0x33   : > { %4487 = vmatprep.subr.bf16.mxu1 %v4920_v56  ;;  %4535 = vmatprep.subr.bf16.mxu0 %v4921_v61  ;;  %v545_v48 = vrot.slane %v6990_v3, 1  ;;  %v542_v24 = vsel %vm469_vm0, %v540_v13, %v541_v22  ;;  %v546_v1 = vrot.slane %v381_v36, 1  ;;  %v1037_v13 = vrot.slane %v337_v9, 2 }
  0x34   : > { %v504_v44 = vsel %vm469_vm0, %v501_v2, %v503_v50  ;;  %v1035_v50 = vrot.slane %v336_v8, 2  ;;  %v4929_v8 = vld [vmem:[%s6946_s1 + $0x88] sm:$0xff]   ;;  %v1040_v9 = vrot.slane %v339_v16, 2 }
  0x35   : > { %4456 = vmatmul.mubr.bf16.gmra.mxu0 %v5477_v47  ;;  %4472 = vmatmul.mubr.bf16.gmra.mxu1 %v5479_v60  ;;  %v5557_v3 = vpack.c.bf16 %v504_v44, %v502_v46  ;;  %v547_v44 = vsel %vm469_vm0, %v545_v48, %v546_v1  ;;  %v4931_v48 = vld [vmem:[%s6946_s1 + $0x80] sm:$0xff]   ;;  %v6999_v46 = vunpack.c.l.bf16 %v5290_v35 }
  0x36   : > { %4488 = vmatpush3.bf16.msra.mxu1 %v4920_v56  ;;  %4536 = vmatpush3.bf16.msra.mxu0 %v4921_v61  ;;  %v505_v56 = vrot.slane %v6987_v51, 1  ;;  %v506_v61 = vrot.slane %v6989_v63, 1  ;;  %v544_v51 = vsel %vm469_vm0, %v541_v22, %v543_v23  ;;  %v548_v63 = vrot.slane %v6991_v32, 1  ;;  %v4928_v22 = vld [vmem:[%s6946_s1 + $0x8] sm:$0xff]  }
  0x37   : > { %4489 = vmatprep.subr.bf16.mxu1 %v4922_v57  ;;  %4537 = vmatprep.subr.bf16.mxu0 %v4923_v0  ;;  %v5559_v2 = vpack.c.bf16 %v544_v51, %v542_v24  ;;  %v1038_v23 = vsel %vm1033_vm1, %v1035_v50, %v1037_v13 }
  0x38   : > { %4459 = vmatprep.mubr.bf16.mxu0 %v5487_v11  ;;  %4475 = vmatprep.mubr.bf16.mxu1 %v5489_v38  ;;  %v509_v24 = vsel %vm469_vm0, %v506_v61, %v508_v17  ;;  %v549_v51 = vsel %vm469_vm0, %v546_v1, %v548_v63  ;;  %v4930_v17 = vld [vmem:[%s6946_s1] sm:$0xff]  }
  0x39   : > { %v5589_v1 = vpack.c.bf16 %v549_v51, %v547_v44  ;;  %v4934_v51 = vld [vmem:[%s6946_s1 + $0xf8] sm:$0xff]  }
  0x3a   : > { %4490 = vmatpush3.bf16.msra.mxu1 %v4922_v57  ;;  %4538 = vmatpush3.bf16.msra.mxu0 %v4923_v0  ;;  %v507_v57 = vsel %vm469_vm0, %v505_v56, %v506_v61  ;;  %v1034_v0 = vrot.slane %v335_v7, 2  ;;  %v1039_v7 = vrot.slane %v338_v15, 2  ;;  %v6997_v56 = vunpack.c.l.bf16 %v5287_v34 }
  0x3b   : > { %4491 = vmatprep.subr.bf16.mxu1 %v4924_v42  ;;  %4539 = vmatprep.subr.bf16.mxu0 %v4925_v43  ;;  %v5587_v63 = vpack.c.bf16 %v509_v24, %v507_v57  ;;  %v7000_v57 = vunpack.c.l.bf16 %v5328_v55 }
  0x3c   : > { %v1036_v15 = vsel %vm1033_vm1, %v1034_v0, %v1035_v50  ;;  %v1044_v16 = vrot.slane %v6997_v56, 2  ;;  %v7001_v50 = vunpack.c.h.bf16 %v5328_v55  ;;  %v1041_v24 = vsel %vm1033_vm1, %v1039_v7, %v1040_v9 }
  0x3d   : > { %4460 = vmatmul.mubr.bf16.gmra.mxu0 %v5523_v37  ;;  %4476 = vmatmul.mubr.bf16.gmra.mxu1 %v5525_v18  ;;  %v1049_v0 = vrot.slane %v7000_v57, 2  ;;  %v7005_v7 = vunpack.c.l.bf16 %v5247_v10 }
  0x3e   : > { %4492 = vmatpush3.bf16.msra.mxu1 %v4924_v42  ;;  %4540 = vmatpush3.bf16.msra.mxu0 %v4925_v43  ;;  %v6996_v42 = vunpack.c.h.bf16 %v5238_v5  ;;  %v6998_v5 = vunpack.c.h.bf16 %v5287_v34  ;;  %v1050_v13 = vrot.slane %v7001_v50, 2  ;;  %v7006_v50 = vunpack.c.l.bf16 %v5276_v27 }
  0x3f   : > { %4493 = vmatprep.subr.bf16.mxu1 %v4926_v62  ;;  %4541 = vmatprep.subr.bf16.mxu0 %v4927_v58 }
  0x40   : > { %v1042_v43 = vrot.slane %v6996_v42, 2  ;;  %4463 = vmatprep.mubr.bf16.mxu0 %v5557_v3  ;;  %4479 = vmatprep.mubr.bf16.mxu1 %v5559_v2  ;;  %v1045_v61 = vrot.slane %v6998_v5, 2  ;;  %v7002_v42 = vunpack.c.h.bf16 %v5290_v35  ;;  %v4935_v35 = vld [vmem:[%s6946_s1 + $0x138] sm:$0xff]  }
  0x42   : > { %4494 = vmatpush3.bf16.msra.mxu1 %v4926_v62  ;;  %4542 = vmatpush3.bf16.msra.mxu0 %v4927_v58  ;;  %v1047_v62 = vrot.slane %v6999_v46, 2  ;;  %v1146_v58 = vpack.c.bf16 %v1038_v23, %v1036_v15  ;;  %v1043_v44 = vsel %vm1033_vm1, %v1040_v9, %v1042_v43  ;;  %v1052_v15 = vrot.slane %v7002_v42, 2 }
  0x43   : > { %4495 = vmatprep.subr.bf16.mxu1 %v4928_v22  ;;  %4543 = vmatprep.subr.bf16.mxu0 %v4929_v8  ;;  %v7003_v23 = vunpack.c.l.bf16 %v5241_v6  ;;  %v1046_v5 = vsel %vm1033_vm1, %v1044_v16, %v1045_v61  ;;  %v7004_v46 = vunpack.c.h.bf16 %v5241_v6  ;;  %v1077_v9 = vrot.slane %v7005_v7, 2 }
  0x44   : > { %v1048_v43 = vsel %vm1033_vm1, %v1045_v61, %v1047_v62  ;;  %v7008_v6 = vunpack.c.h.bf16 %v5247_v10  ;;  %v7010_v62 = vunpack.c.h.bf16 %v5353_v20 }
  0x45   : > { %4464 = vmatmul.mubr.bf16.gmra.mxu0 %v5587_v63  ;;  %4480 = vmatmul.mubr.bf16.gmra.mxu1 %v5589_v1  ;;  %v1074_v56 = vrot.slane %v7003_v23, 2  ;;  %v1075_v57 = vrot.slane %v7004_v46, 2  ;;  %v5636_v23 = vpack.c.bf16 %v1043_v44, %v1041_v24  ;;  %v7009_v46 = vunpack.c.l.bf16 %v5353_v20 }
  0x46   : > { %4496 = vmatpush3.bf16.msra.mxu1 %v4928_v22  ;;  %4544 = vmatpush3.bf16.msra.mxu0 %v4929_v8  ;;  %v1079_v22 = vrot.slane %v7006_v50, 2  ;;  %v7007_v8 = vunpack.c.h.bf16 %v5276_v27  ;;  %v1082_v42 = vrot.slane %v7008_v6, 2  ;;  %v1055_v50 = vrot.slane %v7010_v62, 2 }
  0x47   : > { %4497 = vmatprep.subr.bf16.mxu1 %v4930_v17  ;;  %4545 = vmatprep.subr.bf16.mxu0 %v4931_v48  ;;  %v1054_v7 = vrot.slane %v7009_v46, 2  ;;  %v1076_v32 = vsel %vm1033_vm1, %v1074_v56, %v1075_v57  ;;  %v1078_v61 = vsel %vm1033_vm1, %v1075_v57, %v1077_v9  ;;  %v7012_v56 = vunpack.c.l.bf16 %v5334_v59 }
  0x48   : > { %v1080_v16 = vrot.slane %v7007_v8, 2  ;;  %4499 = vmatprep.mubr.bf16.mxu1 %v5235_v4  ;;  %4547 = vmatprep.mubr.bf16.mxu0 %v1146_v58  ;;  %v5644_v27 = vpack.c.bf16 %v1078_v61, %v1076_v32  ;;  %v5648_v4 = vpack.c.bf16 %v1048_v43, %v1046_v5  ;;  %v7011_v58 = vunpack.c.l.bf16 %v5356_v21  ;;  %v4938_v43 = vld [vmem:[%s6946_s1 + $0xf0] sm:$0xff]  }
  0x49   : > { %v1089_v57 = vrot.slane %v7012_v56, 2  ;;  %v1051_v32 = vsel %vm1033_vm1, %v1049_v0, %v1050_v13  ;;  %v1053_v9 = vsel %vm1033_vm1, %v1050_v13, %v1052_v15  ;;  %v4942_v0 = vld [vmem:[%s6946_s1 + $0xe8] sm:$0xff]   ;;  %v7015_v46 = vunpack.c.l.bf16 %v5386_v52 }
  0x4a   : > { %v1081_v10 = vsel %vm1033_vm1, %v1079_v22, %v1080_v16  ;;  %v1083_v8 = vsel %vm1033_vm1, %v1080_v16, %v1082_v42  ;;  %4498 = vmatpush3.bf16.msra.mxu1 %v4930_v17  ;;  %4546 = vmatpush3.bf16.msra.mxu0 %v4931_v48  ;;  %v1057_v24 = vrot.slane %v7011_v58, 2  ;;  %v7013_v22 = vunpack.c.h.bf16 %v5334_v59  ;;  %v4939_v16 = vld [vmem:[%s6946_s1 + $0x130] sm:$0xff]   ;;  %v4943_v13 = vld [vmem:[%s6946_s1 + $0x128] sm:$0xff]  }
  0x4b   : > { %v5652_v44 = vpack.c.bf16 %v1083_v8, %v1081_v10  ;;  %4579 = vmatprep.subr.bf16.mxu1 %v4934_v51  ;;  %4627 = vmatprep.subr.bf16.mxu0 %v4935_v35  ;;  %v7014_v48 = vunpack.c.h.bf16 %v5308_v45  ;;  %v5678_v42 = vpack.c.bf16 %v1053_v9, %v1051_v32  ;;  %v1059_v61 = vrot.slane %v7015_v46, 2 }
  0x4c   : > { %v1090_v17 = vrot.slane %v7013_v22, 2  ;;  %v7016_v10 = vunpack.c.l.bf16 %v5409_v54  ;;  %v1056_v58 = vsel %vm1033_vm1, %v1054_v7, %v1055_v50  ;;  %v1058_v56 = vsel %vm1033_vm1, %v1055_v50, %v1057_v24 }
  0x4d   : > { %v1092_v5 = vrot.slane %v7014_v48, 2  ;;  %4500 = vmatmul.mubr.bf16.vlgmr.msra.gmra.mxu1 %v5251_v12  ;;  %4548 = vmatmul.mubr.bf16.vlgmr.msra.gmra.mxu0 %v5636_v23  ;;  %v7019_v9 = vunpack.c.h.bf16 %v5386_v52  ;;  %v7022_v7 = vunpack.c.h.bf16 %v5430_v40  ;;  %v7023_v46 = vunpack.c.l.bf16 %v5497_v39 }
  0x4e   : > { %v1091_v15 = vsel %vm1033_vm1, %v1089_v57, %v1090_v17  ;;  %4580 = vmatpush3.bf16.msra.mxu1 %v4934_v51  ;;  %4628 = vmatpush3.bf16.msra.mxu0 %v4935_v35  ;;  %v1099_v8 = vrot.slane %v7016_v10, 2  ;;  %v7017_v51 = vunpack.c.h.bf16 %v5409_v54  ;;  %v7018_v57 = vunpack.c.h.bf16 %v5372_v33 }
  0x4f   : > { %v1093_v6 = vsel %vm1033_vm1, %v1090_v17, %v1092_v5  ;;  %4503 = vmatprep.mubr.bf16.mxu1 %v5287_v34  ;;  %4551 = vmatprep.mubr.bf16.mxu0 %v5648_v4  ;;  %v1060_v22 = vrot.slane %v7019_v9, 2  ;;  %v7020_v17 = vunpack.c.h.bf16 %v5356_v21  ;;  %v7021_v5 = vunpack.c.l.bf16 %v5430_v40 }
  0x50   : > { %v5682_v62 = vpack.c.bf16 %v1093_v6, %v1091_v15  ;;  %v1100_v35 = vrot.slane %v7017_v51, 2  ;;  %v1102_v32 = vrot.slane %v7018_v57, 2  ;;  %4581 = vmatprep.subr.bf16.mxu1 %v4938_v43  ;;  %4629 = vmatprep.subr.bf16.mxu0 %v4939_v16  ;;  %v1065_v50 = vrot.slane %v7022_v7, 2 }
  0x51   : > { %v1062_v48 = vrot.slane %v7020_v17, 2  ;;  %v1064_v15 = vrot.slane %v7021_v5, 2  ;;  %v1109_v10 = vrot.slane %v7023_v46, 2  ;;  %v1110_v51 = vrot.slane %v381_v36, 2  ;;  %v4946_v17 = vld [vmem:[%s6946_s1 + $0xe0] sm:$0xff]  }
  0x52   : > { %v1101_v24 = vsel %vm1033_vm1, %v1099_v8, %v1100_v35  ;;  %v1103_v6 = vsel %vm1033_vm1, %v1100_v35, %v1102_v32  ;;  %4582 = vmatpush3.bf16.msra.mxu1 %v4938_v43  ;;  %4630 = vmatpush3.bf16.msra.mxu0 %v4939_v16  ;;  %v5708_v21 = vpack.c.bf16 %v1058_v56, %v1056_v58  ;;  %v7024_v57 = vunpack.c.l.bf16 %v5437_v14  ;;  %v4947_v43 = vld [vmem:[%s6946_s1 + $0x120] sm:$0xff]  }
  0x53   : > { %v5715_v8 = vpack.c.bf16 %v1103_v6, %v1101_v24  ;;  %v7025_v35 = vunpack.c.h.bf16 %v5448_v53  ;;  %4583 = vmatprep.subr.bf16.mxu1 %v4942_v0  ;;  %4631 = vmatprep.subr.bf16.mxu0 %v4943_v13  ;;  %v1111_v36 = vsel %vm1033_vm1, %v1109_v10, %v1110_v51  ;;  %v1061_v58 = vsel %vm1033_vm1, %v1059_v61, %v1060_v22  ;;  %v4950_v61 = vld [vmem:[%s6946_s1 + $0xd8] sm:$0xff]  }
  0x54   : > { %v1067_v9 = vrot.slane %v7024_v57, 2  ;;  %v1063_v5 = vsel %vm1033_vm1, %v1060_v22, %v1062_v48  ;;  %v7026_v7 = vunpack.c.l.bf16 %v5494_v49  ;;  %v7027_v6 = vunpack.c.h.bf16 %v5494_v49  ;;  %v4951_v57 = vld [vmem:[%s6946_s1 + $0x118] sm:$0xff]  }
  0x55   : > { %v1112_v32 = vrot.slane %v7025_v35, 2  ;;  %4504 = vmatmul.mubr.bf16.gmra.mxu1 %v5328_v55  ;;  %4552 = vmatmul.mubr.bf16.gmra.mxu0 %v5678_v42  ;;  %v7028_v10 = vunpack.c.h.bf16 %v5437_v14  ;;  %v1066_v22 = vsel %vm1033_vm1, %v1064_v15, %v1065_v50  ;;  %v5746_v35 = vpack.c.bf16 %v1063_v5, %v1061_v58  ;;  %v4958_v15 = vld [vmem:[%s6946_s1 + $0xc8] sm:$0xff]  }
  0x56   : > { %4507 = vmatprep.mubr.bf16.mxu1 %v5353_v20  ;;  %4555 = vmatprep.mubr.bf16.mxu0 %v5708_v21  ;;  %v1069_v24 = vrot.slane %v7026_v7, 2  ;;  %v1070_v46 = vrot.slane %v7027_v6, 2  ;;  %v1068_v48 = vsel %vm1033_vm1, %v1065_v50, %v1067_v9  ;;  %v4959_v50 = vld [vmem:[%s6946_s1 + $0x108] sm:$0xff]   ;;  %v7030_v58 = vunpack.c.h.bf16 %v5301_v41  ;;  %v4962_v6 = vld [vmem:[%s6946_s1 + $0xc0] sm:$0xff]  }
  0x57   : > { %v1113_v16 = vsel %vm1033_vm1, %v1110_v51, %v1112_v32  ;;  %v1072_v51 = vrot.slane %v7028_v10, 2  ;;  %4584 = vmatpush3.bf16.msra.mxu1 %v4942_v0  ;;  %4632 = vmatpush3.bf16.msra.mxu0 %v4943_v13  ;;  %v5748_v14 = vpack.c.bf16 %v1068_v48, %v1066_v22  ;;  %v4954_v32 = vld [vmem:[%s6946_s1 + $0xd0] sm:$0xff]   ;;  %v7031_v7 = vunpack.c.l.bf16 %v5308_v45 }
  0x58   : > { %v5727_v56 = vpack.c.bf16 %v1113_v16, %v1111_v36  ;;  %4585 = vmatprep.subr.bf16.mxu1 %v4946_v17  ;;  %4633 = vmatprep.subr.bf16.mxu0 %v4947_v43  ;;  %v4955_v36 = vld [vmem:[%s6946_s1 + $0x110] sm:$0xff]   ;;  %v1071_v0 = vsel %vm1033_vm1, %v1069_v24, %v1070_v46  ;;  %v1085_v5 = vrot.slane %v7030_v58, 2  ;;  %v7032_v48 = vunpack.c.l.bf16 %v5362_v26 }
  0x59   : > { %v1073_v13 = vsel %vm1033_vm1, %v1070_v46, %v1072_v51  ;;  %v1087_v24 = vrot.slane %v7031_v7, 2  ;;  %v4963_v46 = vld [vmem:[%s6946_s1 + $0x100] sm:$0xff]   ;;  %v4964_v51 = vld [vmem:[%s6946_s1 + $0x178] sm:$0xff]  }
  0x5a   : > { %v5768_v9 = vpack.c.bf16 %v1073_v13, %v1071_v0  ;;  %v7034_v13 = vunpack.c.l.bf16 %v5372_v33 }
  0x5b   : > { %4586 = vmatpush3.bf16.msra.mxu1 %v4946_v17  ;;  %4634 = vmatpush3.bf16.msra.mxu0 %v4947_v43  ;;  %v5771_v17 = vld [vmem:[%s5229_s28 + $0x60] sm:$0xff]   ;;  %v7029_v43 = vunpack.c.l.bf16 %v5301_v41  ;;  %v1088_v10 = vsel %vm1033_vm1, %v1085_v5, %v1087_v24  ;;  %v7037_v24 = vunpack.c.l.bf16 %v5448_v53 }
  0x5c   : > { %4587 = vmatprep.subr.bf16.mxu1 %v4950_v61  ;;  %4635 = vmatprep.subr.bf16.mxu0 %v4951_v57 }
  0x5d   : > { %4508 = vmatmul.mubr.bf16.gmra.mxu1 %v5386_v52  ;;  %4556 = vmatmul.mubr.bf16.gmra.mxu0 %v5746_v35  ;;  %v1084_v16 = vrot.slane %v7029_v43, 2 }
  0x5e   : > { %4511 = vmatprep.mubr.bf16.mxu1 %v5430_v40  ;;  %4559 = vmatprep.mubr.bf16.mxu0 %v5748_v14 }
  0x5f   : > { %4588 = vmatpush3.bf16.msra.mxu1 %v4950_v61  ;;  %4636 = vmatpush3.bf16.msra.mxu0 %v4951_v57  ;;  %v1086_v45 = vsel %vm1033_vm1, %v1084_v16, %v1085_v5  ;;  %v4965_v61 = vld [vmem:[%s6946_s1 + $0x1b8] sm:$0xff]   ;;  %v5798_v57 = vld [vmem:[%s5229_s28 + $0x6c] sm:$0xff]   ;;  %v7035_v16 = vunpack.c.l.bf16 %v5445_v19  ;;  %v7036_v5 = vunpack.c.h.bf16 %v5445_v19 }
  0x60   : > { %4589 = vmatprep.subr.bf16.mxu1 %v4954_v32  ;;  %4637 = vmatprep.subr.bf16.mxu0 %v4955_v36  ;;  %v5800_v22 = vpack.c.bf16 %v1088_v10, %v1086_v45  ;;  %v5829_v10 = vld [vmem:[%s5229_s28 + $0xc0] sm:$0xff]  }
  0x61   : > { %v1104_v58 = vrot.slane %v7035_v16, 2  ;;  %v1105_v7 = vrot.slane %v7036_v5, 2  ;;  %v383_v53 = vunpack.c.l.bf16 %v5829_v10  ;;  %v4966_v5 = vld [vmem:[%s6946_s1 + $0x170] sm:$0xff]  }
  0x63   : > { %4590 = vmatpush3.bf16.msra.mxu1 %v4954_v32  ;;  %4638 = vmatpush3.bf16.msra.mxu0 %v4955_v36  ;;  %v1094_v32 = vrot.slane %v7032_v48, 2  ;;  %v7033_v36 = vunpack.c.h.bf16 %v5362_v26 }
  0x64   : > { %4591 = vmatprep.subr.bf16.mxu1 %v4958_v15  ;;  %4639 = vmatprep.subr.bf16.mxu0 %v4959_v50 }
  0x65   : > { %4512 = vmatmul.mubr.bf16.gmra.mxu1 %v5494_v49  ;;  %4560 = vmatmul.mubr.bf16.gmra.mxu0 %v5768_v9  ;;  %v1095_v0 = vrot.slane %v7033_v36, 2  ;;  %v384_v36 = vunpack.c.h.bf16 %v5829_v10 }
  0x66   : > { %4515 = vmatprep.mubr.bf16.mxu1 %v5771_v17  ;;  %4563 = vmatprep.mubr.bf16.mxu0 %v5644_v27 }
  0x67   : > { %4592 = vmatpush3.bf16.msra.mxu1 %v4958_v15  ;;  %4640 = vmatpush3.bf16.msra.mxu0 %v4959_v50  ;;  %v1097_v15 = vrot.slane %v7034_v13, 2  ;;  %v1096_v50 = vsel %vm1033_vm1, %v1094_v32, %v1095_v0  ;;  %v5834_v32 = vld [vmem:[%s5229_s28 + $0xc8] sm:$0xf]  ;;  %v1949_v13 = vrot.slane %v384_v36, 2 }
  0x68   : > { %4593 = vmatprep.subr.bf16.mxu1 %v4962_v6  ;;  %4641 = vmatprep.subr.bf16.mxu0 %v4963_v46 }
  0x69   : > { %v1098_v43 = vsel %vm1033_vm1, %v1095_v0, %v1097_v15  ;;  %v1948_v0 = vrot.slane %v383_v53, 2  ;;  %v385_v15 = vunpack.c.l.bf16 %v5834_v32  ;;  %v4983_v32 = vld [vmem:[%s6946_s1 + $0x1f0] sm:$0xff]  }
  0x6a   : > { %v5814_v33 = vpack.c.bf16 %v1098_v43, %v1096_v50 }
  0x6b   : > { %4594 = vmatpush3.bf16.msra.mxu1 %v4962_v6  ;;  %4642 = vmatpush3.bf16.msra.mxu0 %v4963_v46  ;;  %v1107_v6 = vrot.slane %v7037_v24, 2  ;;  %v1106_v46 = vsel %vm1033_vm1, %v1104_v58, %v1105_v7  ;;  %v1951_v50 = vrot.slane %v385_v15, 2  ;;  %v1950_v43 = vsel %vm1033_vm1, %v1948_v0, %v1949_v13  ;;  %v4972_v24 = vld [vmem:[%s6946_s1 + $0x158] sm:$0xff]   ;;  %v4976_v0 = vld [vmem:[%s6946_s1 + $0x148] sm:$0xff]  }
  0x6c   : > { %4675 = vmatprep.subr.bf16.mxu1 %v4964_v51  ;;  %4723 = vmatprep.subr.bf16.mxu0 %v4965_v61 }
  0x6d   : > { %4516 = vmatmul.mubr.bf16.gmra.mxu1 %v5798_v57  ;;  %4564 = vmatmul.mubr.bf16.gmra.mxu0 %v5652_v44  ;;  %v1108_v45 = vsel %vm1033_vm1, %v1105_v7, %v1107_v6  ;;  %v1952_v16 = vsel %vm1033_vm1, %v1949_v13, %v1951_v50  ;;  %v4967_v7 = vld [vmem:[%s6946_s1 + $0x1b0] sm:$0xff]   ;;  %v4973_v6 = vld [vmem:[%s6946_s1 + $0x198] sm:$0xff]   ;;  %v4977_v13 = vld [vmem:[%s6946_s1 + $0x188] sm:$0xff]  }
  0x6e   : > { %4519 = vmatprep.mubr.bf16.mxu1 %v5301_v41  ;;  %4567 = vmatprep.mubr.bf16.mxu0 %v5800_v22  ;;  %v5831_v48 = vpack.c.bf16 %v1108_v45, %v1106_v46  ;;  %v5851_v58 = vpack.c.bf16 %v1952_v16, %v1950_v43  ;;  %v4974_v46 = vld [vmem:[%s6946_s1 + $0x150] sm:$0xff]   ;;  %v4979_v50 = vld [vmem:[%s6946_s1 + $0x140] sm:$0xff]   ;;  %v4981_v16 = vld [vmem:[%s6946_s1 + $0x1f8] sm:$0xff]  }
  0x6f   : > { %v4975_v45 = vld [vmem:[%s6946_s1 + $0x190] sm:$0xff]   ;;  %v4980_v43 = vld [vmem:[%s6946_s1 + $0x180] sm:$0xff]  }
  0x70   : > { %7038 = vst [vmem:[#allocation2_spill] sm:$0xff] %v5851_v58 }
  0x75   : > { %4520 = vmatmul.mubr.bf16.gmra.mxu1 %v5334_v59  ;;  %4568 = vmatmul.mubr.bf16.gmra.mxu0 %v5682_v62 }
  0x76   : > { %4523 = vmatprep.mubr.bf16.mxu1 %v5362_v26  ;;  %4571 = vmatprep.mubr.bf16.mxu0 %v5814_v33 }
  0x7d   : > { %4524 = vmatmul.mubr.bf16.gmra.mxu1 %v5409_v54  ;;  %4572 = vmatmul.mubr.bf16.gmra.mxu0 %v5715_v8 }
  0x7e   : > { %4527 = vmatprep.mubr.bf16.mxu1 %v5445_v19  ;;  %4575 = vmatprep.mubr.bf16.mxu0 %v5831_v48 }
  0x85   : > { %4528 = vmatmul.mubr.bf16.gmra.mxu1 %v5497_v39  ;;  %4576 = vmatmul.mubr.bf16.gmra.mxu0 %v5727_v56 }
  0x86   : > { %4595 = vmatprep.mubr.bf16.mxu1 %v5251_v12  ;;  %4643 = vmatprep.mubr.bf16.mxu0 %v5364_v28  ;;  %v4968_v12 = vld [vmem:[%s6946_s1 + $0x168] sm:$0xff]  }
  0x87   : > { %v4969_v28 = vld [vmem:[%s6946_s1 + $0x1a8] sm:$0xff]  }
  0x8d   : > { %4596 = vmatmul.mubr.bf16.vlgmr.msra.gmra.mxu1 %v5287_v34  ;;  %4644 = vmatmul.mubr.bf16.vlgmr.msra.gmra.mxu0 %v5368_v30 }
  0x8e   : > { %4676 = vmatpush3.bf16.msra.mxu1 %v4964_v51  ;;  %4724 = vmatpush3.bf16.msra.mxu0 %v4965_v61  ;;  %v4970_v51 = vld [vmem:[%s6946_s1 + $0x160] sm:$0xff]  }
  0x8f   : > { %4599 = vmatprep.mubr.bf16.mxu1 %v5328_v55  ;;  %4647 = vmatprep.mubr.bf16.mxu0 %v5477_v47  ;;  %v4971_v61 = vld [vmem:[%s6946_s1 + $0x1a0] sm:$0xff]  }
  0x90   : > { %4677 = vmatprep.subr.bf16.mxu1 %v4966_v5  ;;  %4725 = vmatprep.subr.bf16.mxu0 %v4967_v7 }
  0x92   : > { %4678 = vmatpush3.bf16.msra.mxu1 %v4966_v5  ;;  %4726 = vmatpush3.bf16.msra.mxu0 %v4967_v7  ;;  %v4982_v5 = vld [vmem:[%s6946_s1 + $0x238] sm:$0xff]   ;;  %v1682_v7 = vrot.slane %v383_v53, 1  ;;  %v4984_v53 = vld [vmem:[%s6946_s1 + $0x230] sm:$0xff]  }
  0x93   : > { %4679 = vmatprep.subr.bf16.mxu1 %v4968_v12  ;;  %4727 = vmatprep.subr.bf16.mxu0 %v4969_v28 }
  0x95   : > { %4600 = vmatmul.mubr.bf16.gmra.mxu1 %v5353_v20  ;;  %4648 = vmatmul.mubr.bf16.gmra.mxu0 %v5487_v11 }
  0x96   : > { %4603 = vmatprep.mubr.bf16.mxu1 %v5386_v52  ;;  %4651 = vmatprep.mubr.bf16.mxu0 %v5523_v37 }
  0x97   : > { %4680 = vmatpush3.bf16.msra.mxu1 %v4968_v12  ;;  %4728 = vmatpush3.bf16.msra.mxu0 %v4969_v28  ;;  %v1683_v12 = vrot.slane %v384_v36, 1  ;;  %v1685_v28 = vrot.slane %v385_v15, 1  ;;  %v4989_v36 = vld [vmem:[%s6946_s1 + $0x1d8] sm:$0xff]  }
  0x98   : > { %4681 = vmatprep.subr.bf16.mxu1 %v4970_v51  ;;  %4729 = vmatprep.subr.bf16.mxu0 %v4971_v61  ;;  %v4990_v15 = vld [vmem:[%s6946_s1 + $0x218] sm:$0xff]  }
  0x9b   : > { %4682 = vmatpush3.bf16.msra.mxu1 %v4970_v51  ;;  %4730 = vmatpush3.bf16.msra.mxu0 %v4971_v61  ;;  %v1684_v51 = vsel %vm469_vm0, %v1682_v7, %v1683_v12  ;;  %v1686_v61 = vsel %vm469_vm0, %v1683_v12, %v1685_v28 }
  0x9c   : > { %4683 = vmatprep.subr.bf16.mxu1 %v4972_v24  ;;  %4731 = vmatprep.subr.bf16.mxu0 %v4973_v6 }
  0x9d   : > { %4604 = vmatmul.mubr.bf16.gmra.mxu1 %v5430_v40  ;;  %4652 = vmatmul.mubr.bf16.gmra.mxu0 %v5557_v3 }
  0x9e   : > { %4607 = vmatprep.mubr.bf16.mxu1 %v5494_v49  ;;  %4655 = vmatprep.mubr.bf16.mxu0 %v5587_v63 }
  0x9f   : > { %4684 = vmatpush3.bf16.msra.mxu1 %v4972_v24  ;;  %4732 = vmatpush3.bf16.msra.mxu0 %v4973_v6  ;;  %v5941_v24 = vpack.c.bf16 %v1686_v61, %v1684_v51  ;;  %v4993_v6 = vld [vmem:[%s6946_s1 + $0x1c8] sm:$0xff]  }
  0xa0   : > { %4685 = vmatprep.subr.bf16.mxu1 %v4974_v46  ;;  %4733 = vmatprep.subr.bf16.mxu0 %v4975_v45 }
  0xa1   : > { %7039 = vst [vmem:[#allocation3_spill] sm:$0xff] %v5941_v24 }
  0xa3   : > { %4686 = vmatpush3.bf16.msra.mxu1 %v4974_v46  ;;  %4734 = vmatpush3.bf16.msra.mxu0 %v4975_v45  ;;  %v4994_v46 = vld [vmem:[%s6946_s1 + $0x208] sm:$0xff]  }
  0xa4   : > { %4687 = vmatprep.subr.bf16.mxu1 %v4976_v0  ;;  %4735 = vmatprep.subr.bf16.mxu0 %v4977_v13 }
  0xa5   : > { %4608 = vmatmul.mubr.bf16.gmra.mxu1 %v5771_v17  ;;  %4656 = vmatmul.mubr.bf16.gmra.mxu0 %v5280_v31 }
  0xa6   : > { %4611 = vmatprep.mubr.bf16.mxu1 %v5798_v57  ;;  %4659 = vmatprep.mubr.bf16.mxu0 %v5366_v29 }
  0xa7   : > { %4688 = vmatpush3.bf16.msra.mxu1 %v4976_v0  ;;  %4736 = vmatpush3.bf16.msra.mxu0 %v4977_v13 }
  0xa8   : > { %4689 = vmatprep.subr.bf16.mxu1 %v4979_v50  ;;  %4737 = vmatprep.subr.bf16.mxu0 %v4980_v43 }
  0xab   : > { %4690 = vmatpush3.bf16.msra.mxu1 %v4979_v50  ;;  %4738 = vmatpush3.bf16.msra.mxu0 %v4980_v43 }
  0xac   : > { %4771 = vmatprep.subr.bf16.mxu1 %v4981_v16  ;;  %4819 = vmatprep.subr.bf16.mxu0 %v4982_v5 }
  0xad   : > { %4612 = vmatmul.mubr.bf16.gmra.mxu1 %v5301_v41  ;;  %4660 = vmatmul.mubr.bf16.gmra.mxu0 %v5414_v25 }
  0xae   : > { %4615 = vmatprep.mubr.bf16.mxu1 %v5334_v59  ;;  %4663 = vmatprep.mubr.bf16.mxu0 %v5479_v60 }
  0xb5   : > { %4616 = vmatmul.mubr.bf16.gmra.mxu1 %v5362_v26  ;;  %4664 = vmatmul.mubr.bf16.gmra.mxu0 %v5489_v38 }
  0xb6   : > { %4619 = vmatprep.mubr.bf16.mxu1 %v5409_v54  ;;  %4667 = vmatprep.mubr.bf16.mxu0 %v5525_v18 }
  0xbd   : > { %4620 = vmatmul.mubr.bf16.gmra.mxu1 %v5445_v19  ;;  %4668 = vmatmul.mubr.bf16.gmra.mxu0 %v5559_v2 }
  0xbe   : > { %4623 = vmatprep.mubr.bf16.mxu1 %v5497_v39  ;;  %4671 = vmatprep.mubr.bf16.mxu0 %v5589_v1 }
  0xc5   : > { %4624 = vmatmul.mubr.bf16.gmra.mxu1 %v5829_v10  ;;  %4672 = vmatmul.mubr.bf16.gmra.mxu0 %v5941_v24 }
  0xc6   : > { %4691 = vmatprep.mubr.bf16.mxu1 %v5636_v23  ;;  %4739 = vmatprep.mubr.bf16.mxu0 %v5287_v34  ;;  %v4985_v34 = vld [vmem:[%s6946_s1 + $0x1e8] sm:$0xff]  }
  0xc7   : > { %v4986_v23 = vld [vmem:[%s6946_s1 + $0x228] sm:$0xff]  }
  0xcd   : > { %4692 = vmatmul.mubr.bf16.vlgmr.msra.gmra.mxu1 %v5648_v4  ;;  %4740 = vmatmul.mubr.bf16.vlgmr.msra.gmra.mxu0 %v5328_v55  ;;  %v4987_v55 = vld [vmem:[%s6946_s1 + $0x1e0] sm:$0xff]  }
  0xce   : > { %4772 = vmatpush3.bf16.msra.mxu1 %v4981_v16  ;;  %4820 = vmatpush3.bf16.msra.mxu0 %v4982_v5 }
  0xcf   : > { %4695 = vmatprep.mubr.bf16.mxu1 %v5678_v42  ;;  %4743 = vmatprep.mubr.bf16.mxu0 %v5353_v20  ;;  %v4988_v20 = vld [vmem:[%s6946_s1 + $0x220] sm:$0xff]  }
  0xd0   : > { %4773 = vmatprep.subr.bf16.mxu1 %v4983_v32  ;;  %4821 = vmatprep.subr.bf16.mxu0 %v4984_v53 }
  0xd2   : > { %4774 = vmatpush3.bf16.msra.mxu1 %v4983_v32  ;;  %4822 = vmatpush3.bf16.msra.mxu0 %v4984_v53 }
  0xd3   : > { %4775 = vmatprep.subr.bf16.mxu1 %v4985_v34  ;;  %4823 = vmatprep.subr.bf16.mxu0 %v4986_v23 }
  0xd5   : > { %4696 = vmatmul.mubr.bf16.gmra.mxu1 %v5708_v21  ;;  %4744 = vmatmul.mubr.bf16.gmra.mxu0 %v5386_v52  ;;  %v4992_v52 = vld [vmem:[%s6946_s1 + $0x210] sm:$0xff]  }
  0xd6   : > { %4699 = vmatprep.mubr.bf16.mxu1 %v5746_v35  ;;  %4747 = vmatprep.mubr.bf16.mxu0 %v5430_v40  ;;  %v4991_v40 = vld [vmem:[%s6946_s1 + $0x1d0] sm:$0xff]  }
  0xd7   : > { %4776 = vmatpush3.bf16.msra.mxu1 %v4985_v34  ;;  %4824 = vmatpush3.bf16.msra.mxu0 %v4986_v23 }
  0xd8   : > { %4777 = vmatprep.subr.bf16.mxu1 %v4987_v55  ;;  %4825 = vmatprep.subr.bf16.mxu0 %v4988_v20 }
  0xdb   : > { %4778 = vmatpush3.bf16.msra.mxu1 %v4987_v55  ;;  %4826 = vmatpush3.bf16.msra.mxu0 %v4988_v20 }
  0xdc   : > { %4779 = vmatprep.subr.bf16.mxu1 %v4989_v36  ;;  %4827 = vmatprep.subr.bf16.mxu0 %v4990_v15 }
  0xdd   : > { %4700 = vmatmul.mubr.bf16.gmra.mxu1 %v5748_v14  ;;  %4748 = vmatmul.mubr.bf16.gmra.mxu0 %v5494_v49  ;;  %v4996_v49 = vld [vmem:[%s6946_s1 + $0x1c0] sm:$0xff]  }
  0xde   : > { %4703 = vmatprep.mubr.bf16.mxu1 %v5768_v9  ;;  %4751 = vmatprep.mubr.bf16.mxu0 %v5771_v17  ;;  %v4997_v17 = vld [vmem:[%s6946_s1 + $0x200] sm:$0xff]  }
  0xdf   : > { %4780 = vmatpush3.bf16.msra.mxu1 %v4989_v36  ;;  %4828 = vmatpush3.bf16.msra.mxu0 %v4990_v15 }
  0xe0   : > { %4781 = vmatprep.subr.bf16.mxu1 %v4991_v40  ;;  %4829 = vmatprep.subr.bf16.mxu0 %v4992_v52 }
  0xe3   : > { %4782 = vmatpush3.bf16.msra.mxu1 %v4991_v40  ;;  %4830 = vmatpush3.bf16.msra.mxu0 %v4992_v52 }
  0xe4   : > { %4783 = vmatprep.subr.bf16.mxu1 %v4993_v6  ;;  %4831 = vmatprep.subr.bf16.mxu0 %v4994_v46 }
  0xe5   : > { %4704 = vmatmul.mubr.bf16.gmra.mxu1 %v5644_v27  ;;  %4752 = vmatmul.mubr.bf16.gmra.mxu0 %v5798_v57 }
  0xe6   : > { %4707 = vmatprep.mubr.bf16.mxu1 %v5652_v44  ;;  %4755 = vmatprep.mubr.bf16.mxu0 %v5301_v41 }
  0xe7   : > { %4784 = vmatpush3.bf16.msra.mxu1 %v4993_v6  ;;  %4832 = vmatpush3.bf16.msra.mxu0 %v4994_v46 }
  0xe8   : > { %4785 = vmatprep.subr.bf16.mxu1 %v4996_v49  ;;  %4833 = vmatprep.subr.bf16.mxu0 %v4997_v17 }
  0xeb   : > { %4786 = vmatpush3.bf16.msra.mxu1 %v4996_v49  ;;  %4834 = vmatpush3.bf16.msra.mxu0 %v4997_v17 }
  0xed   : > { %v4453_v45 = vpop.f32.mrf.mxu0  ;;  %v6005_v0 = vpop.f32.mrf.mxu1  ;;  %4708 = vmatmul.mubr.bf16.gmra.mxu1 %v5800_v22  ;;  %4756 = vmatmul.mubr.bf16.gmra.mxu0 %v5334_v59 }
  0xee   : > { %4711 = vmatprep.mubr.bf16.mxu1 %v5682_v62  ;;  %4759 = vmatprep.mubr.bf16.mxu0 %v5362_v26 }
  0xef   : > { %v697_v57 = vpop.f32.mrf.mxu0  ;;  %v6011_v13 = vpop.f32.mrf.mxu1 }
  0xf1   : > { %v4454_v41 = vpop.f32.mrf.mxu0  ;;  %v6013_v50 = vpop.f32.mrf.mxu1 }
  0xf3   : > { %v700_v43 = vpop.f32.mrf.mxu0  ;;  %v6015_v16 = vpop.f32.mrf.mxu1 }
  0xf5   : > { %v4457_v5 = vpop.f32.mrf.mxu0  ;;  %v6017_v7 = vpop.f32.mrf.mxu1  ;;  %4712 = vmatmul.mubr.bf16.gmra.mxu1 %v5814_v33  ;;  %4760 = vmatmul.mubr.bf16.gmra.mxu0 %v5409_v54  ;;  %v6042_v54 = vld [vmem:[%s5229_s28 + $0xcc] sm:$0xff]  }
  0xf6   : > { %4715 = vmatprep.mubr.bf16.mxu1 %v5715_v8  ;;  %4763 = vmatprep.mubr.bf16.mxu0 %v5445_v19 }
  0xf7   : > { %v713_v59 = vpop.f32.mrf.mxu0  ;;  %v6023_v26 = vpop.f32.mrf.mxu1 }
  0xf9   : > { %v6025_v12 = vpop.f32.mrf.mxu0  ;;  %v6027_v28 = vpop.f32.mrf.mxu1 }
  0xfb   : > { %v6029_v51 = vpop.f32.mrf.mxu0  ;;  %v6031_v61 = vpop.f32.mrf.mxu1 }
  0xfd   : > { %v6033_v32 = vpop.f32.mrf.mxu0  ;;  %v6035_v53 = vpop.f32.mrf.mxu1  ;;  %4716 = vmatmul.mubr.bf16.gmra.mxu1 %v5831_v48  ;;  %4764 = vmatmul.mubr.bf16.gmra.mxu0 %v5497_v39 }
  0xfe   : > { %7040 = vst [vmem:[#allocation4_spill] sm:$0xff] %v6035_v53  ;;  %4719 = vmatprep.mubr.bf16.mxu1 %v5727_v56  ;;  %4767 = vmatprep.mubr.bf16.mxu0 %v5829_v10 }
  0xff   : > { %v6044_v19 = vpop.f32.mrf.mxu0  ;;  %v6046_v34 = vpop.f32.mrf.mxu1 }
 0x100   : > { %7041 = vst [vmem:[#allocation5_spill] sm:$0xff] %v6046_v34 }
 0x101   : > { %v6048_v23 = vpop.f32.mrf.mxu0  ;;  %v6050_v55 = vpop.f32.mrf.mxu1 }
 0x102   : > { %7042 = vst [vmem:[#allocation6_spill] sm:$0xff] %v6050_v55 }
 0x103   : > { %v6052_v20 = vpop.f32.mrf.mxu0  ;;  %v6054_v36 = vpop.f32.mrf.mxu1 }
 0x104   : > { %7043 = vst [vmem:[#allocation7_spill] sm:$0xff] %v6054_v36 }
 0x105   : > { %v6056_v15 = vpop.f32.mrf.mxu0  ;;  %v6058_v39 = vpop.f32.mrf.mxu1  ;;  %4720 = vmatmul.mubr.bf16.gmra.mxu1 %v5851_v58  ;;  %4768 = vmatmul.mubr.bf16.gmra.mxu0 %v6042_v54 }
 0x106   : > { %7044 = vst [vmem:[#allocation8_spill] sm:$0xff] %v6058_v39  ;;  %4787 = vmatprep.mubr.bf16.mxu1 %v5368_v30  ;;  %4835 = vmatprep.mubr.bf16.mxu0 %v5648_v4 }
 0x107   : > { %v6064_v10 = vpop.f32.mrf.mxu0  ;;  %v6066_v40 = vpop.f32.mrf.mxu1 }
 0x108   : > { %7045 = vst [vmem:[#allocation9_spill] sm:$0xff] %v6066_v40 }
 0x109   : > { %v6068_v52 = vpop.f32.mrf.mxu0  ;;  %v6070_v6 = vpop.f32.mrf.mxu1 }
 0x10a   : > { %7046 = vst [vmem:[#allocation10_spill] sm:$0xff] %v6070_v6 }
 0x10b   : > { %v6072_v46 = vpop.f32.mrf.mxu0  ;;  %v6074_v49 = vpop.f32.mrf.mxu1 }
 0x10c   : > { %7047 = vst [vmem:[#allocation11_spill] sm:$0xff] %v6074_v49 }
 0x10d   : > { %v4501_v17 = vpop.f32.mrf.mxu1  ;;  %v4549_v39 = vpop.f32.mrf.mxu0  ;;  %4788 = vmatmul.mubr.bf16.vlgmr.msra.gmra.mxu1 %v5477_v47  ;;  %4836 = vmatmul.mubr.bf16.vlgmr.msra.gmra.mxu0 %v5678_v42 }
 0x10e   : > { %v915_v30 = vadd.f32 %v4501_v17, %v4453_v45  ;;  %4791 = vmatprep.mubr.bf16.mxu1 %v5487_v11  ;;  %4839 = vmatprep.mubr.bf16.mxu0 %v5708_v21 }
 0x10f   : > { %v906_v4 = vpop.f32.mrf.mxu1  ;;  %v1261_v40 = vpop.f32.mrf.mxu0 }
 0x110   : > { %v6080_v36 = vadd.f32 %v4549_v39, %v915_v30  ;;  %v907_v6 = vadd.f32 %v906_v4, %v697_v57 }
 0x111   : > { %v4502_v55 = vpop.f32.mrf.mxu1  ;;  %v4550_v34 = vpop.f32.mrf.mxu0 }
 0x112   : > { %v6082_v58 = vadd.f32 %v1261_v40, %v907_v6  ;;  %v918_v49 = vadd.f32 %v4502_v55, %v4454_v41 }
 0x113   : > { %v909_v24 = vpop.f32.mrf.mxu1  ;;  %v1264_v53 = vpop.f32.mrf.mxu0 }
 0x114   : > { %v6084_v47 = vadd.f32 %v4550_v34, %v918_v49  ;;  %v910_v42 = vadd.f32 %v909_v24, %v700_v43 }
 0x115   : > { %v4505_v45 = vpop.f32.mrf.mxu1  ;;  %v4553_v17 = vpop.f32.mrf.mxu0  ;;  %4792 = vmatmul.mubr.bf16.gmra.mxu1 %v5523_v37  ;;  %4840 = vmatmul.mubr.bf16.gmra.mxu0 %v5746_v35 }
 0x116   : > { %v6088_v11 = vadd.f32 %v1264_v53, %v910_v42  ;;  %v931_v21 = vadd.f32 %v4505_v45, %v4457_v5  ;;  %4795 = vmatprep.mubr.bf16.mxu1 %v5557_v3  ;;  %4843 = vmatprep.mubr.bf16.mxu0 %v5748_v14 }
 0x117   : > { %v922_v57 = vpop.f32.mrf.mxu1  ;;  %v1277_v41 = vpop.f32.mrf.mxu0 }
 0x118   : > { %v6092_v55 = vadd.f32 %v4553_v17, %v931_v21  ;;  %v923_v34 = vadd.f32 %v922_v57, %v713_v59 }
 0x119   : > { %v4506_v39 = vpop.f32.mrf.mxu1  ;;  %v4554_v24 = vpop.f32.mrf.mxu0 }
 0x11a   : > { %v6094_v43 = vadd.f32 %v1277_v41, %v923_v34  ;;  %v934_v37 = vadd.f32 %v4506_v39, %v6025_v12 }
 0x11b   : > { %v925_v40 = vpop.f32.mrf.mxu1  ;;  %v1280_v35 = vpop.f32.mrf.mxu0 }
 0x11c   : > { %v6097_v53 = vadd.f32 %v4554_v24, %v934_v37  ;;  %v926_v5 = vadd.f32 %v925_v40, %v6029_v51 }
 0x11d   : > { %v4509_v3 = vpop.f32.mrf.mxu1  ;;  %v4557_v6 = vpop.f32.mrf.mxu0  ;;  %4796 = vmatmul.mubr.bf16.gmra.mxu1 %v5587_v63  ;;  %4844 = vmatmul.mubr.bf16.gmra.mxu0 %v5768_v9 }
 0x11e   : > { %v6102_v14 = vadd.f32 %v1280_v35, %v926_v5  ;;  %v947_v59 = vadd.f32 %v4509_v3, %v6033_v32  ;;  %4799 = vmatprep.mubr.bf16.mxu1 %v5280_v31  ;;  %4847 = vmatprep.mubr.bf16.mxu0 %v5644_v27 }
 0x11f   : > { %v938_v12 = vpop.f32.mrf.mxu1  ;;  %v1293_v49 = vpop.f32.mrf.mxu0 }
 0x120   : > { %v6107_v30 = vadd.f32 %v4557_v6, %v947_v59  ;;  %v939_v51 = vadd.f32 %v938_v12, %v6044_v19 }
 0x121   : > { %v4510_v4 = vpop.f32.mrf.mxu1  ;;  %v4558_v42 = vpop.f32.mrf.mxu0 }
 0x122   : > { %v6110_v45 = vadd.f32 %v1293_v49, %v939_v51  ;;  %v950_v63 = vadd.f32 %v4510_v4, %v6048_v23 }
 0x123   : > { %v941_v9 = vpop.f32.mrf.mxu1  ;;  %v1296_v17 = vpop.f32.mrf.mxu0 }
 0x124   : > { %v6113_v21 = vadd.f32 %v4558_v42, %v950_v63  ;;  %v942_v31 = vadd.f32 %v941_v9, %v6052_v20  ;;  %v387_v42 = vunpack.c.h.bf16 %v6042_v54 }
 0x125   : > { %v4513_v32 = vpop.f32.mrf.mxu1  ;;  %v4561_v27 = vpop.f32.mrf.mxu0  ;;  %4800 = vmatmul.mubr.bf16.gmra.mxu1 %v5366_v29  ;;  %4848 = vmatmul.mubr.bf16.gmra.mxu0 %v5652_v44 }
 0x126   : > { %v6118_v57 = vadd.f32 %v1296_v17, %v942_v31  ;;  %v963_v19 = vadd.f32 %v4513_v32, %v6056_v15  ;;  %4803 = vmatprep.mubr.bf16.mxu1 %v5414_v25  ;;  %4851 = vmatprep.mubr.bf16.mxu0 %v5800_v22 }
 0x127   : > { %v954_v23 = vpop.f32.mrf.mxu1  ;;  %v1309_v41 = vpop.f32.mrf.mxu0 }
 0x128   : > { %v6123_v34 = vadd.f32 %v4561_v27, %v963_v19  ;;  %v955_v20 = vadd.f32 %v954_v23, %v6064_v10  ;;  %v2477_v19 = vrot.slane %v387_v42, 1  ;;  %v2743_v23 = vrot.slane %v387_v42, 2  ;;  %v7052_v42 = vld [vmem:[#allocation6_spill] sm:$0xff] }
 0x129   : > { %v4514_v39 = vpop.f32.mrf.mxu1  ;;  %v4562_v24 = vpop.f32.mrf.mxu0 }
 0x12a   : > { %v6126_v37 = vadd.f32 %v1309_v41, %v955_v20  ;;  %v966_v29 = vadd.f32 %v4514_v39, %v6068_v52 }
 0x12b   : > { %v957_v44 = vpop.f32.mrf.mxu1  ;;  %v1312_v40 = vpop.f32.mrf.mxu0 }
 0x12c   : > { %v6129_v35 = vadd.f32 %v4562_v24, %v966_v29  ;;  %v958_v25 = vadd.f32 %v957_v44, %v6072_v46 }
 0x12d   : > { %v4517_v15 = vpop.f32.mrf.mxu1  ;;  %v4565_v22 = vpop.f32.mrf.mxu0  ;;  %4804 = vmatmul.mubr.bf16.gmra.mxu1 %v5479_v60  ;;  %4852 = vmatmul.mubr.bf16.gmra.mxu0 %v5682_v62  ;;  %v334_v62 = vld [vmem:[%s5229_s28 + $0xd4] sm:$0xf]  ;;  %s4011_s28 = sshll.u32 %s7095_s15, 7 }
 0x12e   : > { %v6134_v10 = vadd.f32 %v1312_v40, %v958_v25  ;;  %v979_v5 = vadd.f32 %v4517_v15, %v6005_v0  ;;  %4807 = vmatprep.mubr.bf16.mxu1 %v5489_v38  ;;  %4855 = vmatprep.mubr.bf16.mxu0 %v5814_v33  ;;  %v386_v0 = vunpack.c.l.bf16 %v6042_v54  ;;  %s6410_s21 = scalar_lea.vmem %s6948_s3, %s4011_s28  ;;  %s6639_s26 = scalar_lea.vmem %s6949_s4, %s4011_s28 }
 0x12f   : > { %v970_v52 = vpop.f32.mrf.mxu1  ;;  %v1325_v3 = vpop.f32.mrf.mxu0 }
 0x130   : > { %v6139_v6 = vadd.f32 %v4565_v22, %v979_v5  ;;  %v971_v46 = vadd.f32 %v970_v52, %v6011_v13  ;;  %v388_v13 = vunpack.c.l.bf16 %v334_v62  ;;  %v7048_v5 = vld [vmem:[#allocation4_spill] sm:$0xff] }
 0x131   : > { %v4518_v59 = vpop.f32.mrf.mxu1  ;;  %v4566_v12 = vpop.f32.mrf.mxu0 }
 0x132   : > { %v6142_v49 = vadd.f32 %v1325_v3, %v971_v46  ;;  %v982_v60 = vadd.f32 %v4518_v59, %v6013_v50  ;;  %v2479_v20 = vrot.slane %v388_v13, 1  ;;  %v7049_v3 = vld [vmem:[#allocation3_spill] sm:$0xff]  ;;  %v7050_v46 = vld [vmem:[#allocation2_spill] sm:$0xff] }
 0x133   : > { %v973_v51 = vpop.f32.mrf.mxu1  ;;  %v1328_v4 = vpop.f32.mrf.mxu0 }
 0x134   : > { %v6147_v38 = vadd.f32 %v4566_v12, %v982_v60  ;;  %v974_v33 = vadd.f32 %v973_v51, %v6015_v16  ;;  %v2476_v16 = vrot.slane %v386_v0, 1  ;;  %v2480_v15 = vsel %vm469_vm0, %v2477_v19, %v2479_v20 }
 0x135   : > { %v4521_v63 = vpop.f32.mrf.mxu1  ;;  %v4569_v9 = vpop.f32.mrf.mxu0  ;;  %4808 = vmatmul.mubr.bf16.gmra.mxu1 %v5525_v18  ;;  %4856 = vmatmul.mubr.bf16.gmra.mxu0 %v5715_v8  ;;  %v2742_v18 = vrot.slane %v386_v0, 2 }
 0x136   : > { %v6153_v17 = vadd.f32 %v1328_v4, %v974_v33  ;;  %v995_v50 = vadd.f32 %v4521_v63, %v6017_v7  ;;  %4811 = vmatprep.mubr.bf16.mxu1 %v5559_v2  ;;  %4859 = vmatprep.mubr.bf16.mxu0 %v5831_v48  ;;  %v2745_v2 = vrot.slane %v388_v13, 2 }
 0x137   : > { %v986_v31 = vpop.f32.mrf.mxu1  ;;  %v1341_v32 = vpop.f32.mrf.mxu0  ;;  %v2744_v22 = vsel %vm1033_vm1, %v2742_v18, %v2743_v23  ;;  %v7054_v18 = vld [vmem:[#allocation8_spill] sm:$0xff] }
 0x138   : > { %v6158_v27 = vadd.f32 %v4569_v9, %v995_v50  ;;  %v987_v54 = vadd.f32 %v986_v31, %v6023_v26  ;;  %v2478_v26 = vsel %vm469_vm0, %v2476_v16, %v2477_v19  ;;  %v7053_v31 = vld [vmem:[#allocation7_spill] sm:$0xff] }
 0x139   : > { %v4522_v8 = vpop.f32.mrf.mxu1  ;;  %v4570_v41 = vpop.f32.mrf.mxu0  ;;  %v2483_v4 = vpack.c.bf16 %v2480_v15, %v2478_v26 }
 0x13a   : > { %v6161_v39 = vadd.f32 %v1341_v32, %v987_v54  ;;  %v998_v7 = vadd.f32 %v4522_v8, %v6027_v28 }
 0x13b   : > { %v989_v24 = vpop.f32.mrf.mxu1  ;;  %v1344_v48 = vpop.f32.mrf.mxu0 }
 0x13c   : > { %v6164_v29 = vadd.f32 %v4570_v41, %v998_v7  ;;  %v990_v44 = vadd.f32 %v989_v24, %v6031_v61  ;;  %v2746_v61 = vsel %vm1033_vm1, %v2743_v23, %v2745_v2  ;;  %v7055_v7 = vld [vmem:[#allocation9_spill] sm:$0xff] }
 0x13d   : > { %v4525_v40 = vpop.f32.mrf.mxu1  ;;  %v4573_v25 = vpop.f32.mrf.mxu0  ;;  %4812 = vmatmul.mubr.bf16.gmra.mxu1 %v5589_v1  ;;  %4860 = vmatmul.mubr.bf16.gmra.mxu0 %v5727_v56  ;;  %v7051_v56 = vld [vmem:[#allocation5_spill] sm:$0xff]  ;;  %v2749_v0 = vpack.c.bf16 %v2746_v61, %v2744_v22 }
 0x13e   : > { %v6172_v28 = vadd.f32 %v1344_v48, %v990_v44  ;;  %v1011_v52 = vadd.f32 %v4525_v40, %v7048_v5  ;;  %4815 = vmatprep.mubr.bf16.mxu1 %v7049_v3  ;;  %4863 = vmatprep.mubr.bf16.mxu0 %v7050_v46  ;;  %v7056_v40 = vld [vmem:[#allocation10_spill] sm:$0xff]  ;;  %v7057_v5 = vld [vmem:[#allocation11_spill] sm:$0xff] }
 0x13f   : > { %v1002_v59 = vpop.f32.mrf.mxu1  ;;  %v1357_v1 = vpop.f32.mrf.mxu0 }
 0x140   : > { %v6178_v12 = vadd.f32 %v4573_v25, %v1011_v52  ;;  %v1003_v60 = vadd.f32 %v1002_v59, %v7051_v56 }
 0x141   : > { %v4526_v62 = vpop.f32.mrf.mxu1  ;;  %v4574_v51 = vpop.f32.mrf.mxu0 }
 0x142   : > { %v6181_v33 = vadd.f32 %v1357_v1, %v1003_v60  ;;  %v1014_v63 = vadd.f32 %v4526_v62, %v7052_v42 }
 0x143   : > { %v1005_v9 = vpop.f32.mrf.mxu1  ;;  %v1360_v13 = vpop.f32.mrf.mxu0 }
 0x144   : > { %v6184_v50 = vadd.f32 %v4574_v51, %v1014_v63  ;;  %v1006_v32 = vadd.f32 %v1005_v9, %v7053_v31 }
 0x145   : > { %v4529_v16 = vpop.f32.mrf.mxu1  ;;  %v4577_v54 = vpop.f32.mrf.mxu0  ;;  %4816 = vmatmul.mubr.bf16.gmra.mxu1 %v2483_v4  ;;  %4864 = vmatmul.mubr.bf16.gmra.mxu0 %v2749_v0 }
 0x146   : > { %v6187_v19 = vadd.f32 %v1360_v13, %v1006_v32  ;;  %v1027_v23 = vadd.f32 %v4529_v16, %v7054_v18 }
 0x147   : > { %v1018_v8 = vpop.f32.mrf.mxu1  ;;  %v1373_v41 = vpop.f32.mrf.mxu0 }
 0x148   : > { %v6190_v20 = vadd.f32 %v4577_v54, %v1027_v23  ;;  %v1019_v2 = vadd.f32 %v1018_v8, %v7055_v7 }
 0x149   : > { %v4530_v24 = vpop.f32.mrf.mxu1  ;;  %v4578_v48 = vpop.f32.mrf.mxu0 }
 0x14a   : > { %v6193_v44 = vadd.f32 %v1373_v41, %v1019_v2  ;;  %v1030_v25 = vadd.f32 %v4530_v24, %v7056_v40 }
 0x14b   : > { %v1021_v26 = vpop.f32.mrf.mxu1  ;;  %v1376_v15 = vpop.f32.mrf.mxu0 }
 0x14c   : > { %v6196_v22 = vadd.f32 %v4578_v48, %v1030_v25  ;;  %v1022_v52 = vadd.f32 %v1021_v26, %v7057_v5 }
 0x14d   : > { %v4597_v3 = vpop.f32.mrf.mxu1  ;;  %v4645_v46 = vpop.f32.mrf.mxu0 }
 0x14e   : > { %v6199_v61 = vadd.f32 %v1376_v15, %v1022_v52  ;;  %v1649_v59 = vadd.f32 %v4597_v3, %v6080_v36 }
 0x14f   : > { %v1520_v1 = vpop.f32.mrf.mxu1  ;;  %v1789_v56 = vpop.f32.mrf.mxu0 }
 0x150   : > { %v6202_v60 = vadd.f32 %v4645_v46, %v1649_v59  ;;  %v1647_v62 = vadd.f32 %v1520_v1, %v6082_v58 }
 0x151   : > { %v4598_v51 = vpop.f32.mrf.mxu1  ;;  %v4646_v4 = vpop.f32.mrf.mxu0 }
 0x152   : > { %v6205_v0 = vadd.f32 %v1789_v56, %v1647_v62  ;;  %v1650_v42 = vadd.f32 %v4598_v51, %v6084_v47 }
 0x153   : > { %v1523_v63 = vpop.f32.mrf.mxu1  ;;  %v1792_v9 = vpop.f32.mrf.mxu0 }
 0x154   : > { %v6208_v13 = vadd.f32 %v4646_v4, %v1650_v42  ;;  %v1648_v31 = vadd.f32 %v1523_v63, %v6088_v11 }
 0x155   : > { %v4601_v32 = vpop.f32.mrf.mxu1  ;;  %v4649_v36 = vpop.f32.mrf.mxu0 }
 0x156   : > { %v6211_v16 = vadd.f32 %v1792_v9, %v1648_v31  ;;  %v1653_v54 = vadd.f32 %v4601_v32, %v6092_v55 }
 0x157   : > { %v1536_v18 = vpop.f32.mrf.mxu1  ;;  %v1805_v58 = vpop.f32.mrf.mxu0 }
 0x158   : > { %v6214_v23 = vadd.f32 %v4649_v36, %v1653_v54  ;;  %v1651_v8 = vadd.f32 %v1536_v18, %v6094_v43 }
 0x159   : > { %v4602_v41 = vpop.f32.mrf.mxu1  ;;  %v4650_v47 = vpop.f32.mrf.mxu0 }
 0x15a   : > { %v6217_v7 = vadd.f32 %v1805_v58, %v1651_v8  ;;  %v1654_v2 = vadd.f32 %v4602_v41, %v6097_v53 }
 0x15b   : > { %v1539_v24 = vpop.f32.mrf.mxu1  ;;  %v1808_v11 = vpop.f32.mrf.mxu0 }
 0x15c   : > { %v6220_v48 = vadd.f32 %v4650_v47, %v1654_v2  ;;  %v1652_v40 = vadd.f32 %v1539_v24, %v6102_v14 }
 0x15d   : > { %v4605_v25 = vpop.f32.mrf.mxu1  ;;  %v4653_v55 = vpop.f32.mrf.mxu0 }
 0x15e   : > { %v6223_v26 = vadd.f32 %v1808_v11, %v1652_v40  ;;  %v1657_v15 = vadd.f32 %v4605_v25, %v6107_v30 }
 0x15f   : > { %v1552_v5 = vpop.f32.mrf.mxu1  ;;  %v1821_v43 = vpop.f32.mrf.mxu0 }
 0x160   : > { %v6226_v52 = vadd.f32 %v4653_v55, %v1657_v15  ;;  %v1655_v3 = vadd.f32 %v1552_v5, %v6110_v45 }
 0x161   : > { %v4606_v46 = vpop.f32.mrf.mxu1  ;;  %v4654_v53 = vpop.f32.mrf.mxu0 }
 0x162   : > { %v6229_v59 = vadd.f32 %v1821_v43, %v1655_v3  ;;  %v1658_v1 = vadd.f32 %v4606_v46, %v6113_v21 }
 0x163   : > { %v1555_v56 = vpop.f32.mrf.mxu1  ;;  %v1824_v14 = vpop.f32.mrf.mxu0 }
 0x164   : > { %v6232_v62 = vadd.f32 %v4654_v53, %v1658_v1  ;;  %v1656_v51 = vadd.f32 %v1555_v56, %v6118_v57 }
 0x165   : > { %v4609_v4 = vpop.f32.mrf.mxu1  ;;  %v4657_v30 = vpop.f32.mrf.mxu0 }
 0x166   : > { %v6235_v42 = vadd.f32 %v1824_v14, %v1656_v51  ;;  %v1661_v63 = vadd.f32 %v4609_v4, %v6123_v34 }
 0x167   : > { %v1568_v9 = vpop.f32.mrf.mxu1  ;;  %v1837_v45 = vpop.f32.mrf.mxu0 }
 0x168   : > { %v6238_v31 = vadd.f32 %v4657_v30, %v1661_v63  ;;  %v1659_v32 = vadd.f32 %v1568_v9, %v6126_v37 }
 0x169   : > { %v4610_v36 = vpop.f32.mrf.mxu1  ;;  %v4658_v21 = vpop.f32.mrf.mxu0 }
 0x16a   : > { %v6241_v54 = vadd.f32 %v1837_v45, %v1659_v32  ;;  %v1662_v18 = vadd.f32 %v4610_v36, %v6129_v35 }
 0x16b   : > { %v1571_v58 = vpop.f32.mrf.mxu1  ;;  %v1840_v57 = vpop.f32.mrf.mxu0 }
 0x16c   : > { %v6244_v8 = vadd.f32 %v4658_v21, %v1662_v18  ;;  %v1660_v41 = vadd.f32 %v1571_v58, %v6134_v10 }
 0x16d   : > { %v4613_v47 = vpop.f32.mrf.mxu1  ;;  %v4661_v34 = vpop.f32.mrf.mxu0 }
 0x16e   : > { %v6247_v2 = vadd.f32 %v1840_v57, %v1660_v41  ;;  %v1665_v24 = vadd.f32 %v4613_v47, %v6139_v6 }
 0x16f   : > { %v1584_v11 = vpop.f32.mrf.mxu1  ;;  %v1853_v37 = vpop.f32.mrf.mxu0 }
 0x170   : > { %v6250_v40 = vadd.f32 %v4661_v34, %v1665_v24  ;;  %v1663_v25 = vadd.f32 %v1584_v11, %v6142_v49 }
 0x171   : > { %v4614_v55 = vpop.f32.mrf.mxu1  ;;  %v4662_v35 = vpop.f32.mrf.mxu0 }
 0x172   : > { %v6253_v15 = vadd.f32 %v1853_v37, %v1663_v25  ;;  %v1666_v5 = vadd.f32 %v4614_v55, %v6147_v38 }
 0x173   : > { %v1587_v43 = vpop.f32.mrf.mxu1  ;;  %v1856_v10 = vpop.f32.mrf.mxu0 }
 0x174   : > { %v6256_v3 = vadd.f32 %v4662_v35, %v1666_v5  ;;  %v1664_v46 = vadd.f32 %v1587_v43, %v6153_v17 }
 0x175   : > { %v4617_v53 = vpop.f32.mrf.mxu1  ;;  %v4665_v6 = vpop.f32.mrf.mxu0 }
 0x176   : > { %v6259_v1 = vadd.f32 %v1856_v10, %v1664_v46  ;;  %v1669_v56 = vadd.f32 %v4617_v53, %v6158_v27 }
 0x177   : > { %v1600_v14 = vpop.f32.mrf.mxu1  ;;  %v1869_v49 = vpop.f32.mrf.mxu0 }
 0x178   : > { %v6262_v51 = vadd.f32 %v4665_v6, %v1669_v56  ;;  %v1667_v4 = vadd.f32 %v1600_v14, %v6161_v39 }
 0x179   : > { %v4618_v30 = vpop.f32.mrf.mxu1  ;;  %v4666_v38 = vpop.f32.mrf.mxu0 }
 0x17a   : > { %v6265_v63 = vadd.f32 %v1869_v49, %v1667_v4  ;;  %v1670_v9 = vadd.f32 %v4618_v30, %v6164_v29 }
 0x17b   : > { %v1603_v45 = vpop.f32.mrf.mxu1  ;;  %v1872_v17 = vpop.f32.mrf.mxu0 }
 0x17c   : > { %v6268_v32 = vadd.f32 %v4666_v38, %v1670_v9  ;;  %v1668_v36 = vadd.f32 %v1603_v45, %v6172_v28 }
 0x17d   : > { %v4621_v21 = vpop.f32.mrf.mxu1  ;;  %v4669_v27 = vpop.f32.mrf.mxu0 }
 0x17e   : > { %v6271_v18 = vadd.f32 %v1872_v17, %v1668_v36  ;;  %v1673_v58 = vadd.f32 %v4621_v21, %v6178_v12 }
 0x17f   : > { %v1616_v57 = vpop.f32.mrf.mxu1  ;;  %v1885_v39 = vpop.f32.mrf.mxu0 }
 0x180   : > { %v6274_v41 = vadd.f32 %v4669_v27, %v1673_v58  ;;  %v1671_v47 = vadd.f32 %v1616_v57, %v6181_v33 }
 0x181   : > { %v4622_v34 = vpop.f32.mrf.mxu1  ;;  %v4670_v29 = vpop.f32.mrf.mxu0 }
 0x182   : > { %v6277_v24 = vadd.f32 %v1885_v39, %v1671_v47  ;;  %v1674_v11 = vadd.f32 %v4622_v34, %v6184_v50 }
 0x183   : > { %v1619_v37 = vpop.f32.mrf.mxu1  ;;  %v1888_v28 = vpop.f32.mrf.mxu0 }
 0x184   : > { %v6280_v25 = vadd.f32 %v4670_v29, %v1674_v11  ;;  %v1672_v55 = vadd.f32 %v1619_v37, %v6187_v19 }
 0x185   : > { %v4625_v35 = vpop.f32.mrf.mxu1  ;;  %v4673_v12 = vpop.f32.mrf.mxu0 }
 0x186   : > { %v6283_v5 = vadd.f32 %v1888_v28, %v1672_v55  ;;  %v1677_v43 = vadd.f32 %v4625_v35, %v6190_v20 }
 0x187   : > { %v1632_v10 = vpop.f32.mrf.mxu1  ;;  %v1901_v33 = vpop.f32.mrf.mxu0 }
 0x188   : > { %v6286_v46 = vadd.f32 %v4673_v12, %v1677_v43  ;;  %v1675_v53 = vadd.f32 %v1632_v10, %v6193_v44 }
 0x189   : > { %v4626_v6 = vpop.f32.mrf.mxu1  ;;  %v4674_v50 = vpop.f32.mrf.mxu0 }
 0x18a   : > { %v6289_v56 = vadd.f32 %v1901_v33, %v1675_v53  ;;  %v1678_v14 = vadd.f32 %v4626_v6, %v6196_v22 }
 0x18b   : > { %v1635_v49 = vpop.f32.mrf.mxu1  ;;  %v1904_v19 = vpop.f32.mrf.mxu0 }
 0x18c   : > { %v6292_v4 = vadd.f32 %v4674_v50, %v1678_v14  ;;  %v1676_v30 = vadd.f32 %v1635_v49, %v6199_v61 }
 0x18d   : > { %v4693_v38 = vpop.f32.mrf.mxu1  ;;  %v4741_v20 = vpop.f32.mrf.mxu0 }
 0x18e   : > { %v6295_v9 = vadd.f32 %v1904_v19, %v1676_v30  ;;  %v2184_v45 = vadd.f32 %v4693_v38, %v6202_v60 }
 0x18f   : > { %v2055_v17 = vpop.f32.mrf.mxu1  ;;  %v2314_v44 = vpop.f32.mrf.mxu0 }
 0x190   : > { %v6298_v36 = vadd.f32 %v4741_v20, %v2184_v45  ;;  %v2182_v21 = vadd.f32 %v2055_v17, %v6205_v0 }
 0x191   : > { %v6301_v27 = vpop.f32.mrf.mxu1  ;;  %v6303_v22 = vpop.f32.mrf.mxu0 }
 0x192   : > { %v6305_v58 = vadd.f32 %v2314_v44, %v2182_v21 }
 0x193   : > { %v6307_v57 = vpop.f32.mrf.mxu1  ;;  %v6309_v61 = vpop.f32.mrf.mxu0 }
 0x195   : > { %v4697_v39 = vpop.f32.mrf.mxu1  ;;  %v4745_v47 = vpop.f32.mrf.mxu0 }
 0x196   : > { %v2188_v60 = vadd.f32 %v4697_v39, %v6214_v23 }
 0x197   : > { %v2071_v34 = vpop.f32.mrf.mxu1  ;;  %v2330_v29 = vpop.f32.mrf.mxu0 }
 0x198   : > { %v6312_v11 = vadd.f32 %v4745_v47, %v2188_v60  ;;  %v2186_v0 = vadd.f32 %v2071_v34, %v6217_v7 }
 0x199   : > { %v6315_v37 = vpop.f32.mrf.mxu1  ;;  %v6317_v28 = vpop.f32.mrf.mxu0 }
 0x19a   : > { %v6319_v55 = vadd.f32 %v2330_v29, %v2186_v0 }
 0x19b   : > { %v6321_v35 = vpop.f32.mrf.mxu1  ;;  %v6323_v12 = vpop.f32.mrf.mxu0 }
 0x19d   : > { %v4701_v43 = vpop.f32.mrf.mxu1  ;;  %v4749_v10 = vpop.f32.mrf.mxu0 }
 0x19e   : > { %v2192_v23 = vadd.f32 %v4701_v43, %v6226_v52 }
 0x19f   : > { %v2087_v33 = vpop.f32.mrf.mxu1  ;;  %v2346_v53 = vpop.f32.mrf.mxu0 }
 0x1a0   : > { %v6326_v6 = vadd.f32 %v4749_v10, %v2192_v23  ;;  %v2190_v7 = vadd.f32 %v2087_v33, %v6229_v59 }
 0x1a1   : > { %v6329_v50 = vpop.f32.mrf.mxu1  ;;  %v6331_v14 = vpop.f32.mrf.mxu0 }
 0x1a2   : > { %v6333_v49 = vadd.f32 %v2346_v53, %v2190_v7 }
 0x1a3   : > { %v6335_v19 = vpop.f32.mrf.mxu1  ;;  %v6337_v30 = vpop.f32.mrf.mxu0 }
 0x1a5   : > { %v4705_v38 = vpop.f32.mrf.mxu1  ;;  %v4753_v20 = vpop.f32.mrf.mxu0 }
 0x1a6   : > { %v2196_v52 = vadd.f32 %v4705_v38, %v6238_v31 }
 0x1a7   : > { %v2103_v45 = vpop.f32.mrf.mxu1  ;;  %v2362_v17 = vpop.f32.mrf.mxu0 }
 0x1a8   : > { %v6340_v44 = vadd.f32 %v4753_v20, %v2196_v52  ;;  %v2194_v59 = vadd.f32 %v2103_v45, %v6241_v54 }
 0x1a9   : > { %v4706_v21 = vpop.f32.mrf.mxu1  ;;  %v4754_v39 = vpop.f32.mrf.mxu0 }
 0x1aa   : > { %v6343_v47 = vadd.f32 %v2362_v17, %v2194_v59  ;;  %v2197_v60 = vadd.f32 %v4706_v21, %v6244_v8 }
 0x1ab   : > { %v2106_v34 = vpop.f32.mrf.mxu1  ;;  %v2365_v29 = vpop.f32.mrf.mxu0 }
 0x1ac   : > { %v6346_v0 = vadd.f32 %v4754_v39, %v2197_v60  ;;  %v2195_v43 = vadd.f32 %v2106_v34, %v6247_v2 }
 0x1ad   : > { %v4709_v10 = vpop.f32.mrf.mxu1  ;;  %v4757_v31 = vpop.f32.mrf.mxu0 }
 0x1ae   : > { %v6349_v23 = vadd.f32 %v2365_v29, %v2195_v43  ;;  %v2200_v33 = vadd.f32 %v4709_v10, %v6250_v40 }
 0x1af   : > { %v2119_v53 = vpop.f32.mrf.mxu1  ;;  %v2378_v54 = vpop.f32.mrf.mxu0 }
 0x1b0   : > { %v6352_v7 = vadd.f32 %v4757_v31, %v2200_v33  ;;  %v2198_v38 = vadd.f32 %v2119_v53, %v6253_v15 }
 0x1b1   : > { %v4710_v20 = vpop.f32.mrf.mxu1  ;;  %v4758_v8 = vpop.f32.mrf.mxu0 }
 0x1b2   : > { %v6355_v52 = vadd.f32 %v2378_v54, %v2198_v38  ;;  %v2201_v45 = vadd.f32 %v4710_v20, %v6256_v3 }
 0x1b3   : > { %v2122_v17 = vpop.f32.mrf.mxu1  ;;  %v2381_v2 = vpop.f32.mrf.mxu0 }
 0x1b4   : > { %v6358_v59 = vadd.f32 %v4758_v8, %v2201_v45  ;;  %v2199_v21 = vadd.f32 %v2122_v17, %v6259_v1 }
 0x1b5   : > { %v4713_v39 = vpop.f32.mrf.mxu1  ;;  %v4761_v40 = vpop.f32.mrf.mxu0 }
 0x1b6   : > { %v6361_v60 = vadd.f32 %v2381_v2, %v2199_v21  ;;  %v2204_v34 = vadd.f32 %v4713_v39, %v6262_v51 }
 0x1b7   : > { %v2135_v29 = vpop.f32.mrf.mxu1  ;;  %v2394_v15 = vpop.f32.mrf.mxu0 }
 0x1b8   : > { %v6364_v43 = vadd.f32 %v4761_v40, %v2204_v34  ;;  %v2202_v10 = vadd.f32 %v2135_v29, %v6265_v63 }
 0x1b9   : > { %v4714_v31 = vpop.f32.mrf.mxu1  ;;  %v4762_v3 = vpop.f32.mrf.mxu0 }
 0x1ba   : > { %v6367_v33 = vadd.f32 %v2394_v15, %v2202_v10  ;;  %v2205_v53 = vadd.f32 %v4714_v31, %v6268_v32 }
 0x1bb   : > { %v2138_v54 = vpop.f32.mrf.mxu1  ;;  %v2397_v1 = vpop.f32.mrf.mxu0 }
 0x1bc   : > { %v6370_v38 = vadd.f32 %v4762_v3, %v2205_v53  ;;  %v2203_v20 = vadd.f32 %v2138_v54, %v6271_v18 }
 0x1bd   : > { %v4717_v8 = vpop.f32.mrf.mxu1  ;;  %v4765_v51 = vpop.f32.mrf.mxu0 }
 0x1be   : > { %v6373_v45 = vadd.f32 %v2397_v1, %v2203_v20  ;;  %v2208_v17 = vadd.f32 %v4717_v8, %v6274_v41 }
 0x1bf   : > { %v2151_v2 = vpop.f32.mrf.mxu1  ;;  %v2410_v63 = vpop.f32.mrf.mxu0 }
 0x1c0   : > { %v6376_v21 = vadd.f32 %v4765_v51, %v2208_v17  ;;  %v2206_v39 = vadd.f32 %v2151_v2, %v6277_v24 }
 0x1c1   : > { %v4718_v40 = vpop.f32.mrf.mxu1  ;;  %v4766_v32 = vpop.f32.mrf.mxu0 }
 0x1c2   : > { %v6379_v34 = vadd.f32 %v2410_v63, %v2206_v39  ;;  %v2209_v29 = vadd.f32 %v4718_v40, %v6280_v25  ;;  %v2185_v39 = vadd.f32 %v6301_v27, %v6208_v13  ;;  %v6415_v13 = vld [vmem:[%s6947_s2] ss:$0 sm:$0xff] }
 0x1c3   : > { %v2154_v15 = vpop.f32.mrf.mxu1  ;;  %v2413_v18 = vpop.f32.mrf.mxu0 }
 0x1c4   : > { %7058 = vst [vmem:[#allocation4_spill] sm:$0xff] %v6379_v34  ;;  %v6382_v10 = vadd.f32 %v4766_v32, %v2209_v29  ;;  %v2207_v31 = vadd.f32 %v2154_v15, %v6283_v5 }
 0x1c5   : > { %v4721_v3 = vpop.f32.mrf.mxu1  ;;  %v4769_v41 = vpop.f32.mrf.mxu0 }
 0x1c6   : > { %7059 = vst [vmem:[#allocation3_spill] sm:$0xff] %v6382_v10  ;;  %v6385_v53 = vadd.f32 %v2413_v18, %v2207_v31  ;;  %v2212_v54 = vadd.f32 %v4721_v3, %v6286_v46  ;;  %v2183_v18 = vadd.f32 %v6307_v57, %v6211_v16 }
 0x1c7   : > { %v2167_v24 = vpop.f32.mrf.mxu1  ;;  %v2426_v1 = vpop.f32.mrf.mxu0 }
 0x1c8   : > { %7060 = vst [vmem:[#allocation2_spill] sm:$0xff] %v6385_v53  ;;  %v6388_v20 = vadd.f32 %v4769_v41, %v2212_v54  ;;  %v2210_v8 = vadd.f32 %v2167_v24, %v6289_v56  ;;  %v6423_v41 = vld [vmem:[%s6410_s21 + $0x8] sm:$0xff]   ;;  %v6426_v24 = vld [vmem:[%s6410_s21] sm:$0xff]  }
 0x1c9   : > { %v4722_v25 = vpop.f32.mrf.mxu1  ;;  %v4770_v51 = vpop.f32.mrf.mxu0 }
 0x1ca   : > { %7061 = vst [vmem:[#allocation5_spill] sm:$0xff] %v6388_v20  ;;  %v6391_v17 = vadd.f32 %v2426_v1, %v2210_v8  ;;  %v2213_v5 = vadd.f32 %v4722_v25, %v6292_v4  ;;  %v2442_v8 = vadd.f32 %v6309_v61, %v2183_v18  ;;  %v6529_v61 = vld [vmem:[%s6410_s21 + $0x30] sm:$0xff]  }
 0x1cb   : > { %v2170_v2 = vpop.f32.mrf.mxu1  ;;  %v2429_v63 = vpop.f32.mrf.mxu0  ;;  %7065 = vst [vmem:[#allocation9_spill] sm:$0xff] %v6529_v61 }
 0x1cc   : > { %7062 = vst [vmem:[#allocation6_spill] sm:$0xff] %v6391_v17  ;;  %v6396_v40 = vadd.f32 %v4770_v51, %v2213_v5  ;;  %v2211_v46 = vadd.f32 %v2170_v2, %v6295_v9 }
 0x1cd   : > { %v4789_v32 = vpop.f32.mrf.mxu1  ;;  %v4837_v29 = vpop.f32.mrf.mxu0 }
 0x1ce   : > { %7063 = vst [vmem:[#allocation7_spill] sm:$0xff] %v6396_v40  ;;  %v6400_v56 = vadd.f32 %v2429_v63, %v2211_v46  ;;  %v2712_v15 = vadd.f32 %v4789_v32, %v6298_v36  ;;  %v2444_v36 = vadd.f32 %v6303_v22, %v2185_v39  ;;  %v2189_v22 = vadd.f32 %v6315_v37, %v6220_v48  ;;  %v6436_v63 = vld [vmem:[%s6410_s21 + $0x18] sm:$0xff]  }
 0x1cf   : > { %v2583_v4 = vpop.f32.mrf.mxu1  ;;  %v2849_v9 = vpop.f32.mrf.mxu0  ;;  %v2187_v39 = vadd.f32 %v6321_v35, %v6223_v26 }
 0x1d0   : > { %7064 = vst [vmem:[#allocation8_spill] sm:$0xff] %v6400_v56  ;;  %v2978_v27 = vadd.f32 %v4837_v29, %v2712_v15  ;;  %v2710_v16 = vadd.f32 %v2583_v4, %v6305_v58 }
 0x1d1   : > { %v4790_v57 = vpop.f32.mrf.mxu1  ;;  %v4838_v31 = vpop.f32.mrf.mxu0 }
 0x1d2   : > { %v6420_v3 = vadd.f32 %v6415_v13, %v2978_v27  ;;  %v2976_v54 = vadd.f32 %v2849_v9, %v2710_v16  ;;  %v2713_v1 = vadd.f32 %v4790_v57, %v2444_v36  ;;  %v2448_v57 = vadd.f32 %v6317_v28, %v2189_v22 }
 0x1d3   : > { %v2586_v25 = vpop.f32.mrf.mxu1  ;;  %v2852_v51 = vpop.f32.mrf.mxu0  ;;  %v2193_v28 = vadd.f32 %v6329_v50, %v6232_v62 }
 0x1d4   : > { %v3049_v58 = vand.u32 2147483647, %v6420_v3  ;;  %v6433_v5 = vadd.f32 %v6415_v13, %v2976_v54  ;;  %v2979_v2 = vadd.f32 %v4838_v31, %v2713_v1  ;;  %v2711_v32 = vadd.f32 %v2586_v25, %v2442_v8 }
 0x1d5   : > { %v4793_v29 = vpop.f32.mrf.mxu1  ;;  %v4841_v15 = vpop.f32.mrf.mxu0  ;;  %v2446_v8 = vadd.f32 %v6323_v12, %v2187_v39  ;;  %vm3273_vm2 = vcmp.ge.f32.partialorder %v6420_v3, 0.0 }
 0x1d6   : > { %v3081_v18 = vsub.f32 0.0, %v3049_v58  ;;  %v3047_v48 = vand.u32 2147483647, %v6433_v5  ;;  %v6444_v37 = vadd.f32 %v6415_v13, %v2979_v2  ;;  %v2977_v9 = vadd.f32 %v2852_v51, %v2711_v32 }
 0x1d7   : > { %v2716_v26 = vadd.f32 %v4793_v29, %v6312_v11  ;;  %v2599_v27 = vpop.f32.mrf.mxu1  ;;  %v2865_v16 = vpop.f32.mrf.mxu0  ;;  %vm3271_vm3 = vcmp.ge.f32.partialorder %v6433_v5, 0.0 }
 0x1d8   : > { %v3115_v31 = vmul.f32 1.442695, %v3081_v18  ;;  %v3079_v54 = vsub.f32 0.0, %v3047_v48  ;;  %v3050_v1 = vand.u32 2147483647, %v6444_v37  ;;  %v6454_v25 = vadd.f32 %v6415_v13, %v2977_v9 }
 0x1d9   : > { %v2982_v51 = vadd.f32 %v4841_v15, %v2716_v26  ;;  %v2714_v58 = vadd.f32 %v2599_v27, %v6319_v55  ;;  %v4794_v11 = vpop.f32.mrf.mxu1  ;;  %v4842_v2 = vpop.f32.mrf.mxu0  ;;  %v6464_v55 = vld [vmem:[%s6410_s21 + $0x10] sm:$0xff]   ;;  %v2191_v27 = vadd.f32 %v6335_v19, %v6235_v42  ;;  %vm3274_vm4 = vcmp.ge.f32.partialorder %v6444_v37, 0.0 }
 0x1da   : > { %5016 = vpow2.f32 %v3115_v31  ;;  %v3111_v32 = vmul.f32 1.442695, %v3079_v54  ;;  %v3082_v29 = vsub.f32 0.0, %v3050_v1  ;;  %v2717_v35 = vadd.f32 %v4794_v11, %v2448_v57 }
 0x1db   : > { %v3048_v22 = vand.u32 2147483647, %v6454_v25  ;;  %v6461_v12 = vadd.f32 %v6415_v13, %v2982_v51  ;;  %v2980_v39 = vadd.f32 %v2865_v16, %v2714_v58  ;;  %v2602_v18 = vpop.f32.mrf.mxu1  ;;  %v2868_v15 = vpop.f32.mrf.mxu0  ;;  %vm3272_vm5 = vcmp.ge.f32.partialorder %v6454_v25, 0.0 }
 0x1dc   : > { %5018 = vpow2.f32 %v3111_v32  ;;  %v3117_v48 = vmul.f32 1.442695, %v3082_v29  ;;  %v2983_v9 = vadd.f32 %v4842_v2, %v2717_v35  ;;  %v2715_v26 = vadd.f32 %v2602_v18, %v2446_v8 }
 0x1dd   : > { %v3080_v57 = vsub.f32 0.0, %v3048_v22  ;;  %v3053_v62 = vand.u32 2147483647, %v6461_v12  ;;  %v6470_v50 = vadd.f32 %v6415_v13, %v2980_v39  ;;  %v4797_v31 = vpop.f32.mrf.mxu1  ;;  %v4845_v54 = vpop.f32.mrf.mxu0  ;;  %v2452_v2 = vadd.f32 %v6331_v14, %v2193_v28 }
 0x1de   : > { %5020 = vpow2.f32 %v3117_v48  ;;  %v6473_v16 = vadd.f32 %v6415_v13, %v2983_v9  ;;  %v2981_v1 = vadd.f32 %v2868_v15, %v2715_v26  ;;  %v2720_v51 = vadd.f32 %v4797_v31, %v6326_v6 }
 0x1df   : > { %v3113_v35 = vmul.f32 1.442695, %v3080_v57  ;;  %v3085_v8 = vsub.f32 0.0, %v3053_v62  ;;  %v3051_v58 = vand.u32 2147483647, %v6470_v50  ;;  %v2615_v19 = vpop.f32.mrf.mxu1  ;;  %v2881_v11 = vpop.f32.mrf.mxu0  ;;  %v2450_v9 = vadd.f32 %v6337_v30, %v2191_v27  ;;  %v6492_v30 = vld [vmem:[%s6410_s21 + $0x28] sm:$0xff]  }
 0x1e0   : > { %v3054_v32 = vand.u32 2147483647, %v6473_v16  ;;  %v6481_v29 = vadd.f32 %v6415_v13, %v2981_v1  ;;  %v2986_v22 = vadd.f32 %v4845_v54, %v2720_v51  ;;  %v2718_v6 = vadd.f32 %v2615_v19, %v6333_v49 }
 0x1e1   : > { %5022 = vpow2.f32 %v3113_v35  ;;  %v3123_v39 = vmul.f32 1.442695, %v3085_v8  ;;  %v3083_v18 = vsub.f32 0.0, %v3051_v58  ;;  %v4798_v15 = vpop.f32.mrf.mxu1  ;;  %v4846_v48 = vpop.f32.mrf.mxu0  ;;  %vm3277_vm6 = vcmp.ge.f32.partialorder %v6461_v12, 0.0 }
 0x1e2   : > { %v3086_v26 = vsub.f32 0.0, %v3054_v32  ;;  %v3052_v57 = vand.u32 2147483647, %v6481_v29  ;;  %v6487_v14 = vadd.f32 %v6415_v13, %v2986_v22  ;;  %v2984_v62 = vadd.f32 %v2881_v11, %v2718_v6 }
 0x1e3   : > { %5024 = vpow2.f32 %v3123_v39  ;;  %v3119_v28 = vmul.f32 1.442695, %v3083_v18  ;;  %v2721_v31 = vadd.f32 %v4798_v15, %v2452_v2  ;;  %v2618_v54 = vpop.f32.mrf.mxu1  ;;  %v2884_v1 = vpop.f32.mrf.mxu0  ;;  %v6498_v39 = vld [vmem:[%s6410_s21 + $0x20] sm:$0xff]   ;;  %vm3275_vm7 = vcmp.ge.f32.partialorder %v6470_v50, 0.0 }
 0x1e4   : > { %v3125_v51 = vmul.f32 1.442695, %v3086_v26  ;;  %v3084_v35 = vsub.f32 0.0, %v3052_v57  ;;  %v3057_v8 = vand.u32 2147483647, %v6487_v14  ;;  %v6495_v27 = vadd.f32 %v6415_v13, %v2984_v62 }
 0x1e5   : > { %5026 = vpow2.f32 %v3119_v28  ;;  %v2987_v58 = vadd.f32 %v4846_v48, %v2721_v31  ;;  %v2719_v19 = vadd.f32 %v2618_v54, %v2450_v9  ;;  %v4801_v32 = vpop.f32.mrf.mxu1  ;;  %v4849_v11 = vpop.f32.mrf.mxu0  ;;  %vm3278_vm8 = vcmp.ge.f32.partialorder %v6473_v16, 0.0 }
 0x1e6   : > { %5028 = vpow2.f32 %v3125_v51  ;;  %v3121_v2 = vmul.f32 1.442695, %v3084_v35  ;;  %v3089_v22 = vsub.f32 0.0, %v3057_v8  ;;  %v2724_v18 = vadd.f32 %v4801_v32, %v6340_v44 }
 0x1e7   : > { %v6501_v6 = vpop.eup %5016  ;;  %v3055_v26 = vand.u32 2147483647, %v6495_v27  ;;  %v6506_v57 = vadd.f32 %v6415_v13, %v2987_v58  ;;  %v2985_v48 = vadd.f32 %v2884_v1, %v2719_v19  ;;  %v2631_v9 = vpop.f32.mrf.mxu1  ;;  %v6518_v58 = vld [vmem:[%s6410_s21 + $0x38] sm:$0xff]   ;;  %vm3276_vm9 = vcmp.ge.f32.partialorder %v6481_v29, 0.0 }
 0x1e8   : > { %v2897_v28 = vpop.f32.mrf.mxu0  ;;  %v3177_v62 = vadd.f32 1.0, %v6501_v6  ;;  %5030 = vpow2.f32 %v3121_v2  ;;  %v3131_v31 = vmul.f32 1.442695, %v3089_v22  ;;  %v2990_v22 = vadd.f32 %v4849_v11, %v2724_v18 }
 0x1e9   : > { %v6510_v44 = vpop.eup %5018  ;;  %v3087_v51 = vsub.f32 0.0, %v3055_v26  ;;  %v3058_v8 = vand.u32 2147483647, %v6506_v57  ;;  %v6515_v32 = vadd.f32 %v6415_v13, %v2985_v48  ;;  %v4802_v1 = vpop.f32.mrf.mxu1  ;;  %vm3281_vm10 = vcmp.ge.f32.partialorder %v6487_v14, 0.0 }
 0x1ea   : > { %5032 = vrcp.f32 %v3177_v62  ;;  %v3175_v19 = vadd.f32 1.0, %v6510_v44  ;;  %v4850_v54 = vpop.f32.mrf.mxu0  ;;  %v6532_v2 = vadd.f32 %v6415_v13, %v2990_v22  ;;  %vm3279_vm11 = vcmp.ge.f32.partialorder %v6495_v27, 0.0 }
 0x1eb   : > { %v6522_v15 = vpop.eup %5020  ;;  %5034 = vpow2.f32 %v3131_v31  ;;  %v3127_v26 = vmul.f32 1.442695, %v3087_v51  ;;  %v3090_v35 = vsub.f32 0.0, %v3058_v8  ;;  %v3056_v42 = vand.u32 2147483647, %v6515_v32  ;;  %v2634_v48 = vpop.f32.mrf.mxu1 }
 0x1ec   : > { %5036 = vrcp.f32 %v3175_v19  ;;  %v3178_v49 = vadd.f32 1.0, %v6522_v15  ;;  %v2722_v8 = vadd.f32 %v2631_v9, %v6343_v47  ;;  %v2725_v19 = vadd.f32 %v4802_v1, %v6346_v0  ;;  %v2900_v4 = vpop.f32.mrf.mxu0 }
 0x1ed   : > { %5038 = vpow2.f32 %v3127_v26  ;;  %v3133_v11 = vmul.f32 1.442695, %v3090_v35  ;;  %v3088_v18 = vsub.f32 0.0, %v3056_v42  ;;  %v4805_v31 = vpop.f32.mrf.mxu1  ;;  %v2723_v36 = vadd.f32 %v2634_v48, %v6349_v23 }
 0x1ee   : > { %v6534_v51 = vpop.eup %5022  ;;  %5040 = vrcp.f32 %v3178_v49  ;;  %v3061_v22 = vand.u32 2147483647, %v6532_v2  ;;  %v2988_v46 = vadd.f32 %v2897_v28, %v2722_v8  ;;  %v2991_v56 = vadd.f32 %v4850_v54, %v2725_v19  ;;  %v4853_v54 = vpop.f32.mrf.mxu0 }
 0x1ef   : > { %v3176_v62 = vadd.f32 1.0, %v6534_v51  ;;  %5042 = vpow2.f32 %v3133_v11  ;;  %v3129_v26 = vmul.f32 1.442695, %v3088_v18  ;;  %v6545_v47 = vpop.f32.mrf.mxu1  ;;  %v2989_v23 = vadd.f32 %v2900_v4, %v2723_v36 }
 0x1f0   : > { %v6541_v35 = vpop.eup %5024  ;;  %v3093_v48 = vsub.f32 0.0, %v3061_v22  ;;  %v6552_v11 = vadd.f32 %v6415_v13, %v2988_v46  ;;  %v6555_v28 = vadd.f32 %v6415_v13, %v2991_v56  ;;  %v2728_v17 = vadd.f32 %v4805_v31, %v6352_v7 }
 0x1f1   : > { %5044 = vrcp.f32 %v3176_v62  ;;  %v3181_v0 = vadd.f32 1.0, %v6541_v35  ;;  %v6562_v36 = vadd.f32 %v6415_v13, %v2989_v23  ;;  %v6567_v56 = vpop.f32.mrf.mxu1  ;;  %v2913_v23 = vpop.f32.mrf.mxu0  ;;  %v3306_v7 = vsel %vm3274_vm4, 1.0, %v6522_v15 }
 0x1f2   : > { %v6549_v1 = vpop.eup %5026  ;;  %5046 = vpow2.f32 %v3129_v26  ;;  %v3139_v46 = vmul.f32 1.442695, %v3093_v48  ;;  %v3059_v8 = vand.u32 2147483647, %v6552_v11  ;;  %v3062_v26 = vand.u32 2147483647, %v6555_v28 }
 0x1f3   : > { %v6557_v18 = vpop.eup %5028  ;;  %5048 = vrcp.f32 %v3181_v0  ;;  %v3179_v4 = vadd.f32 1.0, %v6549_v1  ;;  %v3060_v42 = vand.u32 2147483647, %v6562_v36  ;;  %v2994_v31 = vadd.f32 %v4853_v54, %v2728_v17 }
 0x1f4   : > { %v3182_v62 = vadd.f32 1.0, %v6557_v18  ;;  %v3091_v0 = vsub.f32 0.0, %v3059_v8  ;;  %v3094_v9 = vsub.f32 0.0, %v3062_v26  ;;  %v3305_v8 = vsel %vm3273_vm2, 1.0, %v6501_v6 }
 0x1f5   : > { %v6569_v19 = vpop.eup %5030  ;;  %5050 = vrcp.f32 %v3179_v4  ;;  %v3092_v53 = vsub.f32 0.0, %v3060_v42  ;;  %v3307_v15 = vsel %vm3275_vm7, 1.0, %v6549_v1  ;;  %v7067_v1 = vunpack.c.h.bf16 %v6423_v41 }
 0x1f6   : > { %5052 = vrcp.f32 %v3182_v62  ;;  %v3180_v22 = vadd.f32 1.0, %v6569_v19  ;;  %v3135_v40 = vmul.f32 1.442695, %v3091_v0  ;;  %v6582_v62 = vpop.f32.mrf.mxu1  ;;  %v3141_v26 = vmul.f32 1.442695, %v3094_v9 }
 0x1f7   : > { %v5033_v48 = vpop.eup %5032  ;;  %5054 = vpow2.f32 %v3139_v46  ;;  %v3137_v42 = vmul.f32 1.442695, %v3092_v53  ;;  %vm3282_vm12 = vcmp.ge.f32.partialorder %v6506_v57, 0.0  ;;  %vm3280_vm13 = vcmp.ge.f32.partialorder %v6515_v32, 0.0 }
 0x1f8   : > { %v6578_v49 = vpop.eup %5034  ;;  %v3241_v4 = vmul.f32 %v5033_v48, %v6420_v3  ;;  %5056 = vrcp.f32 %v3180_v22  ;;  %v3303_v22 = vsel %vm3271_vm3, 1.0, %v6510_v44  ;;  %v4854_v3 = vpop.f32.mrf.mxu0  ;;  %v3304_v44 = vsel %vm3272_vm5, 1.0, %v6534_v51 }
 0x1f9   : > { %v5037_v20 = vpop.eup %5036  ;;  %v3185_v46 = vadd.f32 1.0, %v6578_v49  ;;  %5058 = vpow2.f32 %v3135_v40  ;;  %v6606_v17 = vpop.f32.mrf.mxu1  ;;  %v6614_v40 = vadd.f32 %v6415_v13, %v2994_v31  ;;  %v2726_v51 = vadd.f32 %v6545_v47, %v6355_v52 }
 0x1fa   : > { %v6589_v61 = vpop.eup %5038  ;;  %v3239_v0 = vmul.f32 %v5037_v20, %v6433_v5  ;;  %v3337_v10 = vmul.f32 %v3305_v8, %v3241_v4  ;;  %v3309_v20 = vsel %vm3277_vm6, 1.0, %v6541_v35  ;;  %v6621_v35 = vpop.f32.mrf.mxu0  ;;  %vm3285_vm14 = vcmp.ge.f32.partialorder %v6532_v2, 0.0 }
 0x1fb   : > { %v5041_v6 = vpop.eup %5040  ;;  %5060 = vrcp.f32 %v3185_v46  ;;  %v3183_v9 = vadd.f32 1.0, %v6589_v61  ;;  %v3065_v46 = vand.u32 2147483647, %v6614_v40  ;;  %v2992_v52 = vadd.f32 %v2913_v23, %v2726_v51  ;;  %v6632_v47 = vpop.f32.mrf.mxu1 }
 0x1fc   : > { %v6599_v48 = vpop.eup %5042  ;;  %v3242_v34 = vmul.f32 %v5041_v6, %v6444_v37  ;;  %5062 = vpow2.f32 %v3141_v26  ;;  %v3335_v4 = vmul.f32 %v3303_v22, %v3239_v0  ;;  %v7066_v26 = vunpack.c.l.bf16 %v6423_v41 }
 0x1fd   : > { %5064 = vrcp.f32 %v3183_v9  ;;  %v3186_v53 = vadd.f32 1.0, %v6599_v48  ;;  %v3097_v0 = vsub.f32 0.0, %v3065_v46  ;;  %v3310_v23 = vsel %vm3278_vm8, 1.0, %v6557_v18 }
 0x1fe   : > { %v5045_v5 = vpop.eup %5044  ;;  %v3338_v37 = vmul.f32 %v3306_v7, %v3242_v34  ;;  %5066 = vpow2.f32 %v3137_v42  ;;  %v3433_v7 = vadd.f32 %v7066_v26, %v3337_v10  ;;  %v2729_v10 = vadd.f32 %v6567_v56, %v6358_v59  ;;  %v4810_v26 = vpop.f32.mrf.mxu1 }
 0x1ff   : > { %v6623_v54 = vpop.eup %5046  ;;  %v3240_v8 = vmul.f32 %v5045_v5, %v6454_v25  ;;  %5068 = vrcp.f32 %v3186_v53  ;;  %v6649_v42 = vadd.f32 %v6415_v13, %v2992_v52  ;;  %v7068_v53 = vunpack.c.l.bf16 %v6426_v24 }
 0x200   : > { %v5049_v34 = vpop.eup %5048  ;;  %v3434_v31 = vadd.f32 %v7067_v1, %v3338_v37  ;;  %v3184_v6 = vadd.f32 1.0, %v6623_v54  ;;  %v7069_v59 = vunpack.c.h.bf16 %v6426_v24  ;;  %v3147_v18 = vmul.f32 1.442695, %v3097_v0 }
 0x201   : > { %v3336_v25 = vmul.f32 %v3304_v44, %v3240_v8  ;;  %v3245_v22 = vmul.f32 %v5049_v34, %v6461_v12  ;;  %v6651_v44 = vpop.f32.mrf.mxu0  ;;  %v3431_v5 = vadd.f32 %v7068_v53, %v3335_v4  ;;  %v3063_v34 = vand.u32 2147483647, %v6649_v42 }
 0x202   : > { %v5051_v41 = vpop.eup %5050  ;;  %v4117_v9 = vpack.c.bf16 %v3434_v31, %v3433_v7  ;;  %5070 = vrcp.f32 %v3184_v6  ;;  %v2995_v4 = vadd.f32 %v4854_v3, %v2729_v10  ;;  %v7071_v10 = vunpack.c.h.bf16 %v6436_v63 }
 0x203   : > { %v5053_v12 = vpop.eup %5052  ;;  %v3432_v56 = vadd.f32 %v7069_v59, %v3336_v25  ;;  %v3243_v37 = vmul.f32 %v5051_v41, %v6470_v50  ;;  %v3341_v8 = vmul.f32 %v3309_v20, %v3245_v22  ;;  %v3308_v50 = vsel %vm3276_vm9, 1.0, %v6569_v19  ;;  %v2929_v52 = vpop.f32.mrf.mxu0 }
 0x204   : > { %v6659_v51 = vpop.eup %5054  ;;  %4204 = vst [vmem:[%s6639_s26 + $0x8] sm:$0xff] %v4117_v9   ;;  %v3246_v46 = vmul.f32 %v5053_v12, %v6473_v16  ;;  %v3313_v16 = vsel %vm3281_vm10, 1.0, %v6578_v49  ;;  %5072 = vpow2.f32 %v3147_v18  ;;  %v6677_v25 = vadd.f32 %v6415_v13, %v2995_v4 }
 0x205   : > { %v5057_v24 = vpop.eup %5056  ;;  %v4112_v7 = vpack.c.bf16 %v3432_v56, %v3431_v5  ;;  %v3339_v1 = vmul.f32 %v3307_v15, %v3243_v37  ;;  %v3189_v31 = vadd.f32 1.0, %v6659_v51  ;;  %v3095_v15 = vsub.f32 0.0, %v3063_v34 }
 0x206   : > { %v3342_v6 = vmul.f32 %v3310_v23, %v3246_v46  ;;  %v3244_v20 = vmul.f32 %v5057_v24, %v6481_v29  ;;  %v6673_v3 = vpop.eup %5058  ;;  %v2727_v19 = vadd.f32 %v6582_v62, %v6361_v60  ;;  %v7070_v29 = vunpack.c.l.bf16 %v6436_v63  ;;  %v2666_v23 = vpop.f32.mrf.mxu1 }
 0x207   : > { %4113 = vst [vmem:[%s6639_s26] sm:$0xff] %v4112_v7   ;;  %5074 = vrcp.f32 %v3189_v31  ;;  %v3187_v9 = vadd.f32 1.0, %v6673_v3  ;;  %v7072_v53 = vunpack.c.l.bf16 %v6464_v55  ;;  %v3143_v60 = vmul.f32 1.442695, %v3095_v15  ;;  %v4858_v46 = vpop.f32.mrf.mxu0 }
 0x208   : > { %v5061_v22 = vpop.eup %5060  ;;  %v3437_v0 = vadd.f32 %v7070_v29, %v3341_v8  ;;  %v3438_v49 = vadd.f32 %v7071_v10, %v3342_v6  ;;  %v3340_v41 = vmul.f32 %v3308_v50, %v3244_v20  ;;  %v3066_v62 = vand.u32 2147483647, %v6677_v25  ;;  %v6706_v31 = vpop.f32.mrf.mxu1 }
 0x209   : > { %v6686_v12 = vpop.eup %5062  ;;  %v3435_v5 = vadd.f32 %v7072_v53, %v3339_v1  ;;  %v3249_v59 = vmul.f32 %v5061_v22, %v6487_v14  ;;  %v7073_v63 = vunpack.c.h.bf16 %v6464_v55  ;;  %5076 = vrcp.f32 %v3187_v9  ;;  %v2932_v29 = vpop.f32.mrf.mxu0 }
 0x20a   : > { %v5065_v56 = vpop.eup %5064  ;;  %v4127_v37 = vpack.c.bf16 %v3438_v49, %v3437_v0  ;;  %v3190_v8 = vadd.f32 1.0, %v6686_v12  ;;  %v3311_v14 = vsel %vm3279_vm11, 1.0, %v6589_v61  ;;  %5078 = vpow2.f32 %v3143_v60  ;;  %v6727_v53 = vpop.f32.mrf.mxu1 }
 0x20b   : > { %v3436_v18 = vadd.f32 %v7073_v63, %v3340_v41  ;;  %v6695_v34 = vpop.eup %5066  ;;  %v3345_v4 = vmul.f32 %v3313_v16, %v3249_v59  ;;  %v3247_v24 = vmul.f32 %v5065_v56, %v6495_v27  ;;  %v3314_v55 = vsel %vm3282_vm12, 1.0, %v6599_v48 }
 0x20c   : > { %v5069_v7 = vpop.eup %5068  ;;  %4206 = vst [vmem:[%s6639_s26 + $0x18] sm:$0xff] %v4127_v37   ;;  %5080 = vrcp.f32 %v3190_v8  ;;  %v3188_v50 = vadd.f32 1.0, %v6695_v34  ;;  %v7074_v6 = vunpack.c.l.bf16 %v6492_v30  ;;  %v3312_v61 = vsel %vm3280_vm13, 1.0, %v6623_v54 }
 0x20d   : > { %v4122_v1 = vpack.c.bf16 %v3436_v18, %v3435_v5  ;;  %v3250_v16 = vmul.f32 %v5069_v7, %v6506_v57  ;;  %v3098_v27 = vsub.f32 0.0, %v3066_v62  ;;  %v2993_v48 = vadd.f32 %v6621_v35, %v2727_v19  ;;  %v4814_v18 = vpop.f32.mrf.mxu1 }
 0x20e   : > { %v3441_v20 = vadd.f32 %v7074_v6, %v3345_v4  ;;  %5082 = vrcp.f32 %v3188_v50  ;;  %v2732_v15 = vadd.f32 %v6606_v17, %v6364_v43  ;;  %v2730_v22 = vadd.f32 %v6632_v47, %v6367_v33 }
 0x20f   : > { %4205 = vst [vmem:[%s6639_s26 + $0x10] sm:$0xff] %v4122_v1   ;;  %v5071_v0 = vpop.eup %5070  ;;  %v3343_v57 = vmul.f32 %v3311_v14, %v3247_v24  ;;  %v3346_v10 = vmul.f32 %v3314_v55, %v3250_v16  ;;  %v3149_v49 = vmul.f32 1.442695, %v3098_v27  ;;  %v2733_v54 = vadd.f32 %v4810_v26, %v6370_v38 }
 0x210   : > { %v3248_v41 = vmul.f32 %v5071_v0, %v6515_v32  ;;  %v6724_v9 = vadd.f32 %v6415_v13, %v2993_v48  ;;  %v2998_v35 = vadd.f32 %v6651_v44, %v2732_v15  ;;  %v2996_v19 = vadd.f32 %v2929_v52, %v2730_v22  ;;  %v4861_v44 = vpop.f32.mrf.mxu0  ;;  %v2682_v48 = vpop.f32.mrf.mxu1 }
 0x211   : > { %v7075_v43 = vunpack.c.h.bf16 %v6492_v30  ;;  %5084 = vpow2.f32 %v3149_v49  ;;  %v2999_v17 = vadd.f32 %v4858_v46, %v2733_v54  ;;  %v2731_v47 = vadd.f32 %v2666_v23, %v6373_v45  ;;  %v6737_v26 = vpop.eup %5072 }
 0x212   : > { %v3344_v5 = vmul.f32 %v3312_v61, %v3248_v41  ;;  %vm3283_vm15 = vcmp.ge.f32.partialorder %v6552_v11, 0.0  ;;  %v3064_v38 = vand.u32 2147483647, %v6724_v9  ;;  %v6735_v32 = vadd.f32 %v6415_v13, %v2998_v35  ;;  %v2945_v1 = vpop.f32.mrf.mxu0 }
 0x213   : > { %v3442_v33 = vadd.f32 %v7075_v43, %v3346_v10  ;;  %vm3286_vm0 = vcmp.ge.f32.partialorder %v6555_v28, 0.0  ;;  %v6741_v30 = vadd.f32 %v6415_v13, %v2996_v19  ;;  %v6744_v45 = vadd.f32 %v6415_v13, %v2999_v17  ;;  %v4817_v17 = vpop.f32.mrf.mxu1 }
 0x214   : > { %v5075_v23 = vpop.eup %5074  ;;  %v7076_v59 = vunpack.c.l.bf16 %v6498_v39  ;;  %v7077_v62 = vunpack.c.h.bf16 %v6498_v39  ;;  %v3096_v37 = vsub.f32 0.0, %v3064_v38  ;;  %v2997_v63 = vadd.f32 %v2932_v29, %v2731_v47  ;;  %v4862_v49 = vpop.f32.mrf.mxu0 }
 0x215   : > { %v4137_v52 = vpack.c.bf16 %v3442_v33, %v3441_v20  ;;  %v3253_v8 = vmul.f32 %v5075_v23, %v6532_v2  ;;  %v3193_v46 = vadd.f32 1.0, %v6737_v26  ;;  %v3069_v4 = vand.u32 2147483647, %v6735_v32 }
 0x216   : > { %v3439_v60 = vadd.f32 %v7076_v59, %v3343_v57  ;;  %v3440_v56 = vadd.f32 %v7077_v62, %v3344_v5  ;;  %v3067_v24 = vand.u32 2147483647, %v6741_v30  ;;  %v3317_v7 = vsel %vm3285_vm14, 1.0, %v6659_v51  ;;  %v5077_v55 = vpop.eup %5076 }
 0x217   : > { %4208 = vst [vmem:[%s6639_s26 + $0x28] sm:$0xff] %v4137_v52   ;;  %vm3284_vm1 = vcmp.ge.f32.partialorder %v6562_v36, 0.0  ;;  %v3145_v39 = vmul.f32 1.442695, %v3096_v37  ;;  %v3315_v50 = vsel %vm3283_vm15, 1.0, %v6673_v3  ;;  %v3101_v6 = vsub.f32 0.0, %v3069_v4  ;;  %v6763_v61 = vpop.eup %5078 }
 0x218   : > { %v4132_v14 = vpack.c.bf16 %v3440_v56, %v3439_v60  ;;  %v3099_v20 = vsub.f32 0.0, %v3067_v24  ;;  %v3070_v16 = vand.u32 2147483647, %v6744_v45  ;;  %v3349_v27 = vmul.f32 %v3317_v7, %v3253_v8  ;;  %v7080_v60 = vld [vmem:[#allocation4_spill] sm:$0xff]  ;;  %v2948_v56 = vpop.f32.mrf.mxu0  ;;  %v7085_v7 = vld [vmem:[#allocation2_spill] sm:$0xff] }
 0x219   : > { %v3251_v2 = vmul.f32 %v5077_v55, %v6552_v11  ;;  %5086 = vpow2.f32 %v3145_v39  ;;  %v6768_v51 = vadd.f32 %v6415_v13, %v2997_v63  ;;  %v5081_v15 = vpop.eup %5080  ;;  %v3318_v3 = vsel %vm3286_vm0, 1.0, %v6686_v12  ;;  %v7086_v55 = vld [vmem:[#allocation5_spill] sm:$0xff] }
 0x21a   : > { %4207 = vst [vmem:[%s6639_s26 + $0x20] sm:$0xff] %v4132_v14   ;;  %5088 = vrcp.f32 %v3193_v46  ;;  %v3191_v22 = vadd.f32 1.0, %v6763_v61  ;;  %v3155_v29 = vmul.f32 1.442695, %v3101_v6  ;;  %v3254_v0 = vmul.f32 %v5081_v15, %v6555_v28  ;;  %v2695_v14 = vpop.f32.mrf.mxu1 }
 0x21b   : > { %v3316_v11 = vsel %vm3284_vm1, 1.0, %v6695_v34  ;;  %v3151_v57 = vmul.f32 1.442695, %v3099_v20  ;;  %v3102_v10 = vsub.f32 0.0, %v3070_v16  ;;  %v5083_v54 = vpop.eup %5082  ;;  %v3347_v41 = vmul.f32 %v3315_v50, %v3251_v2  ;;  %v4865_v16 = vpop.f32.mrf.mxu0 }
 0x21c   : > { %5090 = vrcp.f32 %v3191_v22  ;;  %v3068_v35 = vand.u32 2147483647, %v6768_v51  ;;  %v2736_v12 = vadd.f32 %v6706_v31, %v6376_v21  ;;  %v7078_v19 = vunpack.c.l.bf16 %v6518_v58  ;;  %v7081_v31 = vld [vmem:[#allocation3_spill] sm:$0xff]  ;;  %v4818_v22 = vpop.f32.mrf.mxu1 }
 0x21d   : > { %v3350_v33 = vmul.f32 %v3318_v3, %v3254_v0  ;;  %v3252_v28 = vmul.f32 %v5083_v54, %v6562_v36  ;;  %5092 = vpow2.f32 %v3155_v29  ;;  %v3157_v34 = vmul.f32 1.442695, %v3102_v10  ;;  %v7082_v36 = vld [vmem:[#allocation9_spill] sm:$0xff]  ;;  %v6813_v29 = vld [vmem:[%s6410_s21 + $0x48] sm:$0xff]   ;;  %v7087_v54 = vld [vmem:[#allocation6_spill] sm:$0xff] }
 0x21e   : > { %v3445_v43 = vadd.f32 %v7078_v19, %v3349_v27  ;;  %5094 = vpow2.f32 %v3151_v57  ;;  %v3100_v47 = vsub.f32 0.0, %v3068_v35  ;;  %v3002_v5 = vadd.f32 %v4861_v44, %v2736_v12  ;;  %v6784_v38 = vpop.eup %5084  ;;  %v2961_v35 = vpop.f32.mrf.mxu0 }
 0x21f   : > { %v7079_v52 = vunpack.c.h.bf16 %v6518_v58  ;;  %v3348_v59 = vmul.f32 %v3316_v11, %v3252_v28  ;;  %v2734_v21 = vadd.f32 %v6727_v53, %v7080_v60  ;;  %v2737_v62 = vadd.f32 %v4814_v18, %v7081_v31 }
 0x220   : > { %v7083_v37 = vunpack.c.l.bf16 %v7082_v36  ;;  %v3194_v8 = vadd.f32 1.0, %v6784_v38  ;;  %5096 = vpow2.f32 %v3157_v34  ;;  %v3153_v44 = vmul.f32 1.442695, %v3100_v47 }
 0x221   : > { %v3446_v23 = vadd.f32 %v7079_v52, %v3350_v33  ;;  %v7084_v4 = vunpack.c.h.bf16 %v7082_v36  ;;  %v6797_v24 = vadd.f32 %v6415_v13, %v3002_v5  ;;  %v3000_v53 = vadd.f32 %v2945_v1, %v2734_v21  ;;  %v7088_v33 = vld [vmem:[#allocation7_spill] sm:$0xff]  ;;  %v4866_v36 = vpop.f32.mrf.mxu0 }
 0x222   : > { %v3443_v63 = vadd.f32 %v7083_v37, %v3347_v41  ;;  %5098 = vrcp.f32 %v3194_v8  ;;  %v3003_v18 = vadd.f32 %v4862_v49, %v2737_v62  ;;  %v2735_v39 = vadd.f32 %v2682_v48, %v7085_v7 }
 0x223   : > { %v4147_v46 = vpack.c.bf16 %v3446_v23, %v3445_v43  ;;  %v3444_v58 = vadd.f32 %v7084_v4, %v3348_v59  ;;  %v2740_v50 = vadd.f32 %v4817_v17, %v7086_v55  ;;  %5100 = vpow2.f32 %v3153_v44 }
 0x224   : > { %v3073_v20 = vand.u32 2147483647, %v6797_v24  ;;  %v6804_v27 = vadd.f32 %v6415_v13, %v3000_v53  ;;  %v6807_v2 = vadd.f32 %v6415_v13, %v3003_v18  ;;  %v3001_v1 = vadd.f32 %v2948_v56, %v2735_v39 }
 0x225   : > { %4210 = vst [vmem:[%s6639_s26 + $0x38] sm:$0xff] %v4147_v46   ;;  %v4142_v6 = vpack.c.bf16 %v3444_v58, %v3443_v63  ;;  %v3006_v3 = vadd.f32 %v4865_v16, %v2740_v50  ;;  %v2738_v41 = vadd.f32 %v2695_v14, %v7087_v54  ;;  %v2741_v28 = vadd.f32 %v4818_v22, %v7088_v33  ;;  %v2698_v58 = vpop.f32.mrf.mxu1 }
 0x226   : > { %v3105_v15 = vsub.f32 0.0, %v3073_v20  ;;  %v6810_v48 = vpop.eup %5086  ;;  %v3071_v0 = vand.u32 2147483647, %v6804_v27  ;;  %v3074_v11 = vand.u32 2147483647, %v6807_v2  ;;  %v6820_v43 = vadd.f32 %v6415_v13, %v3001_v1 }
 0x227   : > { %4209 = vst [vmem:[%s6639_s26 + $0x30] sm:$0xff] %v4142_v6   ;;  %v5089_v57 = vpop.eup %5088  ;;  %v3192_v10 = vadd.f32 1.0, %v6810_v48  ;;  %v4083_v34 = vunpack.c.l.bf16 %v6813_v29  ;;  %v6825_v47 = vadd.f32 %v6415_v13, %v3006_v3  ;;  %v4084_v23 = vunpack.c.h.bf16 %v6813_v29  ;;  %v7089_v6 = vld [vmem:[#allocation8_spill] sm:$0xff]  ;;  %v4196_v3 = vld [vmem:[%s6410_s21 + $0x40] sm:$0xff]  }
 0x228   : > { %v3163_v49 = vmul.f32 1.442695, %v3105_v15  ;;  %v3103_v12 = vsub.f32 0.0, %v3071_v0  ;;  %v3106_v19 = vsub.f32 0.0, %v3074_v11  ;;  %v3257_v52 = vmul.f32 %v5089_v57, %v6614_v40  ;;  %v2964_v11 = vpop.f32.mrf.mxu0 }
 0x229   : > { %v5091_v17 = vpop.eup %5090  ;;  %5102 = vrcp.f32 %v3192_v10  ;;  %v3072_v62 = vand.u32 2147483647, %v6820_v43  ;;  %v3004_v56 = vadd.f32 %v2961_v35, %v2738_v41  ;;  %vm3289_vm2 = vcmp.ge.f32.partialorder %v6614_v40, 0.0  ;;  %v5146_v35 = vld [vmem:[%s6947_s2] ss:$0 sm:$0xff] }
 0x22a   : > { %v6827_v5 = vpop.eup %5092  ;;  %5104 = vpow2.f32 %v3163_v49  ;;  %v3159_v59 = vmul.f32 1.442695, %v3103_v12  ;;  %v3165_v31 = vmul.f32 1.442695, %v3106_v19  ;;  %v3007_v63 = vadd.f32 %v4866_v36, %v2741_v28 }
 0x22b   : > { %v6831_v60 = vpop.eup %5094  ;;  %v3197_v21 = vadd.f32 1.0, %v6827_v5  ;;  %v3321_v44 = vsel %vm3289_vm2, 1.0, %v6737_v26  ;;  %v3104_v46 = vsub.f32 0.0, %v3072_v62  ;;  %v3077_v4 = vand.u32 2147483647, %v6825_v47 }
 0x22c   : > { %v3195_v37 = vadd.f32 1.0, %v6831_v60  ;;  %5106 = vpow2.f32 %v3159_v59  ;;  %v3353_v53 = vmul.f32 %v3321_v44, %v3257_v52  ;;  %vm3290_vm3 = vcmp.ge.f32.partialorder %v6677_v25, 0.0 }
 0x22d   : > { %v6837_v8 = vpop.eup %5096  ;;  %5108 = vrcp.f32 %v3197_v21  ;;  %v3161_v18 = vmul.f32 1.442695, %v3104_v46  ;;  %v3109_v7 = vsub.f32 0.0, %v3077_v4  ;;  %v6844_v39 = vadd.f32 %v6415_v13, %v3004_v56  ;;  %v4199_v56 = vld [vmem:[%s6410_s21 + $0x58] sm:$0xff]  }
 0x22e   : > { %5110 = vrcp.f32 %v3195_v37  ;;  %v3198_v40 = vadd.f32 1.0, %v6837_v8  ;;  %v6850_v50 = vadd.f32 %v6415_v13, %v3007_v63  ;;  %v2739_v20 = vadd.f32 %v2698_v58, %v7089_v6  ;;  %v4198_v6 = vld [vmem:[%s6410_s21 + $0x50] sm:$0xff]  }
 0x22f   : > { %v5099_v14 = vpop.eup %5098  ;;  %5112 = vpow2.f32 %v3165_v31  ;;  %v3322_v16 = vsel %vm3290_vm3, 1.0, %v6784_v38  ;;  %v3171_v15 = vmul.f32 1.442695, %v3109_v7  ;;  %v3075_v29 = vand.u32 2147483647, %v6844_v39 }
 0x230   : > { %v6846_v26 = vpop.eup %5100  ;;  %v3258_v55 = vmul.f32 %v5099_v14, %v6677_v25  ;;  %5114 = vrcp.f32 %v3198_v40  ;;  %v3078_v0 = vand.u32 2147483647, %v6850_v50  ;;  %v3449_v25 = vadd.f32 %v4083_v34, %v3353_v53 }
 0x231   : > { %v3196_v1 = vadd.f32 1.0, %v6846_v26  ;;  %5116 = vpow2.f32 %v3161_v18  ;;  %v3255_v57 = vmul.f32 %v5091_v17, %v6649_v42  ;;  %v3005_v13 = vadd.f32 %v2964_v11, %v2739_v20 }
 0x232   : > { %v3354_v22 = vmul.f32 %v3322_v16, %v3258_v55  ;;  %v3107_v49 = vsub.f32 0.0, %v3075_v29  ;;  %v3110_v38 = vsub.f32 0.0, %v3078_v0  ;;  %vm3287_vm4 = vcmp.ge.f32.partialorder %v6649_v42, 0.0 }
 0x233   : > { %5118 = vrcp.f32 %v3196_v1  ;;  %v4079_v54 = vunpack.c.l.bf16 %v4196_v3  ;;  %v4080_v41 = vunpack.c.h.bf16 %v4196_v3  ;;  %v6863_v12 = vadd.f32 %v5146_v35, %v3005_v13 }
 0x234   : > { %v3450_v10 = vadd.f32 %v4084_v23, %v3354_v22  ;;  %5120 = vpow2.f32 %v3171_v15  ;;  %v3319_v33 = vsel %vm3287_vm4, 1.0, %v6763_v61  ;;  %v3167_v17 = vmul.f32 1.442695, %v3107_v49 }
 0x235   : > { %v3173_v34 = vmul.f32 1.442695, %v3110_v38  ;;  %v3351_v23 = vmul.f32 %v3319_v33, %v3255_v57  ;;  %vm3288_vm5 = vcmp.ge.f32.partialorder %v6724_v9, 0.0  ;;  %v3076_v59 = vand.u32 2147483647, %v6863_v12 }
 0x236   : > { %v5103_v19 = vpop.eup %5102  ;;  %v4157_v28 = vpack.c.bf16 %v3450_v10, %v3449_v25  ;;  %v3320_v21 = vsel %vm3288_vm5, 1.0, %v6810_v48  ;;  %5122 = vpow2.f32 %v3167_v17  ;;  %vm3293_vm6 = vcmp.ge.f32.partialorder %v6735_v32, 0.0  ;;  %v4201_v17 = vld [vmem:[%s6410_s21 + $0x68] sm:$0xff]  }
 0x237   : > { %v6866_v52 = vpop.eup %5104  ;;  %v3256_v42 = vmul.f32 %v5103_v19, %v6724_v9  ;;  %5124 = vpow2.f32 %v3173_v34  ;;  %v3108_v36 = vsub.f32 0.0, %v3076_v59  ;;  %v3447_v44 = vadd.f32 %v4079_v54, %v3351_v23  ;;  %v4200_v23 = vld [vmem:[%s6410_s21 + $0x60] sm:$0xff]  }
 0x238   : > { %4212 = vst [vmem:[%s6639_s26 + $0x48] sm:$0xff] %v4157_v28   ;;  %v3201_v31 = vadd.f32 1.0, %v6866_v52  ;;  %v4091_v53 = vunpack.c.l.bf16 %v4199_v56  ;;  %v4092_v40 = vunpack.c.h.bf16 %v4199_v56  ;;  %v3325_v7 = vsel %vm3293_vm6, 1.0, %v6827_v5 }
 0x239   : > { %v6874_v62 = vpop.eup %5106  ;;  %v3352_v61 = vmul.f32 %v3320_v21, %v3256_v42  ;;  %v3169_v48 = vmul.f32 1.442695, %v3108_v36  ;;  %vm3294_vm7 = vcmp.ge.f32.partialorder %v6744_v45, 0.0  ;;  %vm3291_vm8 = vcmp.ge.f32.partialorder %v6741_v30, 0.0 }
 0x23a   : > { %v5109_v37 = vpop.eup %5108  ;;  %5126 = vrcp.f32 %v3201_v31  ;;  %v3199_v63 = vadd.f32 1.0, %v6874_v62  ;;  %v3323_v22 = vsel %vm3291_vm8, 1.0, %v6831_v60  ;;  %v4087_v29 = vunpack.c.l.bf16 %v4198_v6 }
 0x23b   : > { %v5111_v9 = vpop.eup %5110  ;;  %v3448_v46 = vadd.f32 %v4080_v41, %v3352_v61  ;;  %v3261_v4 = vmul.f32 %v5109_v37, %v6735_v32  ;;  %v3326_v32 = vsel %vm3294_vm7, 1.0, %v6837_v8  ;;  %v4088_v11 = vunpack.c.h.bf16 %v4198_v6  ;;  %v4203_v6 = vld [vmem:[%s6410_s21 + $0x78] sm:$0xff]  }
 0x23c   : > { %v6879_v58 = vpop.eup %5112  ;;  %5128 = vrcp.f32 %v3199_v63  ;;  %v3259_v55 = vmul.f32 %v5111_v9, %v6741_v30  ;;  %vm3292_vm9 = vcmp.ge.f32.partialorder %v6768_v51, 0.0  ;;  %vm3297_vm10 = vcmp.ge.f32.partialorder %v6797_v24, 0.0 }
 0x23d   : > { %v5115_v14 = vpop.eup %5114  ;;  %v4152_v18 = vpack.c.bf16 %v3448_v46, %v3447_v44  ;;  %v3202_v20 = vadd.f32 1.0, %v6879_v58  ;;  %v3357_v1 = vmul.f32 %v3325_v7, %v3261_v4  ;;  %5130 = vpow2.f32 %v3169_v48 }
 0x23e   : > { %v6886_v16 = vpop.eup %5116  ;;  %v3262_v15 = vmul.f32 %v5115_v14, %v6744_v45  ;;  %v3355_v57 = vmul.f32 %v3323_v22, %v3259_v55  ;;  %v3324_v13 = vsel %vm3292_vm9, 1.0, %v6846_v26  ;;  %v4099_v59 = vunpack.c.l.bf16 %v4201_v17 }
 0x23f   : > { %4211 = vst [vmem:[%s6639_s26 + $0x40] sm:$0xff] %v4152_v18   ;;  %5132 = vrcp.f32 %v3202_v20  ;;  %v3200_v5 = vadd.f32 1.0, %v6886_v16  ;;  %v3453_v30 = vadd.f32 %v4091_v53, %v3357_v1  ;;  %v3329_v61 = vsel %vm3297_vm10, 1.0, %v6866_v52 }
 0x240   : > { %v5119_v3 = vpop.eup %5118  ;;  %v3358_v0 = vmul.f32 %v3326_v32, %v3262_v15  ;;  %v3451_v54 = vadd.f32 %v4087_v29, %v3355_v57  ;;  %v4095_v56 = vunpack.c.l.bf16 %v4200_v23  ;;  %v4100_v36 = vunpack.c.h.bf16 %v4201_v17  ;;  %v4202_v29 = vld [vmem:[%s6410_s21 + $0x70] sm:$0xff]  }
 0x241   : > { %v6895_v25 = vpop.eup %5120  ;;  %v3260_v45 = vmul.f32 %v5119_v3, %v6768_v51  ;;  %5134 = vrcp.f32 %v3200_v5  ;;  %vm3295_vm11 = vcmp.ge.f32.partialorder %v6804_v27, 0.0  ;;  %vm3298_vm12 = vcmp.ge.f32.partialorder %v6807_v2, 0.0 }
 0x242   : > { %v3454_v8 = vadd.f32 %v4092_v40, %v3358_v0  ;;  %v3205_v10 = vadd.f32 1.0, %v6895_v25  ;;  %v3327_v46 = vsel %vm3295_vm11, 1.0, %v6874_v62  ;;  %v4096_v4 = vunpack.c.h.bf16 %v4200_v23 }
 0x243   : > { %v3356_v60 = vmul.f32 %v3324_v13, %v3260_v45  ;;  %v6901_v38 = vpop.eup %5122  ;;  %vm3296_vm13 = vcmp.ge.f32.partialorder %v6820_v43, 0.0  ;;  %vm3301_vm14 = vcmp.ge.f32.partialorder %v6825_v47, 0.0  ;;  %v4107_v15 = vunpack.c.l.bf16 %v4203_v6 }
 0x244   : > { %v4167_v49 = vpack.c.bf16 %v3454_v8, %v3453_v30  ;;  %5136 = vrcp.f32 %v3205_v10  ;;  %v5125_v35 = vpop.eup %5124  ;;  %v3203_v51 = vadd.f32 1.0, %v6901_v38  ;;  %vm3302_vm15 = vcmp.ge.f32.partialorder %v6850_v50, 0.0 }
 0x245   : > { %v3452_v41 = vadd.f32 %v4088_v11, %v3356_v60  ;;  %v3206_v28 = vadd.f32 1.0, %v5125_v35  ;;  %v4108_v3 = vunpack.c.h.bf16 %v4203_v6  ;;  %v3334_v0 = vsel %vm3302_vm15, 1.0, %v5125_v35 }
 0x246   : > { %4214 = vst [vmem:[%s6639_s26 + $0x58] sm:$0xff] %v4167_v49   ;;  %5138 = vrcp.f32 %v3203_v51  ;;  %vm3299_vm0 = vcmp.ge.f32.partialorder %v6844_v39, 0.0  ;;  %v4103_v45 = vunpack.c.l.bf16 %v4202_v29  ;;  %vm3300_vm1 = vcmp.ge.f32.partialorder %v6863_v12, 0.0 }
 0x247   : > { %v5127_v19 = vpop.eup %5126  ;;  %v4162_v33 = vpack.c.bf16 %v3452_v41, %v3451_v54  ;;  %5140 = vrcp.f32 %v3206_v28 }
 0x248   : > { %v3265_v34 = vmul.f32 %v5127_v19, %v6797_v24  ;;  %v3330_v24 = vsel %vm3298_vm12, 1.0, %v6879_v58 }
 0x249   : > { %v5129_v26 = vpop.eup %5128  ;;  %4213 = vst [vmem:[%s6639_s26 + $0x50] sm:$0xff] %v4162_v33  }
 0x24a   : > { %v5131_v42 = vpop.eup %5130  ;;  %v3263_v21 = vmul.f32 %v5129_v26, %v6804_v27  ;;  %v3361_v63 = vmul.f32 %v3329_v61, %v3265_v34  ;;  %v3328_v27 = vsel %vm3296_vm13, 1.0, %v6886_v16  ;;  %v3333_v16 = vsel %vm3301_vm14, 1.0, %v6895_v25 }
 0x24b   : > { %v3204_v37 = vadd.f32 1.0, %v5131_v42  ;;  %v3331_v25 = vsel %vm3299_vm0, 1.0, %v6901_v38  ;;  %v3332_v60 = vsel %vm3300_vm1, 1.0, %v5131_v42 }
 0x24c   : > { %v5133_v31 = vpop.eup %5132  ;;  %v3359_v52 = vmul.f32 %v3327_v46, %v3263_v21 }
 0x24d   : > { %v3266_v9 = vmul.f32 %v5133_v31, %v6807_v2  ;;  %5142 = vrcp.f32 %v3204_v37  ;;  %v3457_v2 = vadd.f32 %v4099_v59, %v3361_v63 }
 0x24e   : > { %v5135_v44 = vpop.eup %5134  ;;  %v3455_v62 = vadd.f32 %v4095_v56, %v3359_v52 }
 0x24f   : > { %v3362_v48 = vmul.f32 %v3330_v24, %v3266_v9  ;;  %v3264_v53 = vmul.f32 %v5135_v44, %v6820_v43 }
 0x251   : > { %v5137_v40 = vpop.eup %5136  ;;  %v3458_v14 = vadd.f32 %v4100_v36, %v3362_v48  ;;  %v3360_v18 = vmul.f32 %v3328_v27, %v3264_v53 }
 0x252   : > { %v3269_v55 = vmul.f32 %v5137_v40, %v6825_v47 }
 0x253   : > { %v4177_v7 = vpack.c.bf16 %v3458_v14, %v3457_v2  ;;  %v3456_v58 = vadd.f32 %v4096_v4, %v3360_v18  ;;  %v5139_v20 = vpop.eup %5138 }
 0x254   : > { %v5141_v43 = vpop.eup %5140  ;;  %v3365_v32 = vmul.f32 %v3333_v16, %v3269_v55  ;;  %v3267_v22 = vmul.f32 %v5139_v20, %v6844_v39 }
 0x255   : > { %4216 = vst [vmem:[%s6639_s26 + $0x68] sm:$0xff] %v4177_v7   ;;  %v4172_v1 = vpack.c.bf16 %v3456_v58, %v3455_v62  ;;  %v3270_v5 = vmul.f32 %v5141_v43, %v6850_v50  ;;  %v4104_v50 = vunpack.c.h.bf16 %v4202_v29 }
 0x256   : > { %v3461_v57 = vadd.f32 %v4107_v15, %v3365_v32  ;;  %v3363_v8 = vmul.f32 %v3331_v25, %v3267_v22 }
 0x257   : > { %4215 = vst [vmem:[%s6639_s26 + $0x60] sm:$0xff] %v4172_v1   ;;  %v3366_v11 = vmul.f32 %v3334_v0, %v3270_v5 }
 0x258   : > { %v3459_v54 = vadd.f32 %v4103_v45, %v3363_v8 }
 0x259   : > { %v3462_v30 = vadd.f32 %v4108_v3, %v3366_v11 }
 0x25a   : > { %v5143_v47 = vpop.eup %5142 }
 0x25b   : > { %v3268_v13 = vmul.f32 %v5143_v47, %v6863_v12  ;;  %v4187_v10 = vpack.c.bf16 %v3462_v30, %v3461_v57 }
 0x25d   : > { %v3364_v49 = vmul.f32 %v3332_v60, %v3268_v13  ;;  %4218 = vst [vmem:[%s6639_s26 + $0x78] sm:$0xff] %v4187_v10  }
 0x25f   : > { %v3460_v41 = vadd.f32 %v4104_v50, %v3364_v49 }
 0x261   : > { %v4182_v39 = vpack.c.bf16 %v3460_v41, %v3459_v54 }
 0x263   : > { %4217 = vst [vmem:[%s6639_s26 + $0x70] sm:$0xff] %v4182_v39  }
 0x264 PF: > { %s14_s17 = sadd.s32 1, %s5169_s17   ;;  %s7090_s15 = smov %s5165_s16 }
 0x265   : > { %p11_p5 = scmp.ge.s32.totalorder %s14_s17, 4   ;;  %s7091_s16 = smov %s7093_s18 }
 0x267   :  { %13 = sbr.rel (!%p11_p5) target bundleno = 2 (0x2), region = 83 }

</bundles_post_ra>
